<compile_context>
chip_gen: v7x
topology: tpu7x:2x2x1
jax: 0.10.0
libtpu: 0.0.40
codegen_flags: <defaults>
</compile_context>

<pallas_src>
import jax
import jax.numpy as jnp
from jax.experimental import pallas as pl
from jax.experimental.pallas import tpu as pltpu

INPUT_SIZE = 3
HIDDEN_SIZE = 128
NUM_LAYERS = 3
OUTPUT_SIZE = 1


def _vmem_spec():
    return pl.BlockSpec(memory_space=pltpu.MemorySpace.VMEM)


def fused_lstm_kernel(
    x_ref, len_ref,
    wih0_ref, whh0_ref, b0_ref,
    wcat1_ref, b1_ref,
    wcat2_ref, b2_ref,
    fcw_ref, fcb_ref,
    out_ref,
    g0_buf, h2_buf,
):
    """Fused 3-layer LSTM (wavefront schedule) + fc + pad-mask.

    x_ref:     (T, B, 3)   time-major input, f32
    len_ref:   (1, B)      int32 sequence lengths
    wih0_ref:  (3, 4H)     f32, gate columns [i, f, o, g]
    whh0_ref:  (H, 4H)     bf16
    b0_ref:    (1, 4H)     f32 (= b_ih + b_hh, layer 0)
    wcatK_ref: (2H, 4H)    bf16 stacked [W_ih; W_hh] for layers 1, 2
    bK_ref:    (1, 4H)     f32
    fcw_ref:   (H, 1), fcb_ref: (1, 1)
    out_ref:   (T, B)      fc output (lane-dense 2-D)
    g0_buf:    VMEM (T, B, 4H) f32  hoisted layer-0 input projection
    h2_buf:    VMEM (T, B, H)  f32  layer-2 hidden states (for the fc epilogue)
    """
    T, B, _ = x_ref.shape
    H = HIDDEN_SIZE

    # ---- layer-0 input projection (no recurrence dependence) hoisted off the serial path ----
    g0_buf[...] = (
        jnp.dot(x_ref[...].reshape(T * B, INPUT_SIZE), wih0_ref[...],
                preferred_element_type=jnp.float32)
        + b0_ref[...]
    ).reshape(T, B, 4 * H)

    # Hoisted bias broadcasts for layers 1/2 (avoid per-iteration broadcast_in_dim).
    b1 = jnp.broadcast_to(b1_ref[...], (B, 4 * H))
    b2 = jnp.broadcast_to(b2_ref[...], (B, 4 * H))

    def cell(gates, c_prev):
        # gates: (B, 4H) f32, columns ordered [i, f, o, g].
        # sigmoid via tanh: 1 EUP op + 1 VPU fma per element (vs exp + reciprocal).
        sig = 0.5 * jnp.tanh(0.5 * gates[:, : 3 * H]) + 0.5
        i = sig[:, 0 * H:1 * H]
        f = sig[:, 1 * H:2 * H]
        o = sig[:, 2 * H:3 * H]
        g = jnp.tanh(gates[:, 3 * H:])
        c_new = f * c_prev + i * g
        h_new = o * jnp.tanh(c_new)
        return h_new, c_new

    def step(s, carry):
        # All three layer updates read the carry from the END of the previous wavefront step,
        # so the three matmuls below are independent and can pipeline through the MXU.
        h0, c0, h1, c1, h2, c2 = carry
        h0b = h0.astype(jnp.bfloat16)
        h1b = h1.astype(jnp.bfloat16)
        h2b = h2.astype(jnp.bfloat16)

        # --- layer 0 @ t = s (index clamped; results past T-1 are never consumed) ---
        t0 = jnp.minimum(s, T - 1)
        gates0 = g0_buf[t0] + jnp.dot(h0b, whh0_ref[...],
                                      preferred_element_type=jnp.float32)
        h0n, c0n = cell(gates0, c0)

        # --- layer 1 @ t = s - 1 : fused [h0_{t} ; h1_{t-1}] @ [W_ih; W_hh], K = 2H = 256 ---
        cat1 = jnp.concatenate([h0b, h1b], axis=-1)
        gates1 = jnp.dot(cat1, wcat1_ref[...], preferred_element_type=jnp.float32) + b1
        h1c, c1c = cell(gates1, c1)
        v1 = (s >= 1).astype(jnp.float32)          # keep zero initial state until valid
        h1n = h1 + v1 * (h1c - h1)
        c1n = c1 + v1 * (c1c - c1)

        # --- layer 2 @ t = s - 2 ---
        cat2 = jnp.concatenate([h1b, h2b], axis=-1)
        gates2 = jnp.dot(cat2, wcat2_ref[...], preferred_element_type=jnp.float32) + b2
        h2c, c2c = cell(gates2, c2)
        v2 = (s >= 2).astype(jnp.float32)
        h2n = h2 + v2 * (h2c - h2)
        c2n = c2 + v2 * (c2c - c2)

        # Clamped write: steps s<2 write zeros to row 0, overwritten by the real value at s=2.
        t2 = jnp.maximum(s - 2, 0)
        h2_buf[t2] = h2n
        return (h0n, c0n, h1n, c1n, h2n, c2n)

    z = jnp.zeros((B, H), jnp.float32)
    n_steps = T + NUM_LAYERS - 1
    jax.lax.fori_loop(0, n_steps, step, (z, z, z, z, z, z),
                      unroll=True if n_steps <= 16 else 8)

    # ---- fc + pad_packed_sequence zero-mask epilogue (single lane-dense 2-D store) ----
    h_all = h2_buf[...]                                   # (T, B, H)
    w = fcw_ref[...][:, 0]                                # (H,)
    y = jnp.sum(h_all * w, axis=-1)                       # (T, B)
    t_idx = jax.lax.broadcasted_iota(jnp.int32, (T, B), 0)
    mask = t_idx < len_ref[...]                           # (1, B) broadcasts to (T, B)
    out_ref[...] = jnp.where(mask, y, 0.0) + fcb_ref[0, 0]


def _permute_gate_cols(w):
    """Reorder gate blocks along the last axis from PyTorch [i, f, g, o] to [i, f, o, g]."""
    H = HIDDEN_SIZE
    return jnp.concatenate(
        [w[..., : 2 * H], w[..., 3 * H: 4 * H], w[..., 2 * H: 3 * H]], axis=-1
    )


def init_params(key):
    """Deterministic init matching PyTorch parameter shapes (uniform +/- 1/sqrt(H)).
    Stored transposed, gate columns reordered to [i, f, o, g]; layers 1/2 stacked [W_ih; W_hh]
    and kept in bf16 (MXU-native); biases / layer-0 input weights stay f32."""
    k = 1.0 / float(jnp.sqrt(jnp.float32(HIDDEN_SIZE)))
    keys = jax.random.split(key, NUM_LAYERS * 4 + 2)
    idx = 0
    layers = []
    din = INPUT_SIZE
    for layer_idx in range(NUM_LAYERS):
        w_ih = jax.random.uniform(keys[idx], (4 * HIDDEN_SIZE, din), jnp.float32, -k, k); idx += 1
        w_hh = jax.random.uniform(keys[idx], (4 * HIDDEN_SIZE, HIDDEN_SIZE), jnp.float32, -k, k); idx += 1
        b_ih = jax.random.uniform(keys[idx], (4 * HIDDEN_SIZE,), jnp.float32, -k, k); idx += 1
        b_hh = jax.random.uniform(keys[idx], (4 * HIDDEN_SIZE,), jnp.float32, -k, k); idx += 1
        w_ih_t = _permute_gate_cols(w_ih.T)                       # (Din, 4H)
        w_hh_t = _permute_gate_cols(w_hh.T)                       # (H,   4H)
        b = _permute_gate_cols((b_ih + b_hh)[None, :])            # (1,   4H)
        if layer_idx == 0:
            layers.append({
                "w_ih": w_ih_t,                                   # (3, 4H)  f32
                "w_hh": w_hh_t.astype(jnp.bfloat16),              # (H, 4H)  bf16
                "b": b,                                           # (1, 4H)  f32
            })
        else:
            layers.append({
                "w_cat": jnp.concatenate([w_ih_t, w_hh_t], axis=0).astype(jnp.bfloat16),
                "b": b,
            })
        din = HIDDEN_SIZE
    fc_w = jax.random.uniform(keys[idx], (OUTPUT_SIZE, HIDDEN_SIZE), jnp.float32, -k, k); idx += 1
    fc_b = jax.random.uniform(keys[idx], (OUTPUT_SIZE,), jnp.float32, -k, k)
    return {"layers": layers, "fc_w_t": fc_w.T, "fc_b": fc_b.reshape(1, 1)}


@jax.jit
def flowrate_lstm_forward(params, x, lengths):
    """x: (B, T, input_size) batch-first (PyTorch layout); lengths: (B,) int32,
    sorted descending (enforce_sorted=True) with lengths[0] == T.
    Returns (B, T, 1) just like the PyTorch module (bf16 matmul operands → small drift vs f32)."""
    B, T, _ = x.shape
    B_pad = ((B + 7) // 8) * 8                                  # pad batch to sublane multiple

    x_tm = jnp.transpose(x, (1, 0, 2)).astype(jnp.float32)      # time-major (T, B, Din)
    lens = lengths.astype(jnp.int32)
    if B_pad != B:
        x_tm = jnp.pad(x_tm, ((0, 0), (0, B_pad - B), (0, 0)))
        lens = jnp.pad(lens, (0, B_pad - B))
    lens2d = lens[None, :]                                      # (1, B_pad)

    l0, l1, l2 = params["layers"]
    y = pl.pallas_call(
        fused_lstm_kernel,
        out_shape=jax.ShapeDtypeStruct((T, B_pad), jnp.float32),
        in_specs=[_vmem_spec()] * 11,
        out_specs=_vmem_spec(),
        scratch_shapes=[
            pltpu.VMEM((T, B_pad, 4 * HIDDEN_SIZE), jnp.float32),   # g0_buf (layer-0 projection)
            pltpu.VMEM((T, B_pad, HIDDEN_SIZE), jnp.float32),       # h2_buf (layer-2 hiddens)
        ],
    )(
        x_tm, lens2d,
        l0["w_ih"], l0["w_hh"], l0["b"],
        l1["w_cat"], l1["b"],
        l2["w_cat"], l2["b"],
        params["fc_w_t"], params["fc_b"],
    )

    y = jnp.transpose(y[:, :B])                                 # (B, T)
    return y[:, :, None]                                        # (B, T, 1)


if __name__ == "__main__":
    key = jax.random.PRNGKey(0)
    pkey, xkey = jax.random.split(key)
    params = init_params(pkey)

    B, T = 4, 8
    lengths = jnp.array([8, 6, 5, 3], dtype=jnp.int32)          # sorted descending, max == T
    x = jax.random.normal(xkey, (B, T, INPUT_SIZE), jnp.float32)
    # zero the padded tail like pad_sequence would (does not affect valid outputs)
    t_idx = jnp.arange(T)[None, :, None]
    x = jnp.where(t_idx < lengths[:, None, None], x, 0.0)

    out = flowrate_lstm_forward(params, x, lengths)
    jax.block_until_ready(out)
    assert out.shape == (B, T, OUTPUT_SIZE), out.shape
    assert bool(jnp.all(jnp.isfinite(out)))
    print("KERNEL_OK")
</pallas_src>

<mosaic_0001>
module attributes {stable_mosaic.version = 11 : i64} {
  func.func @fused_lstm_kernel(%arg0: memref<8x8x3xf32, #tpu.memory_space<vmem>>, %arg1: memref<1x8xi32, #tpu.memory_space<vmem>>, %arg2: memref<3x512xf32, #tpu.memory_space<vmem>>, %arg3: memref<128x512xbf16, #tpu.memory_space<vmem>>, %arg4: memref<1x512xf32, #tpu.memory_space<vmem>>, %arg5: memref<256x512xbf16, #tpu.memory_space<vmem>>, %arg6: memref<1x512xf32, #tpu.memory_space<vmem>>, %arg7: memref<256x512xbf16, #tpu.memory_space<vmem>>, %arg8: memref<1x512xf32, #tpu.memory_space<vmem>>, %arg9: memref<128x1xf32, #tpu.memory_space<vmem>>, %arg10: memref<1x1xf32, #tpu.memory_space<vmem>>, %arg11: memref<8x8xf32, #tpu.memory_space<vmem>>, %arg12: memref<8x8x512xf32, #tpu.memory_space<vmem>>, %arg13: memref<8x8x128xf32, #tpu.memory_space<vmem>>) attributes {dimension_semantics = [], scalar_prefetch = 0 : i64, scratch_operands = 2 : i64, tpu.core_type = #tpu.core_type<tc>} {
    %c0 = arith.constant 0 : index
    %c0_0 = arith.constant 0 : index
    %c0_1 = arith.constant 0 : index
    %0 = vector.load %arg0[%c0, %c0_0, %c0_1] : memref<8x8x3xf32, #tpu.memory_space<vmem>>, vector<8x8x3xf32>
    %1 = vector.shape_cast %0 : vector<8x8x3xf32> to vector<64x3xf32>
    %c0_2 = arith.constant 0 : index
    %c0_3 = arith.constant 0 : index
    %2 = vector.load %arg2[%c0_2, %c0_3] : memref<3x512xf32, #tpu.memory_space<vmem>>, vector<3x512xf32>
    %cst = arith.constant dense<0.000000e+00> : vector<64x512xf32>
    %3 = tpu.matmul %1, %2, %cst {dimension_numbers = #tpu.dot_dimension_numbers<[1], [0], [0], [1], [0, 0, 1, 1], [], []>} : vector<64x3xf32>, vector<3x512xf32>, vector<64x512xf32> -> vector<64x512xf32>
    %c0_4 = arith.constant 0 : index
    %c0_5 = arith.constant 0 : index
    %4 = vector.load %arg4[%c0_4, %c0_5] : memref<1x512xf32, #tpu.memory_space<vmem>>, vector<1x512xf32>
    %5 = vector.broadcast %4 : vector<1x512xf32> to vector<64x512xf32>
    %6 = arith.addf %3, %5 : vector<64x512xf32>
    %7 = vector.shape_cast %6 : vector<64x512xf32> to vector<8x8x512xf32>
    %c0_6 = arith.constant 0 : index
    %c0_7 = arith.constant 0 : index
    %c0_8 = arith.constant 0 : index
    %8 = vector.load %arg12[%c0_6, %c0_7, %c0_8] : memref<8x8x512xf32, #tpu.memory_space<vmem>>, vector<8x8x512xf32>
    tpu.vector_store %arg12[%c0_6, %c0_7, %c0_8], %7 {strides = array<i32>} : memref<8x8x512xf32, #tpu.memory_space<vmem>>, vector<8x8x512xf32>,
    %c0_9 = arith.constant 0 : index
    %c0_10 = arith.constant 0 : index
    %9 = vector.load %arg6[%c0_9, %c0_10] : memref<1x512xf32, #tpu.memory_space<vmem>>, vector<1x512xf32>
    %10 = vector.shape_cast %9 : vector<1x512xf32> to vector<1x512xf32>
    %11 = vector.broadcast %10 : vector<1x512xf32> to vector<8x512xf32>
    %c0_11 = arith.constant 0 : index
    %c0_12 = arith.constant 0 : index
    %12 = vector.load %arg8[%c0_11, %c0_12] : memref<1x512xf32, #tpu.memory_space<vmem>>, vector<1x512xf32>
    %13 = vector.shape_cast %12 : vector<1x512xf32> to vector<1x512xf32>
    %14 = vector.broadcast %13 : vector<1x512xf32> to vector<8x512xf32>
    %cst_13 = arith.constant 0.000000e+00 : f32
    %15 = vector.broadcast %cst_13 : f32 to vector<8x128xf32>
    %c0_i32 = arith.constant 0 : i32
    %16 = arith.truncf %15 : vector<8x128xf32> to vector<8x128xbf16>
    %17 = arith.truncf %15 : vector<8x128xf32> to vector<8x128xbf16>
    %18 = arith.truncf %15 : vector<8x128xf32> to vector<8x128xbf16>
    %c7_i32 = arith.constant 7 : i32
    %19 = arith.minsi %c0_i32, %c7_i32 : i32
    %20 = arith.index_cast %19 : i32 to index
    %c0_14 = arith.constant 0 : index
    %c0_15 = arith.constant 0 : index
    %21 = vector.load %arg12[%20, %c0_14, %c0_15] : memref<8x8x512xf32, #tpu.memory_space<vmem>>, vector<1x8x512xf32>
    %22 = vector.shape_cast %21 : vector<1x8x512xf32> to vector<8x512xf32>
    %c0_16 = arith.constant 0 : index
    %c0_17 = arith.constant 0 : index
    %23 = vector.load %arg3[%c0_16, %c0_17] : memref<128x512xbf16, #tpu.memory_space<vmem>>, vector<128x512xbf16>
    %cst_18 = arith.constant dense<0.000000e+00> : vector<8x512xf32>
    %24 = tpu.matmul %16, %23, %cst_18 {dimension_numbers = #tpu.dot_dimension_numbers<[1], [0], [0], [1], [0, 0, 1, 1], [], []>} : vector<8x128xbf16>, vector<128x512xbf16>, vector<8x512xf32> -> vector<8x512xf32>
    %25 = arith.addf %22, %24 : vector<8x512xf32>
    %26 = vector.extract_strided_slice %25 {offsets = [0, 0], sizes = [8, 384], strides = [1, 1]} : vector<8x512xf32> to vector<8x384xf32>
    %cst_19 = arith.constant 5.000000e-01 : f32
    %27 = vector.broadcast %cst_19 : f32 to vector<8x384xf32>
    %28 = arith.mulf %27, %26 : vector<8x384xf32>
    %29 = math.tanh %28 : vector<8x384xf32>
    %cst_20 = arith.constant 5.000000e-01 : f32
    %30 = vector.broadcast %cst_20 : f32 to vector<8x384xf32>
    %31 = arith.mulf %30, %29 : vector<8x384xf32>
    %cst_21 = arith.constant 5.000000e-01 : f32
    %32 = vector.broadcast %cst_21 : f32 to vector<8x384xf32>
    %33 = arith.addf %31, %32 : vector<8x384xf32>
    %34 = vector.extract_strided_slice %33 {offsets = [0, 0], sizes = [8, 128], strides = [1, 1]} : vector<8x384xf32> to vector<8x128xf32>
    %35 = vector.extract_strided_slice %33 {offsets = [0, 128], sizes = [8, 128], strides = [1, 1]} : vector<8x384xf32> to vector<8x128xf32>
    %36 = vector.extract_strided_slice %33 {offsets = [0, 256], sizes = [8, 128], strides = [1, 1]} : vector<8x384xf32> to vector<8x128xf32>
    %37 = vector.extract_strided_slice %25 {offsets = [0, 384], sizes = [8, 128], strides = [1, 1]} : vector<8x512xf32> to vector<8x128xf32>
    %38 = math.tanh %37 : vector<8x128xf32>
    %39 = arith.mulf %35, %15 : vector<8x128xf32>
    %40 = arith.mulf %34, %38 : vector<8x128xf32>
    %41 = arith.addf %39, %40 : vector<8x128xf32>
    %42 = math.tanh %41 : vector<8x128xf32>
    %43 = arith.mulf %36, %42 : vector<8x128xf32>
    %44 = tpu.concatenate %16, %17 in 1 : vector<8x128xbf16>, vector<8x128xbf16> -> vector<8x256xbf16>
    %c0_22 = arith.constant 0 : index
    %c0_23 = arith.constant 0 : index
    %45 = vector.load %arg5[%c0_22, %c0_23] : memref<256x512xbf16, #tpu.memory_space<vmem>>, vector<256x512xbf16>
    %cst_24 = arith.constant dense<0.000000e+00> : vector<8x512xf32>
    %46 = tpu.matmul %44, %45, %cst_24 {dimension_numbers = #tpu.dot_dimension_numbers<[1], [0], [0], [1], [0, 0, 1, 1], [], []>} : vector<8x256xbf16>, vector<256x512xbf16>, vector<8x512xf32> -> vector<8x512xf32>
    %47 = arith.addf %46, %11 : vector<8x512xf32>
    %48 = vector.extract_strided_slice %47 {offsets = [0, 0], sizes = [8, 384], strides = [1, 1]} : vector<8x512xf32> to vector<8x384xf32>
    %cst_25 = arith.constant 5.000000e-01 : f32
    %49 = vector.broadcast %cst_25 : f32 to vector<8x384xf32>
    %50 = arith.mulf %49, %48 : vector<8x384xf32>
    %51 = math.tanh %50 : vector<8x384xf32>
    %cst_26 = arith.constant 5.000000e-01 : f32
    %52 = vector.broadcast %cst_26 : f32 to vector<8x384xf32>
    %53 = arith.mulf %52, %51 : vector<8x384xf32>
    %cst_27 = arith.constant 5.000000e-01 : f32
    %54 = vector.broadcast %cst_27 : f32 to vector<8x384xf32>
    %55 = arith.addf %53, %54 : vector<8x384xf32>
    %56 = vector.extract_strided_slice %55 {offsets = [0, 0], sizes = [8, 128], strides = [1, 1]} : vector<8x384xf32> to vector<8x128xf32>
    %57 = vector.extract_strided_slice %55 {offsets = [0, 128], sizes = [8, 128], strides = [1, 1]} : vector<8x384xf32> to vector<8x128xf32>
    %58 = vector.extract_strided_slice %55 {offsets = [0, 256], sizes = [8, 128], strides = [1, 1]} : vector<8x384xf32> to vector<8x128xf32>
    %59 = vector.extract_strided_slice %47 {offsets = [0, 384], sizes = [8, 128], strides = [1, 1]} : vector<8x512xf32> to vector<8x128xf32>
    %60 = math.tanh %59 : vector<8x128xf32>
    %61 = arith.mulf %57, %15 : vector<8x128xf32>
    %62 = arith.mulf %56, %60 : vector<8x128xf32>
    %63 = arith.addf %61, %62 : vector<8x128xf32>
    %64 = math.tanh %63 : vector<8x128xf32>
    %65 = arith.mulf %58, %64 : vector<8x128xf32>
    %c1_i32 = arith.constant 1 : i32
    %66 = arith.cmpi sge, %c0_i32, %c1_i32 : i32
    %67 = arith.extui %66 : i1 to i32
    %68 = arith.sitofp %67 : i32 to f32
    %69 = arith.subf %65, %15 : vector<8x128xf32>
    %70 = vector.broadcast %68 : f32 to vector<8x128xf32>
    %71 = arith.mulf %70, %69 : vector<8x128xf32>
    %72 = arith.addf %15, %71 : vector<8x128xf32>
    %73 = arith.subf %63, %15 : vector<8x128xf32>
    %74 = vector.broadcast %68 : f32 to vector<8x128xf32>
    %75 = arith.mulf %74, %73 : vector<8x128xf32>
    %76 = arith.addf %15, %75 : vector<8x128xf32>
    %77 = tpu.concatenate %17, %18 in 1 : vector<8x128xbf16>, vector<8x128xbf16> -> vector<8x256xbf16>
    %c0_28 = arith.constant 0 : index
    %c0_29 = arith.constant 0 : index
    %78 = vector.load %arg7[%c0_28, %c0_29] : memref<256x512xbf16, #tpu.memory_space<vmem>>, vector<256x512xbf16>
    %cst_30 = arith.constant dense<0.000000e+00> : vector<8x512xf32>
    %79 = tpu.matmul %77, %78, %cst_30 {dimension_numbers = #tpu.dot_dimension_numbers<[1], [0], [0], [1], [0, 0, 1, 1], [], []>} : vector<8x256xbf16>, vector<256x512xbf16>, vector<8x512xf32> -> vector<8x512xf32>
    %80 = arith.addf %79, %14 : vector<8x512xf32>
    %81 = vector.extract_strided_slice %80 {offsets = [0, 0], sizes = [8, 384], strides = [1, 1]} : vector<8x512xf32> to vector<8x384xf32>
    %cst_31 = arith.constant 5.000000e-01 : f32
    %82 = vector.broadcast %cst_31 : f32 to vector<8x384xf32>
    %83 = arith.mulf %82, %81 : vector<8x384xf32>
    %84 = math.tanh %83 : vector<8x384xf32>
    %cst_32 = arith.constant 5.000000e-01 : f32
    %85 = vector.broadcast %cst_32 : f32 to vector<8x384xf32>
    %86 = arith.mulf %85, %84 : vector<8x384xf32>
    %cst_33 = arith.constant 5.000000e-01 : f32
    %87 = vector.broadcast %cst_33 : f32 to vector<8x384xf32>
    %88 = arith.addf %86, %87 : vector<8x384xf32>
    %89 = vector.extract_strided_slice %88 {offsets = [0, 0], sizes = [8, 128], strides = [1, 1]} : vector<8x384xf32> to vector<8x128xf32>
    %90 = vector.extract_strided_slice %88 {offsets = [0, 128], sizes = [8, 128], strides = [1, 1]} : vector<8x384xf32> to vector<8x128xf32>
    %91 = vector.extract_strided_slice %88 {offsets = [0, 256], sizes = [8, 128], strides = [1, 1]} : vector<8x384xf32> to vector<8x128xf32>
    %92 = vector.extract_strided_slice %80 {offsets = [0, 384], sizes = [8, 128], strides = [1, 1]} : vector<8x512xf32> to vector<8x128xf32>
    %93 = math.tanh %92 : vector<8x128xf32>
    %94 = arith.mulf %90, %15 : vector<8x128xf32>
    %95 = arith.mulf %89, %93 : vector<8x128xf32>
    %96 = arith.addf %94, %95 : vector<8x128xf32>
    %97 = math.tanh %96 : vector<8x128xf32>
    %98 = arith.mulf %91, %97 : vector<8x128xf32>
    %c2_i32 = arith.constant 2 : i32
    %99 = arith.cmpi sge, %c0_i32, %c2_i32 : i32
    %100 = arith.extui %99 : i1 to i32
    %101 = arith.sitofp %100 : i32 to f32
    %102 = arith.subf %98, %15 : vector<8x128xf32>
    %103 = vector.broadcast %101 : f32 to vector<8x128xf32>
    %104 = arith.mulf %103, %102 : vector<8x128xf32>
    %105 = arith.addf %15, %104 : vector<8x128xf32>
    %106 = arith.subf %96, %15 : vector<8x128xf32>
    %107 = vector.broadcast %101 : f32 to vector<8x128xf32>
    %108 = arith.mulf %107, %106 : vector<8x128xf32>
    %109 = arith.addf %15, %108 : vector<8x128xf32>
    %c2_i32_34 = arith.constant 2 : i32
    %110 = arith.subi %c0_i32, %c2_i32_34 : i32
    %c0_i32_35 = arith.constant 0 : i32
    %111 = arith.maxsi %110, %c0_i32_35 : i32
    %112 = arith.index_cast %111 : i32 to index
    %c0_36 = arith.constant 0 : index
    %c0_37 = arith.constant 0 : index
    %113 = vector.load %arg13[%112, %c0_36, %c0_37] : memref<8x8x128xf32, #tpu.memory_space<vmem>>, vector<1x8x128xf32>
    %114 = vector.shape_cast %113 : vector<1x8x128xf32> to vector<8x128xf32>
    %115 = vector.shape_cast %105 : vector<8x128xf32> to vector<1x8x128xf32>
    tpu.vector_store %arg13[%112, %c0_36, %c0_37], %115 {strides = array<i32>} : memref<8x8x128xf32, #tpu.memory_space<vmem>>, vector<1x8x128xf32>,
    %c1_i32_38 = arith.constant 1 : i32
    %116 = arith.truncf %43 : vector<8x128xf32> to vector<8x128xbf16>
    %117 = arith.truncf %72 : vector<8x128xf32> to vector<8x128xbf16>
    %118 = arith.truncf %105 : vector<8x128xf32> to vector<8x128xbf16>
    %c7_i32_39 = arith.constant 7 : i32
    %119 = arith.minsi %c1_i32_38, %c7_i32_39 : i32
    %120 = arith.index_cast %119 : i32 to index
    %c0_40 = arith.constant 0 : index
    %c0_41 = arith.constant 0 : index
    %121 = vector.load %arg12[%120, %c0_40, %c0_41] : memref<8x8x512xf32, #tpu.memory_space<vmem>>, vector<1x8x512xf32>
    %122 = vector.shape_cast %121 : vector<1x8x512xf32> to vector<8x512xf32>
    %c0_42 = arith.constant 0 : index
    %c0_43 = arith.constant 0 : index
    %123 = vector.load %arg3[%c0_42, %c0_43] : memref<128x512xbf16, #tpu.memory_space<vmem>>, vector<128x512xbf16>
    %cst_44 = arith.constant dense<0.000000e+00> : vector<8x512xf32>
    %124 = tpu.matmul %116, %123, %cst_44 {dimension_numbers = #tpu.dot_dimension_numbers<[1], [0], [0], [1], [0, 0, 1, 1], [], []>} : vector<8x128xbf16>, vector<128x512xbf16>, vector<8x512xf32> -> vector<8x512xf32>
    %125 = arith.addf %122, %124 : vector<8x512xf32>
    %126 = vector.extract_strided_slice %125 {offsets = [0, 0], sizes = [8, 384], strides = [1, 1]} : vector<8x512xf32> to vector<8x384xf32>
    %cst_45 = arith.constant 5.000000e-01 : f32
    %127 = vector.broadcast %cst_45 : f32 to vector<8x384xf32>
    %128 = arith.mulf %127, %126 : vector<8x384xf32>
    %129 = math.tanh %128 : vector<8x384xf32>
    %cst_46 = arith.constant 5.000000e-01 : f32
    %130 = vector.broadcast %cst_46 : f32 to vector<8x384xf32>
    %131 = arith.mulf %130, %129 : vector<8x384xf32>
    %cst_47 = arith.constant 5.000000e-01 : f32
    %132 = vector.broadcast %cst_47 : f32 to vector<8x384xf32>
    %133 = arith.addf %131, %132 : vector<8x384xf32>
    %134 = vector.extract_strided_slice %133 {offsets = [0, 0], sizes = [8, 128], strides = [1, 1]} : vector<8x384xf32> to vector<8x128xf32>
    %135 = vector.extract_strided_slice %133 {offsets = [0, 128], sizes = [8, 128], strides = [1, 1]} : vector<8x384xf32> to vector<8x128xf32>
    %136 = vector.extract_strided_slice %133 {offsets = [0, 256], sizes = [8, 128], strides = [1, 1]} : vector<8x384xf32> to vector<8x128xf32>
    %137 = vector.extract_strided_slice %125 {offsets = [0, 384], sizes = [8, 128], strides = [1, 1]} : vector<8x512xf32> to vector<8x128xf32>
    %138 = math.tanh %137 : vector<8x128xf32>
    %139 = arith.mulf %135, %41 : vector<8x128xf32>
    %140 = arith.mulf %134, %138 : vector<8x128xf32>
    %141 = arith.addf %139, %140 : vector<8x128xf32>
    %142 = math.tanh %141 : vector<8x128xf32>
    %143 = arith.mulf %136, %142 : vector<8x128xf32>
    %144 = tpu.concatenate %116, %117 in 1 : vector<8x128xbf16>, vector<8x128xbf16> -> vector<8x256xbf16>
    %c0_48 = arith.constant 0 : index
    %c0_49 = arith.constant 0 : index
    %145 = vector.load %arg5[%c0_48, %c0_49] : memref<256x512xbf16, #tpu.memory_space<vmem>>, vector<256x512xbf16>
    %cst_50 = arith.constant dense<0.000000e+00> : vector<8x512xf32>
    %146 = tpu.matmul %144, %145, %cst_50 {dimension_numbers = #tpu.dot_dimension_numbers<[1], [0], [0], [1], [0, 0, 1, 1], [], []>} : vector<8x256xbf16>, vector<256x512xbf16>, vector<8x512xf32> -> vector<8x512xf32>
    %147 = arith.addf %146, %11 : vector<8x512xf32>
    %148 = vector.extract_strided_slice %147 {offsets = [0, 0], sizes = [8, 384], strides = [1, 1]} : vector<8x512xf32> to vector<8x384xf32>
    %cst_51 = arith.constant 5.000000e-01 : f32
    %149 = vector.broadcast %cst_51 : f32 to vector<8x384xf32>
    %150 = arith.mulf %149, %148 : vector<8x384xf32>
    %151 = math.tanh %150 : vector<8x384xf32>
    %cst_52 = arith.constant 5.000000e-01 : f32
    %152 = vector.broadcast %cst_52 : f32 to vector<8x384xf32>
    %153 = arith.mulf %152, %151 : vector<8x384xf32>
    %cst_53 = arith.constant 5.000000e-01 : f32
    %154 = vector.broadcast %cst_53 : f32 to vector<8x384xf32>
    %155 = arith.addf %153, %154 : vector<8x384xf32>
    %156 = vector.extract_strided_slice %155 {offsets = [0, 0], sizes = [8, 128], strides = [1, 1]} : vector<8x384xf32> to vector<8x128xf32>
    %157 = vector.extract_strided_slice %155 {offsets = [0, 128], sizes = [8, 128], strides = [1, 1]} : vector<8x384xf32> to vector<8x128xf32>
    %158 = vector.extract_strided_slice %155 {offsets = [0, 256], sizes = [8, 128], strides = [1, 1]} : vector<8x384xf32> to vector<8x128xf32>
    %159 = vector.extract_strided_slice %147 {offsets = [0, 384], sizes = [8, 128], strides = [1, 1]} : vector<8x512xf32> to vector<8x128xf32>
    %160 = math.tanh %159 : vector<8x128xf32>
    %161 = arith.mulf %157, %76 : vector<8x128xf32>
    %162 = arith.mulf %156, %160 : vector<8x128xf32>
    %163 = arith.addf %161, %162 : vector<8x128xf32>
    %164 = math.tanh %163 : vector<8x128xf32>
    %165 = arith.mulf %158, %164 : vector<8x128xf32>
    %c1_i32_54 = arith.constant 1 : i32
    %166 = arith.cmpi sge, %c1_i32_38, %c1_i32_54 : i32
    %167 = arith.extui %166 : i1 to i32
    %168 = arith.sitofp %167 : i32 to f32
    %169 = arith.subf %165, %72 : vector<8x128xf32>
    %170 = vector.broadcast %168 : f32 to vector<8x128xf32>
    %171 = arith.mulf %170, %169 : vector<8x128xf32>
    %172 = arith.addf %72, %171 : vector<8x128xf32>
    %173 = arith.subf %163, %76 : vector<8x128xf32>
    %174 = vector.broadcast %168 : f32 to vector<8x128xf32>
    %175 = arith.mulf %174, %173 : vector<8x128xf32>
    %176 = arith.addf %76, %175 : vector<8x128xf32>
    %177 = tpu.concatenate %117, %118 in 1 : vector<8x128xbf16>, vector<8x128xbf16> -> vector<8x256xbf16>
    %c0_55 = arith.constant 0 : index
    %c0_56 = arith.constant 0 : index
    %178 = vector.load %arg7[%c0_55, %c0_56] : memref<256x512xbf16, #tpu.memory_space<vmem>>, vector<256x512xbf16>
    %cst_57 = arith.constant dense<0.000000e+00> : vector<8x512xf32>
    %179 = tpu.matmul %177, %178, %cst_57 {dimension_numbers = #tpu.dot_dimension_numbers<[1], [0], [0], [1], [0, 0, 1, 1], [], []>} : vector<8x256xbf16>, vector<256x512xbf16>, vector<8x512xf32> -> vector<8x512xf32>
    %180 = arith.addf %179, %14 : vector<8x512xf32>
    %181 = vector.extract_strided_slice %180 {offsets = [0, 0], sizes = [8, 384], strides = [1, 1]} : vector<8x512xf32> to vector<8x384xf32>
    %cst_58 = arith.constant 5.000000e-01 : f32
    %182 = vector.broadcast %cst_58 : f32 to vector<8x384xf32>
    %183 = arith.mulf %182, %181 : vector<8x384xf32>
    %184 = math.tanh %183 : vector<8x384xf32>
    %cst_59 = arith.constant 5.000000e-01 : f32
    %185 = vector.broadcast %cst_59 : f32 to vector<8x384xf32>
    %186 = arith.mulf %185, %184 : vector<8x384xf32>
    %cst_60 = arith.constant 5.000000e-01 : f32
    %187 = vector.broadcast %cst_60 : f32 to vector<8x384xf32>
    %188 = arith.addf %186, %187 : vector<8x384xf32>
    %189 = vector.extract_strided_slice %188 {offsets = [0, 0], sizes = [8, 128], strides = [1, 1]} : vector<8x384xf32> to vector<8x128xf32>
    %190 = vector.extract_strided_slice %188 {offsets = [0, 128], sizes = [8, 128], strides = [1, 1]} : vector<8x384xf32> to vector<8x128xf32>
    %191 = vector.extract_strided_slice %188 {offsets = [0, 256], sizes = [8, 128], strides = [1, 1]} : vector<8x384xf32> to vector<8x128xf32>
    %192 = vector.extract_strided_slice %180 {offsets = [0, 384], sizes = [8, 128], strides = [1, 1]} : vector<8x512xf32> to vector<8x128xf32>
    %193 = math.tanh %192 : vector<8x128xf32>
    %194 = arith.mulf %190, %109 : vector<8x128xf32>
    %195 = arith.mulf %189, %193 : vector<8x128xf32>
    %196 = arith.addf %194, %195 : vector<8x128xf32>
    %197 = math.tanh %196 : vector<8x128xf32>
    %198 = arith.mulf %191, %197 : vector<8x128xf32>
    %c2_i32_61 = arith.constant 2 : i32
    %199 = arith.cmpi sge, %c1_i32_38, %c2_i32_61 : i32
    %200 = arith.extui %199 : i1 to i32
    %201 = arith.sitofp %200 : i32 to f32
    %202 = arith.subf %198, %105 : vector<8x128xf32>
    %203 = vector.broadcast %201 : f32 to vector<8x128xf32>
    %204 = arith.mulf %203, %202 : vector<8x128xf32>
    %205 = arith.addf %105, %204 : vector<8x128xf32>
    %206 = arith.subf %196, %109 : vector<8x128xf32>
    %207 = vector.broadcast %201 : f32 to vector<8x128xf32>
    %208 = arith.mulf %207, %206 : vector<8x128xf32>
    %209 = arith.addf %109, %208 : vector<8x128xf32>
    %c2_i32_62 = arith.constant 2 : i32
    %210 = arith.subi %c1_i32_38, %c2_i32_62 : i32
    %c0_i32_63 = arith.constant 0 : i32
    %211 = arith.maxsi %210, %c0_i32_63 : i32
    %212 = arith.index_cast %211 : i32 to index
    %c0_64 = arith.constant 0 : index
    %c0_65 = arith.constant 0 : index
    %213 = vector.load %arg13[%212, %c0_64, %c0_65] : memref<8x8x128xf32, #tpu.memory_space<vmem>>, vector<1x8x128xf32>
    %214 = vector.shape_cast %213 : vector<1x8x128xf32> to vector<8x128xf32>
    %215 = vector.shape_cast %205 : vector<8x128xf32> to vector<1x8x128xf32>
    tpu.vector_store %arg13[%212, %c0_64, %c0_65], %215 {strides = array<i32>} : memref<8x8x128xf32, #tpu.memory_space<vmem>>, vector<1x8x128xf32>,
    %c2_i32_66 = arith.constant 2 : i32
    %216 = arith.truncf %143 : vector<8x128xf32> to vector<8x128xbf16>
    %217 = arith.truncf %172 : vector<8x128xf32> to vector<8x128xbf16>
    %218 = arith.truncf %205 : vector<8x128xf32> to vector<8x128xbf16>
    %c7_i32_67 = arith.constant 7 : i32
    %219 = arith.minsi %c2_i32_66, %c7_i32_67 : i32
    %220 = arith.index_cast %219 : i32 to index
    %c0_68 = arith.constant 0 : index
    %c0_69 = arith.constant 0 : index
    %221 = vector.load %arg12[%220, %c0_68, %c0_69] : memref<8x8x512xf32, #tpu.memory_space<vmem>>, vector<1x8x512xf32>
    %222 = vector.shape_cast %221 : vector<1x8x512xf32> to vector<8x512xf32>
    %c0_70 = arith.constant 0 : index
    %c0_71 = arith.constant 0 : index
    %223 = vector.load %arg3[%c0_70, %c0_71] : memref<128x512xbf16, #tpu.memory_space<vmem>>, vector<128x512xbf16>
    %cst_72 = arith.constant dense<0.000000e+00> : vector<8x512xf32>
    %224 = tpu.matmul %216, %223, %cst_72 {dimension_numbers = #tpu.dot_dimension_numbers<[1], [0], [0], [1], [0, 0, 1, 1], [], []>} : vector<8x128xbf16>, vector<128x512xbf16>, vector<8x512xf32> -> vector<8x512xf32>
    %225 = arith.addf %222, %224 : vector<8x512xf32>
    %226 = vector.extract_strided_slice %225 {offsets = [0, 0], sizes = [8, 384], strides = [1, 1]} : vector<8x512xf32> to vector<8x384xf32>
    %cst_73 = arith.constant 5.000000e-01 : f32
    %227 = vector.broadcast %cst_73 : f32 to vector<8x384xf32>
    %228 = arith.mulf %227, %226 : vector<8x384xf32>
    %229 = math.tanh %228 : vector<8x384xf32>
    %cst_74 = arith.constant 5.000000e-01 : f32
    %230 = vector.broadcast %cst_74 : f32 to vector<8x384xf32>
    %231 = arith.mulf %230, %229 : vector<8x384xf32>
    %cst_75 = arith.constant 5.000000e-01 : f32
    %232 = vector.broadcast %cst_75 : f32 to vector<8x384xf32>
    %233 = arith.addf %231, %232 : vector<8x384xf32>
    %234 = vector.extract_strided_slice %233 {offsets = [0, 0], sizes = [8, 128], strides = [1, 1]} : vector<8x384xf32> to vector<8x128xf32>
    %235 = vector.extract_strided_slice %233 {offsets = [0, 128], sizes = [8, 128], strides = [1, 1]} : vector<8x384xf32> to vector<8x128xf32>
    %236 = vector.extract_strided_slice %233 {offsets = [0, 256], sizes = [8, 128], strides = [1, 1]} : vector<8x384xf32> to vector<8x128xf32>
    %237 = vector.extract_strided_slice %225 {offsets = [0, 384], sizes = [8, 128], strides = [1, 1]} : vector<8x512xf32> to vector<8x128xf32>
    %238 = math.tanh %237 : vector<8x128xf32>
    %239 = arith.mulf %235, %141 : vector<8x128xf32>
    %240 = arith.mulf %234, %238 : vector<8x128xf32>
    %241 = arith.addf %239, %240 : vector<8x128xf32>
    %242 = math.tanh %241 : vector<8x128xf32>
    %243 = arith.mulf %236, %242 : vector<8x128xf32>
    %244 = tpu.concatenate %216, %217 in 1 : vector<8x128xbf16>, vector<8x128xbf16> -> vector<8x256xbf16>
    %c0_76 = arith.constant 0 : index
    %c0_77 = arith.constant 0 : index
    %245 = vector.load %arg5[%c0_76, %c0_77] : memref<256x512xbf16, #tpu.memory_space<vmem>>, vector<256x512xbf16>
    %cst_78 = arith.constant dense<0.000000e+00> : vector<8x512xf32>
    %246 = tpu.matmul %244, %245, %cst_78 {dimension_numbers = #tpu.dot_dimension_numbers<[1], [0], [0], [1], [0, 0, 1, 1], [], []>} : vector<8x256xbf16>, vector<256x512xbf16>, vector<8x512xf32> -> vector<8x512xf32>
    %247 = arith.addf %246, %11 : vector<8x512xf32>
    %248 = vector.extract_strided_slice %247 {offsets = [0, 0], sizes = [8, 384], strides = [1, 1]} : vector<8x512xf32> to vector<8x384xf32>
    %cst_79 = arith.constant 5.000000e-01 : f32
    %249 = vector.broadcast %cst_79 : f32 to vector<8x384xf32>
    %250 = arith.mulf %249, %248 : vector<8x384xf32>
    %251 = math.tanh %250 : vector<8x384xf32>
    %cst_80 = arith.constant 5.000000e-01 : f32
    %252 = vector.broadcast %cst_80 : f32 to vector<8x384xf32>
    %253 = arith.mulf %252, %251 : vector<8x384xf32>
    %cst_81 = arith.constant 5.000000e-01 : f32
    %254 = vector.broadcast %cst_81 : f32 to vector<8x384xf32>
    %255 = arith.addf %253, %254 : vector<8x384xf32>
    %256 = vector.extract_strided_slice %255 {offsets = [0, 0], sizes = [8, 128], strides = [1, 1]} : vector<8x384xf32> to vector<8x128xf32>
    %257 = vector.extract_strided_slice %255 {offsets = [0, 128], sizes = [8, 128], strides = [1, 1]} : vector<8x384xf32> to vector<8x128xf32>
    %258 = vector.extract_strided_slice %255 {offsets = [0, 256], sizes = [8, 128], strides = [1, 1]} : vector<8x384xf32> to vector<8x128xf32>
    %259 = vector.extract_strided_slice %247 {offsets = [0, 384], sizes = [8, 128], strides = [1, 1]} : vector<8x512xf32> to vector<8x128xf32>
    %260 = math.tanh %259 : vector<8x128xf32>
    %261 = arith.mulf %257, %176 : vector<8x128xf32>
    %262 = arith.mulf %256, %260 : vector<8x128xf32>
    %263 = arith.addf %261, %262 : vector<8x128xf32>
    %264 = math.tanh %263 : vector<8x128xf32>
    %265 = arith.mulf %258, %264 : vector<8x128xf32>
    %c1_i32_82 = arith.constant 1 : i32
    %266 = arith.cmpi sge, %c2_i32_66, %c1_i32_82 : i32
    %267 = arith.extui %266 : i1 to i32
    %268 = arith.sitofp %267 : i32 to f32
    %269 = arith.subf %265, %172 : vector<8x128xf32>
    %270 = vector.broadcast %268 : f32 to vector<8x128xf32>
    %271 = arith.mulf %270, %269 : vector<8x128xf32>
    %272 = arith.addf %172, %271 : vector<8x128xf32>
    %273 = arith.subf %263, %176 : vector<8x128xf32>
    %274 = vector.broadcast %268 : f32 to vector<8x128xf32>
    %275 = arith.mulf %274, %273 : vector<8x128xf32>
    %276 = arith.addf %176, %275 : vector<8x128xf32>
    %277 = tpu.concatenate %217, %218 in 1 : vector<8x128xbf16>, vector<8x128xbf16> -> vector<8x256xbf16>
    %c0_83 = arith.constant 0 : index
    %c0_84 = arith.constant 0 : index
    %278 = vector.load %arg7[%c0_83, %c0_84] : memref<256x512xbf16, #tpu.memory_space<vmem>>, vector<256x512xbf16>
    %cst_85 = arith.constant dense<0.000000e+00> : vector<8x512xf32>
    %279 = tpu.matmul %277, %278, %cst_85 {dimension_numbers = #tpu.dot_dimension_numbers<[1], [0], [0], [1], [0, 0, 1, 1], [], []>} : vector<8x256xbf16>, vector<256x512xbf16>, vector<8x512xf32> -> vector<8x512xf32>
    %280 = arith.addf %279, %14 : vector<8x512xf32>
    %281 = vector.extract_strided_slice %280 {offsets = [0, 0], sizes = [8, 384], strides = [1, 1]} : vector<8x512xf32> to vector<8x384xf32>
    %cst_86 = arith.constant 5.000000e-01 : f32
    %282 = vector.broadcast %cst_86 : f32 to vector<8x384xf32>
    %283 = arith.mulf %282, %281 : vector<8x384xf32>
    %284 = math.tanh %283 : vector<8x384xf32>
    %cst_87 = arith.constant 5.000000e-01 : f32
    %285 = vector.broadcast %cst_87 : f32 to vector<8x384xf32>
    %286 = arith.mulf %285, %284 : vector<8x384xf32>
    %cst_88 = arith.constant 5.000000e-01 : f32
    %287 = vector.broadcast %cst_88 : f32 to vector<8x384xf32>
    %288 = arith.addf %286, %287 : vector<8x384xf32>
    %289 = vector.extract_strided_slice %288 {offsets = [0, 0], sizes = [8, 128], strides = [1, 1]} : vector<8x384xf32> to vector<8x128xf32>
    %290 = vector.extract_strided_slice %288 {offsets = [0, 128], sizes = [8, 128], strides = [1, 1]} : vector<8x384xf32> to vector<8x128xf32>
    %291 = vector.extract_strided_slice %288 {offsets = [0, 256], sizes = [8, 128], strides = [1, 1]} : vector<8x384xf32> to vector<8x128xf32>
    %292 = vector.extract_strided_slice %280 {offsets = [0, 384], sizes = [8, 128], strides = [1, 1]} : vector<8x512xf32> to vector<8x128xf32>
    %293 = math.tanh %292 : vector<8x128xf32>
    %294 = arith.mulf %290, %209 : vector<8x128xf32>
    %295 = arith.mulf %289, %293 : vector<8x128xf32>
    %296 = arith.addf %294, %295 : vector<8x128xf32>
    %297 = math.tanh %296 : vector<8x128xf32>
    %298 = arith.mulf %291, %297 : vector<8x128xf32>
    %c2_i32_89 = arith.constant 2 : i32
    %299 = arith.cmpi sge, %c2_i32_66, %c2_i32_89 : i32
    %300 = arith.extui %299 : i1 to i32
    %301 = arith.sitofp %300 : i32 to f32
    %302 = arith.subf %298, %205 : vector<8x128xf32>
    %303 = vector.broadcast %301 : f32 to vector<8x128xf32>
    %304 = arith.mulf %303, %302 : vector<8x128xf32>
    %305 = arith.addf %205, %304 : vector<8x128xf32>
    %306 = arith.subf %296, %209 : vector<8x128xf32>
    %307 = vector.broadcast %301 : f32 to vector<8x128xf32>
    %308 = arith.mulf %307, %306 : vector<8x128xf32>
    %309 = arith.addf %209, %308 : vector<8x128xf32>
    %c2_i32_90 = arith.constant 2 : i32
    %310 = arith.subi %c2_i32_66, %c2_i32_90 : i32
    %c0_i32_91 = arith.constant 0 : i32
    %311 = arith.maxsi %310, %c0_i32_91 : i32
    %312 = arith.index_cast %311 : i32 to index
    %c0_92 = arith.constant 0 : index
    %c0_93 = arith.constant 0 : index
    %313 = vector.load %arg13[%312, %c0_92, %c0_93] : memref<8x8x128xf32, #tpu.memory_space<vmem>>, vector<1x8x128xf32>
    %314 = vector.shape_cast %313 : vector<1x8x128xf32> to vector<8x128xf32>
    %315 = vector.shape_cast %305 : vector<8x128xf32> to vector<1x8x128xf32>
    tpu.vector_store %arg13[%312, %c0_92, %c0_93], %315 {strides = array<i32>} : memref<8x8x128xf32, #tpu.memory_space<vmem>>, vector<1x8x128xf32>,
    %c3_i32 = arith.constant 3 : i32
    %316 = arith.truncf %243 : vector<8x128xf32> to vector<8x128xbf16>
    %317 = arith.truncf %272 : vector<8x128xf32> to vector<8x128xbf16>
    %318 = arith.truncf %305 : vector<8x128xf32> to vector<8x128xbf16>
    %c7_i32_94 = arith.constant 7 : i32
    %319 = arith.minsi %c3_i32, %c7_i32_94 : i32
    %320 = arith.index_cast %319 : i32 to index
    %c0_95 = arith.constant 0 : index
    %c0_96 = arith.constant 0 : index
    %321 = vector.load %arg12[%320, %c0_95, %c0_96] : memref<8x8x512xf32, #tpu.memory_space<vmem>>, vector<1x8x512xf32>
    %322 = vector.shape_cast %321 : vector<1x8x512xf32> to vector<8x512xf32>
    %c0_97 = arith.constant 0 : index
    %c0_98 = arith.constant 0 : index
    %323 = vector.load %arg3[%c0_97, %c0_98] : memref<128x512xbf16, #tpu.memory_space<vmem>>, vector<128x512xbf16>
    %cst_99 = arith.constant dense<0.000000e+00> : vector<8x512xf32>
    %324 = tpu.matmul %316, %323, %cst_99 {dimension_numbers = #tpu.dot_dimension_numbers<[1], [0], [0], [1], [0, 0, 1, 1], [], []>} : vector<8x128xbf16>, vector<128x512xbf16>, vector<8x512xf32> -> vector<8x512xf32>
    %325 = arith.addf %322, %324 : vector<8x512xf32>
    %326 = vector.extract_strided_slice %325 {offsets = [0, 0], sizes = [8, 384], strides = [1, 1]} : vector<8x512xf32> to vector<8x384xf32>
    %cst_100 = arith.constant 5.000000e-01 : f32
    %327 = vector.broadcast %cst_100 : f32 to vector<8x384xf32>
    %328 = arith.mulf %327, %326 : vector<8x384xf32>
    %329 = math.tanh %328 : vector<8x384xf32>
    %cst_101 = arith.constant 5.000000e-01 : f32
    %330 = vector.broadcast %cst_101 : f32 to vector<8x384xf32>
    %331 = arith.mulf %330, %329 : vector<8x384xf32>
    %cst_102 = arith.constant 5.000000e-01 : f32
    %332 = vector.broadcast %cst_102 : f32 to vector<8x384xf32>
    %333 = arith.addf %331, %332 : vector<8x384xf32>
    %334 = vector.extract_strided_slice %333 {offsets = [0, 0], sizes = [8, 128], strides = [1, 1]} : vector<8x384xf32> to vector<8x128xf32>
    %335 = vector.extract_strided_slice %333 {offsets = [0, 128], sizes = [8, 128], strides = [1, 1]} : vector<8x384xf32> to vector<8x128xf32>
    %336 = vector.extract_strided_slice %333 {offsets = [0, 256], sizes = [8, 128], strides = [1, 1]} : vector<8x384xf32> to vector<8x128xf32>
    %337 = vector.extract_strided_slice %325 {offsets = [0, 384], sizes = [8, 128], strides = [1, 1]} : vector<8x512xf32> to vector<8x128xf32>
    %338 = math.tanh %337 : vector<8x128xf32>
    %339 = arith.mulf %335, %241 : vector<8x128xf32>
    %340 = arith.mulf %334, %338 : vector<8x128xf32>
    %341 = arith.addf %339, %340 : vector<8x128xf32>
    %342 = math.tanh %341 : vector<8x128xf32>
    %343 = arith.mulf %336, %342 : vector<8x128xf32>
    %344 = tpu.concatenate %316, %317 in 1 : vector<8x128xbf16>, vector<8x128xbf16> -> vector<8x256xbf16>
    %c0_103 = arith.constant 0 : index
    %c0_104 = arith.constant 0 : index
    %345 = vector.load %arg5[%c0_103, %c0_104] : memref<256x512xbf16, #tpu.memory_space<vmem>>, vector<256x512xbf16>
    %cst_105 = arith.constant dense<0.000000e+00> : vector<8x512xf32>
    %346 = tpu.matmul %344, %345, %cst_105 {dimension_numbers = #tpu.dot_dimension_numbers<[1], [0], [0], [1], [0, 0, 1, 1], [], []>} : vector<8x256xbf16>, vector<256x512xbf16>, vector<8x512xf32> -> vector<8x512xf32>
    %347 = arith.addf %346, %11 : vector<8x512xf32>
    %348 = vector.extract_strided_slice %347 {offsets = [0, 0], sizes = [8, 384], strides = [1, 1]} : vector<8x512xf32> to vector<8x384xf32>
    %cst_106 = arith.constant 5.000000e-01 : f32
    %349 = vector.broadcast %cst_106 : f32 to vector<8x384xf32>
    %350 = arith.mulf %349, %348 : vector<8x384xf32>
    %351 = math.tanh %350 : vector<8x384xf32>
    %cst_107 = arith.constant 5.000000e-01 : f32
    %352 = vector.broadcast %cst_107 : f32 to vector<8x384xf32>
    %353 = arith.mulf %352, %351 : vector<8x384xf32>
    %cst_108 = arith.constant 5.000000e-01 : f32
    %354 = vector.broadcast %cst_108 : f32 to vector<8x384xf32>
    %355 = arith.addf %353, %354 : vector<8x384xf32>
    %356 = vector.extract_strided_slice %355 {offsets = [0, 0], sizes = [8, 128], strides = [1, 1]} : vector<8x384xf32> to vector<8x128xf32>
    %357 = vector.extract_strided_slice %355 {offsets = [0, 128], sizes = [8, 128], strides = [1, 1]} : vector<8x384xf32> to vector<8x128xf32>
    %358 = vector.extract_strided_slice %355 {offsets = [0, 256], sizes = [8, 128], strides = [1, 1]} : vector<8x384xf32> to vector<8x128xf32>
    %359 = vector.extract_strided_slice %347 {offsets = [0, 384], sizes = [8, 128], strides = [1, 1]} : vector<8x512xf32> to vector<8x128xf32>
    %360 = math.tanh %359 : vector<8x128xf32>
    %361 = arith.mulf %357, %276 : vector<8x128xf32>
    %362 = arith.mulf %356, %360 : vector<8x128xf32>
    %363 = arith.addf %361, %362 : vector<8x128xf32>
    %364 = math.tanh %363 : vector<8x128xf32>
    %365 = arith.mulf %358, %364 : vector<8x128xf32>
    %c1_i32_109 = arith.constant 1 : i32
    %366 = arith.cmpi sge, %c3_i32, %c1_i32_109 : i32
    %367 = arith.extui %366 : i1 to i32
    %368 = arith.sitofp %367 : i32 to f32
    %369 = arith.subf %365, %272 : vector<8x128xf32>
    %370 = vector.broadcast %368 : f32 to vector<8x128xf32>
    %371 = arith.mulf %370, %369 : vector<8x128xf32>
    %372 = arith.addf %272, %371 : vector<8x128xf32>
    %373 = arith.subf %363, %276 : vector<8x128xf32>
    %374 = vector.broadcast %368 : f32 to vector<8x128xf32>
    %375 = arith.mulf %374, %373 : vector<8x128xf32>
    %376 = arith.addf %276, %375 : vector<8x128xf32>
    %377 = tpu.concatenate %317, %318 in 1 : vector<8x128xbf16>, vector<8x128xbf16> -> vector<8x256xbf16>
    %c0_110 = arith.constant 0 : index
    %c0_111 = arith.constant 0 : index
    %378 = vector.load %arg7[%c0_110, %c0_111] : memref<256x512xbf16, #tpu.memory_space<vmem>>, vector<256x512xbf16>
    %cst_112 = arith.constant dense<0.000000e+00> : vector<8x512xf32>
    %379 = tpu.matmul %377, %378, %cst_112 {dimension_numbers = #tpu.dot_dimension_numbers<[1], [0], [0], [1], [0, 0, 1, 1], [], []>} : vector<8x256xbf16>, vector<256x512xbf16>, vector<8x512xf32> -> vector<8x512xf32>
    %380 = arith.addf %379, %14 : vector<8x512xf32>
    %381 = vector.extract_strided_slice %380 {offsets = [0, 0], sizes = [8, 384], strides = [1, 1]} : vector<8x512xf32> to vector<8x384xf32>
    %cst_113 = arith.constant 5.000000e-01 : f32
    %382 = vector.broadcast %cst_113 : f32 to vector<8x384xf32>
    %383 = arith.mulf %382, %381 : vector<8x384xf32>
    %384 = math.tanh %383 : vector<8x384xf32>
    %cst_114 = arith.constant 5.000000e-01 : f32
    %385 = vector.broadcast %cst_114 : f32 to vector<8x384xf32>
    %386 = arith.mulf %385, %384 : vector<8x384xf32>
    %cst_115 = arith.constant 5.000000e-01 : f32
    %387 = vector.broadcast %cst_115 : f32 to vector<8x384xf32>
    %388 = arith.addf %386, %387 : vector<8x384xf32>
    %389 = vector.extract_strided_slice %388 {offsets = [0, 0], sizes = [8, 128], strides = [1, 1]} : vector<8x384xf32> to vector<8x128xf32>
    %390 = vector.extract_strided_slice %388 {offsets = [0, 128], sizes = [8, 128], strides = [1, 1]} : vector<8x384xf32> to vector<8x128xf32>
    %391 = vector.extract_strided_slice %388 {offsets = [0, 256], sizes = [8, 128], strides = [1, 1]} : vector<8x384xf32> to vector<8x128xf32>
    %392 = vector.extract_strided_slice %380 {offsets = [0, 384], sizes = [8, 128], strides = [1, 1]} : vector<8x512xf32> to vector<8x128xf32>
    %393 = math.tanh %392 : vector<8x128xf32>
    %394 = arith.mulf %390, %309 : vector<8x128xf32>
    %395 = arith.mulf %389, %393 : vector<8x128xf32>
    %396 = arith.addf %394, %395 : vector<8x128xf32>
    %397 = math.tanh %396 : vector<8x128xf32>
    %398 = arith.mulf %391, %397 : vector<8x128xf32>
    %c2_i32_116 = arith.constant 2 : i32
    %399 = arith.cmpi sge, %c3_i32, %c2_i32_116 : i32
    %400 = arith.extui %399 : i1 to i32
    %401 = arith.sitofp %400 : i32 to f32
    %402 = arith.subf %398, %305 : vector<8x128xf32>
    %403 = vector.broadcast %401 : f32 to vector<8x128xf32>
    %404 = arith.mulf %403, %402 : vector<8x128xf32>
    %405 = arith.addf %305, %404 : vector<8x128xf32>
    %406 = arith.subf %396, %309 : vector<8x128xf32>
    %407 = vector.broadcast %401 : f32 to vector<8x128xf32>
    %408 = arith.mulf %407, %406 : vector<8x128xf32>
    %409 = arith.addf %309, %408 : vector<8x128xf32>
    %c2_i32_117 = arith.constant 2 : i32
    %410 = arith.subi %c3_i32, %c2_i32_117 : i32
    %c0_i32_118 = arith.constant 0 : i32
    %411 = arith.maxsi %410, %c0_i32_118 : i32
    %412 = arith.index_cast %411 : i32 to index
    %c0_119 = arith.constant 0 : index
    %c0_120 = arith.constant 0 : index
    %413 = vector.load %arg13[%412, %c0_119, %c0_120] : memref<8x8x128xf32, #tpu.memory_space<vmem>>, vector<1x8x128xf32>
    %414 = vector.shape_cast %413 : vector<1x8x128xf32> to vector<8x128xf32>
    %415 = vector.shape_cast %405 : vector<8x128xf32> to vector<1x8x128xf32>
    tpu.vector_store %arg13[%412, %c0_119, %c0_120], %415 {strides = array<i32>} : memref<8x8x128xf32, #tpu.memory_space<vmem>>, vector<1x8x128xf32>,
    %c4_i32 = arith.constant 4 : i32
    %416 = arith.truncf %343 : vector<8x128xf32> to vector<8x128xbf16>
    %417 = arith.truncf %372 : vector<8x128xf32> to vector<8x128xbf16>
    %418 = arith.truncf %405 : vector<8x128xf32> to vector<8x128xbf16>
    %c7_i32_121 = arith.constant 7 : i32
    %419 = arith.minsi %c4_i32, %c7_i32_121 : i32
    %420 = arith.index_cast %419 : i32 to index
    %c0_122 = arith.constant 0 : index
    %c0_123 = arith.constant 0 : index
    %421 = vector.load %arg12[%420, %c0_122, %c0_123] : memref<8x8x512xf32, #tpu.memory_space<vmem>>, vector<1x8x512xf32>
    %422 = vector.shape_cast %421 : vector<1x8x512xf32> to vector<8x512xf32>
    %c0_124 = arith.constant 0 : index
    %c0_125 = arith.constant 0 : index
    %423 = vector.load %arg3[%c0_124, %c0_125] : memref<128x512xbf16, #tpu.memory_space<vmem>>, vector<128x512xbf16>
    %cst_126 = arith.constant dense<0.000000e+00> : vector<8x512xf32>
    %424 = tpu.matmul %416, %423, %cst_126 {dimension_numbers = #tpu.dot_dimension_numbers<[1], [0], [0], [1], [0, 0, 1, 1], [], []>} : vector<8x128xbf16>, vector<128x512xbf16>, vector<8x512xf32> -> vector<8x512xf32>
    %425 = arith.addf %422, %424 : vector<8x512xf32>
    %426 = vector.extract_strided_slice %425 {offsets = [0, 0], sizes = [8, 384], strides = [1, 1]} : vector<8x512xf32> to vector<8x384xf32>
    %cst_127 = arith.constant 5.000000e-01 : f32
    %427 = vector.broadcast %cst_127 : f32 to vector<8x384xf32>
    %428 = arith.mulf %427, %426 : vector<8x384xf32>
    %429 = math.tanh %428 : vector<8x384xf32>
    %cst_128 = arith.constant 5.000000e-01 : f32
    %430 = vector.broadcast %cst_128 : f32 to vector<8x384xf32>
    %431 = arith.mulf %430, %429 : vector<8x384xf32>
    %cst_129 = arith.constant 5.000000e-01 : f32
    %432 = vector.broadcast %cst_129 : f32 to vector<8x384xf32>
    %433 = arith.addf %431, %432 : vector<8x384xf32>
    %434 = vector.extract_strided_slice %433 {offsets = [0, 0], sizes = [8, 128], strides = [1, 1]} : vector<8x384xf32> to vector<8x128xf32>
    %435 = vector.extract_strided_slice %433 {offsets = [0, 128], sizes = [8, 128], strides = [1, 1]} : vector<8x384xf32> to vector<8x128xf32>
    %436 = vector.extract_strided_slice %433 {offsets = [0, 256], sizes = [8, 128], strides = [1, 1]} : vector<8x384xf32> to vector<8x128xf32>
    %437 = vector.extract_strided_slice %425 {offsets = [0, 384], sizes = [8, 128], strides = [1, 1]} : vector<8x512xf32> to vector<8x128xf32>
    %438 = math.tanh %437 : vector<8x128xf32>
    %439 = arith.mulf %435, %341 : vector<8x128xf32>
    %440 = arith.mulf %434, %438 : vector<8x128xf32>
    %441 = arith.addf %439, %440 : vector<8x128xf32>
    %442 = math.tanh %441 : vector<8x128xf32>
    %443 = arith.mulf %436, %442 : vector<8x128xf32>
    %444 = tpu.concatenate %416, %417 in 1 : vector<8x128xbf16>, vector<8x128xbf16> -> vector<8x256xbf16>
    %c0_130 = arith.constant 0 : index
    %c0_131 = arith.constant 0 : index
    %445 = vector.load %arg5[%c0_130, %c0_131] : memref<256x512xbf16, #tpu.memory_space<vmem>>, vector<256x512xbf16>
    %cst_132 = arith.constant dense<0.000000e+00> : vector<8x512xf32>
    %446 = tpu.matmul %444, %445, %cst_132 {dimension_numbers = #tpu.dot_dimension_numbers<[1], [0], [0], [1], [0, 0, 1, 1], [], []>} : vector<8x256xbf16>, vector<256x512xbf16>, vector<8x512xf32> -> vector<8x512xf32>
    %447 = arith.addf %446, %11 : vector<8x512xf32>
    %448 = vector.extract_strided_slice %447 {offsets = [0, 0], sizes = [8, 384], strides = [1, 1]} : vector<8x512xf32> to vector<8x384xf32>
    %cst_133 = arith.constant 5.000000e-01 : f32
    %449 = vector.broadcast %cst_133 : f32 to vector<8x384xf32>
    %450 = arith.mulf %449, %448 : vector<8x384xf32>
    %451 = math.tanh %450 : vector<8x384xf32>
    %cst_134 = arith.constant 5.000000e-01 : f32
    %452 = vector.broadcast %cst_134 : f32 to vector<8x384xf32>
    %453 = arith.mulf %452, %451 : vector<8x384xf32>
    %cst_135 = arith.constant 5.000000e-01 : f32
    %454 = vector.broadcast %cst_135 : f32 to vector<8x384xf32>
    %455 = arith.addf %453, %454 : vector<8x384xf32>
    %456 = vector.extract_strided_slice %455 {offsets = [0, 0], sizes = [8, 128], strides = [1, 1]} : vector<8x384xf32> to vector<8x128xf32>
    %457 = vector.extract_strided_slice %455 {offsets = [0, 128], sizes = [8, 128], strides = [1, 1]} : vector<8x384xf32> to vector<8x128xf32>
    %458 = vector.extract_strided_slice %455 {offsets = [0, 256], sizes = [8, 128], strides = [1, 1]} : vector<8x384xf32> to vector<8x128xf32>
    %459 = vector.extract_strided_slice %447 {offsets = [0, 384], sizes = [8, 128], strides = [1, 1]} : vector<8x512xf32> to vector<8x128xf32>
    %460 = math.tanh %459 : vector<8x128xf32>
    %461 = arith.mulf %457, %376 : vector<8x128xf32>
    %462 = arith.mulf %456, %460 : vector<8x128xf32>
    %463 = arith.addf %461, %462 : vector<8x128xf32>
    %464 = math.tanh %463 : vector<8x128xf32>
    %465 = arith.mulf %458, %464 : vector<8x128xf32>
    %c1_i32_136 = arith.constant 1 : i32
    %466 = arith.cmpi sge, %c4_i32, %c1_i32_136 : i32
    %467 = arith.extui %466 : i1 to i32
    %468 = arith.sitofp %467 : i32 to f32
    %469 = arith.subf %465, %372 : vector<8x128xf32>
    %470 = vector.broadcast %468 : f32 to vector<8x128xf32>
    %471 = arith.mulf %470, %469 : vector<8x128xf32>
    %472 = arith.addf %372, %471 : vector<8x128xf32>
    %473 = arith.subf %463, %376 : vector<8x128xf32>
    %474 = vector.broadcast %468 : f32 to vector<8x128xf32>
    %475 = arith.mulf %474, %473 : vector<8x128xf32>
    %476 = arith.addf %376, %475 : vector<8x128xf32>
    %477 = tpu.concatenate %417, %418 in 1 : vector<8x128xbf16>, vector<8x128xbf16> -> vector<8x256xbf16>
    %c0_137 = arith.constant 0 : index
    %c0_138 = arith.constant 0 : index
    %478 = vector.load %arg7[%c0_137, %c0_138] : memref<256x512xbf16, #tpu.memory_space<vmem>>, vector<256x512xbf16>
    %cst_139 = arith.constant dense<0.000000e+00> : vector<8x512xf32>
    %479 = tpu.matmul %477, %478, %cst_139 {dimension_numbers = #tpu.dot_dimension_numbers<[1], [0], [0], [1], [0, 0, 1, 1], [], []>} : vector<8x256xbf16>, vector<256x512xbf16>, vector<8x512xf32> -> vector<8x512xf32>
    %480 = arith.addf %479, %14 : vector<8x512xf32>
    %481 = vector.extract_strided_slice %480 {offsets = [0, 0], sizes = [8, 384], strides = [1, 1]} : vector<8x512xf32> to vector<8x384xf32>
    %cst_140 = arith.constant 5.000000e-01 : f32
    %482 = vector.broadcast %cst_140 : f32 to vector<8x384xf32>
    %483 = arith.mulf %482, %481 : vector<8x384xf32>
    %484 = math.tanh %483 : vector<8x384xf32>
    %cst_141 = arith.constant 5.000000e-01 : f32
    %485 = vector.broadcast %cst_141 : f32 to vector<8x384xf32>
    %486 = arith.mulf %485, %484 : vector<8x384xf32>
    %cst_142 = arith.constant 5.000000e-01 : f32
    %487 = vector.broadcast %cst_142 : f32 to vector<8x384xf32>
    %488 = arith.addf %486, %487 : vector<8x384xf32>
    %489 = vector.extract_strided_slice %488 {offsets = [0, 0], sizes = [8, 128], strides = [1, 1]} : vector<8x384xf32> to vector<8x128xf32>
    %490 = vector.extract_strided_slice %488 {offsets = [0, 128], sizes = [8, 128], strides = [1, 1]} : vector<8x384xf32> to vector<8x128xf32>
    %491 = vector.extract_strided_slice %488 {offsets = [0, 256], sizes = [8, 128], strides = [1, 1]} : vector<8x384xf32> to vector<8x128xf32>
    %492 = vector.extract_strided_slice %480 {offsets = [0, 384], sizes = [8, 128], strides = [1, 1]} : vector<8x512xf32> to vector<8x128xf32>
    %493 = math.tanh %492 : vector<8x128xf32>
    %494 = arith.mulf %490, %409 : vector<8x128xf32>
    %495 = arith.mulf %489, %493 : vector<8x128xf32>
    %496 = arith.addf %494, %495 : vector<8x128xf32>
    %497 = math.tanh %496 : vector<8x128xf32>
    %498 = arith.mulf %491, %497 : vector<8x128xf32>
    %c2_i32_143 = arith.constant 2 : i32
    %499 = arith.cmpi sge, %c4_i32, %c2_i32_143 : i32
    %500 = arith.extui %499 : i1 to i32
    %501 = arith.sitofp %500 : i32 to f32
    %502 = arith.subf %498, %405 : vector<8x128xf32>
    %503 = vector.broadcast %501 : f32 to vector<8x128xf32>
    %504 = arith.mulf %503, %502 : vector<8x128xf32>
    %505 = arith.addf %405, %504 : vector<8x128xf32>
    %506 = arith.subf %496, %409 : vector<8x128xf32>
    %507 = vector.broadcast %501 : f32 to vector<8x128xf32>
    %508 = arith.mulf %507, %506 : vector<8x128xf32>
    %509 = arith.addf %409, %508 : vector<8x128xf32>
    %c2_i32_144 = arith.constant 2 : i32
    %510 = arith.subi %c4_i32, %c2_i32_144 : i32
    %c0_i32_145 = arith.constant 0 : i32
    %511 = arith.maxsi %510, %c0_i32_145 : i32
    %512 = arith.index_cast %511 : i32 to index
    %c0_146 = arith.constant 0 : index
    %c0_147 = arith.constant 0 : index
    %513 = vector.load %arg13[%512, %c0_146, %c0_147] : memref<8x8x128xf32, #tpu.memory_space<vmem>>, vector<1x8x128xf32>
    %514 = vector.shape_cast %513 : vector<1x8x128xf32> to vector<8x128xf32>
    %515 = vector.shape_cast %505 : vector<8x128xf32> to vector<1x8x128xf32>
    tpu.vector_store %arg13[%512, %c0_146, %c0_147], %515 {strides = array<i32>} : memref<8x8x128xf32, #tpu.memory_space<vmem>>, vector<1x8x128xf32>,
    %c5_i32 = arith.constant 5 : i32
    %516 = arith.truncf %443 : vector<8x128xf32> to vector<8x128xbf16>
    %517 = arith.truncf %472 : vector<8x128xf32> to vector<8x128xbf16>
    %518 = arith.truncf %505 : vector<8x128xf32> to vector<8x128xbf16>
    %c7_i32_148 = arith.constant 7 : i32
    %519 = arith.minsi %c5_i32, %c7_i32_148 : i32
    %520 = arith.index_cast %519 : i32 to index
    %c0_149 = arith.constant 0 : index
    %c0_150 = arith.constant 0 : index
    %521 = vector.load %arg12[%520, %c0_149, %c0_150] : memref<8x8x512xf32, #tpu.memory_space<vmem>>, vector<1x8x512xf32>
    %522 = vector.shape_cast %521 : vector<1x8x512xf32> to vector<8x512xf32>
    %c0_151 = arith.constant 0 : index
    %c0_152 = arith.constant 0 : index
    %523 = vector.load %arg3[%c0_151, %c0_152] : memref<128x512xbf16, #tpu.memory_space<vmem>>, vector<128x512xbf16>
    %cst_153 = arith.constant dense<0.000000e+00> : vector<8x512xf32>
    %524 = tpu.matmul %516, %523, %cst_153 {dimension_numbers = #tpu.dot_dimension_numbers<[1], [0], [0], [1], [0, 0, 1, 1], [], []>} : vector<8x128xbf16>, vector<128x512xbf16>, vector<8x512xf32> -> vector<8x512xf32>
    %525 = arith.addf %522, %524 : vector<8x512xf32>
    %526 = vector.extract_strided_slice %525 {offsets = [0, 0], sizes = [8, 384], strides = [1, 1]} : vector<8x512xf32> to vector<8x384xf32>
    %cst_154 = arith.constant 5.000000e-01 : f32
    %527 = vector.broadcast %cst_154 : f32 to vector<8x384xf32>
    %528 = arith.mulf %527, %526 : vector<8x384xf32>
    %529 = math.tanh %528 : vector<8x384xf32>
    %cst_155 = arith.constant 5.000000e-01 : f32
    %530 = vector.broadcast %cst_155 : f32 to vector<8x384xf32>
    %531 = arith.mulf %530, %529 : vector<8x384xf32>
    %cst_156 = arith.constant 5.000000e-01 : f32
    %532 = vector.broadcast %cst_156 : f32 to vector<8x384xf32>
    %533 = arith.addf %531, %532 : vector<8x384xf32>
    %534 = vector.extract_strided_slice %533 {offsets = [0, 0], sizes = [8, 128], strides = [1, 1]} : vector<8x384xf32> to vector<8x128xf32>
    %535 = vector.extract_strided_slice %533 {offsets = [0, 128], sizes = [8, 128], strides = [1, 1]} : vector<8x384xf32> to vector<8x128xf32>
    %536 = vector.extract_strided_slice %533 {offsets = [0, 256], sizes = [8, 128], strides = [1, 1]} : vector<8x384xf32> to vector<8x128xf32>
    %537 = vector.extract_strided_slice %525 {offsets = [0, 384], sizes = [8, 128], strides = [1, 1]} : vector<8x512xf32> to vector<8x128xf32>
    %538 = math.tanh %537 : vector<8x128xf32>
    %539 = arith.mulf %535, %441 : vector<8x128xf32>
    %540 = arith.mulf %534, %538 : vector<8x128xf32>
    %541 = arith.addf %539, %540 : vector<8x128xf32>
    %542 = math.tanh %541 : vector<8x128xf32>
    %543 = arith.mulf %536, %542 : vector<8x128xf32>
    %544 = tpu.concatenate %516, %517 in 1 : vector<8x128xbf16>, vector<8x128xbf16> -> vector<8x256xbf16>
    %c0_157 = arith.constant 0 : index
    %c0_158 = arith.constant 0 : index
    %545 = vector.load %arg5[%c0_157, %c0_158] : memref<256x512xbf16, #tpu.memory_space<vmem>>, vector<256x512xbf16>
    %cst_159 = arith.constant dense<0.000000e+00> : vector<8x512xf32>
    %546 = tpu.matmul %544, %545, %cst_159 {dimension_numbers = #tpu.dot_dimension_numbers<[1], [0], [0], [1], [0, 0, 1, 1], [], []>} : vector<8x256xbf16>, vector<256x512xbf16>, vector<8x512xf32> -> vector<8x512xf32>
    %547 = arith.addf %546, %11 : vector<8x512xf32>
    %548 = vector.extract_strided_slice %547 {offsets = [0, 0], sizes = [8, 384], strides = [1, 1]} : vector<8x512xf32> to vector<8x384xf32>
    %cst_160 = arith.constant 5.000000e-01 : f32
    %549 = vector.broadcast %cst_160 : f32 to vector<8x384xf32>
    %550 = arith.mulf %549, %548 : vector<8x384xf32>
    %551 = math.tanh %550 : vector<8x384xf32>
    %cst_161 = arith.constant 5.000000e-01 : f32
    %552 = vector.broadcast %cst_161 : f32 to vector<8x384xf32>
    %553 = arith.mulf %552, %551 : vector<8x384xf32>
    %cst_162 = arith.constant 5.000000e-01 : f32
    %554 = vector.broadcast %cst_162 : f32 to vector<8x384xf32>
    %555 = arith.addf %553, %554 : vector<8x384xf32>
    %556 = vector.extract_strided_slice %555 {offsets = [0, 0], sizes = [8, 128], strides = [1, 1]} : vector<8x384xf32> to vector<8x128xf32>
    %557 = vector.extract_strided_slice %555 {offsets = [0, 128], sizes = [8, 128], strides = [1, 1]} : vector<8x384xf32> to vector<8x128xf32>
    %558 = vector.extract_strided_slice %555 {offsets = [0, 256], sizes = [8, 128], strides = [1, 1]} : vector<8x384xf32> to vector<8x128xf32>
    %559 = vector.extract_strided_slice %547 {offsets = [0, 384], sizes = [8, 128], strides = [1, 1]} : vector<8x512xf32> to vector<8x128xf32>
    %560 = math.tanh %559 : vector<8x128xf32>
    %561 = arith.mulf %557, %476 : vector<8x128xf32>
    %562 = arith.mulf %556, %560 : vector<8x128xf32>
    %563 = arith.addf %561, %562 : vector<8x128xf32>
    %564 = math.tanh %563 : vector<8x128xf32>
    %565 = arith.mulf %558, %564 : vector<8x128xf32>
    %c1_i32_163 = arith.constant 1 : i32
    %566 = arith.cmpi sge, %c5_i32, %c1_i32_163 : i32
    %567 = arith.extui %566 : i1 to i32
    %568 = arith.sitofp %567 : i32 to f32
    %569 = arith.subf %565, %472 : vector<8x128xf32>
    %570 = vector.broadcast %568 : f32 to vector<8x128xf32>
    %571 = arith.mulf %570, %569 : vector<8x128xf32>
    %572 = arith.addf %472, %571 : vector<8x128xf32>
    %573 = arith.subf %563, %476 : vector<8x128xf32>
    %574 = vector.broadcast %568 : f32 to vector<8x128xf32>
    %575 = arith.mulf %574, %573 : vector<8x128xf32>
    %576 = arith.addf %476, %575 : vector<8x128xf32>
    %577 = tpu.concatenate %517, %518 in 1 : vector<8x128xbf16>, vector<8x128xbf16> -> vector<8x256xbf16>
    %c0_164 = arith.constant 0 : index
    %c0_165 = arith.constant 0 : index
    %578 = vector.load %arg7[%c0_164, %c0_165] : memref<256x512xbf16, #tpu.memory_space<vmem>>, vector<256x512xbf16>
    %cst_166 = arith.constant dense<0.000000e+00> : vector<8x512xf32>
    %579 = tpu.matmul %577, %578, %cst_166 {dimension_numbers = #tpu.dot_dimension_numbers<[1], [0], [0], [1], [0, 0, 1, 1], [], []>} : vector<8x256xbf16>, vector<256x512xbf16>, vector<8x512xf32> -> vector<8x512xf32>
    %580 = arith.addf %579, %14 : vector<8x512xf32>
    %581 = vector.extract_strided_slice %580 {offsets = [0, 0], sizes = [8, 384], strides = [1, 1]} : vector<8x512xf32> to vector<8x384xf32>
    %cst_167 = arith.constant 5.000000e-01 : f32
    %582 = vector.broadcast %cst_167 : f32 to vector<8x384xf32>
    %583 = arith.mulf %582, %581 : vector<8x384xf32>
    %584 = math.tanh %583 : vector<8x384xf32>
    %cst_168 = arith.constant 5.000000e-01 : f32
    %585 = vector.broadcast %cst_168 : f32 to vector<8x384xf32>
    %586 = arith.mulf %585, %584 : vector<8x384xf32>
    %cst_169 = arith.constant 5.000000e-01 : f32
    %587 = vector.broadcast %cst_169 : f32 to vector<8x384xf32>
    %588 = arith.addf %586, %587 : vector<8x384xf32>
    %589 = vector.extract_strided_slice %588 {offsets = [0, 0], sizes = [8, 128], strides = [1, 1]} : vector<8x384xf32> to vector<8x128xf32>
    %590 = vector.extract_strided_slice %588 {offsets = [0, 128], sizes = [8, 128], strides = [1, 1]} : vector<8x384xf32> to vector<8x128xf32>
    %591 = vector.extract_strided_slice %588 {offsets = [0, 256], sizes = [8, 128], strides = [1, 1]} : vector<8x384xf32> to vector<8x128xf32>
    %592 = vector.extract_strided_slice %580 {offsets = [0, 384], sizes = [8, 128], strides = [1, 1]} : vector<8x512xf32> to vector<8x128xf32>
    %593 = math.tanh %592 : vector<8x128xf32>
    %594 = arith.mulf %590, %509 : vector<8x128xf32>
    %595 = arith.mulf %589, %593 : vector<8x128xf32>
    %596 = arith.addf %594, %595 : vector<8x128xf32>
    %597 = math.tanh %596 : vector<8x128xf32>
    %598 = arith.mulf %591, %597 : vector<8x128xf32>
    %c2_i32_170 = arith.constant 2 : i32
    %599 = arith.cmpi sge, %c5_i32, %c2_i32_170 : i32
    %600 = arith.extui %599 : i1 to i32
    %601 = arith.sitofp %600 : i32 to f32
    %602 = arith.subf %598, %505 : vector<8x128xf32>
    %603 = vector.broadcast %601 : f32 to vector<8x128xf32>
    %604 = arith.mulf %603, %602 : vector<8x128xf32>
    %605 = arith.addf %505, %604 : vector<8x128xf32>
    %606 = arith.subf %596, %509 : vector<8x128xf32>
    %607 = vector.broadcast %601 : f32 to vector<8x128xf32>
    %608 = arith.mulf %607, %606 : vector<8x128xf32>
    %609 = arith.addf %509, %608 : vector<8x128xf32>
    %c2_i32_171 = arith.constant 2 : i32
    %610 = arith.subi %c5_i32, %c2_i32_171 : i32
    %c0_i32_172 = arith.constant 0 : i32
    %611 = arith.maxsi %610, %c0_i32_172 : i32
    %612 = arith.index_cast %611 : i32 to index
    %c0_173 = arith.constant 0 : index
    %c0_174 = arith.constant 0 : index
    %613 = vector.load %arg13[%612, %c0_173, %c0_174] : memref<8x8x128xf32, #tpu.memory_space<vmem>>, vector<1x8x128xf32>
    %614 = vector.shape_cast %613 : vector<1x8x128xf32> to vector<8x128xf32>
    %615 = vector.shape_cast %605 : vector<8x128xf32> to vector<1x8x128xf32>
    tpu.vector_store %arg13[%612, %c0_173, %c0_174], %615 {strides = array<i32>} : memref<8x8x128xf32, #tpu.memory_space<vmem>>, vector<1x8x128xf32>,
    %c6_i32 = arith.constant 6 : i32
    %616 = arith.truncf %543 : vector<8x128xf32> to vector<8x128xbf16>
    %617 = arith.truncf %572 : vector<8x128xf32> to vector<8x128xbf16>
    %618 = arith.truncf %605 : vector<8x128xf32> to vector<8x128xbf16>
    %c7_i32_175 = arith.constant 7 : i32
    %619 = arith.minsi %c6_i32, %c7_i32_175 : i32
    %620 = arith.index_cast %619 : i32 to index
    %c0_176 = arith.constant 0 : index
    %c0_177 = arith.constant 0 : index
    %621 = vector.load %arg12[%620, %c0_176, %c0_177] : memref<8x8x512xf32, #tpu.memory_space<vmem>>, vector<1x8x512xf32>
    %622 = vector.shape_cast %621 : vector<1x8x512xf32> to vector<8x512xf32>
    %c0_178 = arith.constant 0 : index
    %c0_179 = arith.constant 0 : index
    %623 = vector.load %arg3[%c0_178, %c0_179] : memref<128x512xbf16, #tpu.memory_space<vmem>>, vector<128x512xbf16>
    %cst_180 = arith.constant dense<0.000000e+00> : vector<8x512xf32>
    %624 = tpu.matmul %616, %623, %cst_180 {dimension_numbers = #tpu.dot_dimension_numbers<[1], [0], [0], [1], [0, 0, 1, 1], [], []>} : vector<8x128xbf16>, vector<128x512xbf16>, vector<8x512xf32> -> vector<8x512xf32>
    %625 = arith.addf %622, %624 : vector<8x512xf32>
    %626 = vector.extract_strided_slice %625 {offsets = [0, 0], sizes = [8, 384], strides = [1, 1]} : vector<8x512xf32> to vector<8x384xf32>
    %cst_181 = arith.constant 5.000000e-01 : f32
    %627 = vector.broadcast %cst_181 : f32 to vector<8x384xf32>
    %628 = arith.mulf %627, %626 : vector<8x384xf32>
    %629 = math.tanh %628 : vector<8x384xf32>
    %cst_182 = arith.constant 5.000000e-01 : f32
    %630 = vector.broadcast %cst_182 : f32 to vector<8x384xf32>
    %631 = arith.mulf %630, %629 : vector<8x384xf32>
    %cst_183 = arith.constant 5.000000e-01 : f32
    %632 = vector.broadcast %cst_183 : f32 to vector<8x384xf32>
    %633 = arith.addf %631, %632 : vector<8x384xf32>
    %634 = vector.extract_strided_slice %633 {offsets = [0, 0], sizes = [8, 128], strides = [1, 1]} : vector<8x384xf32> to vector<8x128xf32>
    %635 = vector.extract_strided_slice %633 {offsets = [0, 128], sizes = [8, 128], strides = [1, 1]} : vector<8x384xf32> to vector<8x128xf32>
    %636 = vector.extract_strided_slice %633 {offsets = [0, 256], sizes = [8, 128], strides = [1, 1]} : vector<8x384xf32> to vector<8x128xf32>
    %637 = vector.extract_strided_slice %625 {offsets = [0, 384], sizes = [8, 128], strides = [1, 1]} : vector<8x512xf32> to vector<8x128xf32>
    %638 = math.tanh %637 : vector<8x128xf32>
    %639 = arith.mulf %635, %541 : vector<8x128xf32>
    %640 = arith.mulf %634, %638 : vector<8x128xf32>
    %641 = arith.addf %639, %640 : vector<8x128xf32>
    %642 = math.tanh %641 : vector<8x128xf32>
    %643 = arith.mulf %636, %642 : vector<8x128xf32>
    %644 = tpu.concatenate %616, %617 in 1 : vector<8x128xbf16>, vector<8x128xbf16> -> vector<8x256xbf16>
    %c0_184 = arith.constant 0 : index
    %c0_185 = arith.constant 0 : index
    %645 = vector.load %arg5[%c0_184, %c0_185] : memref<256x512xbf16, #tpu.memory_space<vmem>>, vector<256x512xbf16>
    %cst_186 = arith.constant dense<0.000000e+00> : vector<8x512xf32>
    %646 = tpu.matmul %644, %645, %cst_186 {dimension_numbers = #tpu.dot_dimension_numbers<[1], [0], [0], [1], [0, 0, 1, 1], [], []>} : vector<8x256xbf16>, vector<256x512xbf16>, vector<8x512xf32> -> vector<8x512xf32>
    %647 = arith.addf %646, %11 : vector<8x512xf32>
    %648 = vector.extract_strided_slice %647 {offsets = [0, 0], sizes = [8, 384], strides = [1, 1]} : vector<8x512xf32> to vector<8x384xf32>
    %cst_187 = arith.constant 5.000000e-01 : f32
    %649 = vector.broadcast %cst_187 : f32 to vector<8x384xf32>
    %650 = arith.mulf %649, %648 : vector<8x384xf32>
    %651 = math.tanh %650 : vector<8x384xf32>
    %cst_188 = arith.constant 5.000000e-01 : f32
    %652 = vector.broadcast %cst_188 : f32 to vector<8x384xf32>
    %653 = arith.mulf %652, %651 : vector<8x384xf32>
    %cst_189 = arith.constant 5.000000e-01 : f32
    %654 = vector.broadcast %cst_189 : f32 to vector<8x384xf32>
    %655 = arith.addf %653, %654 : vector<8x384xf32>
    %656 = vector.extract_strided_slice %655 {offsets = [0, 0], sizes = [8, 128], strides = [1, 1]} : vector<8x384xf32> to vector<8x128xf32>
    %657 = vector.extract_strided_slice %655 {offsets = [0, 128], sizes = [8, 128], strides = [1, 1]} : vector<8x384xf32> to vector<8x128xf32>
    %658 = vector.extract_strided_slice %655 {offsets = [0, 256], sizes = [8, 128], strides = [1, 1]} : vector<8x384xf32> to vector<8x128xf32>
    %659 = vector.extract_strided_slice %647 {offsets = [0, 384], sizes = [8, 128], strides = [1, 1]} : vector<8x512xf32> to vector<8x128xf32>
    %660 = math.tanh %659 : vector<8x128xf32>
    %661 = arith.mulf %657, %576 : vector<8x128xf32>
    %662 = arith.mulf %656, %660 : vector<8x128xf32>
    %663 = arith.addf %661, %662 : vector<8x128xf32>
    %664 = math.tanh %663 : vector<8x128xf32>
    %665 = arith.mulf %658, %664 : vector<8x128xf32>
    %c1_i32_190 = arith.constant 1 : i32
    %666 = arith.cmpi sge, %c6_i32, %c1_i32_190 : i32
    %667 = arith.extui %666 : i1 to i32
    %668 = arith.sitofp %667 : i32 to f32
    %669 = arith.subf %665, %572 : vector<8x128xf32>
    %670 = vector.broadcast %668 : f32 to vector<8x128xf32>
    %671 = arith.mulf %670, %669 : vector<8x128xf32>
    %672 = arith.addf %572, %671 : vector<8x128xf32>
    %673 = arith.subf %663, %576 : vector<8x128xf32>
    %674 = vector.broadcast %668 : f32 to vector<8x128xf32>
    %675 = arith.mulf %674, %673 : vector<8x128xf32>
    %676 = arith.addf %576, %675 : vector<8x128xf32>
    %677 = tpu.concatenate %617, %618 in 1 : vector<8x128xbf16>, vector<8x128xbf16> -> vector<8x256xbf16>
    %c0_191 = arith.constant 0 : index
    %c0_192 = arith.constant 0 : index
    %678 = vector.load %arg7[%c0_191, %c0_192] : memref<256x512xbf16, #tpu.memory_space<vmem>>, vector<256x512xbf16>
    %cst_193 = arith.constant dense<0.000000e+00> : vector<8x512xf32>
    %679 = tpu.matmul %677, %678, %cst_193 {dimension_numbers = #tpu.dot_dimension_numbers<[1], [0], [0], [1], [0, 0, 1, 1], [], []>} : vector<8x256xbf16>, vector<256x512xbf16>, vector<8x512xf32> -> vector<8x512xf32>
    %680 = arith.addf %679, %14 : vector<8x512xf32>
    %681 = vector.extract_strided_slice %680 {offsets = [0, 0], sizes = [8, 384], strides = [1, 1]} : vector<8x512xf32> to vector<8x384xf32>
    %cst_194 = arith.constant 5.000000e-01 : f32
    %682 = vector.broadcast %cst_194 : f32 to vector<8x384xf32>
    %683 = arith.mulf %682, %681 : vector<8x384xf32>
    %684 = math.tanh %683 : vector<8x384xf32>
    %cst_195 = arith.constant 5.000000e-01 : f32
    %685 = vector.broadcast %cst_195 : f32 to vector<8x384xf32>
    %686 = arith.mulf %685, %684 : vector<8x384xf32>
    %cst_196 = arith.constant 5.000000e-01 : f32
    %687 = vector.broadcast %cst_196 : f32 to vector<8x384xf32>
    %688 = arith.addf %686, %687 : vector<8x384xf32>
    %689 = vector.extract_strided_slice %688 {offsets = [0, 0], sizes = [8, 128], strides = [1, 1]} : vector<8x384xf32> to vector<8x128xf32>
    %690 = vector.extract_strided_slice %688 {offsets = [0, 128], sizes = [8, 128], strides = [1, 1]} : vector<8x384xf32> to vector<8x128xf32>
    %691 = vector.extract_strided_slice %688 {offsets = [0, 256], sizes = [8, 128], strides = [1, 1]} : vector<8x384xf32> to vector<8x128xf32>
    %692 = vector.extract_strided_slice %680 {offsets = [0, 384], sizes = [8, 128], strides = [1, 1]} : vector<8x512xf32> to vector<8x128xf32>
    %693 = math.tanh %692 : vector<8x128xf32>
    %694 = arith.mulf %690, %609 : vector<8x128xf32>
    %695 = arith.mulf %689, %693 : vector<8x128xf32>
    %696 = arith.addf %694, %695 : vector<8x128xf32>
    %697 = math.tanh %696 : vector<8x128xf32>
    %698 = arith.mulf %691, %697 : vector<8x128xf32>
    %c2_i32_197 = arith.constant 2 : i32
    %699 = arith.cmpi sge, %c6_i32, %c2_i32_197 : i32
    %700 = arith.extui %699 : i1 to i32
    %701 = arith.sitofp %700 : i32 to f32
    %702 = arith.subf %698, %605 : vector<8x128xf32>
    %703 = vector.broadcast %701 : f32 to vector<8x128xf32>
    %704 = arith.mulf %703, %702 : vector<8x128xf32>
    %705 = arith.addf %605, %704 : vector<8x128xf32>
    %706 = arith.subf %696, %609 : vector<8x128xf32>
    %707 = vector.broadcast %701 : f32 to vector<8x128xf32>
    %708 = arith.mulf %707, %706 : vector<8x128xf32>
    %709 = arith.addf %609, %708 : vector<8x128xf32>
    %c2_i32_198 = arith.constant 2 : i32
    %710 = arith.subi %c6_i32, %c2_i32_198 : i32
    %c0_i32_199 = arith.constant 0 : i32
    %711 = arith.maxsi %710, %c0_i32_199 : i32
    %712 = arith.index_cast %711 : i32 to index
    %c0_200 = arith.constant 0 : index
    %c0_201 = arith.constant 0 : index
    %713 = vector.load %arg13[%712, %c0_200, %c0_201] : memref<8x8x128xf32, #tpu.memory_space<vmem>>, vector<1x8x128xf32>
    %714 = vector.shape_cast %713 : vector<1x8x128xf32> to vector<8x128xf32>
    %715 = vector.shape_cast %705 : vector<8x128xf32> to vector<1x8x128xf32>
    tpu.vector_store %arg13[%712, %c0_200, %c0_201], %715 {strides = array<i32>} : memref<8x8x128xf32, #tpu.memory_space<vmem>>, vector<1x8x128xf32>,
    %c7_i32_202 = arith.constant 7 : i32
    %716 = arith.truncf %643 : vector<8x128xf32> to vector<8x128xbf16>
    %717 = arith.truncf %672 : vector<8x128xf32> to vector<8x128xbf16>
    %718 = arith.truncf %705 : vector<8x128xf32> to vector<8x128xbf16>
    %c7_i32_203 = arith.constant 7 : i32
    %719 = arith.minsi %c7_i32_202, %c7_i32_203 : i32
    %720 = arith.index_cast %719 : i32 to index
    %c0_204 = arith.constant 0 : index
    %c0_205 = arith.constant 0 : index
    %721 = vector.load %arg12[%720, %c0_204, %c0_205] : memref<8x8x512xf32, #tpu.memory_space<vmem>>, vector<1x8x512xf32>
    %722 = vector.shape_cast %721 : vector<1x8x512xf32> to vector<8x512xf32>
    %c0_206 = arith.constant 0 : index
    %c0_207 = arith.constant 0 : index
    %723 = vector.load %arg3[%c0_206, %c0_207] : memref<128x512xbf16, #tpu.memory_space<vmem>>, vector<128x512xbf16>
    %cst_208 = arith.constant dense<0.000000e+00> : vector<8x512xf32>
    %724 = tpu.matmul %716, %723, %cst_208 {dimension_numbers = #tpu.dot_dimension_numbers<[1], [0], [0], [1], [0, 0, 1, 1], [], []>} : vector<8x128xbf16>, vector<128x512xbf16>, vector<8x512xf32> -> vector<8x512xf32>
    %725 = arith.addf %722, %724 : vector<8x512xf32>
    %726 = vector.extract_strided_slice %725 {offsets = [0, 0], sizes = [8, 384], strides = [1, 1]} : vector<8x512xf32> to vector<8x384xf32>
    %cst_209 = arith.constant 5.000000e-01 : f32
    %727 = vector.broadcast %cst_209 : f32 to vector<8x384xf32>
    %728 = arith.mulf %727, %726 : vector<8x384xf32>
    %729 = math.tanh %728 : vector<8x384xf32>
    %cst_210 = arith.constant 5.000000e-01 : f32
    %730 = vector.broadcast %cst_210 : f32 to vector<8x384xf32>
    %731 = arith.mulf %730, %729 : vector<8x384xf32>
    %cst_211 = arith.constant 5.000000e-01 : f32
    %732 = vector.broadcast %cst_211 : f32 to vector<8x384xf32>
    %733 = arith.addf %731, %732 : vector<8x384xf32>
    %734 = vector.extract_strided_slice %733 {offsets = [0, 0], sizes = [8, 128], strides = [1, 1]} : vector<8x384xf32> to vector<8x128xf32>
    %735 = vector.extract_strided_slice %733 {offsets = [0, 128], sizes = [8, 128], strides = [1, 1]} : vector<8x384xf32> to vector<8x128xf32>
    %736 = vector.extract_strided_slice %733 {offsets = [0, 256], sizes = [8, 128], strides = [1, 1]} : vector<8x384xf32> to vector<8x128xf32>
    %737 = vector.extract_strided_slice %725 {offsets = [0, 384], sizes = [8, 128], strides = [1, 1]} : vector<8x512xf32> to vector<8x128xf32>
    %738 = math.tanh %737 : vector<8x128xf32>
    %739 = arith.mulf %735, %641 : vector<8x128xf32>
    %740 = arith.mulf %734, %738 : vector<8x128xf32>
    %741 = arith.addf %739, %740 : vector<8x128xf32>
    %742 = math.tanh %741 : vector<8x128xf32>
    %743 = arith.mulf %736, %742 : vector<8x128xf32>
    %744 = tpu.concatenate %716, %717 in 1 : vector<8x128xbf16>, vector<8x128xbf16> -> vector<8x256xbf16>
    %c0_212 = arith.constant 0 : index
    %c0_213 = arith.constant 0 : index
    %745 = vector.load %arg5[%c0_212, %c0_213] : memref<256x512xbf16, #tpu.memory_space<vmem>>, vector<256x512xbf16>
    %cst_214 = arith.constant dense<0.000000e+00> : vector<8x512xf32>
    %746 = tpu.matmul %744, %745, %cst_214 {dimension_numbers = #tpu.dot_dimension_numbers<[1], [0], [0], [1], [0, 0, 1, 1], [], []>} : vector<8x256xbf16>, vector<256x512xbf16>, vector<8x512xf32> -> vector<8x512xf32>
    %747 = arith.addf %746, %11 : vector<8x512xf32>
    %748 = vector.extract_strided_slice %747 {offsets = [0, 0], sizes = [8, 384], strides = [1, 1]} : vector<8x512xf32> to vector<8x384xf32>
    %cst_215 = arith.constant 5.000000e-01 : f32
    %749 = vector.broadcast %cst_215 : f32 to vector<8x384xf32>
    %750 = arith.mulf %749, %748 : vector<8x384xf32>
    %751 = math.tanh %750 : vector<8x384xf32>
    %cst_216 = arith.constant 5.000000e-01 : f32
    %752 = vector.broadcast %cst_216 : f32 to vector<8x384xf32>
    %753 = arith.mulf %752, %751 : vector<8x384xf32>
    %cst_217 = arith.constant 5.000000e-01 : f32
    %754 = vector.broadcast %cst_217 : f32 to vector<8x384xf32>
    %755 = arith.addf %753, %754 : vector<8x384xf32>
    %756 = vector.extract_strided_slice %755 {offsets = [0, 0], sizes = [8, 128], strides = [1, 1]} : vector<8x384xf32> to vector<8x128xf32>
    %757 = vector.extract_strided_slice %755 {offsets = [0, 128], sizes = [8, 128], strides = [1, 1]} : vector<8x384xf32> to vector<8x128xf32>
    %758 = vector.extract_strided_slice %755 {offsets = [0, 256], sizes = [8, 128], strides = [1, 1]} : vector<8x384xf32> to vector<8x128xf32>
    %759 = vector.extract_strided_slice %747 {offsets = [0, 384], sizes = [8, 128], strides = [1, 1]} : vector<8x512xf32> to vector<8x128xf32>
    %760 = math.tanh %759 : vector<8x128xf32>
    %761 = arith.mulf %757, %676 : vector<8x128xf32>
    %762 = arith.mulf %756, %760 : vector<8x128xf32>
    %763 = arith.addf %761, %762 : vector<8x128xf32>
    %764 = math.tanh %763 : vector<8x128xf32>
    %765 = arith.mulf %758, %764 : vector<8x128xf32>
    %c1_i32_218 = arith.constant 1 : i32
    %766 = arith.cmpi sge, %c7_i32_202, %c1_i32_218 : i32
    %767 = arith.extui %766 : i1 to i32
    %768 = arith.sitofp %767 : i32 to f32
    %769 = arith.subf %765, %672 : vector<8x128xf32>
    %770 = vector.broadcast %768 : f32 to vector<8x128xf32>
    %771 = arith.mulf %770, %769 : vector<8x128xf32>
    %772 = arith.addf %672, %771 : vector<8x128xf32>
    %773 = arith.subf %763, %676 : vector<8x128xf32>
    %774 = vector.broadcast %768 : f32 to vector<8x128xf32>
    %775 = arith.mulf %774, %773 : vector<8x128xf32>
    %776 = arith.addf %676, %775 : vector<8x128xf32>
    %777 = tpu.concatenate %717, %718 in 1 : vector<8x128xbf16>, vector<8x128xbf16> -> vector<8x256xbf16>
    %c0_219 = arith.constant 0 : index
    %c0_220 = arith.constant 0 : index
    %778 = vector.load %arg7[%c0_219, %c0_220] : memref<256x512xbf16, #tpu.memory_space<vmem>>, vector<256x512xbf16>
    %cst_221 = arith.constant dense<0.000000e+00> : vector<8x512xf32>
    %779 = tpu.matmul %777, %778, %cst_221 {dimension_numbers = #tpu.dot_dimension_numbers<[1], [0], [0], [1], [0, 0, 1, 1], [], []>} : vector<8x256xbf16>, vector<256x512xbf16>, vector<8x512xf32> -> vector<8x512xf32>
    %780 = arith.addf %779, %14 : vector<8x512xf32>
    %781 = vector.extract_strided_slice %780 {offsets = [0, 0], sizes = [8, 384], strides = [1, 1]} : vector<8x512xf32> to vector<8x384xf32>
    %cst_222 = arith.constant 5.000000e-01 : f32
    %782 = vector.broadcast %cst_222 : f32 to vector<8x384xf32>
    %783 = arith.mulf %782, %781 : vector<8x384xf32>
    %784 = math.tanh %783 : vector<8x384xf32>
    %cst_223 = arith.constant 5.000000e-01 : f32
    %785 = vector.broadcast %cst_223 : f32 to vector<8x384xf32>
    %786 = arith.mulf %785, %784 : vector<8x384xf32>
    %cst_224 = arith.constant 5.000000e-01 : f32
    %787 = vector.broadcast %cst_224 : f32 to vector<8x384xf32>
    %788 = arith.addf %786, %787 : vector<8x384xf32>
    %789 = vector.extract_strided_slice %788 {offsets = [0, 0], sizes = [8, 128], strides = [1, 1]} : vector<8x384xf32> to vector<8x128xf32>
    %790 = vector.extract_strided_slice %788 {offsets = [0, 128], sizes = [8, 128], strides = [1, 1]} : vector<8x384xf32> to vector<8x128xf32>
    %791 = vector.extract_strided_slice %788 {offsets = [0, 256], sizes = [8, 128], strides = [1, 1]} : vector<8x384xf32> to vector<8x128xf32>
    %792 = vector.extract_strided_slice %780 {offsets = [0, 384], sizes = [8, 128], strides = [1, 1]} : vector<8x512xf32> to vector<8x128xf32>
    %793 = math.tanh %792 : vector<8x128xf32>
    %794 = arith.mulf %790, %709 : vector<8x128xf32>
    %795 = arith.mulf %789, %793 : vector<8x128xf32>
    %796 = arith.addf %794, %795 : vector<8x128xf32>
    %797 = math.tanh %796 : vector<8x128xf32>
    %798 = arith.mulf %791, %797 : vector<8x128xf32>
    %c2_i32_225 = arith.constant 2 : i32
    %799 = arith.cmpi sge, %c7_i32_202, %c2_i32_225 : i32
    %800 = arith.extui %799 : i1 to i32
    %801 = arith.sitofp %800 : i32 to f32
    %802 = arith.subf %798, %705 : vector<8x128xf32>
    %803 = vector.broadcast %801 : f32 to vector<8x128xf32>
    %804 = arith.mulf %803, %802 : vector<8x128xf32>
    %805 = arith.addf %705, %804 : vector<8x128xf32>
    %806 = arith.subf %796, %709 : vector<8x128xf32>
    %807 = vector.broadcast %801 : f32 to vector<8x128xf32>
    %808 = arith.mulf %807, %806 : vector<8x128xf32>
    %809 = arith.addf %709, %808 : vector<8x128xf32>
    %c2_i32_226 = arith.constant 2 : i32
    %810 = arith.subi %c7_i32_202, %c2_i32_226 : i32
    %c0_i32_227 = arith.constant 0 : i32
    %811 = arith.maxsi %810, %c0_i32_227 : i32
    %812 = arith.index_cast %811 : i32 to index
    %c0_228 = arith.constant 0 : index
    %c0_229 = arith.constant 0 : index
    %813 = vector.load %arg13[%812, %c0_228, %c0_229] : memref<8x8x128xf32, #tpu.memory_space<vmem>>, vector<1x8x128xf32>
    %814 = vector.shape_cast %813 : vector<1x8x128xf32> to vector<8x128xf32>
    %815 = vector.shape_cast %805 : vector<8x128xf32> to vector<1x8x128xf32>
    tpu.vector_store %arg13[%812, %c0_228, %c0_229], %815 {strides = array<i32>} : memref<8x8x128xf32, #tpu.memory_space<vmem>>, vector<1x8x128xf32>,
    %c8_i32 = arith.constant 8 : i32
    %816 = arith.truncf %743 : vector<8x128xf32> to vector<8x128xbf16>
    %817 = arith.truncf %772 : vector<8x128xf32> to vector<8x128xbf16>
    %818 = arith.truncf %805 : vector<8x128xf32> to vector<8x128xbf16>
    %c7_i32_230 = arith.constant 7 : i32
    %819 = arith.minsi %c8_i32, %c7_i32_230 : i32
    %820 = arith.index_cast %819 : i32 to index
    %c0_231 = arith.constant 0 : index
    %c0_232 = arith.constant 0 : index
    %821 = vector.load %arg12[%820, %c0_231, %c0_232] : memref<8x8x512xf32, #tpu.memory_space<vmem>>, vector<1x8x512xf32>
    %822 = vector.shape_cast %821 : vector<1x8x512xf32> to vector<8x512xf32>
    %c0_233 = arith.constant 0 : index
    %c0_234 = arith.constant 0 : index
    %823 = vector.load %arg3[%c0_233, %c0_234] : memref<128x512xbf16, #tpu.memory_space<vmem>>, vector<128x512xbf16>
    %cst_235 = arith.constant dense<0.000000e+00> : vector<8x512xf32>
    %824 = tpu.matmul %816, %823, %cst_235 {dimension_numbers = #tpu.dot_dimension_numbers<[1], [0], [0], [1], [0, 0, 1, 1], [], []>} : vector<8x128xbf16>, vector<128x512xbf16>, vector<8x512xf32> -> vector<8x512xf32>
    %825 = arith.addf %822, %824 : vector<8x512xf32>
    %826 = vector.extract_strided_slice %825 {offsets = [0, 0], sizes = [8, 384], strides = [1, 1]} : vector<8x512xf32> to vector<8x384xf32>
    %cst_236 = arith.constant 5.000000e-01 : f32
    %827 = vector.broadcast %cst_236 : f32 to vector<8x384xf32>
    %828 = arith.mulf %827, %826 : vector<8x384xf32>
    %829 = math.tanh %828 : vector<8x384xf32>
    %cst_237 = arith.constant 5.000000e-01 : f32
    %830 = vector.broadcast %cst_237 : f32 to vector<8x384xf32>
    %831 = arith.mulf %830, %829 : vector<8x384xf32>
    %cst_238 = arith.constant 5.000000e-01 : f32
    %832 = vector.broadcast %cst_238 : f32 to vector<8x384xf32>
    %833 = arith.addf %831, %832 : vector<8x384xf32>
    %834 = vector.extract_strided_slice %833 {offsets = [0, 0], sizes = [8, 128], strides = [1, 1]} : vector<8x384xf32> to vector<8x128xf32>
    %835 = vector.extract_strided_slice %833 {offsets = [0, 128], sizes = [8, 128], strides = [1, 1]} : vector<8x384xf32> to vector<8x128xf32>
    %836 = vector.extract_strided_slice %833 {offsets = [0, 256], sizes = [8, 128], strides = [1, 1]} : vector<8x384xf32> to vector<8x128xf32>
    %837 = vector.extract_strided_slice %825 {offsets = [0, 384], sizes = [8, 128], strides = [1, 1]} : vector<8x512xf32> to vector<8x128xf32>
    %838 = math.tanh %837 : vector<8x128xf32>
    %839 = arith.mulf %835, %741 : vector<8x128xf32>
    %840 = arith.mulf %834, %838 : vector<8x128xf32>
    %841 = arith.addf %839, %840 : vector<8x128xf32>
    %842 = math.tanh %841 : vector<8x128xf32>
    %843 = arith.mulf %836, %842 : vector<8x128xf32>
    %844 = tpu.concatenate %816, %817 in 1 : vector<8x128xbf16>, vector<8x128xbf16> -> vector<8x256xbf16>
    %c0_239 = arith.constant 0 : index
    %c0_240 = arith.constant 0 : index
    %845 = vector.load %arg5[%c0_239, %c0_240] : memref<256x512xbf16, #tpu.memory_space<vmem>>, vector<256x512xbf16>
    %cst_241 = arith.constant dense<0.000000e+00> : vector<8x512xf32>
    %846 = tpu.matmul %844, %845, %cst_241 {dimension_numbers = #tpu.dot_dimension_numbers<[1], [0], [0], [1], [0, 0, 1, 1], [], []>} : vector<8x256xbf16>, vector<256x512xbf16>, vector<8x512xf32> -> vector<8x512xf32>
    %847 = arith.addf %846, %11 : vector<8x512xf32>
    %848 = vector.extract_strided_slice %847 {offsets = [0, 0], sizes = [8, 384], strides = [1, 1]} : vector<8x512xf32> to vector<8x384xf32>
    %cst_242 = arith.constant 5.000000e-01 : f32
    %849 = vector.broadcast %cst_242 : f32 to vector<8x384xf32>
    %850 = arith.mulf %849, %848 : vector<8x384xf32>
    %851 = math.tanh %850 : vector<8x384xf32>
    %cst_243 = arith.constant 5.000000e-01 : f32
    %852 = vector.broadcast %cst_243 : f32 to vector<8x384xf32>
    %853 = arith.mulf %852, %851 : vector<8x384xf32>
    %cst_244 = arith.constant 5.000000e-01 : f32
    %854 = vector.broadcast %cst_244 : f32 to vector<8x384xf32>
    %855 = arith.addf %853, %854 : vector<8x384xf32>
    %856 = vector.extract_strided_slice %855 {offsets = [0, 0], sizes = [8, 128], strides = [1, 1]} : vector<8x384xf32> to vector<8x128xf32>
    %857 = vector.extract_strided_slice %855 {offsets = [0, 128], sizes = [8, 128], strides = [1, 1]} : vector<8x384xf32> to vector<8x128xf32>
    %858 = vector.extract_strided_slice %855 {offsets = [0, 256], sizes = [8, 128], strides = [1, 1]} : vector<8x384xf32> to vector<8x128xf32>
    %859 = vector.extract_strided_slice %847 {offsets = [0, 384], sizes = [8, 128], strides = [1, 1]} : vector<8x512xf32> to vector<8x128xf32>
    %860 = math.tanh %859 : vector<8x128xf32>
    %861 = arith.mulf %857, %776 : vector<8x128xf32>
    %862 = arith.mulf %856, %860 : vector<8x128xf32>
    %863 = arith.addf %861, %862 : vector<8x128xf32>
    %864 = math.tanh %863 : vector<8x128xf32>
    %865 = arith.mulf %858, %864 : vector<8x128xf32>
    %c1_i32_245 = arith.constant 1 : i32
    %866 = arith.cmpi sge, %c8_i32, %c1_i32_245 : i32
    %867 = arith.extui %866 : i1 to i32
    %868 = arith.sitofp %867 : i32 to f32
    %869 = arith.subf %865, %772 : vector<8x128xf32>
    %870 = vector.broadcast %868 : f32 to vector<8x128xf32>
    %871 = arith.mulf %870, %869 : vector<8x128xf32>
    %872 = arith.addf %772, %871 : vector<8x128xf32>
    %873 = arith.subf %863, %776 : vector<8x128xf32>
    %874 = vector.broadcast %868 : f32 to vector<8x128xf32>
    %875 = arith.mulf %874, %873 : vector<8x128xf32>
    %876 = arith.addf %776, %875 : vector<8x128xf32>
    %877 = tpu.concatenate %817, %818 in 1 : vector<8x128xbf16>, vector<8x128xbf16> -> vector<8x256xbf16>
    %c0_246 = arith.constant 0 : index
    %c0_247 = arith.constant 0 : index
    %878 = vector.load %arg7[%c0_246, %c0_247] : memref<256x512xbf16, #tpu.memory_space<vmem>>, vector<256x512xbf16>
    %cst_248 = arith.constant dense<0.000000e+00> : vector<8x512xf32>
    %879 = tpu.matmul %877, %878, %cst_248 {dimension_numbers = #tpu.dot_dimension_numbers<[1], [0], [0], [1], [0, 0, 1, 1], [], []>} : vector<8x256xbf16>, vector<256x512xbf16>, vector<8x512xf32> -> vector<8x512xf32>
    %880 = arith.addf %879, %14 : vector<8x512xf32>
    %881 = vector.extract_strided_slice %880 {offsets = [0, 0], sizes = [8, 384], strides = [1, 1]} : vector<8x512xf32> to vector<8x384xf32>
    %cst_249 = arith.constant 5.000000e-01 : f32
    %882 = vector.broadcast %cst_249 : f32 to vector<8x384xf32>
    %883 = arith.mulf %882, %881 : vector<8x384xf32>
    %884 = math.tanh %883 : vector<8x384xf32>
    %cst_250 = arith.constant 5.000000e-01 : f32
    %885 = vector.broadcast %cst_250 : f32 to vector<8x384xf32>
    %886 = arith.mulf %885, %884 : vector<8x384xf32>
    %cst_251 = arith.constant 5.000000e-01 : f32
    %887 = vector.broadcast %cst_251 : f32 to vector<8x384xf32>
    %888 = arith.addf %886, %887 : vector<8x384xf32>
    %889 = vector.extract_strided_slice %888 {offsets = [0, 0], sizes = [8, 128], strides = [1, 1]} : vector<8x384xf32> to vector<8x128xf32>
    %890 = vector.extract_strided_slice %888 {offsets = [0, 128], sizes = [8, 128], strides = [1, 1]} : vector<8x384xf32> to vector<8x128xf32>
    %891 = vector.extract_strided_slice %888 {offsets = [0, 256], sizes = [8, 128], strides = [1, 1]} : vector<8x384xf32> to vector<8x128xf32>
    %892 = vector.extract_strided_slice %880 {offsets = [0, 384], sizes = [8, 128], strides = [1, 1]} : vector<8x512xf32> to vector<8x128xf32>
    %893 = math.tanh %892 : vector<8x128xf32>
    %894 = arith.mulf %890, %809 : vector<8x128xf32>
    %895 = arith.mulf %889, %893 : vector<8x128xf32>
    %896 = arith.addf %894, %895 : vector<8x128xf32>
    %897 = math.tanh %896 : vector<8x128xf32>
    %898 = arith.mulf %891, %897 : vector<8x128xf32>
    %c2_i32_252 = arith.constant 2 : i32
    %899 = arith.cmpi sge, %c8_i32, %c2_i32_252 : i32
    %900 = arith.extui %899 : i1 to i32
    %901 = arith.sitofp %900 : i32 to f32
    %902 = arith.subf %898, %805 : vector<8x128xf32>
    %903 = vector.broadcast %901 : f32 to vector<8x128xf32>
    %904 = arith.mulf %903, %902 : vector<8x128xf32>
    %905 = arith.addf %805, %904 : vector<8x128xf32>
    %906 = arith.subf %896, %809 : vector<8x128xf32>
    %907 = vector.broadcast %901 : f32 to vector<8x128xf32>
    %908 = arith.mulf %907, %906 : vector<8x128xf32>
    %909 = arith.addf %809, %908 : vector<8x128xf32>
    %c2_i32_253 = arith.constant 2 : i32
    %910 = arith.subi %c8_i32, %c2_i32_253 : i32
    %c0_i32_254 = arith.constant 0 : i32
    %911 = arith.maxsi %910, %c0_i32_254 : i32
    %912 = arith.index_cast %911 : i32 to index
    %c0_255 = arith.constant 0 : index
    %c0_256 = arith.constant 0 : index
    %913 = vector.load %arg13[%912, %c0_255, %c0_256] : memref<8x8x128xf32, #tpu.memory_space<vmem>>, vector<1x8x128xf32>
    %914 = vector.shape_cast %913 : vector<1x8x128xf32> to vector<8x128xf32>
    %915 = vector.shape_cast %905 : vector<8x128xf32> to vector<1x8x128xf32>
    tpu.vector_store %arg13[%912, %c0_255, %c0_256], %915 {strides = array<i32>} : memref<8x8x128xf32, #tpu.memory_space<vmem>>, vector<1x8x128xf32>,
    %c9_i32 = arith.constant 9 : i32
    %916 = arith.truncf %843 : vector<8x128xf32> to vector<8x128xbf16>
    %917 = arith.truncf %872 : vector<8x128xf32> to vector<8x128xbf16>
    %918 = arith.truncf %905 : vector<8x128xf32> to vector<8x128xbf16>
    %c7_i32_257 = arith.constant 7 : i32
    %919 = arith.minsi %c9_i32, %c7_i32_257 : i32
    %920 = arith.index_cast %919 : i32 to index
    %c0_258 = arith.constant 0 : index
    %c0_259 = arith.constant 0 : index
    %921 = vector.load %arg12[%920, %c0_258, %c0_259] : memref<8x8x512xf32, #tpu.memory_space<vmem>>, vector<1x8x512xf32>
    %922 = vector.shape_cast %921 : vector<1x8x512xf32> to vector<8x512xf32>
    %c0_260 = arith.constant 0 : index
    %c0_261 = arith.constant 0 : index
    %923 = vector.load %arg3[%c0_260, %c0_261] : memref<128x512xbf16, #tpu.memory_space<vmem>>, vector<128x512xbf16>
    %cst_262 = arith.constant dense<0.000000e+00> : vector<8x512xf32>
    %924 = tpu.matmul %916, %923, %cst_262 {dimension_numbers = #tpu.dot_dimension_numbers<[1], [0], [0], [1], [0, 0, 1, 1], [], []>} : vector<8x128xbf16>, vector<128x512xbf16>, vector<8x512xf32> -> vector<8x512xf32>
    %925 = arith.addf %922, %924 : vector<8x512xf32>
    %926 = vector.extract_strided_slice %925 {offsets = [0, 0], sizes = [8, 384], strides = [1, 1]} : vector<8x512xf32> to vector<8x384xf32>
    %cst_263 = arith.constant 5.000000e-01 : f32
    %927 = vector.broadcast %cst_263 : f32 to vector<8x384xf32>
    %928 = arith.mulf %927, %926 : vector<8x384xf32>
    %929 = math.tanh %928 : vector<8x384xf32>
    %cst_264 = arith.constant 5.000000e-01 : f32
    %930 = vector.broadcast %cst_264 : f32 to vector<8x384xf32>
    %931 = arith.mulf %930, %929 : vector<8x384xf32>
    %cst_265 = arith.constant 5.000000e-01 : f32
    %932 = vector.broadcast %cst_265 : f32 to vector<8x384xf32>
    %933 = arith.addf %931, %932 : vector<8x384xf32>
    %934 = vector.extract_strided_slice %933 {offsets = [0, 0], sizes = [8, 128], strides = [1, 1]} : vector<8x384xf32> to vector<8x128xf32>
    %935 = vector.extract_strided_slice %933 {offsets = [0, 128], sizes = [8, 128], strides = [1, 1]} : vector<8x384xf32> to vector<8x128xf32>
    %936 = vector.extract_strided_slice %933 {offsets = [0, 256], sizes = [8, 128], strides = [1, 1]} : vector<8x384xf32> to vector<8x128xf32>
    %937 = vector.extract_strided_slice %925 {offsets = [0, 384], sizes = [8, 128], strides = [1, 1]} : vector<8x512xf32> to vector<8x128xf32>
    %938 = math.tanh %937 : vector<8x128xf32>
    %939 = arith.mulf %935, %841 : vector<8x128xf32>
    %940 = arith.mulf %934, %938 : vector<8x128xf32>
    %941 = arith.addf %939, %940 : vector<8x128xf32>
    %942 = math.tanh %941 : vector<8x128xf32>
    %943 = arith.mulf %936, %942 : vector<8x128xf32>
    %944 = tpu.concatenate %916, %917 in 1 : vector<8x128xbf16>, vector<8x128xbf16> -> vector<8x256xbf16>
    %c0_266 = arith.constant 0 : index
    %c0_267 = arith.constant 0 : index
    %945 = vector.load %arg5[%c0_266, %c0_267] : memref<256x512xbf16, #tpu.memory_space<vmem>>, vector<256x512xbf16>
    %cst_268 = arith.constant dense<0.000000e+00> : vector<8x512xf32>
    %946 = tpu.matmul %944, %945, %cst_268 {dimension_numbers = #tpu.dot_dimension_numbers<[1], [0], [0], [1], [0, 0, 1, 1], [], []>} : vector<8x256xbf16>, vector<256x512xbf16>, vector<8x512xf32> -> vector<8x512xf32>
    %947 = arith.addf %946, %11 : vector<8x512xf32>
    %948 = vector.extract_strided_slice %947 {offsets = [0, 0], sizes = [8, 384], strides = [1, 1]} : vector<8x512xf32> to vector<8x384xf32>
    %cst_269 = arith.constant 5.000000e-01 : f32
    %949 = vector.broadcast %cst_269 : f32 to vector<8x384xf32>
    %950 = arith.mulf %949, %948 : vector<8x384xf32>
    %951 = math.tanh %950 : vector<8x384xf32>
    %cst_270 = arith.constant 5.000000e-01 : f32
    %952 = vector.broadcast %cst_270 : f32 to vector<8x384xf32>
    %953 = arith.mulf %952, %951 : vector<8x384xf32>
    %cst_271 = arith.constant 5.000000e-01 : f32
    %954 = vector.broadcast %cst_271 : f32 to vector<8x384xf32>
    %955 = arith.addf %953, %954 : vector<8x384xf32>
    %956 = vector.extract_strided_slice %955 {offsets = [0, 0], sizes = [8, 128], strides = [1, 1]} : vector<8x384xf32> to vector<8x128xf32>
    %957 = vector.extract_strided_slice %955 {offsets = [0, 128], sizes = [8, 128], strides = [1, 1]} : vector<8x384xf32> to vector<8x128xf32>
    %958 = vector.extract_strided_slice %955 {offsets = [0, 256], sizes = [8, 128], strides = [1, 1]} : vector<8x384xf32> to vector<8x128xf32>
    %959 = vector.extract_strided_slice %947 {offsets = [0, 384], sizes = [8, 128], strides = [1, 1]} : vector<8x512xf32> to vector<8x128xf32>
    %960 = math.tanh %959 : vector<8x128xf32>
    %961 = arith.mulf %957, %876 : vector<8x128xf32>
    %962 = arith.mulf %956, %960 : vector<8x128xf32>
    %963 = arith.addf %961, %962 : vector<8x128xf32>
    %964 = math.tanh %963 : vector<8x128xf32>
    %965 = arith.mulf %958, %964 : vector<8x128xf32>
    %c1_i32_272 = arith.constant 1 : i32
    %966 = arith.cmpi sge, %c9_i32, %c1_i32_272 : i32
    %967 = arith.extui %966 : i1 to i32
    %968 = arith.sitofp %967 : i32 to f32
    %969 = arith.subf %965, %872 : vector<8x128xf32>
    %970 = vector.broadcast %968 : f32 to vector<8x128xf32>
    %971 = arith.mulf %970, %969 : vector<8x128xf32>
    %972 = arith.addf %872, %971 : vector<8x128xf32>
    %973 = arith.subf %963, %876 : vector<8x128xf32>
    %974 = vector.broadcast %968 : f32 to vector<8x128xf32>
    %975 = arith.mulf %974, %973 : vector<8x128xf32>
    %976 = arith.addf %876, %975 : vector<8x128xf32>
    %977 = tpu.concatenate %917, %918 in 1 : vector<8x128xbf16>, vector<8x128xbf16> -> vector<8x256xbf16>
    %c0_273 = arith.constant 0 : index
    %c0_274 = arith.constant 0 : index
    %978 = vector.load %arg7[%c0_273, %c0_274] : memref<256x512xbf16, #tpu.memory_space<vmem>>, vector<256x512xbf16>
    %cst_275 = arith.constant dense<0.000000e+00> : vector<8x512xf32>
    %979 = tpu.matmul %977, %978, %cst_275 {dimension_numbers = #tpu.dot_dimension_numbers<[1], [0], [0], [1], [0, 0, 1, 1], [], []>} : vector<8x256xbf16>, vector<256x512xbf16>, vector<8x512xf32> -> vector<8x512xf32>
    %980 = arith.addf %979, %14 : vector<8x512xf32>
    %981 = vector.extract_strided_slice %980 {offsets = [0, 0], sizes = [8, 384], strides = [1, 1]} : vector<8x512xf32> to vector<8x384xf32>
    %cst_276 = arith.constant 5.000000e-01 : f32
    %982 = vector.broadcast %cst_276 : f32 to vector<8x384xf32>
    %983 = arith.mulf %982, %981 : vector<8x384xf32>
    %984 = math.tanh %983 : vector<8x384xf32>
    %cst_277 = arith.constant 5.000000e-01 : f32
    %985 = vector.broadcast %cst_277 : f32 to vector<8x384xf32>
    %986 = arith.mulf %985, %984 : vector<8x384xf32>
    %cst_278 = arith.constant 5.000000e-01 : f32
    %987 = vector.broadcast %cst_278 : f32 to vector<8x384xf32>
    %988 = arith.addf %986, %987 : vector<8x384xf32>
    %989 = vector.extract_strided_slice %988 {offsets = [0, 0], sizes = [8, 128], strides = [1, 1]} : vector<8x384xf32> to vector<8x128xf32>
    %990 = vector.extract_strided_slice %988 {offsets = [0, 128], sizes = [8, 128], strides = [1, 1]} : vector<8x384xf32> to vector<8x128xf32>
    %991 = vector.extract_strided_slice %988 {offsets = [0, 256], sizes = [8, 128], strides = [1, 1]} : vector<8x384xf32> to vector<8x128xf32>
    %992 = vector.extract_strided_slice %980 {offsets = [0, 384], sizes = [8, 128], strides = [1, 1]} : vector<8x512xf32> to vector<8x128xf32>
    %993 = math.tanh %992 : vector<8x128xf32>
    %994 = arith.mulf %990, %909 : vector<8x128xf32>
    %995 = arith.mulf %989, %993 : vector<8x128xf32>
    %996 = arith.addf %994, %995 : vector<8x128xf32>
    %997 = math.tanh %996 : vector<8x128xf32>
    %998 = arith.mulf %991, %997 : vector<8x128xf32>
    %c2_i32_279 = arith.constant 2 : i32
    %999 = arith.cmpi sge, %c9_i32, %c2_i32_279 : i32
    %1000 = arith.extui %999 : i1 to i32
    %1001 = arith.sitofp %1000 : i32 to f32
    %1002 = arith.subf %998, %905 : vector<8x128xf32>
    %1003 = vector.broadcast %1001 : f32 to vector<8x128xf32>
    %1004 = arith.mulf %1003, %1002 : vector<8x128xf32>
    %1005 = arith.addf %905, %1004 : vector<8x128xf32>
    %1006 = arith.subf %996, %909 : vector<8x128xf32>
    %1007 = vector.broadcast %1001 : f32 to vector<8x128xf32>
    %1008 = arith.mulf %1007, %1006 : vector<8x128xf32>
    %1009 = arith.addf %909, %1008 : vector<8x128xf32>
    %c2_i32_280 = arith.constant 2 : i32
    %1010 = arith.subi %c9_i32, %c2_i32_280 : i32
    %c0_i32_281 = arith.constant 0 : i32
    %1011 = arith.maxsi %1010, %c0_i32_281 : i32
    %1012 = arith.index_cast %1011 : i32 to index
    %c0_282 = arith.constant 0 : index
    %c0_283 = arith.constant 0 : index
    %1013 = vector.load %arg13[%1012, %c0_282, %c0_283] : memref<8x8x128xf32, #tpu.memory_space<vmem>>, vector<1x8x128xf32>
    %1014 = vector.shape_cast %1013 : vector<1x8x128xf32> to vector<8x128xf32>
    %1015 = vector.shape_cast %1005 : vector<8x128xf32> to vector<1x8x128xf32>
    tpu.vector_store %arg13[%1012, %c0_282, %c0_283], %1015 {strides = array<i32>} : memref<8x8x128xf32, #tpu.memory_space<vmem>>, vector<1x8x128xf32>,
    %c10_i32 = arith.constant 10 : i32
    %c0_284 = arith.constant 0 : index
    %c0_285 = arith.constant 0 : index
    %c0_286 = arith.constant 0 : index
    %1016 = vector.load %arg13[%c0_284, %c0_285, %c0_286] : memref<8x8x128xf32, #tpu.memory_space<vmem>>, vector<8x8x128xf32>
    %c0_287 = arith.constant 0 : index
    %c0_288 = arith.constant 0 : index
    %1017 = vector.load %arg9[%c0_287, %c0_288] : memref<128x1xf32, #tpu.memory_space<vmem>>, vector<128x1xf32>
    %1018 = vector.shape_cast %1017 : vector<128x1xf32> to vector<128xf32>
    %1019 = vector.shape_cast %1018 : vector<128xf32> to vector<1x1x128xf32>
    %1020 = vector.broadcast %1019 : vector<1x1x128xf32> to vector<8x8x128xf32>
    %1021 = arith.mulf %1016, %1020 : vector<8x8x128xf32>
    %cst_289 = arith.constant dense<0.000000e+00> : vector<8x8xf32>
    %1022 = vector.multi_reduction <add>, %1021, %cst_289 [2] : vector<8x8x128xf32> to vector<8x8xf32>
    %1023 = tpu.iota {dimensions = array<i32: 0>} : vector<8x8xi32>
    %c0_290 = arith.constant 0 : index
    %c0_291 = arith.constant 0 : index
    %1024 = vector.load %arg1[%c0_290, %c0_291] : memref<1x8xi32, #tpu.memory_space<vmem>>, vector<1x8xi32>
    %1025 = vector.broadcast %1024 : vector<1x8xi32> to vector<8x8xi32>
    %1026 = arith.cmpi slt, %1023, %1025 : vector<8x8xi32>
    %cst_292 = arith.constant 0.000000e+00 : f32
    %1027 = vector.broadcast %cst_292 : f32 to vector<8x8xf32>
    %1028 = arith.select %1026, %1022, %1027 : vector<8x8xi1>, vector<8x8xf32>
    %c0_293 = arith.constant 0 : index
    %c0_294 = arith.constant 0 : index
    %1029 = vector.load %arg10[%c0_293, %c0_294] : memref<1x1xf32, #tpu.memory_space<vmem>>, vector<1x1xf32>
    %1030 = vector.extract %1029[0, 0] : f32 from vector<1x1xf32>
    %1031 = vector.broadcast %1030 : f32 to vector<8x8xf32>
    %1032 = arith.addf %1028, %1031 : vector<8x8xf32>
    %c0_295 = arith.constant 0 : index
    %c0_296 = arith.constant 0 : index
    %1033 = vector.load %arg11[%c0_295, %c0_296] : memref<8x8xf32, #tpu.memory_space<vmem>>, vector<8x8xf32>
    tpu.vector_store %arg11[%c0_295, %c0_296], %1032 {strides = array<i32>} : memref<8x8xf32, #tpu.memory_space<vmem>>, vector<8x8xf32>,
    return
  }
}

</mosaic_0001>

<bundles_post_ra>
// kernel: flowrate_lstm_forward.1
= control target key start
LH: loop header
LB: loop body
LE: loop exit
PB: predicated region body
PF: predicated region fallthrough
CT: control target
= control target key end

     0   :  { %s18404_s0 = inlined_call_operand.vmem [shape: f32[8,8,3], index: 0, kind: input, shape index: {}]   ;;  %s18405_s1 = inlined_call_operand.vmem [shape: s32[1,8], index: 1, kind: input, shape index: {}]   ;;  %s18406_s2 = inlined_call_operand.vmem [shape: f32[3,512], index: 2, kind: input, shape index: {}]   ;;  %s18407_s3 = inlined_call_operand.vmem [shape: bf16[128,512], index: 3, kind: input, shape index: {}]   ;;  %s18408_s4 = inlined_call_operand.vmem [shape: f32[1,512], index: 4, kind: input, shape index: {}]   ;;  %s18409_s5 = inlined_call_operand.hbm [shape: bf16[256,512], index: 5, kind: input, shape index: {}]   ;;  %s18410_s6 = inlined_call_operand.vmem [shape: f32[1,512], index: 6, kind: input, shape index: {}]   ;;  %s18411_s7 = inlined_call_operand.hbm [shape: bf16[256,512], index: 7, kind: input, shape index: {}]   ;;  %s18412_s8 = inlined_call_operand.vmem [shape: f32[1,512], index: 8, kind: input, shape index: {}]   ;;  %s18413_s9 = inlined_call_operand.vmem [shape: f32[128,1], index: 9, kind: input, shape index: {}]   ;;  %s18414_s10 = inlined_call_operand.<no memory space> [shape: f32[1,1], index: 10, kind: input, shape index: {}]   ;;  %s18415_s11 = inlined_call_operand.vmem [shape: f32[8,8], index: 11, kind: output, shape index: {}]  }
   0x1   :  { %v16_v0 = vstv %s18414_s10 }
   0x2   :  { %17 = vst [vmem:[#allocation4] sm:$0x1] %v16_v0 }
   0x3   :  { %18 = vsyncpa [#allocation6], 0 }
   0x4   :  { %19 = vsyncpa [#allocation8], 0  ;;  %s16306_s19 = smov [#allocation5]   ;;  %s16258_s23 = scalar_lea.hbm %s18409_s5, 8192 }
   0x5   :  { %s35_s20 = sshll.u32 %s16306_s19, 4  ;;  %p16259_p0 = scmp.ne.s32.totalorder %s18409_s5, %s16258_s23  ;;  %s36_s20 = int_to_ptr.vmem [resolvable:$true] %s35_s20 }
   0x6   :  { %p16262_p1 = scmp.lt.u32.totalorder %s16258_s23, %s18409_s5 }
   0x8   :  { %p16264_p2 = pnand %p16262_p1, %p16259_p0 }
   0xa   :  { %16267 = shalt.err (!%p16264_p2)
}
   0xb   :  { %s16268_s10 = scalar_lea.vmem %s36_s20, 8192  ;;  %p16273_p4 = scmp.lt.s32.totalorder %s36_s20, %s36_s20 }
   0xc   :  { %p16269_p3 = scmp.ne.s32.totalorder %s36_s20, %s16268_s10  ;;  %p16274_p5 = scmp.lt.s32.totalorder %s16268_s10, %s16268_s10 }
   0xe   :  { %p16275_p6 = por %p16274_p5, %p16273_p4 }
  0x10   :  { %p16276_p7 = pnand %p16275_p6, %p16269_p3 }
  0x12   :  { %16279 = shalt.err (!%p16276_p7)
}
  0x13   :  { %s16307_s28 = smov 256   ;;  %s16308_s29 = smov 16  }
  0x14   :  { %41 = dma.hbm_to_vmem [thread:$0]  %s18409_s5, 8192, %s36_s20, [#allocation6], %s16307_s28, %s16307_s28, %s16308_s29  }
  0x15   :  { %s16309_s13 = smov [#allocation7]   ;;  %s16280_s17 = scalar_lea.hbm %s18411_s7, 8192 }
  0x16   :  { %s49_s14 = sshll.u32 %s16309_s13, 4  ;;  %p16281_p8 = scmp.ne.s32.totalorder %s18411_s7, %s16280_s17  ;;  %s50_s14 = int_to_ptr.vmem [resolvable:$true] %s49_s14 }
  0x17   :  { %p16284_p9 = scmp.lt.u32.totalorder %s16280_s17, %s18411_s7 }
  0x19   :  { %p16286_p10 = pnand %p16284_p9, %p16281_p8 }
  0x1b   :  { %16289 = shalt.err (!%p16286_p10)
}
  0x1c   :  { %s16290_s23 = scalar_lea.vmem %s50_s14, 8192  ;;  %p16295_p12 = scmp.lt.s32.totalorder %s50_s14, %s50_s14 }
  0x1d   :  { %p16291_p11 = scmp.ne.s32.totalorder %s50_s14, %s16290_s23  ;;  %p16296_p13 = scmp.lt.s32.totalorder %s16290_s23, %s16290_s23 }
  0x1f   :  { %p16297_p0 = por %p16296_p13, %p16295_p12 }
  0x21   :  { %p16298_p1 = pnand %p16297_p0, %p16291_p11 }
  0x23   :  { %16301 = shalt.err (!%p16298_p1)
}
  0x24   :  { %55 = dma.hbm_to_vmem [thread:$0]  %s18411_s7, 8192, %s50_s14, [#allocation8], %s16307_s28, %s16307_s28, %s16308_s29  }
  0x25   :  { %16302 = dma.done.wait [#allocation6], 8192  }
  0x26   :  { %16303 = vsyncadd [#allocation6], 4294959104 }
  0x27   :  { %16304 = dma.done.wait [#allocation8], 8192  }
  0x28   :  { %16305 = vsyncadd [#allocation8], 4294959104  ;;  %v16310_v1 = vmov 0.0   ;;  %v18417_v2 = vmov 0   ;;  %v77_v3 = vld [vmem:[%s18406_s2] sm:$0x77] }
  0x29   :  { %203 = vmatprep.mubr.f32.mxu0 %v16310_v1  ;;  %316 = vmatprep.mubr.f32.mxu1 %v16310_v1  ;;  %vm130_vm0 = vcmask 1042432   ;;  %v78_v4 = vld [vmem:[%s18406_s2 + $0x8] sm:$0x77]  ;;  %v103_v5 = vcombine.high %v77_v3, %v77_v3  ;;  %v69_v7 = vld [vmem:[%s18404_s0] sm:$0xff]  ;;  %vm105_vm1 = vcmask 23552   ;;  %v71_v17 = vld [vmem:[%s18404_s0 + $0x10] sm:$0xff] }
  0x2a   :  { %13968 = vset.pattern.permute.xlu0 %v18417_v2  ;;  %13969 = vset.pattern.permute.xlu1 %v18417_v2  ;;  %v104_v6 = vcombine.high %v78_v4, %v78_v4  ;;  %v13974_v8 = vld [vmem:[%s18407_s3 + $0x4] ss:$16 sps:$4 sm:$0xff]   ;;  %v13972_v9 = vld [vmem:[%s18407_s3] ss:$16 sps:$4 sm:$0xff]   ;;  %v13975_v10 = vld [vmem:[%s18407_s3 + $0x8] ss:$16 sps:$4 sm:$0xff]  }
  0x2b   :  { %12467 = vmatprep.subr.msk.mxu0 %vm130_vm0, %v103_v5  ;;  %v13977_v11 = vld [vmem:[%s18407_s3 + $0xc] ss:$16 sps:$4 sm:$0xff]   ;;  %v13978_v13 = vld [vmem:[%s18407_s3 + $0x20] ss:$16 sps:$4 sm:$0xff]   ;;  %v13980_v14 = vld [vmem:[%s18407_s3 + $0x24] ss:$16 sps:$4 sm:$0xff]  }
  0x2c   :  { %12477 = vmatprep.subr.msk.mxu1 %vm130_vm0, %v104_v6  ;;  %12468 = vmatpush1.msk.msra.mxu0 %vm130_vm0, %v77_v3  ;;  %v70_v12 = vld [vmem:[%s18404_s0 + $0x8] sm:$0xff]  ;;  %v13984_v18 = vld [vmem:[%s18407_s3 + $0x40] ss:$16 sps:$4 sm:$0xff]   ;;  %v13986_v19 = vld [vmem:[%s18407_s3 + $0x44] ss:$16 sps:$4 sm:$0xff]   ;;  %vm12260_vm2 = vcmask 130112  }
  0x2d   :  { %12478 = vmatpush1.msk.msra.mxu1 %vm130_vm0, %v78_v4  ;;  %12469 = vmatmul.mubr.msk.f32.vlgmr.msra.gmra.mrb[0].mxu0 %vm105_vm1, %v69_v7  ;;  %v13983_v15 = vld [vmem:[%s18407_s3 + $0x2c] ss:$16 sps:$4 sm:$0xff]   ;;  %v13981_v16 = vld [vmem:[%s18407_s3 + $0x28] ss:$16 sps:$4 sm:$0xff]   ;;  %v13992_v23 = vld [vmem:[%s18407_s3 + $0x64] ss:$16 sps:$4 sm:$0xff]  }
  0x2e   :  { %12479 = vmatmul.mubr.msk.f32.vlgmr.msra.gmra.mrb[0].mxu1 %vm105_vm1, %v69_v7  ;;  %637 = vmatprep.subr.bf16.mxu0 %v13974_v8  ;;  %v13989_v20 = vld [vmem:[%s18407_s3 + $0x4c] ss:$16 sps:$4 sm:$0xff]   ;;  %v13987_v21 = vld [vmem:[%s18407_s3 + $0x48] ss:$16 sps:$4 sm:$0xff]   ;;  %v13990_v25 = vld [vmem:[%s18407_s3 + $0x60] ss:$16 sps:$4 sm:$0xff]  }
  0x2f   :  { %678 = vmatprep.subr.bf16.mxu1 %v13977_v11  ;;  %638 = vmatpush1.bf16.msra.mxu0 %v13972_v9  ;;  %v72_v22 = vld [vmem:[%s18404_s0 + $0x18] sm:$0xff]  ;;  %v73_v27 = vld [vmem:[%s18404_s0 + $0x20] sm:$0xff]  ;;  %v74_v32 = vld [vmem:[%s18404_s0 + $0x28] sm:$0xff]  ;;  %vm12267_vm3 = vcmask 195712   ;;  %vm12274_vm4 = vcmask 261312   ;;  %vm12281_vm5 = vcmask 326912  }
  0x30   :  { %679 = vmatpush1.bf16.msra.mxu1 %v13975_v10  ;;  %209 = vmatprep.mubr.f32.mxu0 %v16310_v1  ;;  %v13995_v24 = vld [vmem:[%s18407_s3 + $0x6c] ss:$16 sps:$4 sm:$0xff]   ;;  %v13993_v26 = vld [vmem:[%s18407_s3 + $0x68] ss:$16 sps:$4 sm:$0xff]   ;;  %v13996_v28 = vld [vmem:[%s18407_s3 + $0x80] ss:$16 sps:$4 sm:$0xff]  }
  0x31   :  { %322 = vmatprep.mubr.f32.mxu1 %v16310_v1  ;;  %12470 = vmatmul.mubr.msk.f32.gmra.mrb[2].mxu0 %vm105_vm1, %v70_v12  ;;  %v13998_v29 = vld [vmem:[%s18407_s3 + $0x84] ss:$16 sps:$4 sm:$0xff]   ;;  %v14001_v30 = vld [vmem:[%s18407_s3 + $0x8c] ss:$16 sps:$4 sm:$0xff]   ;;  %v13999_v31 = vld [vmem:[%s18407_s3 + $0x88] ss:$16 sps:$4 sm:$0xff]  }
  0x32   :  { %12480 = vmatmul.mubr.msk.f32.gmra.mrb[2].mxu1 %vm105_vm1, %v70_v12  ;;  %639 = vmatprep.subr.bf16.mxu0 %v13980_v14  ;;  %v14002_v33 = vld [vmem:[%s18407_s3 + $0xa0] ss:$16 sps:$4 sm:$0xff]   ;;  %v14004_v34 = vld [vmem:[%s18407_s3 + $0xa4] ss:$16 sps:$4 sm:$0xff]   ;;  %v14007_v35 = vld [vmem:[%s18407_s3 + $0xac] ss:$16 sps:$4 sm:$0xff]  }
  0x33   :  { %680 = vmatprep.subr.bf16.mxu1 %v13983_v15  ;;  %640 = vmatpush1.bf16.msra.mxu0 %v13978_v13  ;;  %v14005_v36 = vld [vmem:[%s18407_s3 + $0xa8] ss:$16 sps:$4 sm:$0xff]   ;;  %v75_v37 = vld [vmem:[%s18404_s0 + $0x30] sm:$0xff]  ;;  %v14013_v40 = vld [vmem:[%s18407_s3 + $0xcc] ss:$16 sps:$4 sm:$0xff]   ;;  %vm12288_vm6 = vcmask 392512  }
  0x34   :  { %681 = vmatpush1.bf16.msra.mxu1 %v13981_v16  ;;  %215 = vmatprep.mubr.f32.mxu0 %v16310_v1  ;;  %v14008_v38 = vld [vmem:[%s18407_s3 + $0xc0] ss:$16 sps:$4 sm:$0xff]   ;;  %v14010_v39 = vld [vmem:[%s18407_s3 + $0xc4] ss:$16 sps:$4 sm:$0xff]   ;;  %v14011_v41 = vld [vmem:[%s18407_s3 + $0xc8] ss:$16 sps:$4 sm:$0xff]  }
  0x35   :  { %328 = vmatprep.mubr.f32.mxu1 %v16310_v1  ;;  %12471 = vmatmul.mubr.msk.f32.gmra.mrb[4].mxu0 %vm105_vm1, %v71_v17  ;;  %v76_v42 = vld [vmem:[%s18404_s0 + $0x38] sm:$0xff]  ;;  %v14014_v43 = vld [vmem:[%s18407_s3 + $0xe0] ss:$16 sps:$4 sm:$0xff]   ;;  %v14016_v44 = vld [vmem:[%s18407_s3 + $0xe4] ss:$16 sps:$4 sm:$0xff]   ;;  %vm12295_vm7 = vcmask 458112  }
  0x36   :  { %12481 = vmatmul.mubr.msk.f32.gmra.mrb[4].mxu1 %vm105_vm1, %v71_v17  ;;  %641 = vmatprep.subr.bf16.mxu0 %v13986_v19  ;;  %v14019_v45 = vld [vmem:[%s18407_s3 + $0xec] ss:$16 sps:$4 sm:$0xff]   ;;  %v14017_v46 = vld [vmem:[%s18407_s3 + $0xe8] ss:$16 sps:$4 sm:$0xff]   ;;  %v14020_v49 = vld [vmem:[#allocation5] ss:$16 sps:$4 sm:$0xff]  }
  0x37   :  { %682 = vmatprep.subr.bf16.mxu1 %v13989_v20  ;;  %642 = vmatpush1.bf16.msra.mxu0 %v13984_v18  ;;  %v14022_v47 = vld [vmem:[#allocation5 + $0x4] ss:$16 sps:$4 sm:$0xff]   ;;  %v14025_v48 = vld [vmem:[#allocation5 + $0xc] ss:$16 sps:$4 sm:$0xff]   ;;  %v14023_v50 = vld [vmem:[#allocation5 + $0x8] ss:$16 sps:$4 sm:$0xff]  }
  0x38   :  { %683 = vmatpush1.bf16.msra.mxu1 %v13987_v21  ;;  %221 = vmatprep.mubr.f32.mxu0 %v16310_v1  ;;  %v14028_v51 = vld [vmem:[#allocation5 + $0x24] ss:$16 sps:$4 sm:$0xff]   ;;  %v14031_v52 = vld [vmem:[#allocation5 + $0x2c] ss:$16 sps:$4 sm:$0xff]   ;;  %v14026_v53 = vld [vmem:[#allocation5 + $0x20] ss:$16 sps:$4 sm:$0xff]  }
  0x39   :  { %334 = vmatprep.mubr.f32.mxu1 %v16310_v1  ;;  %12472 = vmatmul.mubr.msk.f32.gmra.mrb[6].mxu0 %vm105_vm1, %v72_v22  ;;  %v14029_v54 = vld [vmem:[#allocation5 + $0x28] ss:$16 sps:$4 sm:$0xff]   ;;  %v14034_v55 = vld [vmem:[#allocation5 + $0x44] ss:$16 sps:$4 sm:$0xff]   ;;  %v14037_v56 = vld [vmem:[#allocation5 + $0x4c] ss:$16 sps:$4 sm:$0xff]  }
  0x3a   :  { %12482 = vmatmul.mubr.msk.f32.gmra.mrb[6].mxu1 %vm105_vm1, %v72_v22  ;;  %643 = vmatprep.subr.bf16.mxu0 %v13992_v23  ;;  %v14032_v57 = vld [vmem:[#allocation5 + $0x40] ss:$16 sps:$4 sm:$0xff]   ;;  %v14035_v58 = vld [vmem:[#allocation5 + $0x48] ss:$16 sps:$4 sm:$0xff]   ;;  %v14040_v59 = vld [vmem:[#allocation5 + $0x64] ss:$16 sps:$4 sm:$0xff]  }
  0x3b   :  { %684 = vmatprep.subr.bf16.mxu1 %v13995_v24  ;;  %644 = vmatpush1.bf16.msra.mxu0 %v13990_v25  ;;  %v14043_v60 = vld [vmem:[#allocation5 + $0x6c] ss:$16 sps:$4 sm:$0xff]   ;;  %v14038_v61 = vld [vmem:[#allocation5 + $0x60] ss:$16 sps:$4 sm:$0xff]   ;;  %v14041_v62 = vld [vmem:[#allocation5 + $0x68] ss:$16 sps:$4 sm:$0xff]  }
  0x3c   :  { %685 = vmatpush1.bf16.msra.mxu1 %v13993_v26  ;;  %227 = vmatprep.mubr.f32.mxu0 %v16310_v1  ;;  %v14046_v63 = vld [vmem:[#allocation5 + $0x84] ss:$16 sps:$4 sm:$0xff]   ;;  %v14049_v0 = vld [vmem:[#allocation5 + $0x8c] ss:$16 sps:$4 sm:$0xff]   ;;  %v14047_v3 = vld [vmem:[#allocation5 + $0x88] ss:$16 sps:$4 sm:$0xff]  }
  0x3d   :  { %340 = vmatprep.mubr.f32.mxu1 %v16310_v1  ;;  %12473 = vmatmul.mubr.msk.f32.gmra.mrb[8].mxu0 %vm105_vm1, %v73_v27  ;;  %v14052_v4 = vld [vmem:[#allocation5 + $0xa4] ss:$16 sps:$4 sm:$0xff]   ;;  %v14055_v5 = vld [vmem:[#allocation5 + $0xac] ss:$16 sps:$4 sm:$0xff]   ;;  %v14050_v6 = vld [vmem:[#allocation5 + $0xa0] ss:$16 sps:$4 sm:$0xff]  }
  0x3e   :  { %12483 = vmatmul.mubr.msk.f32.gmra.mrb[8].mxu1 %vm105_vm1, %v73_v27  ;;  %645 = vmatprep.subr.bf16.mxu0 %v13998_v29  ;;  %v14053_v7 = vld [vmem:[#allocation5 + $0xa8] ss:$16 sps:$4 sm:$0xff]   ;;  %v14058_v8 = vld [vmem:[#allocation5 + $0xc4] ss:$16 sps:$4 sm:$0xff]   ;;  %v14061_v9 = vld [vmem:[#allocation5 + $0xcc] ss:$16 sps:$4 sm:$0xff]  }
  0x3f   :  { %686 = vmatprep.subr.bf16.mxu1 %v14001_v30  ;;  %646 = vmatpush1.bf16.msra.mxu0 %v13996_v28  ;;  %v14056_v10 = vld [vmem:[#allocation5 + $0xc0] ss:$16 sps:$4 sm:$0xff]   ;;  %v14059_v11 = vld [vmem:[#allocation5 + $0xc8] ss:$16 sps:$4 sm:$0xff]   ;;  %v14064_v12 = vld [vmem:[#allocation5 + $0xe4] ss:$16 sps:$4 sm:$0xff]  }
  0x40   :  { %687 = vmatpush1.bf16.msra.mxu1 %v13999_v31  ;;  %233 = vmatprep.mubr.f32.mxu0 %v16310_v1  ;;  %v14067_v13 = vld [vmem:[#allocation5 + $0xec] ss:$16 sps:$4 sm:$0xff]   ;;  %v14062_v14 = vld [vmem:[#allocation5 + $0xe0] ss:$16 sps:$4 sm:$0xff]   ;;  %v14065_v15 = vld [vmem:[#allocation5 + $0xe8] ss:$16 sps:$4 sm:$0xff]  }
  0x41   :  { %346 = vmatprep.mubr.f32.mxu1 %v16310_v1  ;;  %12474 = vmatmul.mubr.msk.f32.gmra.mrb[10].mxu0 %vm105_vm1, %v74_v32  ;;  %v14070_v16 = vld [vmem:[#allocation5 + $0x104] ss:$16 sps:$4 sm:$0xff]   ;;  %v14073_v17 = vld [vmem:[#allocation5 + $0x10c] ss:$16 sps:$4 sm:$0xff]   ;;  %v14068_v18 = vld [vmem:[#allocation5 + $0x100] ss:$16 sps:$4 sm:$0xff]  }
  0x42   :  { %12484 = vmatmul.mubr.msk.f32.gmra.mrb[10].mxu1 %vm105_vm1, %v74_v32  ;;  %647 = vmatprep.subr.bf16.mxu0 %v14004_v34  ;;  %v14071_v19 = vld [vmem:[#allocation5 + $0x108] ss:$16 sps:$4 sm:$0xff]   ;;  %v14076_v20 = vld [vmem:[#allocation5 + $0x124] ss:$16 sps:$4 sm:$0xff]   ;;  %v14079_v21 = vld [vmem:[#allocation5 + $0x12c] ss:$16 sps:$4 sm:$0xff]  }
  0x43   :  { %688 = vmatprep.subr.bf16.mxu1 %v14007_v35  ;;  %648 = vmatpush1.bf16.msra.mxu0 %v14002_v33  ;;  %v14074_v22 = vld [vmem:[#allocation5 + $0x120] ss:$16 sps:$4 sm:$0xff]   ;;  %v14077_v23 = vld [vmem:[#allocation5 + $0x128] ss:$16 sps:$4 sm:$0xff]   ;;  %v14082_v24 = vld [vmem:[#allocation5 + $0x144] ss:$16 sps:$4 sm:$0xff]  }
  0x44   :  { %689 = vmatpush1.bf16.msra.mxu1 %v14005_v36  ;;  %239 = vmatprep.mubr.f32.mxu0 %v16310_v1  ;;  %v14085_v25 = vld [vmem:[#allocation5 + $0x14c] ss:$16 sps:$4 sm:$0xff]   ;;  %v14080_v26 = vld [vmem:[#allocation5 + $0x140] ss:$16 sps:$4 sm:$0xff]   ;;  %v14083_v27 = vld [vmem:[#allocation5 + $0x148] ss:$16 sps:$4 sm:$0xff]  }
  0x45   :  { %352 = vmatprep.mubr.f32.mxu1 %v16310_v1  ;;  %12475 = vmatmul.mubr.msk.f32.gmra.mrb[12].mxu0 %vm105_vm1, %v75_v37  ;;  %v14088_v28 = vld [vmem:[#allocation5 + $0x164] ss:$16 sps:$4 sm:$0xff]   ;;  %v14091_v29 = vld [vmem:[#allocation5 + $0x16c] ss:$16 sps:$4 sm:$0xff]   ;;  %v14086_v30 = vld [vmem:[#allocation5 + $0x160] ss:$16 sps:$4 sm:$0xff]  }
  0x46   :  { %12485 = vmatmul.mubr.msk.f32.gmra.mrb[12].mxu1 %vm105_vm1, %v75_v37  ;;  %649 = vmatprep.subr.bf16.mxu0 %v14010_v39  ;;  %v14089_v31 = vld [vmem:[#allocation5 + $0x168] ss:$16 sps:$4 sm:$0xff]   ;;  %v14094_v32 = vld [vmem:[#allocation5 + $0x184] ss:$16 sps:$4 sm:$0xff]   ;;  %v14097_v33 = vld [vmem:[#allocation5 + $0x18c] ss:$16 sps:$4 sm:$0xff]  }
  0x47   :  { %690 = vmatprep.subr.bf16.mxu1 %v14013_v40  ;;  %650 = vmatpush1.bf16.msra.mxu0 %v14008_v38  ;;  %v14092_v34 = vld [vmem:[#allocation5 + $0x180] ss:$16 sps:$4 sm:$0xff]   ;;  %v14095_v35 = vld [vmem:[#allocation5 + $0x188] ss:$16 sps:$4 sm:$0xff]   ;;  %v14100_v36 = vld [vmem:[#allocation5 + $0x1a4] ss:$16 sps:$4 sm:$0xff]  }
  0x48   :  { %691 = vmatpush1.bf16.msra.mxu1 %v14011_v41  ;;  %245 = vmatprep.mubr.f32.mxu0 %v16310_v1  ;;  %v14103_v37 = vld [vmem:[#allocation5 + $0x1ac] ss:$16 sps:$4 sm:$0xff]   ;;  %v14098_v38 = vld [vmem:[#allocation5 + $0x1a0] ss:$16 sps:$4 sm:$0xff]   ;;  %v14101_v39 = vld [vmem:[#allocation5 + $0x1a8] ss:$16 sps:$4 sm:$0xff]  }
  0x49   :  { %358 = vmatprep.mubr.f32.mxu1 %v16310_v1  ;;  %12476 = vmatmul.mubr.msk.f32.gmra.mrb[14].mxu0 %vm105_vm1, %v76_v42  ;;  %v14044_v1 = vld [vmem:[#allocation5 + $0x80] ss:$16 sps:$4 sm:$0xff]   ;;  %v14106_v40 = vld [vmem:[#allocation5 + $0x1c4] ss:$16 sps:$4 sm:$0xff]   ;;  %v14109_v41 = vld [vmem:[#allocation5 + $0x1cc] ss:$16 sps:$4 sm:$0xff]  }
  0x4a   :  { %12486 = vmatmul.mubr.msk.f32.gmra.mrb[14].mxu1 %vm105_vm1, %v76_v42  ;;  %651 = vmatprep.subr.bf16.mxu0 %v14016_v44  ;;  %v14104_v42 = vld [vmem:[#allocation5 + $0x1c0] ss:$16 sps:$4 sm:$0xff]   ;;  %v14112_v44 = vld [vmem:[#allocation5 + $0x1e4] ss:$16 sps:$4 sm:$0xff]   ;;  %vm12302_vm8 = vcmask 523712   ;;  %vm12309_vm9 = vcmask 589312  }
  0x4b   :  { %692 = vmatprep.subr.bf16.mxu1 %v14019_v45  ;;  %652 = vmatpush1.bf16.msra.mxu0 %v14014_v43  ;;  %v14107_v43 = vld [vmem:[#allocation5 + $0x1c8] ss:$16 sps:$4 sm:$0xff]   ;;  %v14115_v45 = vld [vmem:[#allocation5 + $0x1ec] ss:$16 sps:$4 sm:$0xff]   ;;  %vm12316_vm10 = vcmask 654912   ;;  %vm12323_vm11 = vcmask 720512  }
  0x4c   :  { %693 = vmatpush1.bf16.msra.mxu1 %v14017_v46  ;;  %669 = vmatprep.mubr.bf16.mxu0 %v18417_v2  ;;  %v14110_v46 = vld [vmem:[#allocation5 + $0x1e0] ss:$16 sps:$4 sm:$0xff]   ;;  %vm12330_vm12 = vcmask 786112   ;;  %vm12337_vm13 = vcmask 851712   ;;  %vm12344_vm14 = vcmask 917312   ;;  %vm12351_vm15 = vcmask 982912  }
  0x4d   :  { %710 = vmatprep.mubr.bf16.mxu1 %v18417_v2  ;;  %1125 = vmatprep.subr.bf16.mxu0 %v14022_v47  ;;  %v14113_v47 = vld [vmem:[#allocation5 + $0x1e8] ss:$16 sps:$4 sm:$0xff]   ;;  %vm12358_vm0 = vcmask 1048512   ;;  %vm12360_vm1 = vcmask 1041409  }
  0x4e   :  { %1166 = vmatprep.subr.bf16.mxu1 %v14025_v48  ;;  %670 = vmatmul.mubr.bf16.vlgmr.msra.gmra.mrb[16].mxu0 %v18417_v2  ;;  %v14118_v48 = vld [vmem:[#allocation7 + $0x4] ss:$16 sps:$4 sm:$0xff]  }
  0x4f   :  { %711 = vmatmul.mubr.bf16.vlgmr.msra.gmra.mrb[16].mxu1 %v18417_v2  ;;  %1126 = vmatpush1.bf16.msra.mxu0 %v14020_v49  ;;  %v14121_v49 = vld [vmem:[#allocation7 + $0xc] ss:$16 sps:$4 sm:$0xff]  }
  0x50   :  { %1167 = vmatpush1.bf16.msra.mxu1 %v14023_v50  ;;  %1127 = vmatprep.subr.bf16.mxu0 %v14028_v51  ;;  %v14116_v50 = vld [vmem:[#allocation7] ss:$16 sps:$4 sm:$0xff]   ;;  %v14119_v51 = vld [vmem:[#allocation7 + $0x8] ss:$16 sps:$4 sm:$0xff]  }
  0x51   :  { %1168 = vmatprep.subr.bf16.mxu1 %v14031_v52  ;;  %1157 = vmatprep.mubr.bf16.mxu0 %v18417_v2  ;;  %v14124_v52 = vld [vmem:[#allocation7 + $0x24] ss:$16 sps:$4 sm:$0xff]  }
  0x52   :  { %1198 = vmatprep.mubr.bf16.mxu1 %v18417_v2 }
  0x53   :  { %1128 = vmatpush1.bf16.msra.mxu0 %v14026_v53  ;;  %v14127_v53 = vld [vmem:[#allocation7 + $0x2c] ss:$16 sps:$4 sm:$0xff]  }
  0x54   :  { %1169 = vmatpush1.bf16.msra.mxu1 %v14029_v54  ;;  %1129 = vmatprep.subr.bf16.mxu0 %v14034_v55  ;;  %v14122_v54 = vld [vmem:[#allocation7 + $0x20] ss:$16 sps:$4 sm:$0xff]   ;;  %v14125_v55 = vld [vmem:[#allocation7 + $0x28] ss:$16 sps:$4 sm:$0xff]  }
  0x55   :  { %1170 = vmatprep.subr.bf16.mxu1 %v14037_v56  ;;  %v14130_v56 = vld [vmem:[#allocation7 + $0x44] ss:$16 sps:$4 sm:$0xff]  }
  0x57   :  { %1130 = vmatpush1.bf16.msra.mxu0 %v14032_v57  ;;  %v14133_v57 = vld [vmem:[#allocation7 + $0x4c] ss:$16 sps:$4 sm:$0xff]  }
  0x58   :  { %1171 = vmatpush1.bf16.msra.mxu1 %v14035_v58  ;;  %1131 = vmatprep.subr.bf16.mxu0 %v14040_v59  ;;  %v14128_v58 = vld [vmem:[#allocation7 + $0x40] ss:$16 sps:$4 sm:$0xff]   ;;  %v14131_v59 = vld [vmem:[#allocation7 + $0x48] ss:$16 sps:$4 sm:$0xff]  }
  0x59   :  { %1172 = vmatprep.subr.bf16.mxu1 %v14043_v60  ;;  %v14136_v60 = vld [vmem:[#allocation7 + $0x64] ss:$16 sps:$4 sm:$0xff]  }
  0x5b   :  { %1132 = vmatpush1.bf16.msra.mxu0 %v14038_v61  ;;  %v14139_v61 = vld [vmem:[#allocation7 + $0x6c] ss:$16 sps:$4 sm:$0xff]  }
  0x5c   :  { %1173 = vmatpush1.bf16.msra.mxu1 %v14041_v62  ;;  %1133 = vmatprep.subr.bf16.mxu0 %v14046_v63  ;;  %v14134_v62 = vld [vmem:[#allocation7 + $0x60] ss:$16 sps:$4 sm:$0xff]   ;;  %v14137_v63 = vld [vmem:[#allocation7 + $0x68] ss:$16 sps:$4 sm:$0xff]  }
  0x5d   :  { %1174 = vmatprep.subr.bf16.mxu1 %v14049_v0  ;;  %v14142_v0 = vld [vmem:[#allocation7 + $0x84] ss:$16 sps:$4 sm:$0xff]  }
  0x5f   :  { %1134 = vmatpush1.bf16.msra.mxu0 %v14044_v1  ;;  %v14145_v1 = vld [vmem:[#allocation7 + $0x8c] ss:$16 sps:$4 sm:$0xff]  }
  0x60   :  { %1175 = vmatpush1.bf16.msra.mxu1 %v14047_v3  ;;  %1135 = vmatprep.subr.bf16.mxu0 %v14052_v4  ;;  %v14140_v3 = vld [vmem:[#allocation7 + $0x80] ss:$16 sps:$4 sm:$0xff]   ;;  %v14143_v4 = vld [vmem:[#allocation7 + $0x88] ss:$16 sps:$4 sm:$0xff]  }
  0x61   :  { %1176 = vmatprep.subr.bf16.mxu1 %v14055_v5  ;;  %v14148_v5 = vld [vmem:[#allocation7 + $0xa4] ss:$16 sps:$4 sm:$0xff]  }
  0x63   :  { %1136 = vmatpush1.bf16.msra.mxu0 %v14050_v6  ;;  %v14151_v6 = vld [vmem:[#allocation7 + $0xac] ss:$16 sps:$4 sm:$0xff]  }
  0x64   :  { %1177 = vmatpush1.bf16.msra.mxu1 %v14053_v7  ;;  %1137 = vmatprep.subr.bf16.mxu0 %v14058_v8  ;;  %v14146_v7 = vld [vmem:[#allocation7 + $0xa0] ss:$16 sps:$4 sm:$0xff]   ;;  %v14149_v8 = vld [vmem:[#allocation7 + $0xa8] ss:$16 sps:$4 sm:$0xff]  }
  0x65   :  { %1178 = vmatprep.subr.bf16.mxu1 %v14061_v9  ;;  %v14154_v9 = vld [vmem:[#allocation7 + $0xc4] ss:$16 sps:$4 sm:$0xff]  }
  0x67   :  { %1138 = vmatpush1.bf16.msra.mxu0 %v14056_v10  ;;  %v14157_v10 = vld [vmem:[#allocation7 + $0xcc] ss:$16 sps:$4 sm:$0xff]  }
  0x68   :  { %1179 = vmatpush1.bf16.msra.mxu1 %v14059_v11  ;;  %1139 = vmatprep.subr.bf16.mxu0 %v14064_v12  ;;  %v14152_v11 = vld [vmem:[#allocation7 + $0xc0] ss:$16 sps:$4 sm:$0xff]   ;;  %v14155_v12 = vld [vmem:[#allocation7 + $0xc8] ss:$16 sps:$4 sm:$0xff]  }
  0x69   :  { %1180 = vmatprep.subr.bf16.mxu1 %v14067_v13  ;;  %v14160_v13 = vld [vmem:[#allocation7 + $0xe4] ss:$16 sps:$4 sm:$0xff]  }
  0x6b   :  { %1140 = vmatpush1.bf16.msra.mxu0 %v14062_v14  ;;  %v14163_v14 = vld [vmem:[#allocation7 + $0xec] ss:$16 sps:$4 sm:$0xff]  }
  0x6c   :  { %1181 = vmatpush1.bf16.msra.mxu1 %v14065_v15  ;;  %1141 = vmatprep.subr.bf16.mxu0 %v14070_v16  ;;  %v14158_v15 = vld [vmem:[#allocation7 + $0xe0] ss:$16 sps:$4 sm:$0xff]   ;;  %v14161_v16 = vld [vmem:[#allocation7 + $0xe8] ss:$16 sps:$4 sm:$0xff]  }
  0x6d   :  { %1182 = vmatprep.subr.bf16.mxu1 %v14073_v17  ;;  %v14166_v17 = vld [vmem:[#allocation7 + $0x104] ss:$16 sps:$4 sm:$0xff]  }
  0x6f   :  { %1142 = vmatpush1.bf16.msra.mxu0 %v14068_v18  ;;  %v14169_v18 = vld [vmem:[#allocation7 + $0x10c] ss:$16 sps:$4 sm:$0xff]  }
  0x70   :  { %1183 = vmatpush1.bf16.msra.mxu1 %v14071_v19  ;;  %1143 = vmatprep.subr.bf16.mxu0 %v14076_v20  ;;  %v14164_v19 = vld [vmem:[#allocation7 + $0x100] ss:$16 sps:$4 sm:$0xff]   ;;  %v14167_v20 = vld [vmem:[#allocation7 + $0x108] ss:$16 sps:$4 sm:$0xff]  }
  0x71   :  { %1184 = vmatprep.subr.bf16.mxu1 %v14079_v21  ;;  %v14172_v21 = vld [vmem:[#allocation7 + $0x124] ss:$16 sps:$4 sm:$0xff]  }
  0x73   :  { %1144 = vmatpush1.bf16.msra.mxu0 %v14074_v22  ;;  %v14175_v22 = vld [vmem:[#allocation7 + $0x12c] ss:$16 sps:$4 sm:$0xff]  }
  0x74   :  { %1185 = vmatpush1.bf16.msra.mxu1 %v14077_v23  ;;  %1145 = vmatprep.subr.bf16.mxu0 %v14082_v24  ;;  %v14170_v23 = vld [vmem:[#allocation7 + $0x120] ss:$16 sps:$4 sm:$0xff]   ;;  %v14173_v24 = vld [vmem:[#allocation7 + $0x128] ss:$16 sps:$4 sm:$0xff]  }
  0x75   :  { %1186 = vmatprep.subr.bf16.mxu1 %v14085_v25  ;;  %v14178_v25 = vld [vmem:[#allocation7 + $0x144] ss:$16 sps:$4 sm:$0xff]  }
  0x77   :  { %1146 = vmatpush1.bf16.msra.mxu0 %v14080_v26  ;;  %v14181_v26 = vld [vmem:[#allocation7 + $0x14c] ss:$16 sps:$4 sm:$0xff]  }
  0x78   :  { %1187 = vmatpush1.bf16.msra.mxu1 %v14083_v27  ;;  %1147 = vmatprep.subr.bf16.mxu0 %v14088_v28  ;;  %v14176_v27 = vld [vmem:[#allocation7 + $0x140] ss:$16 sps:$4 sm:$0xff]   ;;  %v14179_v28 = vld [vmem:[#allocation7 + $0x148] ss:$16 sps:$4 sm:$0xff]  }
  0x79   :  { %1188 = vmatprep.subr.bf16.mxu1 %v14091_v29  ;;  %v14184_v29 = vld [vmem:[#allocation7 + $0x164] ss:$16 sps:$4 sm:$0xff]  }
  0x7b   :  { %1148 = vmatpush1.bf16.msra.mxu0 %v14086_v30  ;;  %v14187_v30 = vld [vmem:[#allocation7 + $0x16c] ss:$16 sps:$4 sm:$0xff]  }
  0x7c   :  { %1189 = vmatpush1.bf16.msra.mxu1 %v14089_v31  ;;  %1149 = vmatprep.subr.bf16.mxu0 %v14094_v32  ;;  %v14182_v31 = vld [vmem:[#allocation7 + $0x160] ss:$16 sps:$4 sm:$0xff]   ;;  %v14185_v32 = vld [vmem:[#allocation7 + $0x168] ss:$16 sps:$4 sm:$0xff]  }
  0x7d   :  { %1190 = vmatprep.subr.bf16.mxu1 %v14097_v33  ;;  %v14190_v33 = vld [vmem:[#allocation7 + $0x184] ss:$16 sps:$4 sm:$0xff]  }
  0x7f   :  { %1150 = vmatpush1.bf16.msra.mxu0 %v14092_v34  ;;  %v14193_v34 = vld [vmem:[#allocation7 + $0x18c] ss:$16 sps:$4 sm:$0xff]  }
  0x80   :  { %1191 = vmatpush1.bf16.msra.mxu1 %v14095_v35  ;;  %1151 = vmatprep.subr.bf16.mxu0 %v14100_v36  ;;  %v14188_v35 = vld [vmem:[#allocation7 + $0x180] ss:$16 sps:$4 sm:$0xff]   ;;  %v14191_v36 = vld [vmem:[#allocation7 + $0x188] ss:$16 sps:$4 sm:$0xff]  }
  0x81   :  { %1192 = vmatprep.subr.bf16.mxu1 %v14103_v37  ;;  %v14196_v37 = vld [vmem:[#allocation7 + $0x1a4] ss:$16 sps:$4 sm:$0xff]  }
  0x83   :  { %1152 = vmatpush1.bf16.msra.mxu0 %v14098_v38  ;;  %v14199_v38 = vld [vmem:[#allocation7 + $0x1ac] ss:$16 sps:$4 sm:$0xff]  }
  0x84   :  { %1193 = vmatpush1.bf16.msra.mxu1 %v14101_v39  ;;  %1153 = vmatprep.subr.bf16.mxu0 %v14106_v40  ;;  %v14194_v39 = vld [vmem:[#allocation7 + $0x1a0] ss:$16 sps:$4 sm:$0xff]   ;;  %v14197_v40 = vld [vmem:[#allocation7 + $0x1a8] ss:$16 sps:$4 sm:$0xff]  }
  0x85   :  { %1194 = vmatprep.subr.bf16.mxu1 %v14109_v41  ;;  %v14202_v41 = vld [vmem:[#allocation7 + $0x1c4] ss:$16 sps:$4 sm:$0xff]  }
  0x87   :  { %1154 = vmatpush1.bf16.msra.mxu0 %v14104_v42  ;;  %v14205_v42 = vld [vmem:[#allocation7 + $0x1cc] ss:$16 sps:$4 sm:$0xff]  }
  0x88   :  { %1195 = vmatpush1.bf16.msra.mxu1 %v14107_v43  ;;  %1155 = vmatprep.subr.bf16.mxu0 %v14112_v44  ;;  %v14200_v43 = vld [vmem:[#allocation7 + $0x1c0] ss:$16 sps:$4 sm:$0xff]   ;;  %v14203_v44 = vld [vmem:[#allocation7 + $0x1c8] ss:$16 sps:$4 sm:$0xff]  }
  0x89   :  { %1196 = vmatprep.subr.bf16.mxu1 %v14115_v45  ;;  %v14208_v45 = vld [vmem:[#allocation7 + $0x1e4] ss:$16 sps:$4 sm:$0xff]  }
  0x8b   :  { %1156 = vmatpush1.bf16.msra.mxu0 %v14110_v46  ;;  %v14211_v46 = vld [vmem:[#allocation7 + $0x1ec] ss:$16 sps:$4 sm:$0xff]  }
  0x8c   :  { %1197 = vmatpush1.bf16.msra.mxu1 %v14113_v47  ;;  %1613 = vmatprep.subr.bf16.mxu0 %v14118_v48  ;;  %v14206_v47 = vld [vmem:[#allocation7 + $0x1e0] ss:$16 sps:$4 sm:$0xff]   ;;  %v14209_v48 = vld [vmem:[#allocation7 + $0x1e8] ss:$16 sps:$4 sm:$0xff]  }
  0x8d   :  { %1654 = vmatprep.subr.bf16.mxu1 %v14121_v49  ;;  %v14214_v49 = vld [vmem:[%s18407_s3 + $0x4] ss:$16 sps:$4 sm:$0xff]  }
  0x8e   :  { %1158 = vmatmul.mubr.bf16.vlgmr.msra.gmra.mrb[20].mxu0 %v18417_v2 }
  0x8f   :  { %1199 = vmatmul.mubr.bf16.vlgmr.msra.gmra.mrb[20].mxu1 %v18417_v2  ;;  %1614 = vmatpush1.bf16.msra.mxu0 %v14116_v50  ;;  %v14217_v50 = vld [vmem:[%s18407_s3 + $0xc] ss:$16 sps:$4 sm:$0xff]  }
  0x90   :  { %1655 = vmatpush1.bf16.msra.mxu1 %v14119_v51  ;;  %1615 = vmatprep.subr.bf16.mxu0 %v14124_v52  ;;  %v14212_v51 = vld [vmem:[%s18407_s3] ss:$16 sps:$4 sm:$0xff]   ;;  %v14215_v52 = vld [vmem:[%s18407_s3 + $0x8] ss:$16 sps:$4 sm:$0xff]  }
  0x91   :  { %1656 = vmatprep.subr.bf16.mxu1 %v14127_v53  ;;  %1645 = vmatprep.mubr.bf16.mxu0 %v18417_v2  ;;  %v14220_v53 = vld [vmem:[%s18407_s3 + $0x24] ss:$16 sps:$4 sm:$0xff]  }
  0x92   :  { %1686 = vmatprep.mubr.bf16.mxu1 %v18417_v2 }
  0x93   :  { %1616 = vmatpush1.bf16.msra.mxu0 %v14122_v54  ;;  %v14223_v54 = vld [vmem:[%s18407_s3 + $0x2c] ss:$16 sps:$4 sm:$0xff]  }
  0x94   :  { %1657 = vmatpush1.bf16.msra.mxu1 %v14125_v55  ;;  %1617 = vmatprep.subr.bf16.mxu0 %v14130_v56  ;;  %v14218_v55 = vld [vmem:[%s18407_s3 + $0x20] ss:$16 sps:$4 sm:$0xff]   ;;  %v14221_v56 = vld [vmem:[%s18407_s3 + $0x28] ss:$16 sps:$4 sm:$0xff]  }
  0x95   :  { %1658 = vmatprep.subr.bf16.mxu1 %v14133_v57  ;;  %v14226_v57 = vld [vmem:[%s18407_s3 + $0x44] ss:$16 sps:$4 sm:$0xff]  }
  0x97   :  { %1618 = vmatpush1.bf16.msra.mxu0 %v14128_v58  ;;  %v14229_v58 = vld [vmem:[%s18407_s3 + $0x4c] ss:$16 sps:$4 sm:$0xff]  }
  0x98   :  { %1659 = vmatpush1.bf16.msra.mxu1 %v14131_v59  ;;  %1619 = vmatprep.subr.bf16.mxu0 %v14136_v60  ;;  %v14224_v59 = vld [vmem:[%s18407_s3 + $0x40] ss:$16 sps:$4 sm:$0xff]   ;;  %v14227_v60 = vld [vmem:[%s18407_s3 + $0x48] ss:$16 sps:$4 sm:$0xff]  }
  0x99   :  { %1660 = vmatprep.subr.bf16.mxu1 %v14139_v61  ;;  %v14232_v61 = vld [vmem:[%s18407_s3 + $0x64] ss:$16 sps:$4 sm:$0xff]  }
  0x9b   :  { %1620 = vmatpush1.bf16.msra.mxu0 %v14134_v62  ;;  %v14235_v62 = vld [vmem:[%s18407_s3 + $0x6c] ss:$16 sps:$4 sm:$0xff]  }
  0x9c   :  { %1661 = vmatpush1.bf16.msra.mxu1 %v14137_v63  ;;  %1621 = vmatprep.subr.bf16.mxu0 %v14142_v0  ;;  %v14230_v63 = vld [vmem:[%s18407_s3 + $0x60] ss:$16 sps:$4 sm:$0xff]   ;;  %v14233_v0 = vld [vmem:[%s18407_s3 + $0x68] ss:$16 sps:$4 sm:$0xff]  }
  0x9d   :  { %1662 = vmatprep.subr.bf16.mxu1 %v14145_v1  ;;  %v14238_v1 = vld [vmem:[%s18407_s3 + $0x84] ss:$16 sps:$4 sm:$0xff]  }
  0x9f   :  { %1622 = vmatpush1.bf16.msra.mxu0 %v14140_v3  ;;  %v14241_v3 = vld [vmem:[%s18407_s3 + $0x8c] ss:$16 sps:$4 sm:$0xff]  }
  0xa0   :  { %1663 = vmatpush1.bf16.msra.mxu1 %v14143_v4  ;;  %1623 = vmatprep.subr.bf16.mxu0 %v14148_v5  ;;  %v14236_v4 = vld [vmem:[%s18407_s3 + $0x80] ss:$16 sps:$4 sm:$0xff]   ;;  %v14239_v5 = vld [vmem:[%s18407_s3 + $0x88] ss:$16 sps:$4 sm:$0xff]  }
  0xa1   :  { %1664 = vmatprep.subr.bf16.mxu1 %v14151_v6  ;;  %v14244_v6 = vld [vmem:[%s18407_s3 + $0xa4] ss:$16 sps:$4 sm:$0xff]  }
  0xa3   :  { %1624 = vmatpush1.bf16.msra.mxu0 %v14146_v7  ;;  %v14247_v7 = vld [vmem:[%s18407_s3 + $0xac] ss:$16 sps:$4 sm:$0xff]  }
  0xa4   :  { %1665 = vmatpush1.bf16.msra.mxu1 %v14149_v8  ;;  %1625 = vmatprep.subr.bf16.mxu0 %v14154_v9  ;;  %v14242_v8 = vld [vmem:[%s18407_s3 + $0xa0] ss:$16 sps:$4 sm:$0xff]   ;;  %v14245_v9 = vld [vmem:[%s18407_s3 + $0xa8] ss:$16 sps:$4 sm:$0xff]  }
  0xa5   :  { %1666 = vmatprep.subr.bf16.mxu1 %v14157_v10  ;;  %v14250_v10 = vld [vmem:[%s18407_s3 + $0xc4] ss:$16 sps:$4 sm:$0xff]  }
  0xa7   :  { %1626 = vmatpush1.bf16.msra.mxu0 %v14152_v11  ;;  %v14253_v11 = vld [vmem:[%s18407_s3 + $0xcc] ss:$16 sps:$4 sm:$0xff]  }
  0xa8   :  { %1667 = vmatpush1.bf16.msra.mxu1 %v14155_v12  ;;  %1627 = vmatprep.subr.bf16.mxu0 %v14160_v13  ;;  %v14248_v12 = vld [vmem:[%s18407_s3 + $0xc0] ss:$16 sps:$4 sm:$0xff]   ;;  %v14251_v13 = vld [vmem:[%s18407_s3 + $0xc8] ss:$16 sps:$4 sm:$0xff]  }
  0xa9   :  { %1668 = vmatprep.subr.bf16.mxu1 %v14163_v14  ;;  %v14256_v14 = vld [vmem:[%s18407_s3 + $0xe4] ss:$16 sps:$4 sm:$0xff]  }
  0xab   :  { %1628 = vmatpush1.bf16.msra.mxu0 %v14158_v15  ;;  %v14259_v15 = vld [vmem:[%s18407_s3 + $0xec] ss:$16 sps:$4 sm:$0xff]  }
  0xac   :  { %1669 = vmatpush1.bf16.msra.mxu1 %v14161_v16  ;;  %1629 = vmatprep.subr.bf16.mxu0 %v14166_v17  ;;  %v14254_v16 = vld [vmem:[%s18407_s3 + $0xe0] ss:$16 sps:$4 sm:$0xff]   ;;  %v14257_v17 = vld [vmem:[%s18407_s3 + $0xe8] ss:$16 sps:$4 sm:$0xff]  }
  0xad   :  { %1670 = vmatprep.subr.bf16.mxu1 %v14169_v18  ;;  %v14262_v18 = vld [vmem:[#allocation5 + $0x4] ss:$16 sps:$4 sm:$0xff]  }
  0xaf   :  { %1630 = vmatpush1.bf16.msra.mxu0 %v14164_v19  ;;  %v14265_v19 = vld [vmem:[#allocation5 + $0xc] ss:$16 sps:$4 sm:$0xff]  }
  0xb0   :  { %1671 = vmatpush1.bf16.msra.mxu1 %v14167_v20  ;;  %1631 = vmatprep.subr.bf16.mxu0 %v14172_v21  ;;  %v18416_v20 = vlaneseq }
  0xb1   :  { %1672 = vmatprep.subr.bf16.mxu1 %v14175_v22 }
  0xb2   :  { %v16670_v21 = vshrl.u32 %v18416_v20, 7  ;;  %v14316_v20 = vld [vmem:[#allocation5 + $0x124] ss:$16 sps:$4 sm:$0xff]  }
  0xb3   :  { %1632 = vmatpush1.bf16.msra.mxu0 %v14170_v23 }
  0xb4   :  { %1673 = vmatpush1.bf16.msra.mxu1 %v14173_v24  ;;  %1633 = vmatprep.subr.bf16.mxu0 %v14178_v25  ;;  %18512 = vst [vmem:[#allocation11_spill] sm:$0xff] %v16670_v21  ;;  %v16673_v22 = vsub.s32 0, %v16670_v21  ;;  %v16676_v23 = vsub.s32 2, %v16670_v21  ;;  %v79_v24 = vld [vmem:[%s18408_s4] sm:$0xf] }
  0xb5   :  { %1674 = vmatprep.subr.bf16.mxu1 %v14181_v26  ;;  %v16684_v26 = vsub.s32 1, %v16670_v21 }
  0xb7   :  { %1634 = vmatpush1.bf16.msra.mxu0 %v14176_v27 }
  0xb8   :  { %1675 = vmatpush1.bf16.msra.mxu1 %v14179_v28  ;;  %1635 = vmatprep.subr.bf16.mxu0 %v14184_v29  ;;  %v16689_v28 = vsub.s32 3, %v16670_v21 }
  0xb9   :  { %1676 = vmatprep.subr.bf16.mxu1 %v14187_v30 }
  0xbb   :  { %1636 = vmatpush1.bf16.msra.mxu0 %v14182_v31  ;;  %v84_v31 = vrot.slane %v79_v24, %v16673_v22 }
  0xbc   :  { %1677 = vmatpush1.bf16.msra.mxu1 %v14185_v32  ;;  %1637 = vmatprep.subr.bf16.mxu0 %v14190_v33  ;;  %v92_v32 = vrot.slane %v79_v24, %v16676_v23  ;;  %v88_v33 = vrot.slane %v79_v24, %v16684_v26 }
  0xbd   :  { %1678 = vmatprep.subr.bf16.mxu1 %v14193_v34 }
  0xbf   :  { %1638 = vmatpush1.bf16.msra.mxu0 %v14188_v35  ;;  %v96_v35 = vrot.slane %v79_v24, %v16689_v28 }
  0xc0   :  { %1679 = vmatpush1.bf16.msra.mxu1 %v14191_v36  ;;  %1639 = vmatprep.subr.bf16.mxu0 %v14196_v37 }
  0xc1   :  { %1680 = vmatprep.subr.bf16.mxu1 %v14199_v38 }
  0xc3   :  { %1640 = vmatpush1.bf16.msra.mxu0 %v14194_v39 }
  0xc4   :  { %1681 = vmatpush1.bf16.msra.mxu1 %v14197_v40  ;;  %1641 = vmatprep.subr.bf16.mxu0 %v14202_v41 }
  0xc5   :  { %1682 = vmatprep.subr.bf16.mxu1 %v14205_v42 }
  0xc7   :  { %1642 = vmatpush1.bf16.msra.mxu0 %v14200_v43 }
  0xc8   :  { %1683 = vmatpush1.bf16.msra.mxu1 %v14203_v44  ;;  %1643 = vmatprep.subr.bf16.mxu0 %v14208_v45 }
  0xc9   :  { %1684 = vmatprep.subr.bf16.mxu1 %v14211_v46 }
  0xcb   :  { %1644 = vmatpush1.bf16.msra.mxu0 %v14206_v47 }
  0xcc   :  { %1685 = vmatpush1.bf16.msra.mxu1 %v14209_v48  ;;  %1918 = vmatprep.subr.bf16.mxu0 %v14214_v49 }
  0xcd   :  { %1959 = vmatprep.subr.bf16.mxu1 %v14217_v50 }
  0xce   :  { %1646 = vmatmul.mubr.bf16.vlgmr.msra.gmra.mrb[24].mxu0 %v18417_v2 }
  0xcf   :  { %1687 = vmatmul.mubr.bf16.vlgmr.msra.gmra.mrb[24].mxu1 %v18417_v2  ;;  %1919 = vmatpush1.bf16.msra.mxu0 %v14212_v51 }
  0xd0   :  { %1960 = vmatpush1.bf16.msra.mxu1 %v14215_v52  ;;  %1920 = vmatprep.subr.bf16.mxu0 %v14220_v53 }
  0xd1   :  { %1961 = vmatprep.subr.bf16.mxu1 %v14223_v54  ;;  %1950 = vmatprep.mubr.bf16.mxu0 %v18417_v2 }
  0xd2   :  { %1991 = vmatprep.mubr.bf16.mxu1 %v18417_v2 }
  0xd3   :  { %1921 = vmatpush1.bf16.msra.mxu0 %v14218_v55 }
  0xd4   :  { %1962 = vmatpush1.bf16.msra.mxu1 %v14221_v56  ;;  %1922 = vmatprep.subr.bf16.mxu0 %v14226_v57 }
  0xd5   :  { %1963 = vmatprep.subr.bf16.mxu1 %v14229_v58 }
  0xd7   :  { %1923 = vmatpush1.bf16.msra.mxu0 %v14224_v59 }
  0xd8   :  { %1964 = vmatpush1.bf16.msra.mxu1 %v14227_v60  ;;  %1924 = vmatprep.subr.bf16.mxu0 %v14232_v61 }
  0xd9   :  { %1965 = vmatprep.subr.bf16.mxu1 %v14235_v62 }
  0xdb   :  { %1925 = vmatpush1.bf16.msra.mxu0 %v14230_v63 }
  0xdc   :  { %1966 = vmatpush1.bf16.msra.mxu1 %v14233_v0  ;;  %1926 = vmatprep.subr.bf16.mxu0 %v14238_v1 }
  0xdd   :  { %1967 = vmatprep.subr.bf16.mxu1 %v14241_v3 }
  0xdf   :  { %1927 = vmatpush1.bf16.msra.mxu0 %v14236_v4 }
  0xe0   :  { %1968 = vmatpush1.bf16.msra.mxu1 %v14239_v5  ;;  %1928 = vmatprep.subr.bf16.mxu0 %v14244_v6 }
  0xe1   :  { %1969 = vmatprep.subr.bf16.mxu1 %v14247_v7 }
  0xe3   :  { %1929 = vmatpush1.bf16.msra.mxu0 %v14242_v8 }
  0xe4   :  { %1970 = vmatpush1.bf16.msra.mxu1 %v14245_v9  ;;  %1930 = vmatprep.subr.bf16.mxu0 %v14250_v10 }
  0xe5   :  { %1971 = vmatprep.subr.bf16.mxu1 %v14253_v11 }
  0xe7   :  { %1931 = vmatpush1.bf16.msra.mxu0 %v14248_v12 }
  0xe8   :  { %1972 = vmatpush1.bf16.msra.mxu1 %v14251_v13  ;;  %1932 = vmatprep.subr.bf16.mxu0 %v14256_v14 }
  0xe9   :  { %1973 = vmatprep.subr.bf16.mxu1 %v14259_v15 }
  0xeb   :  { %1933 = vmatpush1.bf16.msra.mxu0 %v14254_v16 }
  0xec   :  { %1974 = vmatpush1.bf16.msra.mxu1 %v14257_v17  ;;  %2406 = vmatprep.subr.bf16.mxu0 %v14262_v18 }
  0xed   :  { %2447 = vmatprep.subr.bf16.mxu1 %v14265_v19 }
 0x100   :  { %v16681_v25 = vpop.f32.mrb[0].mxu0 }
 0x101   :  { %v16686_v27 = vpop.f32.mrb[0].mxu1  ;;  %v16691_v29 = vpop.f32.mrb[1].mxu0 }
 0x102   :  { %v16693_v30 = vpop.f32.mrb[1].mxu1 }
 0x104   :  { %v211_v34 = vpop.f32.mrb[2].mxu0 }
 0x105   :  { %v324_v36 = vpop.f32.mrb[2].mxu1  ;;  %v16699_v37 = vadd.f32 %v211_v34, %v84_v31  ;;  %v213_v38 = vpop.f32.mrb[3].mxu0 }
 0x106   :  { %v16701_v39 = vadd.f32 %v324_v36, %v92_v32  ;;  %v326_v40 = vpop.f32.mrb[3].mxu1  ;;  %v16703_v41 = vadd.f32 %v213_v38, %v88_v33 }
 0x107   :  { %v16705_v42 = vadd.f32 %v326_v40, %v96_v35 }
 0x108   :  { %v217_v43 = vpop.f32.mrb[4].mxu0 }
 0x109   :  { %v330_v44 = vpop.f32.mrb[4].mxu1  ;;  %v16707_v45 = vadd.f32 %v217_v43, %v84_v31  ;;  %v219_v46 = vpop.f32.mrb[5].mxu0 }
 0x10a   :  { %v16709_v47 = vadd.f32 %v330_v44, %v92_v32  ;;  %v332_v48 = vpop.f32.mrb[5].mxu1  ;;  %v16711_v49 = vadd.f32 %v219_v46, %v88_v33 }
 0x10b   :  { %v16713_v50 = vadd.f32 %v332_v48, %v96_v35  ;;  %v206_v48 = vadd.f32 %v16681_v25, %v84_v31 }
 0x10c   :  { %v223_v51 = vpop.f32.mrb[6].mxu0 }
 0x10d   :  { %v336_v52 = vpop.f32.mrb[6].mxu1  ;;  %v16715_v53 = vadd.f32 %v223_v51, %v84_v31  ;;  %v225_v54 = vpop.f32.mrb[7].mxu0  ;;  %v319_v51 = vadd.f32 %v16686_v27, %v92_v32 }
 0x10e   :  { %v16717_v55 = vadd.f32 %v336_v52, %v92_v32  ;;  %v338_v56 = vpop.f32.mrb[7].mxu1  ;;  %v16719_v57 = vadd.f32 %v225_v54, %v88_v33  ;;  %v208_v52 = vadd.f32 %v16691_v29, %v88_v33  ;;  %v321_v54 = vadd.f32 %v16693_v30, %v96_v35 }
 0x10f   :  { %v16721_v58 = vadd.f32 %v338_v56, %v96_v35 }
 0x110   :  { %v229_v59 = vpop.f32.mrb[8].mxu0 }
 0x111   :  { %v342_v60 = vpop.f32.mrb[8].mxu1  ;;  %v16723_v61 = vadd.f32 %v229_v59, %v84_v31  ;;  %v231_v62 = vpop.f32.mrb[9].mxu0 }
 0x112   :  { %v16725_v63 = vadd.f32 %v342_v60, %v92_v32  ;;  %v344_v0 = vpop.f32.mrb[9].mxu1  ;;  %v16727_v1 = vadd.f32 %v231_v62, %v88_v33 }
 0x113   :  { %v16729_v3 = vadd.f32 %v344_v0, %v96_v35 }
 0x114   :  { %v235_v4 = vpop.f32.mrb[10].mxu0 }
 0x115   :  { %v348_v5 = vpop.f32.mrb[10].mxu1  ;;  %v16731_v6 = vadd.f32 %v235_v4, %v84_v31  ;;  %v237_v7 = vpop.f32.mrb[11].mxu0 }
 0x116   :  { %v16733_v8 = vadd.f32 %v348_v5, %v92_v32  ;;  %v350_v9 = vpop.f32.mrb[11].mxu1  ;;  %v16735_v10 = vadd.f32 %v237_v7, %v88_v33 }
 0x117   :  { %v16737_v11 = vadd.f32 %v350_v9, %v96_v35 }
 0x118   :  { %v241_v12 = vpop.f32.mrb[12].mxu0 }
 0x119   :  { %v354_v13 = vpop.f32.mrb[12].mxu1  ;;  %v16739_v14 = vadd.f32 %v241_v12, %v84_v31  ;;  %v243_v15 = vpop.f32.mrb[13].mxu0 }
 0x11a   :  { %v16741_v16 = vadd.f32 %v354_v13, %v92_v32  ;;  %v356_v17 = vpop.f32.mrb[13].mxu1  ;;  %v16743_v18 = vadd.f32 %v243_v15, %v88_v33 }
 0x11b   :  { %v16745_v19 = vadd.f32 %v356_v17, %v96_v35 }
 0x11c   :  { %v247_v24 = vpop.f32.mrb[14].mxu0 }
 0x11d   :  { %v360_v34 = vpop.f32.mrb[14].mxu1  ;;  %v16747_v36 = vadd.f32 %v247_v24, %v84_v31  ;;  %v249_v38 = vpop.f32.mrb[15].mxu0 }
 0x11e   :  { %v16749_v40 = vadd.f32 %v360_v34, %v92_v32  ;;  %v362_v43 = vpop.f32.mrb[15].mxu1  ;;  %v16751_v44 = vadd.f32 %v249_v38, %v88_v33 }
 0x11f   :  { %18513 = vst [vmem:[#allocation12_spill] sm:$0xff] %v16747_v36  ;;  %v16753_v46 = vadd.f32 %v362_v43, %v96_v35  ;;  %v17916_v36 = vld [vmem:[#allocation5 + $0x18c] ss:$16 sps:$4 sm:$0xff]  }
 0x120   :  { %18514 = vst [vmem:[#allocation13_spill] sm:$0xff] %v16749_v40  ;;  %18515 = vst [vmem:[#allocation14_spill] sm:$0xff] %v16751_v44  ;;  %v17914_v40 = vld [vmem:[#allocation5 + $0x184] ss:$16 sps:$4 sm:$0xff]  }
 0x121   :  { %18516 = vst [vmem:[#allocation15_spill] sm:$0xff] %v16753_v46  ;;  %v671_v56 = vpop.f32.mrb[16].mxu0  ;;  %18543 = vst [vmem:[#allocation40_spill] sm:$0xff] %v17914_v40 }
 0x122   :  { %v712_v59 = vpop.f32.mrb[16].mxu1  ;;  %v719_v60 = vadd.f32 %v671_v56, %v206_v48  ;;  %v673_v0 = vpop.f32.mrb[17].mxu0  ;;  %v14260_v56 = vld [vmem:[#allocation5] ss:$16 sps:$4 sm:$0xff]   ;;  %18544 = vst [vmem:[#allocation41_spill] sm:$0xff] %v17916_v36 }
 0x123   :  { %v721_v62 = vadd.f32 %v712_v59, %v319_v51  ;;  %v714_v4 = vpop.f32.mrb[17].mxu1  ;;  %v720_v5 = vadd.f32 %v673_v0, %v208_v52  ;;  %v675_v9 = vpop.f32.mrb[18].mxu0  ;;  %v14263_v59 = vld [vmem:[#allocation5 + $0x8] ss:$16 sps:$4 sm:$0xff]   ;;  %v14271_v0 = vld [vmem:[#allocation5 + $0x2c] ss:$16 sps:$4 sm:$0xff]  }
 0x124   :  { %v722_v7 = vadd.f32 %v714_v4, %v321_v54  ;;  %v716_v12 = vpop.f32.mrb[18].mxu1  ;;  %v723_v13 = vmul.f32 0.5, %v719_v60  ;;  %v676_v15 = vpop.f32.mrb[19].mxu0  ;;  %v14274_v9 = vld [vmem:[#allocation5 + $0x44] ss:$16 sps:$4 sm:$0xff]  }
 0x125   :  { %v717_v17 = vpop.f32.mrb[19].mxu1  ;;  %v724_v25 = vmul.f32 0.5, %v720_v5  ;;  %v725_v27 = vmul.f32 0.5, %v721_v62  ;;  %v14268_v62 = vld [vmem:[#allocation5 + $0x24] ss:$16 sps:$4 sm:$0xff]  }
 0x126   :  { %15988 = vtanh.f32 %v723_v13  ;;  %v14266_v5 = vld [vmem:[#allocation5 + $0x20] ss:$16 sps:$4 sm:$0xff]   ;;  %v14277_v12 = vld [vmem:[#allocation5 + $0x4c] ss:$16 sps:$4 sm:$0xff]   ;;  %v14275_v15 = vld [vmem:[#allocation5 + $0x48] ss:$16 sps:$4 sm:$0xff]  }
 0x127   :  { %15990 = vtanh.f32 %v724_v25  ;;  %v14272_v13 = vld [vmem:[#allocation5 + $0x40] ss:$16 sps:$4 sm:$0xff]   ;;  %v14280_v17 = vld [vmem:[#allocation5 + $0x64] ss:$16 sps:$4 sm:$0xff]   ;;  %v14283_v25 = vld [vmem:[#allocation5 + $0x6c] ss:$16 sps:$4 sm:$0xff]  }
 0x128   :  { %15992 = vtanh.f32 %v722_v7  ;;  %v14269_v7 = vld [vmem:[#allocation5 + $0x28] ss:$16 sps:$4 sm:$0xff]  }
 0x129   :  { %15994 = vtanh.f32 %v725_v27  ;;  %v14278_v27 = vld [vmem:[#allocation5 + $0x60] ss:$16 sps:$4 sm:$0xff]  }
 0x130   :  { %v15989_v29 = vpop.eup %15988 }
 0x131   :  { %v729_v30 = vmul.f32 0.5, %v15989_v29  ;;  %v15991_v31 = vpop.eup %15990  ;;  %v14281_v29 = vld [vmem:[#allocation5 + $0x68] ss:$16 sps:$4 sm:$0xff]  }
 0x132   :  { %v730_v33 = vmul.f32 0.5, %v15991_v31  ;;  %v15993_v35 = vpop.eup %15992  ;;  %v14289_v31 = vld [vmem:[#allocation5 + $0x8c] ss:$16 sps:$4 sm:$0xff]  }
 0x133   :  { %v732_v32 = vadd.f32 0.5, %v729_v30  ;;  %v15995_v48 = vpop.eup %15994  ;;  %v14286_v30 = vld [vmem:[#allocation5 + $0x84] ss:$16 sps:$4 sm:$0xff]  }
 0x134   :  { %v733_v24 = vadd.f32 0.5, %v730_v33  ;;  %v731_v51 = vmul.f32 0.5, %v15995_v48  ;;  %v14287_v33 = vld [vmem:[#allocation5 + $0x88] ss:$16 sps:$4 sm:$0xff]   ;;  %v397_v48 = vld [vmem:[%s18410_s6] sm:$0xf] }
 0x135   :  { %v737_v34 = vmul.f32 %v15993_v35, %v732_v32  ;;  %v14284_v32 = vld [vmem:[#allocation5 + $0x80] ss:$16 sps:$4 sm:$0xff]   ;;  %v14292_v35 = vld [vmem:[#allocation5 + $0xa4] ss:$16 sps:$4 sm:$0xff]  }
 0x136   :  { %v736_v38 = vmul.f32 0.0, %v733_v24  ;;  %v734_v52 = vadd.f32 0.5, %v731_v51  ;;  %v14295_v24 = vld [vmem:[#allocation5 + $0xac] ss:$16 sps:$4 sm:$0xff]   ;;  %v14298_v51 = vld [vmem:[#allocation5 + $0xc4] ss:$16 sps:$4 sm:$0xff]  }
 0x138   :  { %v16759_v43 = vadd.f32 %v737_v34, %v736_v38  ;;  %v14290_v34 = vld [vmem:[#allocation5 + $0xa0] ss:$16 sps:$4 sm:$0xff]   ;;  %v14293_v38 = vld [vmem:[#allocation5 + $0xa8] ss:$16 sps:$4 sm:$0xff]  }
 0x13a   :  { %15996 = vtanh.f32 %v16759_v43 }
 0x144   :  { %v15997_v54 = vpop.eup %15996 }
 0x145   :  { %v740_v60 = vmul.f32 %v15997_v54, %v734_v52  ;;  %v14301_v52 = vld [vmem:[#allocation5 + $0xcc] ss:$16 sps:$4 sm:$0xff]   ;;  %v14296_v54 = vld [vmem:[#allocation5 + $0xc0] ss:$16 sps:$4 sm:$0xff]  }
 0x147   :  { %v16762_v4 = vpack.c.bf16 %v740_v60, %v740_v60  ;;  %v14304_v60 = vld [vmem:[#allocation5 + $0xe4] ss:$16 sps:$4 sm:$0xff]  }
 0x149   :  { %1951 = vmatmul.mubr.bf16.vlgmr.msra.gmra.mrb[28].mxu0 %v16762_v4  ;;  %1992 = vmatmul.mubr.bf16.vlgmr.msra.gmra.mrb[28].mxu1 %v16762_v4 }
 0x14a   :  { %2407 = vmatpush1.bf16.msra.mxu0 %v14260_v56  ;;  %2448 = vmatpush1.bf16.msra.mxu1 %v14263_v59  ;;  %v14299_v56 = vld [vmem:[#allocation5 + $0xc8] ss:$16 sps:$4 sm:$0xff]   ;;  %v16770_v59 = vrot.slane %v397_v48, %v16673_v22 }
 0x14b   :  { %2408 = vmatprep.subr.bf16.mxu0 %v14268_v62  ;;  %2449 = vmatprep.subr.bf16.mxu1 %v14271_v0  ;;  %v14307_v62 = vld [vmem:[#allocation5 + $0xec] ss:$16 sps:$4 sm:$0xff]   ;;  %v16773_v0 = vrot.slane %v397_v48, %v16684_v26 }
 0x14c   :  { %18517 = vst [vmem:[#allocation16_spill] sm:$0xff] %v16770_v59 }
 0x14d   :  { %18518 = vst [vmem:[#allocation17_spill] sm:$0xff] %v16773_v0 }
 0x14e   :  { %2409 = vmatpush1.bf16.msra.mxu0 %v14266_v5  ;;  %2450 = vmatpush1.bf16.msra.mxu1 %v14269_v7  ;;  %v16776_v5 = vrot.slane %v397_v48, %v16689_v28 }
 0x14f   :  { %2410 = vmatprep.subr.bf16.mxu0 %v14274_v9  ;;  %2451 = vmatprep.subr.bf16.mxu1 %v14277_v12  ;;  %v14302_v12 = vld [vmem:[#allocation5 + $0xe0] ss:$16 sps:$4 sm:$0xff]  }
 0x150   :  { %18519 = vst [vmem:[#allocation18_spill] sm:$0xff] %v16776_v5 }
 0x152   :  { %2411 = vmatpush1.bf16.msra.mxu0 %v14272_v13  ;;  %2452 = vmatpush1.bf16.msra.mxu1 %v14275_v15  ;;  %v14305_v13 = vld [vmem:[#allocation5 + $0xe8] ss:$16 sps:$4 sm:$0xff]  }
 0x153   :  { %2412 = vmatprep.subr.bf16.mxu0 %v14280_v17  ;;  %2453 = vmatprep.subr.bf16.mxu1 %v14283_v25 }
 0x156   :  { %2413 = vmatpush1.bf16.msra.mxu0 %v14278_v27  ;;  %2454 = vmatpush1.bf16.msra.mxu1 %v14281_v29  ;;  %v14310_v27 = vld [vmem:[#allocation5 + $0x104] ss:$16 sps:$4 sm:$0xff]   ;;  %v14313_v29 = vld [vmem:[#allocation5 + $0x10c] ss:$16 sps:$4 sm:$0xff]  }
 0x157   :  { %2414 = vmatprep.subr.bf16.mxu0 %v14286_v30  ;;  %2455 = vmatprep.subr.bf16.mxu1 %v14289_v31 }
 0x15a   :  { %2415 = vmatpush1.bf16.msra.mxu0 %v14284_v32  ;;  %2456 = vmatpush1.bf16.msra.mxu1 %v14287_v33 }
 0x15b   :  { %2416 = vmatprep.subr.bf16.mxu0 %v14292_v35  ;;  %2457 = vmatprep.subr.bf16.mxu1 %v14295_v24 }
 0x15e   :  { %2417 = vmatpush1.bf16.msra.mxu0 %v14290_v34  ;;  %2458 = vmatpush1.bf16.msra.mxu1 %v14293_v38 }
 0x15f   :  { %2418 = vmatprep.subr.bf16.mxu0 %v14298_v51  ;;  %2459 = vmatprep.subr.bf16.mxu1 %v14301_v52  ;;  %v14308_v51 = vld [vmem:[#allocation5 + $0x100] ss:$16 sps:$4 sm:$0xff]   ;;  %v14311_v52 = vld [vmem:[#allocation5 + $0x108] ss:$16 sps:$4 sm:$0xff]  }
 0x161   :  { %v1159_v7 = vpop.f32.mrb[20].mxu0 }
 0x162   :  { %v1200_v9 = vpop.f32.mrb[20].mxu1  ;;  %v1160_v15 = vadd.f32 %v1159_v7, %v16770_v59  ;;  %v1161_v17 = vpop.f32.mrb[21].mxu0  ;;  %2419 = vmatpush1.bf16.msra.mxu0 %v14296_v54  ;;  %2460 = vmatpush1.bf16.msra.mxu1 %v14299_v56  ;;  %v16782_v7 = vrot.slane %v397_v48, %v16676_v23  ;;  %v14314_v54 = vld [vmem:[#allocation5 + $0x120] ss:$16 sps:$4 sm:$0xff]   ;;  %v14317_v56 = vld [vmem:[#allocation5 + $0x128] ss:$16 sps:$4 sm:$0xff]  }
 0x163   :  { %v1202_v25 = vpop.f32.mrb[21].mxu1  ;;  %v1162_v30 = vadd.f32 %v1161_v17, %v16773_v0  ;;  %v1163_v31 = vpop.f32.mrb[22].mxu0  ;;  %2420 = vmatprep.subr.bf16.mxu0 %v14304_v60  ;;  %2461 = vmatprep.subr.bf16.mxu1 %v14307_v62  ;;  %v14319_v17 = vld [vmem:[#allocation5 + $0x12c] ss:$16 sps:$4 sm:$0xff]   ;;  %v14322_v62 = vld [vmem:[#allocation5 + $0x144] ss:$16 sps:$4 sm:$0xff]  }
 0x164   :  { %v1204_v32 = vpop.f32.mrb[22].mxu1  ;;  %v1207_v33 = vmul.f32 0.5, %v1160_v15  ;;  %v1164_v35 = vpop.f32.mrb[23].mxu0  ;;  %v1203_v24 = vadd.f32 %v1202_v25, %v16776_v5  ;;  %18520 = vst [vmem:[#allocation19_spill] sm:$0xff] %v16782_v7  ;;  %v1201_v60 = vadd.f32 %v1200_v9, %v16782_v7  ;;  %v14325_v15 = vld [vmem:[#allocation5 + $0x14c] ss:$16 sps:$4 sm:$0xff]  }
 0x165   :  { %v1205_v34 = vpop.f32.mrb[23].mxu1  ;;  %v1208_v38 = vmul.f32 0.5, %v1162_v30  ;;  %v14320_v48 = vld [vmem:[#allocation5 + $0x140] ss:$16 sps:$4 sm:$0xff]   ;;  %v14323_v25 = vld [vmem:[#allocation5 + $0x148] ss:$16 sps:$4 sm:$0xff]  }
 0x166   :  { %15998 = vtanh.f32 %v1207_v33  ;;  %2421 = vmatpush1.bf16.msra.mxu0 %v14302_v12  ;;  %2462 = vmatpush1.bf16.msra.mxu1 %v14305_v13  ;;  %v1209_v30 = vmul.f32 0.5, %v1201_v60  ;;  %v14328_v31 = vld [vmem:[#allocation5 + $0x164] ss:$16 sps:$4 sm:$0xff]   ;;  %v14331_v32 = vld [vmem:[#allocation5 + $0x16c] ss:$16 sps:$4 sm:$0xff]  }
 0x167   :  { %16000 = vtanh.f32 %v1208_v38  ;;  %2422 = vmatprep.subr.bf16.mxu0 %v14310_v27  ;;  %2463 = vmatprep.subr.bf16.mxu1 %v14313_v29  ;;  %v14326_v29 = vld [vmem:[#allocation5 + $0x160] ss:$16 sps:$4 sm:$0xff]   ;;  %v14329_v9 = vld [vmem:[#allocation5 + $0x168] ss:$16 sps:$4 sm:$0xff]   ;;  %v14343_v60 = vld [vmem:[#allocation5 + $0x1ac] ss:$16 sps:$4 sm:$0xff]  }
 0x168   :  { %16002 = vtanh.f32 %v1203_v24  ;;  %v14334_v24 = vld [vmem:[#allocation5 + $0x184] ss:$16 sps:$4 sm:$0xff]  }
 0x169   :  { %16004 = vtanh.f32 %v1209_v30  ;;  %v14341_v30 = vld [vmem:[#allocation5 + $0x1a8] ss:$16 sps:$4 sm:$0xff]  }
 0x16a   :  { %2423 = vmatpush1.bf16.msra.mxu0 %v14308_v51  ;;  %2464 = vmatpush1.bf16.msra.mxu1 %v14311_v52  ;;  %v14332_v52 = vld [vmem:[#allocation5 + $0x180] ss:$16 sps:$4 sm:$0xff]  }
 0x16b   :  { %2424 = vmatprep.subr.bf16.mxu0 %v14316_v20  ;;  %2465 = vmatprep.subr.bf16.mxu1 %v14319_v17  ;;  %v14337_v20 = vld [vmem:[#allocation5 + $0x18c] ss:$16 sps:$4 sm:$0xff]   ;;  %v14335_v17 = vld [vmem:[#allocation5 + $0x188] ss:$16 sps:$4 sm:$0xff]  }
 0x16e   :  { %2425 = vmatpush1.bf16.msra.mxu0 %v14314_v54  ;;  %2466 = vmatpush1.bf16.msra.mxu1 %v14317_v56  ;;  %v14340_v56 = vld [vmem:[#allocation5 + $0x1a4] ss:$16 sps:$4 sm:$0xff]  }
 0x16f   :  { %2426 = vmatprep.subr.bf16.mxu0 %v14322_v62  ;;  %2467 = vmatprep.subr.bf16.mxu1 %v14325_v15  ;;  %v14338_v15 = vld [vmem:[#allocation5 + $0x1a0] ss:$16 sps:$4 sm:$0xff]  }
 0x170   :  { %v15999_v12 = vpop.eup %15998 }
 0x171   :  { %v16001_v13 = vpop.eup %16000  ;;  %v1213_v27 = vmul.f32 0.5, %v15999_v12  ;;  %v14347_v12 = vld [vmem:[#allocation5 + $0x1c8] ss:$16 sps:$4 sm:$0xff]  }
 0x172   :  { %v16003_v33 = vpop.eup %16002  ;;  %v1214_v35 = vmul.f32 0.5, %v16001_v13  ;;  %2427 = vmatpush1.bf16.msra.mxu0 %v14320_v48  ;;  %2468 = vmatpush1.bf16.msra.mxu1 %v14323_v25  ;;  %v14346_v48 = vld [vmem:[#allocation5 + $0x1c4] ss:$16 sps:$4 sm:$0xff]   ;;  %v14349_v25 = vld [vmem:[#allocation5 + $0x1cc] ss:$16 sps:$4 sm:$0xff]  }
 0x173   :  { %v1216_v34 = vadd.f32 0.5, %v1213_v27  ;;  %2428 = vmatprep.subr.bf16.mxu0 %v14328_v31  ;;  %2469 = vmatprep.subr.bf16.mxu1 %v14331_v32  ;;  %v16005_v31 = vpop.eup %16004  ;;  %v14344_v32 = vld [vmem:[#allocation5 + $0x1c0] ss:$16 sps:$4 sm:$0xff]   ;;  %v14352_v13 = vld [vmem:[#allocation5 + $0x1e4] ss:$16 sps:$4 sm:$0xff]  }
 0x174   :  { %v1217_v38 = vadd.f32 0.5, %v1214_v35  ;;  %v14355_v27 = vld [vmem:[#allocation5 + $0x1ec] ss:$16 sps:$4 sm:$0xff]   ;;  %v14358_v35 = vld [vmem:[#allocation7 + $0x4] ss:$16 sps:$4 sm:$0xff]  }
 0x175   :  { %v1221_v51 = vmul.f32 %v16003_v33, %v1216_v34  ;;  %v14353_v33 = vld [vmem:[#allocation5 + $0x1e8] ss:$16 sps:$4 sm:$0xff]  }
 0x176   :  { %v1220_v54 = vmul.f32 0.0, %v1217_v38  ;;  %2429 = vmatpush1.bf16.msra.mxu0 %v14326_v29  ;;  %2470 = vmatpush1.bf16.msra.mxu1 %v14329_v9  ;;  %v1215_v29 = vmul.f32 0.5, %v16005_v31  ;;  %v14350_v9 = vld [vmem:[#allocation5 + $0x1e0] ss:$16 sps:$4 sm:$0xff]  }
 0x177   :  { %2430 = vmatprep.subr.bf16.mxu0 %v14334_v24  ;;  %2471 = vmatprep.subr.bf16.mxu1 %v14337_v20  ;;  %v14361_v24 = vld [vmem:[#allocation7 + $0xc] ss:$16 sps:$4 sm:$0xff]   ;;  %v14368_v31 = vld [vmem:[#allocation7 + $0x40] ss:$16 sps:$4 sm:$0xff]  }
 0x178   :  { %v16785_v62 = vadd.f32 %v1221_v51, %v1220_v54  ;;  %v1218_v20 = vadd.f32 0.5, %v1215_v29  ;;  %v14364_v54 = vld [vmem:[#allocation7 + $0x24] ss:$16 sps:$4 sm:$0xff]   ;;  %v14377_v29 = vld [vmem:[#allocation7 + $0x68] ss:$16 sps:$4 sm:$0xff]  }
 0x17a   :  { %16006 = vtanh.f32 %v16785_v62  ;;  %2431 = vmatpush1.bf16.msra.mxu0 %v14332_v52  ;;  %2472 = vmatpush1.bf16.msra.mxu1 %v14335_v17  ;;  %v14356_v52 = vld [vmem:[#allocation7] ss:$16 sps:$4 sm:$0xff]   ;;  %v14359_v17 = vld [vmem:[#allocation7 + $0x8] ss:$16 sps:$4 sm:$0xff]  }
 0x17b   :  { %2432 = vmatprep.subr.bf16.mxu0 %v14340_v56  ;;  %2473 = vmatprep.subr.bf16.mxu1 %v14343_v60  ;;  %v14367_v56 = vld [vmem:[#allocation7 + $0x2c] ss:$16 sps:$4 sm:$0xff]  }
 0x17e   :  { %2433 = vmatpush1.bf16.msra.mxu0 %v14338_v15  ;;  %2474 = vmatpush1.bf16.msra.mxu1 %v14341_v30  ;;  %v14362_v15 = vld [vmem:[#allocation7 + $0x20] ss:$16 sps:$4 sm:$0xff]   ;;  %v14365_v30 = vld [vmem:[#allocation7 + $0x28] ss:$16 sps:$4 sm:$0xff]  }
 0x17f   :  { %2434 = vmatprep.subr.bf16.mxu0 %v14346_v48  ;;  %2475 = vmatprep.subr.bf16.mxu1 %v14349_v25  ;;  %v14370_v48 = vld [vmem:[#allocation7 + $0x44] ss:$16 sps:$4 sm:$0xff]   ;;  %v14373_v25 = vld [vmem:[#allocation7 + $0x4c] ss:$16 sps:$4 sm:$0xff]  }
 0x182   :  { %2435 = vmatpush1.bf16.msra.mxu0 %v14344_v32  ;;  %2476 = vmatpush1.bf16.msra.mxu1 %v14347_v12  ;;  %v14371_v32 = vld [vmem:[#allocation7 + $0x48] ss:$16 sps:$4 sm:$0xff]   ;;  %v14376_v12 = vld [vmem:[#allocation7 + $0x64] ss:$16 sps:$4 sm:$0xff]  }
 0x183   :  { %2436 = vmatprep.subr.bf16.mxu0 %v14352_v13  ;;  %2477 = vmatprep.subr.bf16.mxu1 %v14355_v27  ;;  %v14379_v13 = vld [vmem:[#allocation7 + $0x6c] ss:$16 sps:$4 sm:$0xff]   ;;  %v14374_v27 = vld [vmem:[#allocation7 + $0x60] ss:$16 sps:$4 sm:$0xff]  }
 0x184   :  { %v16007_v34 = vpop.eup %16006 }
 0x185   :  { %v1224_v38 = vmul.f32 %v16007_v34, %v1218_v20  ;;  %v14391_v20 = vld [vmem:[#allocation7 + $0xac] ss:$16 sps:$4 sm:$0xff]  }
 0x186   :  { %2437 = vmatpush1.bf16.msra.mxu0 %v14350_v9  ;;  %2478 = vmatpush1.bf16.msra.mxu1 %v14353_v33  ;;  %v14382_v9 = vld [vmem:[#allocation7 + $0x84] ss:$16 sps:$4 sm:$0xff]   ;;  %v14385_v33 = vld [vmem:[#allocation7 + $0x8c] ss:$16 sps:$4 sm:$0xff]  }
 0x187   :  { %v16788_v51 = vmul.f32 0.0, %v1224_v38  ;;  %2894 = vmatprep.subr.bf16.mxu0 %v14358_v35  ;;  %2935 = vmatprep.subr.bf16.mxu1 %v14361_v24  ;;  %v14383_v35 = vld [vmem:[#allocation7 + $0x88] ss:$16 sps:$4 sm:$0xff]   ;;  %v14388_v24 = vld [vmem:[#allocation7 + $0xa4] ss:$16 sps:$4 sm:$0xff]  }
 0x188   :  { %v419_v34 = vld [vmem:[%s18412_s8] sm:$0xf] }
 0x189   :  { %v16792_v60 = vpack.c.bf16 %v16788_v51, %v16788_v51  ;;  %v14386_v38 = vld [vmem:[#allocation7 + $0xa0] ss:$16 sps:$4 sm:$0xff]  }
 0x18b   :  { %2438 = vmatprep.mubr.bf16.mxu0 %v16792_v60  ;;  %2479 = vmatprep.mubr.bf16.mxu1 %v16792_v60 }
 0x18c   :  { %2439 = vmatmul.mubr.bf16.vlgmr.msra.gmra.mrb[32].mxu0 %v16762_v4  ;;  %2480 = vmatmul.mubr.bf16.vlgmr.msra.gmra.mrb[32].mxu1 %v16762_v4  ;;  %v14380_v4 = vld [vmem:[#allocation7 + $0x80] ss:$16 sps:$4 sm:$0xff]  }
 0x18d   :  { %2895 = vmatpush1.bf16.msra.mxu0 %v14356_v52  ;;  %2936 = vmatpush1.bf16.msra.mxu1 %v14359_v17  ;;  %v14389_v52 = vld [vmem:[#allocation7 + $0xa8] ss:$16 sps:$4 sm:$0xff]   ;;  %v14394_v17 = vld [vmem:[#allocation7 + $0xc4] ss:$16 sps:$4 sm:$0xff]  }
 0x18e   :  { %2896 = vmatprep.subr.bf16.mxu0 %v14364_v54  ;;  %2937 = vmatprep.subr.bf16.mxu1 %v14367_v56  ;;  %v14397_v54 = vld [vmem:[#allocation7 + $0xcc] ss:$16 sps:$4 sm:$0xff]   ;;  %v16802_v56 = vrot.slane %v419_v34, %v16673_v22 }
 0x190   :  { %18521 = vst [vmem:[#allocation20_spill] sm:$0xff] %v16802_v56 }
 0x191   :  { %2897 = vmatpush1.bf16.msra.mxu0 %v14362_v15  ;;  %2938 = vmatpush1.bf16.msra.mxu1 %v14365_v30  ;;  %v16805_v15 = vrot.slane %v419_v34, %v16684_v26  ;;  %v14392_v30 = vld [vmem:[#allocation7 + $0xc0] ss:$16 sps:$4 sm:$0xff]  }
 0x192   :  { %2898 = vmatprep.subr.bf16.mxu0 %v14370_v48  ;;  %2939 = vmatprep.subr.bf16.mxu1 %v14373_v25  ;;  %v14395_v48 = vld [vmem:[#allocation7 + $0xc8] ss:$16 sps:$4 sm:$0xff]   ;;  %v16808_v25 = vrot.slane %v419_v34, %v16689_v28 }
 0x195   :  { %2899 = vmatpush1.bf16.msra.mxu0 %v14368_v31  ;;  %2940 = vmatpush1.bf16.msra.mxu1 %v14371_v32  ;;  %v14400_v31 = vld [vmem:[#allocation7 + $0xe4] ss:$16 sps:$4 sm:$0xff]   ;;  %v14403_v32 = vld [vmem:[#allocation7 + $0xec] ss:$16 sps:$4 sm:$0xff]  }
 0x196   :  { %2900 = vmatprep.subr.bf16.mxu0 %v14376_v12  ;;  %2941 = vmatprep.subr.bf16.mxu1 %v14379_v13 }
 0x199   :  { %2901 = vmatpush1.bf16.msra.mxu0 %v14374_v27  ;;  %2942 = vmatpush1.bf16.msra.mxu1 %v14377_v29 }
 0x19a   :  { %2902 = vmatprep.subr.bf16.mxu0 %v14382_v9  ;;  %2943 = vmatprep.subr.bf16.mxu1 %v14385_v33 }
 0x19d   :  { %2903 = vmatpush1.bf16.msra.mxu0 %v14380_v4  ;;  %2944 = vmatpush1.bf16.msra.mxu1 %v14383_v35 }
 0x19e   :  { %2904 = vmatprep.subr.bf16.mxu0 %v14388_v24  ;;  %2945 = vmatprep.subr.bf16.mxu1 %v14391_v20  ;;  %v14398_v20 = vld [vmem:[#allocation7 + $0xe0] ss:$16 sps:$4 sm:$0xff]  }
 0x1a1   :  { %v1647_v12 = vpop.f32.mrb[24].mxu0  ;;  %2905 = vmatpush1.bf16.msra.mxu0 %v14386_v38  ;;  %2946 = vmatpush1.bf16.msra.mxu1 %v14389_v52  ;;  %v14401_v38 = vld [vmem:[#allocation7 + $0xe8] ss:$16 sps:$4 sm:$0xff]   ;;  %v14406_v52 = vld [vmem:[#allocation7 + $0x104] ss:$16 sps:$4 sm:$0xff]  }
 0x1a2   :  { %v1688_v13 = vpop.f32.mrb[24].mxu1  ;;  %v1648_v27 = vadd.f32 %v1647_v12, %v16802_v56  ;;  %v1649_v22 = vpop.f32.mrb[25].mxu0  ;;  %2906 = vmatprep.subr.bf16.mxu0 %v14394_v17  ;;  %2947 = vmatprep.subr.bf16.mxu1 %v14397_v54  ;;  %v16814_v12 = vrot.slane %v419_v34, %v16676_v23  ;;  %v14409_v17 = vld [vmem:[#allocation7 + $0x10c] ss:$16 sps:$4 sm:$0xff]   ;;  %v14404_v54 = vld [vmem:[#allocation7 + $0x100] ss:$16 sps:$4 sm:$0xff]  }
 0x1a3   :  { %v1690_v29 = vpop.f32.mrb[25].mxu1  ;;  %v1650_v26 = vadd.f32 %v1649_v22, %v16805_v15  ;;  %v1651_v9 = vpop.f32.mrb[26].mxu0  ;;  %v14412_v22 = vld [vmem:[#allocation7 + $0x124] ss:$16 sps:$4 sm:$0xff]   ;;  %v14421_v34 = vld [vmem:[#allocation7 + $0x14c] ss:$16 sps:$4 sm:$0xff]  }
 0x1a4   :  { %v1692_v33 = vpop.f32.mrb[26].mxu1  ;;  %v1695_v4 = vmul.f32 0.5, %v1648_v27  ;;  %v1652_v35 = vpop.f32.mrb[27].mxu0  ;;  %v1691_v28 = vadd.f32 %v1690_v29, %v16808_v25  ;;  %18522 = vst [vmem:[#allocation21_spill] sm:$0xff] %v16814_v12  ;;  %v14407_v27 = vld [vmem:[#allocation7 + $0x108] ss:$16 sps:$4 sm:$0xff]  }
 0x1a5   :  { %v1693_v24 = vpop.f32.mrb[27].mxu1  ;;  %v1696_v2 = vmul.f32 0.5, %v1650_v26  ;;  %2907 = vmatpush1.bf16.msra.mxu0 %v14392_v30  ;;  %2948 = vmatpush1.bf16.msra.mxu1 %v14395_v48  ;;  %v14415_v29 = vld [vmem:[#allocation7 + $0x12c] ss:$16 sps:$4 sm:$0xff]   ;;  %v1689_v30 = vadd.f32 %v1688_v13, %v16814_v12  ;;  %v14410_v48 = vld [vmem:[#allocation7 + $0x120] ss:$16 sps:$4 sm:$0xff]  }
 0x1a6   :  { %16008 = vtanh.f32 %v1695_v4  ;;  %2908 = vmatprep.subr.bf16.mxu0 %v14400_v31  ;;  %2949 = vmatprep.subr.bf16.mxu1 %v14403_v32  ;;  %v14413_v26 = vld [vmem:[#allocation7 + $0x128] ss:$16 sps:$4 sm:$0xff]   ;;  %v14418_v23 = vld [vmem:[#allocation7 + $0x144] ss:$16 sps:$4 sm:$0xff]   ;;  %v14416_v32 = vld [vmem:[#allocation7 + $0x140] ss:$16 sps:$4 sm:$0xff]  }
 0x1a7   :  { %16010 = vtanh.f32 %v1696_v2  ;;  %v1697_v31 = vmul.f32 0.5, %v1689_v30  ;;  %v14419_v9 = vld [vmem:[#allocation7 + $0x148] ss:$16 sps:$4 sm:$0xff]   ;;  %v14424_v35 = vld [vmem:[#allocation7 + $0x164] ss:$16 sps:$4 sm:$0xff]  }
 0x1a8   :  { %16012 = vtanh.f32 %v1691_v28  ;;  %v14427_v13 = vld [vmem:[#allocation7 + $0x16c] ss:$16 sps:$4 sm:$0xff]  }
 0x1a9   :  { %2909 = vmatpush1.bf16.msra.mxu0 %v14398_v20  ;;  %2950 = vmatpush1.bf16.msra.mxu1 %v14401_v38  ;;  %16014 = vtanh.f32 %v1697_v31  ;;  %v14434_v31 = vld [vmem:[#allocation7 + $0x1a0] ss:$16 sps:$4 sm:$0xff]  }
 0x1aa   :  { %2910 = vmatprep.subr.bf16.mxu0 %v14406_v52  ;;  %2951 = vmatprep.subr.bf16.mxu1 %v14409_v17  ;;  %v14422_v52 = vld [vmem:[#allocation7 + $0x160] ss:$16 sps:$4 sm:$0xff]   ;;  %v14425_v17 = vld [vmem:[#allocation7 + $0x168] ss:$16 sps:$4 sm:$0xff]  }
 0x1ad   :  { %2911 = vmatpush1.bf16.msra.mxu0 %v14404_v54  ;;  %2952 = vmatpush1.bf16.msra.mxu1 %v14407_v27  ;;  %v14430_v27 = vld [vmem:[#allocation7 + $0x184] ss:$16 sps:$4 sm:$0xff]  }
 0x1ae   :  { %2912 = vmatprep.subr.bf16.mxu0 %v14412_v22  ;;  %2953 = vmatprep.subr.bf16.mxu1 %v14415_v29  ;;  %v14433_v22 = vld [vmem:[#allocation7 + $0x18c] ss:$16 sps:$4 sm:$0xff]  }
 0x1b0   :  { %v16009_v2 = vpop.eup %16008 }
 0x1b1   :  { %v16011_v33 = vpop.eup %16010  ;;  %v1701_v4 = vmul.f32 0.5, %v16009_v2  ;;  %2913 = vmatpush1.bf16.msra.mxu0 %v14410_v48  ;;  %2954 = vmatpush1.bf16.msra.mxu1 %v14413_v26  ;;  %v14428_v48 = vld [vmem:[#allocation7 + $0x180] ss:$16 sps:$4 sm:$0xff]   ;;  %v14431_v26 = vld [vmem:[#allocation7 + $0x188] ss:$16 sps:$4 sm:$0xff]  }
 0x1b2   :  { %v16013_v28 = vpop.eup %16012  ;;  %v1702_v24 = vmul.f32 0.5, %v16011_v33  ;;  %2914 = vmatprep.subr.bf16.mxu0 %v14418_v23  ;;  %2955 = vmatprep.subr.bf16.mxu1 %v14421_v34  ;;  %v14436_v23 = vld [vmem:[#allocation7 + $0x1a4] ss:$16 sps:$4 sm:$0xff]   ;;  %v14439_v34 = vld [vmem:[#allocation7 + $0x1ac] ss:$16 sps:$4 sm:$0xff]  }
 0x1b3   :  { %v1704_v20 = vadd.f32 0.5, %v1701_v4  ;;  %v14437_v2 = vld [vmem:[#allocation7 + $0x1a8] ss:$16 sps:$4 sm:$0xff]   ;;  %v14445_v33 = vld [vmem:[#allocation7 + $0x1cc] ss:$16 sps:$4 sm:$0xff]  }
 0x1b4   :  { %v1705_v38 = vadd.f32 0.5, %v1702_v24  ;;  %v14451_v24 = vld [vmem:[#allocation7 + $0x1ec] ss:$16 sps:$4 sm:$0xff]  }
 0x1b5   :  { %v1709_v54 = vmul.f32 %v16013_v28, %v1704_v20  ;;  %2915 = vmatpush1.bf16.msra.mxu0 %v14416_v32  ;;  %2956 = vmatpush1.bf16.msra.mxu1 %v14419_v9  ;;  %v16015_v32 = vpop.eup %16014  ;;  %v14442_v9 = vld [vmem:[#allocation7 + $0x1c4] ss:$16 sps:$4 sm:$0xff]  }
 0x1b6   :  { %v1708_v29 = vmul.f32 0.0, %v1705_v38  ;;  %2916 = vmatprep.subr.bf16.mxu0 %v14424_v35  ;;  %2957 = vmatprep.subr.bf16.mxu1 %v14427_v13  ;;  %v1703_v4 = vmul.f32 0.5, %v16015_v32  ;;  %v14440_v35 = vld [vmem:[#allocation7 + $0x1c0] ss:$16 sps:$4 sm:$0xff]   ;;  %v14443_v13 = vld [vmem:[#allocation7 + $0x1c8] ss:$16 sps:$4 sm:$0xff]  }
 0x1b7   :  { %v14448_v28 = vld [vmem:[#allocation7 + $0x1e4] ss:$16 sps:$4 sm:$0xff]   ;;  %v14446_v38 = vld [vmem:[#allocation7 + $0x1e0] ss:$16 sps:$4 sm:$0xff]  }
 0x1b8   :  { %v16817_v30 = vadd.f32 %v1709_v54, %v1708_v29  ;;  %v1706_v20 = vadd.f32 0.5, %v1703_v4  ;;  %v14461_v32 = vld [vmem:[%s18407_s3 + $0x28] ss:$16 sps:$4 sm:$0xff]   ;;  %v14464_v4 = vld [vmem:[%s18407_s3 + $0x40] ss:$16 sps:$4 sm:$0xff]  }
 0x1b9   :  { %2917 = vmatpush1.bf16.msra.mxu0 %v14422_v52  ;;  %2958 = vmatpush1.bf16.msra.mxu1 %v14425_v17  ;;  %v14449_v52 = vld [vmem:[#allocation7 + $0x1e8] ss:$16 sps:$4 sm:$0xff]  }
 0x1ba   :  { %16016 = vtanh.f32 %v16817_v30  ;;  %2918 = vmatprep.subr.bf16.mxu0 %v14430_v27  ;;  %2959 = vmatprep.subr.bf16.mxu1 %v14433_v22  ;;  %v14454_v27 = vld [vmem:[%s18407_s3 + $0x4] ss:$16 sps:$4 sm:$0xff]   ;;  %v14457_v22 = vld [vmem:[%s18407_s3 + $0xc] ss:$16 sps:$4 sm:$0xff]  }
 0x1bd   :  { %2919 = vmatpush1.bf16.msra.mxu0 %v14428_v48  ;;  %2960 = vmatpush1.bf16.msra.mxu1 %v14431_v26  ;;  %v14452_v48 = vld [vmem:[%s18407_s3] ss:$16 sps:$4 sm:$0xff]   ;;  %v14455_v26 = vld [vmem:[%s18407_s3 + $0x8] ss:$16 sps:$4 sm:$0xff]  }
 0x1be   :  { %2920 = vmatprep.subr.bf16.mxu0 %v14436_v23  ;;  %2961 = vmatprep.subr.bf16.mxu1 %v14439_v34  ;;  %v14460_v23 = vld [vmem:[%s18407_s3 + $0x24] ss:$16 sps:$4 sm:$0xff]   ;;  %v14463_v34 = vld [vmem:[%s18407_s3 + $0x2c] ss:$16 sps:$4 sm:$0xff]  }
 0x1c1   :  { %2921 = vmatpush1.bf16.msra.mxu0 %v14434_v31  ;;  %2962 = vmatpush1.bf16.msra.mxu1 %v14437_v2  ;;  %v14458_v2 = vld [vmem:[%s18407_s3 + $0x20] ss:$16 sps:$4 sm:$0xff]  }
 0x1c2   :  { %2922 = vmatprep.subr.bf16.mxu0 %v14442_v9  ;;  %2963 = vmatprep.subr.bf16.mxu1 %v14445_v33  ;;  %v14466_v9 = vld [vmem:[%s18407_s3 + $0x44] ss:$16 sps:$4 sm:$0xff]   ;;  %v14469_v33 = vld [vmem:[%s18407_s3 + $0x4c] ss:$16 sps:$4 sm:$0xff]  }
 0x1c4   :  { %v16017_v17 = vpop.eup %16016 }
 0x1c5   :  { %2923 = vmatpush1.bf16.msra.mxu0 %v14440_v35  ;;  %2964 = vmatpush1.bf16.msra.mxu1 %v14443_v13  ;;  %v1712_v54 = vmul.f32 %v16017_v17, %v1706_v20  ;;  %v18523_v35 = vmov 0   ;;  %v14472_v13 = vld [vmem:[%s18407_s3 + $0x64] ss:$16 sps:$4 sm:$0xff]   ;;  %v14473_v20 = vld [vmem:[%s18407_s3 + $0x68] ss:$16 sps:$4 sm:$0xff]  }
 0x1c6   :  { %2924 = vmatprep.subr.bf16.mxu0 %v14448_v28  ;;  %2965 = vmatprep.subr.bf16.mxu1 %v14451_v24  ;;  %v14475_v28 = vld [vmem:[%s18407_s3 + $0x6c] ss:$16 sps:$4 sm:$0xff]   ;;  %v14470_v24 = vld [vmem:[%s18407_s3 + $0x60] ss:$16 sps:$4 sm:$0xff]  }
 0x1c7   :  { %v16826_v29 = vmul.f32 0.0, %v1712_v54  ;;  %v14476_v17 = vld [vmem:[%s18407_s3 + $0x80] ss:$16 sps:$4 sm:$0xff]   ;;  %v14479_v54 = vld [vmem:[%s18407_s3 + $0x88] ss:$16 sps:$4 sm:$0xff]  }
 0x1c9   :  { %2925 = vmatpush1.bf16.msra.mxu0 %v14446_v38  ;;  %2966 = vmatpush1.bf16.msra.mxu1 %v14449_v52  ;;  %v1720_v31 = vpack.c.bf16 %v16826_v29, %v16826_v29  ;;  %v14478_v38 = vld [vmem:[%s18407_s3 + $0x84] ss:$16 sps:$4 sm:$0xff]   ;;  %v14481_v52 = vld [vmem:[%s18407_s3 + $0x8c] ss:$16 sps:$4 sm:$0xff]  }
 0x1ca   :  { %3201 = vmatprep.subr.bf16.mxu0 %v14454_v27  ;;  %3242 = vmatprep.subr.bf16.mxu1 %v14457_v22  ;;  %v14484_v27 = vld [vmem:[%s18407_s3 + $0xa4] ss:$16 sps:$4 sm:$0xff]   ;;  %v14487_v22 = vld [vmem:[%s18407_s3 + $0xac] ss:$16 sps:$4 sm:$0xff]  }
 0x1cb   :  { %2926 = vmatprep.mubr.bf16.mxu0 %v1720_v31  ;;  %2967 = vmatprep.mubr.bf16.mxu1 %v1720_v31  ;;  %v14488_v31 = vld [vmem:[%s18407_s3 + $0xc0] ss:$16 sps:$4 sm:$0xff]  }
 0x1cc   :  { %2927 = vmatmul.mubr.bf16.vlgmr.msra.gmra.mrb[36].mxu0 %v16792_v60  ;;  %2968 = vmatmul.mubr.bf16.vlgmr.msra.gmra.mrb[36].mxu1 %v16792_v60  ;;  %v14467_v60 = vld [vmem:[%s18407_s3 + $0x48] ss:$16 sps:$4 sm:$0xff]  }
 0x1cd   :  { %3202 = vmatpush1.bf16.msra.mxu0 %v14452_v48  ;;  %3243 = vmatpush1.bf16.msra.mxu1 %v14455_v26  ;;  %v14482_v48 = vld [vmem:[%s18407_s3 + $0xa0] ss:$16 sps:$4 sm:$0xff]   ;;  %v14485_v26 = vld [vmem:[%s18407_s3 + $0xa8] ss:$16 sps:$4 sm:$0xff]  }
 0x1ce   :  { %3203 = vmatprep.subr.bf16.mxu0 %v14460_v23  ;;  %3244 = vmatprep.subr.bf16.mxu1 %v14463_v34  ;;  %v14490_v23 = vld [vmem:[%s18407_s3 + $0xc4] ss:$16 sps:$4 sm:$0xff]   ;;  %v14493_v34 = vld [vmem:[%s18407_s3 + $0xcc] ss:$16 sps:$4 sm:$0xff]  }
 0x1cf   :  { %3233 = vmatprep.mubr.bf16.mxu0 %v18523_v35  ;;  %3274 = vmatprep.mubr.bf16.mxu1 %v18523_v35 }
 0x1d1   :  { %3204 = vmatpush1.bf16.msra.mxu0 %v14458_v2  ;;  %3245 = vmatpush1.bf16.msra.mxu1 %v14461_v32  ;;  %v14491_v2 = vld [vmem:[%s18407_s3 + $0xc8] ss:$16 sps:$4 sm:$0xff]   ;;  %v14496_v32 = vld [vmem:[%s18407_s3 + $0xe4] ss:$16 sps:$4 sm:$0xff]  }
 0x1d2   :  { %3205 = vmatprep.subr.bf16.mxu0 %v14466_v9  ;;  %3246 = vmatprep.subr.bf16.mxu1 %v14469_v33  ;;  %v14499_v9 = vld [vmem:[%s18407_s3 + $0xec] ss:$16 sps:$4 sm:$0xff]   ;;  %v14494_v33 = vld [vmem:[%s18407_s3 + $0xe0] ss:$16 sps:$4 sm:$0xff]  }
 0x1d5   :  { %3206 = vmatpush1.bf16.msra.mxu0 %v14464_v4  ;;  %3247 = vmatpush1.bf16.msra.mxu1 %v14467_v60  ;;  %v14497_v4 = vld [vmem:[%s18407_s3 + $0xe8] ss:$16 sps:$4 sm:$0xff]  }
 0x1d6   :  { %3207 = vmatprep.subr.bf16.mxu0 %v14472_v13  ;;  %3248 = vmatprep.subr.bf16.mxu1 %v14475_v28  ;;  %v14502_v60 = vld [vmem:[#allocation5 + $0x4] ss:$16 sps:$4 sm:$0xff]   ;;  %v14505_v13 = vld [vmem:[#allocation5 + $0xc] ss:$16 sps:$4 sm:$0xff]  }
 0x1d9   :  { %3208 = vmatpush1.bf16.msra.mxu0 %v14470_v24  ;;  %3249 = vmatpush1.bf16.msra.mxu1 %v14473_v20 }
 0x1da   :  { %3209 = vmatprep.subr.bf16.mxu0 %v14478_v38  ;;  %3250 = vmatprep.subr.bf16.mxu1 %v14481_v52 }
 0x1dd   :  { %3210 = vmatpush1.bf16.msra.mxu0 %v14476_v17  ;;  %3251 = vmatpush1.bf16.msra.mxu1 %v14479_v54 }
 0x1de   :  { %3211 = vmatprep.subr.bf16.mxu0 %v14484_v27  ;;  %3252 = vmatprep.subr.bf16.mxu1 %v14487_v22 }
 0x1e1   :  { %3212 = vmatpush1.bf16.msra.mxu0 %v14482_v48  ;;  %3253 = vmatpush1.bf16.msra.mxu1 %v14485_v26 }
 0x1e2   :  { %3213 = vmatprep.subr.bf16.mxu0 %v14490_v23  ;;  %3254 = vmatprep.subr.bf16.mxu1 %v14493_v34 }
 0x1e5   :  { %3214 = vmatpush1.bf16.msra.mxu0 %v14488_v31  ;;  %3255 = vmatpush1.bf16.msra.mxu1 %v14491_v2 }
 0x1e6   :  { %3215 = vmatprep.subr.bf16.mxu0 %v14496_v32  ;;  %3256 = vmatprep.subr.bf16.mxu1 %v14499_v9 }
 0x1e9   :  { %3216 = vmatpush1.bf16.msra.mxu0 %v14494_v33  ;;  %3257 = vmatpush1.bf16.msra.mxu1 %v14497_v4 }
 0x1ea   :  { %3689 = vmatprep.subr.bf16.mxu0 %v14502_v60  ;;  %3730 = vmatprep.subr.bf16.mxu1 %v14505_v13 }
 0x21c   :  { %v1952_v28 = vpop.f32.mrb[28].mxu0  ;;  %v1993_v24 = vpop.f32.mrb[28].mxu1 }
 0x21d   :  { %v2000_v20 = vadd.f32 %v1952_v28, %v16699_v37  ;;  %v2002_v38 = vadd.f32 %v1993_v24, %v16701_v39  ;;  %v1954_v52 = vpop.f32.mrb[29].mxu0  ;;  %v1995_v17 = vpop.f32.mrb[29].mxu1 }
 0x21e   :  { %v2001_v54 = vadd.f32 %v1954_v52, %v16703_v41  ;;  %v2003_v27 = vadd.f32 %v1995_v17, %v16705_v42  ;;  %v1956_v22 = vpop.f32.mrb[30].mxu0  ;;  %v1997_v48 = vpop.f32.mrb[30].mxu1  ;;  %v14500_v17 = vld [vmem:[#allocation5] ss:$16 sps:$4 sm:$0xff]  }
 0x21f   :  { %v2004_v26 = vmul.f32 0.5, %v2000_v20  ;;  %v1957_v23 = vpop.f32.mrb[31].mxu0  ;;  %v1998_v34 = vpop.f32.mrb[31].mxu1  ;;  %v2006_v2 = vmul.f32 0.5, %v2002_v38  ;;  %v14511_v22 = vld [vmem:[#allocation5 + $0x2c] ss:$16 sps:$4 sm:$0xff]  }
 0x220   :  { %v2005_v31 = vmul.f32 0.5, %v2001_v54  ;;  %v14503_v54 = vld [vmem:[#allocation5 + $0x8] ss:$16 sps:$4 sm:$0xff]   ;;  %v14514_v23 = vld [vmem:[#allocation5 + $0x44] ss:$16 sps:$4 sm:$0xff]  }
 0x221   :  { %16018 = vtanh.f32 %v2004_v26  ;;  %v14509_v26 = vld [vmem:[#allocation5 + $0x28] ss:$16 sps:$4 sm:$0xff]   ;;  %v14517_v34 = vld [vmem:[#allocation5 + $0x4c] ss:$16 sps:$4 sm:$0xff]  }
 0x222   :  { %16020 = vtanh.f32 %v2005_v31  ;;  %v14512_v31 = vld [vmem:[#allocation5 + $0x40] ss:$16 sps:$4 sm:$0xff]  }
 0x223   :  { %16022 = vtanh.f32 %v2003_v27  ;;  %v14508_v27 = vld [vmem:[#allocation5 + $0x24] ss:$16 sps:$4 sm:$0xff]  }
 0x224   :  { %16024 = vtanh.f32 %v2006_v2  ;;  %v14515_v2 = vld [vmem:[#allocation5 + $0x48] ss:$16 sps:$4 sm:$0xff]  }
 0x22b   :  { %v16019_v32 = vpop.eup %16018 }
 0x22c   :  { %v2010_v37 = vmul.f32 0.5, %v16019_v32  ;;  %v16021_v9 = vpop.eup %16020  ;;  %v14520_v32 = vld [vmem:[#allocation5 + $0x64] ss:$16 sps:$4 sm:$0xff]  }
 0x22d   :  { %v2011_v33 = vmul.f32 0.5, %v16021_v9  ;;  %v16023_v4 = vpop.eup %16022  ;;  %v14518_v9 = vld [vmem:[#allocation5 + $0x60] ss:$16 sps:$4 sm:$0xff]  }
 0x22e   :  { %v2013_v39 = vadd.f32 0.5, %v2010_v37  ;;  %v16025_v28 = vpop.eup %16024  ;;  %v14523_v37 = vld [vmem:[#allocation5 + $0x6c] ss:$16 sps:$4 sm:$0xff]  }
 0x22f   :  { %v2014_v41 = vadd.f32 0.5, %v2011_v33  ;;  %v2012_v24 = vmul.f32 0.5, %v16025_v28  ;;  %v14526_v33 = vld [vmem:[#allocation5 + $0x84] ss:$16 sps:$4 sm:$0xff]   ;;  %v14535_v28 = vld [vmem:[#allocation5 + $0xac] ss:$16 sps:$4 sm:$0xff]  }
 0x230   :  { %v2018_v60 = vmul.f32 %v16023_v4, %v2013_v39  ;;  %v14521_v39 = vld [vmem:[#allocation5 + $0x68] ss:$16 sps:$4 sm:$0xff]   ;;  %v14529_v4 = vld [vmem:[#allocation5 + $0x8c] ss:$16 sps:$4 sm:$0xff]  }
 0x231   :  { %v2017_v42 = vmul.f32 %v2014_v41, %v16759_v43  ;;  %v2015_v20 = vadd.f32 0.5, %v2012_v24  ;;  %v14506_v43 = vld [vmem:[#allocation5 + $0x20] ss:$16 sps:$4 sm:$0xff]  }
 0x232   :  { %v14524_v41 = vld [vmem:[#allocation5 + $0x80] ss:$16 sps:$4 sm:$0xff]  }
 0x233   :  { %v16929_v13 = vadd.f32 %v2018_v60, %v2017_v42  ;;  %v14527_v60 = vld [vmem:[#allocation5 + $0x88] ss:$16 sps:$4 sm:$0xff]   ;;  %v14532_v42 = vld [vmem:[#allocation5 + $0xa4] ss:$16 sps:$4 sm:$0xff]   ;;  %v14530_v24 = vld [vmem:[#allocation5 + $0xa0] ss:$16 sps:$4 sm:$0xff]  }
 0x235   :  { %16026 = vtanh.f32 %v16929_v13 }
 0x23f   :  { %v16027_v52 = vpop.eup %16026 }
 0x240   :  { %v2021_v38 = vmul.f32 %v16027_v52, %v2015_v20  ;;  %v14533_v20 = vld [vmem:[#allocation5 + $0xa8] ss:$16 sps:$4 sm:$0xff]   ;;  %v14538_v52 = vld [vmem:[#allocation5 + $0xc4] ss:$16 sps:$4 sm:$0xff]  }
 0x242   :  { %v16932_v48 = vpack.c.bf16 %v2021_v38, %v2021_v38  ;;  %v14541_v38 = vld [vmem:[#allocation5 + $0xcc] ss:$16 sps:$4 sm:$0xff]  }
 0x244   :  { %3234 = vmatmul.mubr.bf16.vlgmr.msra.gmra.mrb[40].mxu0 %v16932_v48  ;;  %3275 = vmatmul.mubr.bf16.vlgmr.msra.gmra.mrb[40].mxu1 %v16932_v48 }
 0x245   :  { %3690 = vmatpush1.bf16.msra.mxu0 %v14500_v17  ;;  %3731 = vmatpush1.bf16.msra.mxu1 %v14503_v54  ;;  %v14536_v17 = vld [vmem:[#allocation5 + $0xc0] ss:$16 sps:$4 sm:$0xff]   ;;  %v14539_v54 = vld [vmem:[#allocation5 + $0xc8] ss:$16 sps:$4 sm:$0xff]  }
 0x246   :  { %3691 = vmatprep.subr.bf16.mxu0 %v14508_v27  ;;  %3732 = vmatprep.subr.bf16.mxu1 %v14511_v22  ;;  %v14544_v27 = vld [vmem:[#allocation5 + $0xe4] ss:$16 sps:$4 sm:$0xff]   ;;  %v14547_v22 = vld [vmem:[#allocation5 + $0xec] ss:$16 sps:$4 sm:$0xff]  }
 0x249   :  { %3692 = vmatpush1.bf16.msra.mxu0 %v14506_v43  ;;  %3733 = vmatpush1.bf16.msra.mxu1 %v14509_v26  ;;  %v14542_v43 = vld [vmem:[#allocation5 + $0xe0] ss:$16 sps:$4 sm:$0xff]   ;;  %v14545_v26 = vld [vmem:[#allocation5 + $0xe8] ss:$16 sps:$4 sm:$0xff]  }
 0x24a   :  { %3693 = vmatprep.subr.bf16.mxu0 %v14514_v23  ;;  %3734 = vmatprep.subr.bf16.mxu1 %v14517_v34  ;;  %v14550_v23 = vld [vmem:[#allocation5 + $0x104] ss:$16 sps:$4 sm:$0xff]   ;;  %v14553_v34 = vld [vmem:[#allocation5 + $0x10c] ss:$16 sps:$4 sm:$0xff]  }
 0x24d   :  { %3694 = vmatpush1.bf16.msra.mxu0 %v14512_v31  ;;  %3735 = vmatpush1.bf16.msra.mxu1 %v14515_v2 }
 0x24e   :  { %3695 = vmatprep.subr.bf16.mxu0 %v14520_v32  ;;  %3736 = vmatprep.subr.bf16.mxu1 %v14523_v37 }
 0x251   :  { %3696 = vmatpush1.bf16.msra.mxu0 %v14518_v9  ;;  %3737 = vmatpush1.bf16.msra.mxu1 %v14521_v39 }
 0x252   :  { %3697 = vmatprep.subr.bf16.mxu0 %v14526_v33  ;;  %3738 = vmatprep.subr.bf16.mxu1 %v14529_v4 }
 0x255   :  { %3698 = vmatpush1.bf16.msra.mxu0 %v14524_v41  ;;  %3739 = vmatpush1.bf16.msra.mxu1 %v14527_v60  ;;  %v14548_v41 = vld [vmem:[#allocation5 + $0x100] ss:$16 sps:$4 sm:$0xff]   ;;  %v14551_v60 = vld [vmem:[#allocation5 + $0x108] ss:$16 sps:$4 sm:$0xff]  }
 0x256   :  { %3699 = vmatprep.subr.bf16.mxu0 %v14532_v42  ;;  %3740 = vmatprep.subr.bf16.mxu1 %v14535_v28 }
 0x259   :  { %3700 = vmatpush1.bf16.msra.mxu0 %v14530_v24  ;;  %3741 = vmatpush1.bf16.msra.mxu1 %v14533_v20  ;;  %v14556_v20 = vld [vmem:[#allocation5 + $0x124] ss:$16 sps:$4 sm:$0xff]  }
 0x25a   :  { %3701 = vmatprep.subr.bf16.mxu0 %v14538_v52  ;;  %3742 = vmatprep.subr.bf16.mxu1 %v14541_v38  ;;  %v14559_v52 = vld [vmem:[#allocation5 + $0x12c] ss:$16 sps:$4 sm:$0xff]  }
 0x25d   :  { %3702 = vmatpush1.bf16.msra.mxu0 %v14536_v17  ;;  %3743 = vmatpush1.bf16.msra.mxu1 %v14539_v54  ;;  %v14554_v54 = vld [vmem:[#allocation5 + $0x120] ss:$16 sps:$4 sm:$0xff]  }
 0x25e   :  { %3703 = vmatprep.subr.bf16.mxu0 %v14544_v27  ;;  %3744 = vmatprep.subr.bf16.mxu1 %v14547_v22  ;;  %v14557_v27 = vld [vmem:[#allocation5 + $0x128] ss:$16 sps:$4 sm:$0xff]   ;;  %v14562_v22 = vld [vmem:[#allocation5 + $0x144] ss:$16 sps:$4 sm:$0xff]  }
 0x25f   :  { %v2440_v31 = vpop.f32.mrb[32].mxu0  ;;  %v2481_v2 = vpop.f32.mrb[32].mxu1 }
 0x260   :  { %v2441_v32 = vadd.f32 %v2440_v31, %v16770_v59  ;;  %v2442_v37 = vpop.f32.mrb[33].mxu0  ;;  %v2483_v9 = vpop.f32.mrb[33].mxu1  ;;  %v14565_v31 = vld [vmem:[#allocation5 + $0x14c] ss:$16 sps:$4 sm:$0xff]  }
 0x261   :  { %v2443_v39 = vadd.f32 %v2442_v37, %v16773_v0  ;;  %v2444_v33 = vpop.f32.mrb[34].mxu0  ;;  %v2485_v4 = vpop.f32.mrb[34].mxu1  ;;  %3704 = vmatpush1.bf16.msra.mxu0 %v14542_v43  ;;  %3745 = vmatpush1.bf16.msra.mxu1 %v14545_v26  ;;  %v2484_v17 = vadd.f32 %v2483_v9, %v16776_v5  ;;  %v14560_v37 = vld [vmem:[#allocation5 + $0x140] ss:$16 sps:$4 sm:$0xff]   ;;  %v14563_v43 = vld [vmem:[#allocation5 + $0x148] ss:$16 sps:$4 sm:$0xff]  }
 0x262   :  { %v2488_v42 = vmul.f32 0.5, %v2441_v32  ;;  %v2445_v28 = vpop.f32.mrb[35].mxu0  ;;  %v2486_v24 = vpop.f32.mrb[35].mxu1  ;;  %3705 = vmatprep.subr.bf16.mxu0 %v14550_v23  ;;  %3746 = vmatprep.subr.bf16.mxu1 %v14553_v34  ;;  %v2482_v32 = vadd.f32 %v2481_v2, %v16782_v7  ;;  %v14568_v26 = vld [vmem:[#allocation5 + $0x164] ss:$16 sps:$4 sm:$0xff]  }
 0x263   :  { %v2489_v38 = vmul.f32 0.5, %v2443_v39  ;;  %v14571_v39 = vld [vmem:[#allocation5 + $0x16c] ss:$16 sps:$4 sm:$0xff]   ;;  %v14566_v34 = vld [vmem:[#allocation5 + $0x160] ss:$16 sps:$4 sm:$0xff]  }
 0x264   :  { %16028 = vtanh.f32 %v2488_v42  ;;  %v2490_v23 = vmul.f32 0.5, %v2482_v32  ;;  %v14569_v9 = vld [vmem:[#allocation5 + $0x168] ss:$16 sps:$4 sm:$0xff]   ;;  %v14574_v4 = vld [vmem:[#allocation5 + $0x184] ss:$16 sps:$4 sm:$0xff]  }
 0x265   :  { %16030 = vtanh.f32 %v2489_v38  ;;  %3706 = vmatpush1.bf16.msra.mxu0 %v14548_v41  ;;  %3747 = vmatpush1.bf16.msra.mxu1 %v14551_v60  ;;  %v14577_v41 = vld [vmem:[#allocation5 + $0x18c] ss:$16 sps:$4 sm:$0xff]   ;;  %v14572_v24 = vld [vmem:[#allocation5 + $0x180] ss:$16 sps:$4 sm:$0xff]   ;;  %v14580_v38 = vld [vmem:[#allocation5 + $0x1a4] ss:$16 sps:$4 sm:$0xff]  }
 0x266   :  { %16032 = vtanh.f32 %v2484_v17  ;;  %3707 = vmatprep.subr.bf16.mxu0 %v14556_v20  ;;  %3748 = vmatprep.subr.bf16.mxu1 %v14559_v52  ;;  %v14575_v20 = vld [vmem:[#allocation5 + $0x188] ss:$16 sps:$4 sm:$0xff]   ;;  %v14583_v17 = vld [vmem:[#allocation5 + $0x1ac] ss:$16 sps:$4 sm:$0xff]   ;;  %v14578_v32 = vld [vmem:[#allocation5 + $0x1a0] ss:$16 sps:$4 sm:$0xff]  }
 0x267   :  { %16034 = vtanh.f32 %v2490_v23  ;;  %v14584_v23 = vld [vmem:[#allocation5 + $0x1c0] ss:$16 sps:$4 sm:$0xff]  }
 0x269   :  { %3708 = vmatpush1.bf16.msra.mxu0 %v14554_v54  ;;  %3749 = vmatpush1.bf16.msra.mxu1 %v14557_v27  ;;  %v1227_v54 = vmul.f32 0.0, %v16785_v62 }
 0x26a   :  { %3709 = vmatprep.subr.bf16.mxu0 %v14562_v22  ;;  %3750 = vmatprep.subr.bf16.mxu1 %v14565_v31 }
 0x26d   :  { %3710 = vmatpush1.bf16.msra.mxu0 %v14560_v37  ;;  %3751 = vmatpush1.bf16.msra.mxu1 %v14563_v43  ;;  %v14581_v37 = vld [vmem:[#allocation5 + $0x1a8] ss:$16 sps:$4 sm:$0xff]   ;;  %v14586_v43 = vld [vmem:[#allocation5 + $0x1c4] ss:$16 sps:$4 sm:$0xff]  }
 0x26e   :  { %v16029_v33 = vpop.eup %16028  ;;  %3711 = vmatprep.subr.bf16.mxu0 %v14568_v26  ;;  %3752 = vmatprep.subr.bf16.mxu1 %v14571_v39  ;;  %v14589_v26 = vld [vmem:[#allocation5 + $0x1cc] ss:$16 sps:$4 sm:$0xff]  }
 0x26f   :  { %v2494_v60 = vmul.f32 0.5, %v16029_v33  ;;  %v16031_v42 = vpop.eup %16030  ;;  %v14587_v33 = vld [vmem:[#allocation5 + $0x1c8] ss:$16 sps:$4 sm:$0xff]  }
 0x270   :  { %v2495_v28 = vmul.f32 0.5, %v16031_v42  ;;  %v16033_v52 = vpop.eup %16032  ;;  %v14595_v42 = vld [vmem:[#allocation5 + $0x1ec] ss:$16 sps:$4 sm:$0xff]  }
 0x271   :  { %v2497_v2 = vadd.f32 0.5, %v2494_v60  ;;  %3712 = vmatpush1.bf16.msra.mxu0 %v14566_v34  ;;  %3753 = vmatpush1.bf16.msra.mxu1 %v14569_v9  ;;  %v14592_v60 = vld [vmem:[#allocation5 + $0x1e4] ss:$16 sps:$4 sm:$0xff]   ;;  %v16035_v34 = vpop.eup %16034 }
 0x272   :  { %v2498_v27 = vadd.f32 0.5, %v2495_v28  ;;  %3713 = vmatprep.subr.bf16.mxu0 %v14574_v4  ;;  %3754 = vmatprep.subr.bf16.mxu1 %v14577_v41  ;;  %v14590_v4 = vld [vmem:[#allocation5 + $0x1e0] ss:$16 sps:$4 sm:$0xff]   ;;  %v14593_v41 = vld [vmem:[#allocation5 + $0x1e8] ss:$16 sps:$4 sm:$0xff]  }
 0x273   :  { %v2502_v22 = vmul.f32 %v16033_v52, %v2497_v2  ;;  %v2496_v2 = vmul.f32 0.5, %v16035_v34  ;;  %v14598_v28 = vld [vmem:[#allocation7 + $0x4] ss:$16 sps:$4 sm:$0xff]   ;;  %v14617_v34 = vld [vmem:[#allocation7 + $0x68] ss:$16 sps:$4 sm:$0xff]  }
 0x274   :  { %v2501_v31 = vmul.f32 %v2498_v27, %v1227_v54  ;;  %v14596_v27 = vld [vmem:[#allocation7] ss:$16 sps:$4 sm:$0xff]  }
 0x275   :  { %3714 = vmatpush1.bf16.msra.mxu0 %v14572_v24  ;;  %3755 = vmatpush1.bf16.msra.mxu1 %v14575_v20  ;;  %v14601_v24 = vld [vmem:[#allocation7 + $0xc] ss:$16 sps:$4 sm:$0xff]   ;;  %v2499_v20 = vadd.f32 0.5, %v2496_v2  ;;  %v14623_v2 = vld [vmem:[#allocation7 + $0x88] ss:$16 sps:$4 sm:$0xff]  }
 0x276   :  { %v2503_v39 = vadd.f32 %v2502_v22, %v2501_v31  ;;  %3715 = vmatprep.subr.bf16.mxu0 %v14580_v38  ;;  %3756 = vmatprep.subr.bf16.mxu1 %v14583_v17  ;;  %v14599_v22 = vld [vmem:[#allocation7 + $0x8] ss:$16 sps:$4 sm:$0xff]   ;;  %v14604_v31 = vld [vmem:[#allocation7 + $0x24] ss:$16 sps:$4 sm:$0xff]  }
 0x278   :  { %16036 = vtanh.f32 %v2503_v39  ;;  %v2508_v62 = vsub.f32 %v2503_v39, %v1227_v54  ;;  %v14613_v39 = vld [vmem:[#allocation7 + $0x4c] ss:$16 sps:$4 sm:$0xff]  }
 0x279   :  { %3716 = vmatpush1.bf16.msra.mxu0 %v14578_v32  ;;  %3757 = vmatpush1.bf16.msra.mxu1 %v14581_v37  ;;  %v14607_v32 = vld [vmem:[#allocation7 + $0x2c] ss:$16 sps:$4 sm:$0xff]  }
 0x27a   :  { %v16941_v9 = vadd.f32 %v2508_v62, %v1227_v54  ;;  %3717 = vmatprep.subr.bf16.mxu0 %v14586_v43  ;;  %3758 = vmatprep.subr.bf16.mxu1 %v14589_v26  ;;  %v14602_v43 = vld [vmem:[#allocation7 + $0x20] ss:$16 sps:$4 sm:$0xff]   ;;  %v14605_v26 = vld [vmem:[#allocation7 + $0x28] ss:$16 sps:$4 sm:$0xff]   ;;  %v14616_v62 = vld [vmem:[#allocation7 + $0x64] ss:$16 sps:$4 sm:$0xff]  }
 0x27d   :  { %3718 = vmatpush1.bf16.msra.mxu0 %v14584_v23  ;;  %3759 = vmatpush1.bf16.msra.mxu1 %v14587_v33  ;;  %v14608_v23 = vld [vmem:[#allocation7 + $0x40] ss:$16 sps:$4 sm:$0xff]   ;;  %v14611_v33 = vld [vmem:[#allocation7 + $0x48] ss:$16 sps:$4 sm:$0xff]  }
 0x27e   :  { %3719 = vmatprep.subr.bf16.mxu0 %v14592_v60  ;;  %3760 = vmatprep.subr.bf16.mxu1 %v14595_v42  ;;  %v14619_v60 = vld [vmem:[#allocation7 + $0x6c] ss:$16 sps:$4 sm:$0xff]   ;;  %v14614_v42 = vld [vmem:[#allocation7 + $0x60] ss:$16 sps:$4 sm:$0xff]  }
 0x281   :  { %3720 = vmatpush1.bf16.msra.mxu0 %v14590_v4  ;;  %3761 = vmatpush1.bf16.msra.mxu1 %v14593_v41  ;;  %v14625_v4 = vld [vmem:[#allocation7 + $0x8c] ss:$16 sps:$4 sm:$0xff]   ;;  %v14620_v41 = vld [vmem:[#allocation7 + $0x80] ss:$16 sps:$4 sm:$0xff]  }
 0x282   :  { %v16037_v52 = vpop.eup %16036  ;;  %4177 = vmatprep.subr.bf16.mxu0 %v14598_v28  ;;  %4218 = vmatprep.subr.bf16.mxu1 %v14601_v24  ;;  %v14628_v28 = vld [vmem:[#allocation7 + $0xa4] ss:$16 sps:$4 sm:$0xff]   ;;  %v14631_v24 = vld [vmem:[#allocation7 + $0xac] ss:$16 sps:$4 sm:$0xff]  }
 0x283   :  { %v2505_v38 = vmul.f32 %v16037_v52, %v2499_v20  ;;  %v14626_v20 = vld [vmem:[#allocation7 + $0xa0] ss:$16 sps:$4 sm:$0xff]   ;;  %v14629_v52 = vld [vmem:[#allocation7 + $0xa8] ss:$16 sps:$4 sm:$0xff]  }
 0x285   :  { %v2506_v17 = vsub.f32 %v2505_v38, %v16788_v51 }
 0x287   :  { %v16945_v54 = vadd.f32 %v2506_v17, %v16788_v51  ;;  %v14610_v51 = vld [vmem:[#allocation7 + $0x44] ss:$16 sps:$4 sm:$0xff]  }
 0x289   :  { %v16949_v37 = vpack.c.bf16 %v16945_v54, %v16945_v54 }
 0x28b   :  { %3721 = vmatprep.mubr.bf16.mxu0 %v16949_v37  ;;  %3762 = vmatprep.mubr.bf16.mxu1 %v16949_v37 }
 0x28c   :  { %3722 = vmatmul.mubr.bf16.vlgmr.msra.gmra.mrb[44].mxu0 %v16932_v48  ;;  %3763 = vmatmul.mubr.bf16.vlgmr.msra.gmra.mrb[44].mxu1 %v16932_v48  ;;  %v14622_v48 = vld [vmem:[#allocation7 + $0x84] ss:$16 sps:$4 sm:$0xff]  }
 0x28d   :  { %4178 = vmatpush1.bf16.msra.mxu0 %v14596_v27  ;;  %4219 = vmatpush1.bf16.msra.mxu1 %v14599_v22  ;;  %v14634_v27 = vld [vmem:[#allocation7 + $0xc4] ss:$16 sps:$4 sm:$0xff]   ;;  %v14637_v22 = vld [vmem:[#allocation7 + $0xcc] ss:$16 sps:$4 sm:$0xff]  }
 0x28e   :  { %4179 = vmatprep.subr.bf16.mxu0 %v14604_v31  ;;  %4220 = vmatprep.subr.bf16.mxu1 %v14607_v32 }
 0x291   :  { %4180 = vmatpush1.bf16.msra.mxu0 %v14602_v43  ;;  %4221 = vmatpush1.bf16.msra.mxu1 %v14605_v26 }
 0x292   :  { %4181 = vmatprep.subr.bf16.mxu0 %v14610_v51  ;;  %4222 = vmatprep.subr.bf16.mxu1 %v14613_v39 }
 0x295   :  { %4182 = vmatpush1.bf16.msra.mxu0 %v14608_v23  ;;  %4223 = vmatpush1.bf16.msra.mxu1 %v14611_v33  ;;  %v14632_v23 = vld [vmem:[#allocation7 + $0xc0] ss:$16 sps:$4 sm:$0xff]  }
 0x296   :  { %4183 = vmatprep.subr.bf16.mxu0 %v14616_v62  ;;  %4224 = vmatprep.subr.bf16.mxu1 %v14619_v60 }
 0x299   :  { %4184 = vmatpush1.bf16.msra.mxu0 %v14614_v42  ;;  %4225 = vmatpush1.bf16.msra.mxu1 %v14617_v34  ;;  %v14635_v42 = vld [vmem:[#allocation7 + $0xc8] ss:$16 sps:$4 sm:$0xff]  }
 0x29a   :  { %4185 = vmatprep.subr.bf16.mxu0 %v14622_v48  ;;  %4226 = vmatprep.subr.bf16.mxu1 %v14625_v4  ;;  %v14640_v48 = vld [vmem:[#allocation7 + $0xe4] ss:$16 sps:$4 sm:$0xff]   ;;  %v14643_v4 = vld [vmem:[#allocation7 + $0xec] ss:$16 sps:$4 sm:$0xff]  }
 0x29d   :  { %4186 = vmatpush1.bf16.msra.mxu0 %v14620_v41  ;;  %4227 = vmatpush1.bf16.msra.mxu1 %v14623_v2  ;;  %v14638_v2 = vld [vmem:[#allocation7 + $0xe0] ss:$16 sps:$4 sm:$0xff]  }
 0x29e   :  { %4187 = vmatprep.subr.bf16.mxu0 %v14628_v28  ;;  %4228 = vmatprep.subr.bf16.mxu1 %v14631_v24  ;;  %v14641_v28 = vld [vmem:[#allocation7 + $0xe8] ss:$16 sps:$4 sm:$0xff]   ;;  %v14646_v24 = vld [vmem:[#allocation7 + $0x104] ss:$16 sps:$4 sm:$0xff]  }
 0x29f   :  { %v2928_v38 = vpop.f32.mrb[36].mxu0  ;;  %v2969_v17 = vpop.f32.mrb[36].mxu1 }
 0x2a0   :  { %v2929_v31 = vadd.f32 %v2928_v38, %v16802_v56  ;;  %v2930_v32 = vpop.f32.mrb[37].mxu0  ;;  %v2971_v43 = vpop.f32.mrb[37].mxu1  ;;  %v14649_v38 = vld [vmem:[#allocation7 + $0x10c] ss:$16 sps:$4 sm:$0xff]  }
 0x2a1   :  { %v2931_v26 = vadd.f32 %v2930_v32, %v16805_v15  ;;  %v2932_v51 = vpop.f32.mrb[38].mxu0  ;;  %v2973_v39 = vpop.f32.mrb[38].mxu1  ;;  %4188 = vmatpush1.bf16.msra.mxu0 %v14626_v20  ;;  %4229 = vmatpush1.bf16.msra.mxu1 %v14629_v52  ;;  %v2972_v41 = vadd.f32 %v2971_v43, %v16808_v25  ;;  %v2970_v20 = vadd.f32 %v2969_v17, %v16814_v12  ;;  %v14644_v52 = vld [vmem:[#allocation7 + $0x100] ss:$16 sps:$4 sm:$0xff]  }
 0x2a2   :  { %v2976_v33 = vmul.f32 0.5, %v2929_v31  ;;  %v2933_v62 = vpop.f32.mrb[39].mxu0  ;;  %v2974_v60 = vpop.f32.mrb[39].mxu1  ;;  %4189 = vmatprep.subr.bf16.mxu0 %v14634_v27  ;;  %4230 = vmatprep.subr.bf16.mxu1 %v14637_v22  ;;  %v14647_v27 = vld [vmem:[#allocation7 + $0x108] ss:$16 sps:$4 sm:$0xff]   ;;  %v12169_v43 = vld [vmem:[%s18413_s9] sm:$0xff] }
 0x2a3   :  { %v2977_v34 = vmul.f32 0.5, %v2931_v26  ;;  %v14652_v22 = vld [vmem:[#allocation7 + $0x124] ss:$16 sps:$4 sm:$0xff]   ;;  %v14655_v31 = vld [vmem:[#allocation7 + $0x12c] ss:$16 sps:$4 sm:$0xff]   ;;  %v2978_v32 = vmul.f32 0.5, %v2970_v20  ;;  %12202 = vperm.xlu0 %13968, %v12169_v43  }
 0x2a4   :  { %16038 = vtanh.f32 %v2976_v33  ;;  %v14650_v51 = vld [vmem:[#allocation7 + $0x120] ss:$16 sps:$4 sm:$0xff]   ;;  %v14653_v39 = vld [vmem:[#allocation7 + $0x128] ss:$16 sps:$4 sm:$0xff]   ;;  %v14658_v33 = vld [vmem:[#allocation7 + $0x144] ss:$16 sps:$4 sm:$0xff]  }
 0x2a5   :  { %16040 = vtanh.f32 %v2977_v34  ;;  %4190 = vmatpush1.bf16.msra.mxu0 %v14632_v23  ;;  %4231 = vmatpush1.bf16.msra.mxu1 %v14635_v42  ;;  %v12171_v17 = vld [vmem:[%s18413_s9 + $0x10] sm:$0xff]  ;;  %v14665_v43 = vld [vmem:[#allocation7 + $0x168] ss:$16 sps:$4 sm:$0xff]  }
 0x2a6   :  { %4191 = vmatprep.subr.bf16.mxu0 %v14640_v48  ;;  %4232 = vmatprep.subr.bf16.mxu1 %v14643_v4  ;;  %16042 = vtanh.f32 %v2972_v41  ;;  %v14661_v62 = vld [vmem:[#allocation7 + $0x14c] ss:$16 sps:$4 sm:$0xff]   ;;  %v14656_v41 = vld [vmem:[#allocation7 + $0x140] ss:$16 sps:$4 sm:$0xff]  }
 0x2a7   :  { %12208 = vperm.xlu1 %13969, %v12171_v17   ;;  %16044 = vtanh.f32 %v2978_v32  ;;  %v12170_v48 = vld [vmem:[%s18413_s9 + $0x8] sm:$0xff]  ;;  %v12175_v17 = vld [vmem:[%s18413_s9 + $0x30] sm:$0xff] }
 0x2a8   :  { %12205 = vperm.xlu0 %13968, %v12170_v48   ;;  %v12174_v32 = vld [vmem:[%s18413_s9 + $0x28] sm:$0xff] }
 0x2a9   :  { %4192 = vmatpush1.bf16.msra.mxu0 %v14638_v2  ;;  %4233 = vmatpush1.bf16.msra.mxu1 %v14641_v28  ;;  %v14659_v2 = vld [vmem:[#allocation7 + $0x148] ss:$16 sps:$4 sm:$0xff]   ;;  %v14679_v48 = vld [vmem:[#allocation7 + $0x1ac] ss:$16 sps:$4 sm:$0xff]  }
 0x2aa   :  { %4193 = vmatprep.subr.bf16.mxu0 %v14646_v24  ;;  %4234 = vmatprep.subr.bf16.mxu1 %v14649_v38  ;;  %v12172_v28 = vld [vmem:[%s18413_s9 + $0x18] sm:$0xff]  ;;  %v1715_v24 = vmul.f32 0.0, %v16817_v30  ;;  %v14662_v30 = vld [vmem:[#allocation7 + $0x160] ss:$16 sps:$4 sm:$0xff]  }
 0x2ab   :  { %12211 = vperm.xlu1 %13969, %v12172_v28  }
 0x2ad   :  { %4194 = vmatpush1.bf16.msra.mxu0 %v14644_v52  ;;  %4235 = vmatpush1.bf16.msra.mxu1 %v14647_v27  ;;  %v14664_v52 = vld [vmem:[#allocation7 + $0x164] ss:$16 sps:$4 sm:$0xff]   ;;  %v14667_v27 = vld [vmem:[#allocation7 + $0x16c] ss:$16 sps:$4 sm:$0xff]  }
 0x2ae   :  { %v16039_v26 = vpop.eup %16038  ;;  %4195 = vmatprep.subr.bf16.mxu0 %v14652_v22  ;;  %4236 = vmatprep.subr.bf16.mxu1 %v14655_v31  ;;  %v12173_v31 = vld [vmem:[%s18413_s9 + $0x20] sm:$0xff] }
 0x2af   :  { %v2982_v23 = vmul.f32 0.5, %v16039_v26  ;;  %v16041_v60 = vpop.eup %16040  ;;  %12214 = vperm.xlu0 %13968, %v12173_v31   ;;  %12217 = vperm.xlu1 %13969, %v12174_v32   ;;  %v12179_v31 = vld [vmem:[%s18413_s9 + $0x50] sm:$0xff] }
 0x2b0   :  { %v2983_v34 = vmul.f32 0.5, %v16041_v60  ;;  %v16043_v4 = vpop.eup %16042  ;;  %v14671_v60 = vld [vmem:[#allocation7 + $0x188] ss:$16 sps:$4 sm:$0xff]  }
 0x2b1   :  { %v2985_v42 = vadd.f32 0.5, %v2982_v23  ;;  %4196 = vmatpush1.bf16.msra.mxu0 %v14650_v51  ;;  %4237 = vmatpush1.bf16.msra.mxu1 %v14653_v39  ;;  %v14670_v51 = vld [vmem:[#allocation7 + $0x184] ss:$16 sps:$4 sm:$0xff]   ;;  %v14673_v39 = vld [vmem:[#allocation7 + $0x18c] ss:$16 sps:$4 sm:$0xff]  }
 0x2b2   :  { %v2986_v38 = vadd.f32 0.5, %v2983_v34  ;;  %4197 = vmatprep.subr.bf16.mxu0 %v14658_v33  ;;  %4238 = vmatprep.subr.bf16.mxu1 %v14661_v62  ;;  %v12176_v23 = vld [vmem:[%s18413_s9 + $0x38] sm:$0xff]  ;;  %v14668_v62 = vld [vmem:[#allocation7 + $0x180] ss:$16 sps:$4 sm:$0xff]  }
 0x2b3   :  { %v2990_v20 = vmul.f32 %v16043_v4, %v2985_v42  ;;  %v16045_v42 = vpop.eup %16044  ;;  %v14676_v34 = vld [vmem:[#allocation7 + $0x1a4] ss:$16 sps:$4 sm:$0xff]   ;;  %12220 = vperm.xlu0 %13968, %v12175_v17   ;;  %12223 = vperm.xlu1 %13969, %v12176_v23  }
 0x2b4   :  { %v2989_v22 = vmul.f32 %v2986_v38, %v1715_v24  ;;  %v2984_v38 = vmul.f32 0.5, %v16045_v42  ;;  %v12181_v23 = vld [vmem:[%s18413_s9 + $0x60] sm:$0xff] }
 0x2b5   :  { %4198 = vmatpush1.bf16.msra.mxu0 %v14656_v41  ;;  %4239 = vmatpush1.bf16.msra.mxu1 %v14659_v2  ;;  %v12177_v41 = vld [vmem:[%s18413_s9 + $0x40] sm:$0xff]  ;;  %v12178_v2 = vld [vmem:[%s18413_s9 + $0x48] sm:$0xff] }
 0x2b6   :  { %v2991_v26 = vadd.f32 %v2990_v20, %v2989_v22  ;;  %4199 = vmatprep.subr.bf16.mxu0 %v14664_v52  ;;  %4240 = vmatprep.subr.bf16.mxu1 %v14667_v27  ;;  %v14674_v20 = vld [vmem:[#allocation7 + $0x1a0] ss:$16 sps:$4 sm:$0xff]   ;;  %v14677_v52 = vld [vmem:[#allocation7 + $0x1a8] ss:$16 sps:$4 sm:$0xff]   ;;  %v14682_v27 = vld [vmem:[#allocation7 + $0x1c4] ss:$16 sps:$4 sm:$0xff]  }
 0x2b7   :  { %v14685_v22 = vld [vmem:[#allocation7 + $0x1cc] ss:$16 sps:$4 sm:$0xff]   ;;  %12226 = vperm.xlu0 %13968, %v12177_v41   ;;  %12229 = vperm.xlu1 %13969, %v12178_v2   ;;  %v2987_v32 = vadd.f32 0.5, %v2984_v38 }
 0x2b8   :  { %16046 = vtanh.f32 %v2991_v26  ;;  %v2997_v33 = vsub.f32 %v2991_v26, %v1715_v24  ;;  %v12183_v41 = vld [vmem:[%s18413_s9 + $0x70] sm:$0xff]  ;;  %v12184_v2 = vld [vmem:[%s18413_s9 + $0x78] sm:$0xff] }
 0x2b9   :  { %4200 = vmatpush1.bf16.msra.mxu0 %v14662_v30  ;;  %4241 = vmatpush1.bf16.msra.mxu1 %v14665_v43  ;;  %v14683_v30 = vld [vmem:[#allocation7 + $0x1c8] ss:$16 sps:$4 sm:$0xff]  }
 0x2ba   :  { %4201 = vmatprep.subr.bf16.mxu0 %v14670_v51  ;;  %4242 = vmatprep.subr.bf16.mxu1 %v14673_v39  ;;  %v2998_v4 = vmul.f32 0.0, %v2997_v33  ;;  %v12180_v43 = vld [vmem:[%s18413_s9 + $0x58] sm:$0xff]  ;;  %v12182_v33 = vld [vmem:[%s18413_s9 + $0x68] sm:$0xff] }
 0x2bb   :  { %v14688_v51 = vld [vmem:[#allocation7 + $0x1e4] ss:$16 sps:$4 sm:$0xff]   ;;  %v14691_v39 = vld [vmem:[#allocation7 + $0x1ec] ss:$16 sps:$4 sm:$0xff]   ;;  %12232 = vperm.xlu0 %13968, %v12179_v31   ;;  %12235 = vperm.xlu1 %13969, %v12180_v43  }
 0x2bc   :  { %v16990_v28 = vadd.f32 %v2998_v4, %v1715_v24  ;;  %v14680_v24 = vld [vmem:[#allocation7 + $0x1c0] ss:$16 sps:$4 sm:$0xff]   ;;  %v14707_v43 = vld [vmem:[%s18407_s3 + $0x48] ss:$16 sps:$4 sm:$0xff]  }
 0x2bd   :  { %4202 = vmatpush1.bf16.msra.mxu0 %v14668_v62  ;;  %4243 = vmatpush1.bf16.msra.mxu1 %v14671_v60  ;;  %v14686_v62 = vld [vmem:[#allocation7 + $0x1e0] ss:$16 sps:$4 sm:$0xff]   ;;  %v14689_v60 = vld [vmem:[#allocation7 + $0x1e8] ss:$16 sps:$4 sm:$0xff]  }
 0x2be   :  { %4203 = vmatprep.subr.bf16.mxu0 %v14676_v34  ;;  %4244 = vmatprep.subr.bf16.mxu1 %v14679_v48  ;;  %v14694_v34 = vld [vmem:[%s18407_s3 + $0x4] ss:$16 sps:$4 sm:$0xff]   ;;  %v14697_v48 = vld [vmem:[%s18407_s3 + $0xc] ss:$16 sps:$4 sm:$0xff]   ;;  %v14698_v31 = vld [vmem:[%s18407_s3 + $0x20] ss:$16 sps:$4 sm:$0xff]  }
 0x2bf   :  { %12238 = vperm.xlu0 %13968, %v12181_v23   ;;  %12241 = vperm.xlu1 %13969, %v12182_v33   ;;  %v14718_v23 = vld [vmem:[%s18407_s3 + $0x84] ss:$16 sps:$4 sm:$0xff]   ;;  %v14721_v33 = vld [vmem:[%s18407_s3 + $0x8c] ss:$16 sps:$4 sm:$0xff]  }
 0x2c1   :  { %4204 = vmatpush1.bf16.msra.mxu0 %v14674_v20  ;;  %4245 = vmatpush1.bf16.msra.mxu1 %v14677_v52  ;;  %v14692_v52 = vld [vmem:[%s18407_s3] ss:$16 sps:$4 sm:$0xff]  }
 0x2c2   :  { %v16047_v26 = vpop.eup %16046  ;;  %4205 = vmatprep.subr.bf16.mxu0 %v14682_v27  ;;  %4246 = vmatprep.subr.bf16.mxu1 %v14685_v22  ;;  %v14695_v27 = vld [vmem:[%s18407_s3 + $0x8] ss:$16 sps:$4 sm:$0xff]   ;;  %v14703_v22 = vld [vmem:[%s18407_s3 + $0x2c] ss:$16 sps:$4 sm:$0xff]  }
 0x2c3   :  { %v2993_v17 = vmul.f32 %v16047_v26, %v2987_v32  ;;  %12244 = vperm.xlu0 %13968, %v12183_v41   ;;  %12247 = vperm.xlu1 %13969, %v12184_v2   ;;  %v14701_v32 = vld [vmem:[%s18407_s3 + $0x28] ss:$16 sps:$4 sm:$0xff]   ;;  %v14712_v26 = vld [vmem:[%s18407_s3 + $0x64] ss:$16 sps:$4 sm:$0xff]   ;;  %v14733_v2 = vld [vmem:[%s18407_s3 + $0xcc] ss:$16 sps:$4 sm:$0xff]  }
 0x2c4   :  { %v14730_v41 = vld [vmem:[%s18407_s3 + $0xc4] ss:$16 sps:$4 sm:$0xff]  }
 0x2c5   :  { %4206 = vmatpush1.bf16.msra.mxu0 %v14680_v24  ;;  %4247 = vmatpush1.bf16.msra.mxu1 %v14683_v30  ;;  %v2994_v42 = vsub.f32 %v2993_v17, %v16826_v29  ;;  %v14706_v24 = vld [vmem:[%s18407_s3 + $0x44] ss:$16 sps:$4 sm:$0xff]   ;;  %v14704_v30 = vld [vmem:[%s18407_s3 + $0x40] ss:$16 sps:$4 sm:$0xff]   ;;  %v14713_v17 = vld [vmem:[%s18407_s3 + $0x68] ss:$16 sps:$4 sm:$0xff]  }
 0x2c6   :  { %4207 = vmatprep.subr.bf16.mxu0 %v14688_v51  ;;  %4248 = vmatprep.subr.bf16.mxu1 %v14691_v39  ;;  %v14715_v51 = vld [vmem:[%s18407_s3 + $0x6c] ss:$16 sps:$4 sm:$0xff]   ;;  %v14710_v39 = vld [vmem:[%s18407_s3 + $0x60] ss:$16 sps:$4 sm:$0xff]  }
 0x2c7   :  { %v2995_v4 = vmul.f32 0.0, %v2994_v42  ;;  %v14724_v42 = vld [vmem:[%s18407_s3 + $0xa4] ss:$16 sps:$4 sm:$0xff]  }
 0x2c9   :  { %4208 = vmatpush1.bf16.msra.mxu0 %v14686_v62  ;;  %4249 = vmatpush1.bf16.msra.mxu1 %v14689_v60  ;;  %v17018_v38 = vadd.f32 %v2995_v4, %v16826_v29  ;;  %v14700_v29 = vld [vmem:[%s18407_s3 + $0x24] ss:$16 sps:$4 sm:$0xff]   ;;  %v14716_v62 = vld [vmem:[%s18407_s3 + $0x80] ss:$16 sps:$4 sm:$0xff]   ;;  %v14719_v60 = vld [vmem:[%s18407_s3 + $0x88] ss:$16 sps:$4 sm:$0xff]  }
 0x2ca   :  { %4482 = vmatprep.subr.bf16.mxu0 %v14694_v34  ;;  %4523 = vmatprep.subr.bf16.mxu1 %v14697_v48  ;;  %v14727_v34 = vld [vmem:[%s18407_s3 + $0xac] ss:$16 sps:$4 sm:$0xff]   ;;  %v14722_v48 = vld [vmem:[%s18407_s3 + $0xa0] ss:$16 sps:$4 sm:$0xff]   ;;  %v14725_v4 = vld [vmem:[%s18407_s3 + $0xa8] ss:$16 sps:$4 sm:$0xff]  }
 0x2cb   :  { %v3003_v20 = vpack.c.bf16 %v17018_v38, %v17018_v38 }
 0x2cd   :  { %4209 = vmatprep.mubr.bf16.mxu0 %v3003_v20  ;;  %4250 = vmatprep.mubr.bf16.mxu1 %v3003_v20  ;;  %v14728_v20 = vld [vmem:[%s18407_s3 + $0xc0] ss:$16 sps:$4 sm:$0xff]  }
 0x2ce   :  { %4210 = vmatmul.mubr.bf16.vlgmr.msra.gmra.mrb[48].mxu0 %v16949_v37  ;;  %4251 = vmatmul.mubr.bf16.vlgmr.msra.gmra.mrb[48].mxu1 %v16949_v37  ;;  %v14709_v37 = vld [vmem:[%s18407_s3 + $0x4c] ss:$16 sps:$4 sm:$0xff]  }
 0x2cf   :  { %4483 = vmatpush1.bf16.msra.mxu0 %v14692_v52  ;;  %4524 = vmatpush1.bf16.msra.mxu1 %v14695_v27  ;;  %v14731_v52 = vld [vmem:[%s18407_s3 + $0xc8] ss:$16 sps:$4 sm:$0xff]   ;;  %v14736_v27 = vld [vmem:[%s18407_s3 + $0xe4] ss:$16 sps:$4 sm:$0xff]  }
 0x2d0   :  { %4484 = vmatprep.subr.bf16.mxu0 %v14700_v29  ;;  %4525 = vmatprep.subr.bf16.mxu1 %v14703_v22  ;;  %v14739_v29 = vld [vmem:[%s18407_s3 + $0xec] ss:$16 sps:$4 sm:$0xff]   ;;  %v14734_v22 = vld [vmem:[%s18407_s3 + $0xe0] ss:$16 sps:$4 sm:$0xff]  }
 0x2d1   :  { %4514 = vmatprep.mubr.bf16.mxu0 %v18523_v35  ;;  %4555 = vmatprep.mubr.bf16.mxu1 %v18523_v35 }
 0x2d3   :  { %4485 = vmatpush1.bf16.msra.mxu0 %v14698_v31  ;;  %4526 = vmatpush1.bf16.msra.mxu1 %v14701_v32  ;;  %v14737_v31 = vld [vmem:[%s18407_s3 + $0xe8] ss:$16 sps:$4 sm:$0xff]  }
 0x2d4   :  { %4486 = vmatprep.subr.bf16.mxu0 %v14706_v24  ;;  %4527 = vmatprep.subr.bf16.mxu1 %v14709_v37  ;;  %v14742_v32 = vld [vmem:[#allocation5 + $0x4] ss:$16 sps:$4 sm:$0xff]   ;;  %v14745_v24 = vld [vmem:[#allocation5 + $0xc] ss:$16 sps:$4 sm:$0xff]  }
 0x2d7   :  { %4487 = vmatpush1.bf16.msra.mxu0 %v14704_v30  ;;  %4528 = vmatpush1.bf16.msra.mxu1 %v14707_v43 }
 0x2d8   :  { %4488 = vmatprep.subr.bf16.mxu0 %v14712_v26  ;;  %4529 = vmatprep.subr.bf16.mxu1 %v14715_v51 }
 0x2db   :  { %4489 = vmatpush1.bf16.msra.mxu0 %v14710_v39  ;;  %4530 = vmatpush1.bf16.msra.mxu1 %v14713_v17 }
 0x2dc   :  { %4490 = vmatprep.subr.bf16.mxu0 %v14718_v23  ;;  %4531 = vmatprep.subr.bf16.mxu1 %v14721_v33 }
 0x2df   :  { %4491 = vmatpush1.bf16.msra.mxu0 %v14716_v62  ;;  %4532 = vmatpush1.bf16.msra.mxu1 %v14719_v60 }
 0x2e0   :  { %4492 = vmatprep.subr.bf16.mxu0 %v14724_v42  ;;  %4533 = vmatprep.subr.bf16.mxu1 %v14727_v34 }
 0x2e3   :  { %4493 = vmatpush1.bf16.msra.mxu0 %v14722_v48  ;;  %4534 = vmatpush1.bf16.msra.mxu1 %v14725_v4 }
 0x2e4   :  { %4494 = vmatprep.subr.bf16.mxu0 %v14730_v41  ;;  %4535 = vmatprep.subr.bf16.mxu1 %v14733_v2 }
 0x2e7   :  { %4495 = vmatpush1.bf16.msra.mxu0 %v14728_v20  ;;  %4536 = vmatpush1.bf16.msra.mxu1 %v14731_v52 }
 0x2e8   :  { %4496 = vmatprep.subr.bf16.mxu0 %v14736_v27  ;;  %4537 = vmatprep.subr.bf16.mxu1 %v14739_v29 }
 0x2eb   :  { %4497 = vmatpush1.bf16.msra.mxu0 %v14734_v22  ;;  %4538 = vmatpush1.bf16.msra.mxu1 %v14737_v31 }
 0x2ec   :  { %4970 = vmatprep.subr.bf16.mxu0 %v14742_v32  ;;  %5011 = vmatprep.subr.bf16.mxu1 %v14745_v24 }
 0x317   :  { %v3235_v37 = vpop.f32.mrb[40].mxu0  ;;  %v3276_v30 = vpop.f32.mrb[40].mxu1 }
 0x318   :  { %v3283_v43 = vadd.f32 %v3235_v37, %v16707_v45  ;;  %v3285_v26 = vadd.f32 %v3276_v30, %v16709_v47  ;;  %v3237_v51 = vpop.f32.mrb[41].mxu0  ;;  %v3278_v39 = vpop.f32.mrb[41].mxu1  ;;  %v14740_v30 = vld [vmem:[#allocation5] ss:$16 sps:$4 sm:$0xff]  }
 0x319   :  { %v3284_v17 = vadd.f32 %v3237_v51, %v16711_v49  ;;  %v3286_v23 = vadd.f32 %v3278_v39, %v16713_v50  ;;  %v3239_v33 = vpop.f32.mrb[42].mxu0  ;;  %v3280_v62 = vpop.f32.mrb[42].mxu1  ;;  %v14748_v51 = vld [vmem:[#allocation5 + $0x24] ss:$16 sps:$4 sm:$0xff]   ;;  %v14751_v39 = vld [vmem:[#allocation5 + $0x2c] ss:$16 sps:$4 sm:$0xff]  }
 0x31a   :  { %v3287_v60 = vmul.f32 0.5, %v3283_v43  ;;  %v3240_v42 = vpop.f32.mrb[43].mxu0  ;;  %v3281_v34 = vpop.f32.mrb[43].mxu1  ;;  %v3289_v4 = vmul.f32 0.5, %v3285_v26  ;;  %v14743_v43 = vld [vmem:[#allocation5 + $0x8] ss:$16 sps:$4 sm:$0xff]  }
 0x31b   :  { %v3288_v48 = vmul.f32 0.5, %v3284_v17  ;;  %v14749_v17 = vld [vmem:[#allocation5 + $0x28] ss:$16 sps:$4 sm:$0xff]   ;;  %v14757_v33 = vld [vmem:[#allocation5 + $0x4c] ss:$16 sps:$4 sm:$0xff]  }
 0x31c   :  { %16048 = vtanh.f32 %v3287_v60  ;;  %v14752_v62 = vld [vmem:[#allocation5 + $0x40] ss:$16 sps:$4 sm:$0xff]   ;;  %v14755_v60 = vld [vmem:[#allocation5 + $0x48] ss:$16 sps:$4 sm:$0xff]   ;;  %v14760_v42 = vld [vmem:[#allocation5 + $0x64] ss:$16 sps:$4 sm:$0xff]  }
 0x31d   :  { %16050 = vtanh.f32 %v3288_v48  ;;  %v14763_v34 = vld [vmem:[#allocation5 + $0x6c] ss:$16 sps:$4 sm:$0xff]   ;;  %v14758_v48 = vld [vmem:[#allocation5 + $0x60] ss:$16 sps:$4 sm:$0xff]  }
 0x31e   :  { %16052 = vtanh.f32 %v3286_v23  ;;  %v14754_v23 = vld [vmem:[#allocation5 + $0x44] ss:$16 sps:$4 sm:$0xff]  }
 0x31f   :  { %16054 = vtanh.f32 %v3289_v4  ;;  %v14761_v4 = vld [vmem:[#allocation5 + $0x68] ss:$16 sps:$4 sm:$0xff]  }
 0x326   :  { %v16049_v41 = vpop.eup %16048 }
 0x327   :  { %v3293_v45 = vmul.f32 0.5, %v16049_v41  ;;  %v16051_v2 = vpop.eup %16050  ;;  %v14766_v41 = vld [vmem:[#allocation5 + $0x84] ss:$16 sps:$4 sm:$0xff]  }
 0x328   :  { %v3294_v20 = vmul.f32 0.5, %v16051_v2  ;;  %v16053_v52 = vpop.eup %16052  ;;  %v14764_v2 = vld [vmem:[#allocation5 + $0x80] ss:$16 sps:$4 sm:$0xff]  }
 0x329   :  { %v3296_v47 = vadd.f32 0.5, %v3293_v45  ;;  %v16055_v22 = vpop.eup %16054  ;;  %v14769_v45 = vld [vmem:[#allocation5 + $0x8c] ss:$16 sps:$4 sm:$0xff]  }
 0x32a   :  { %v3297_v49 = vadd.f32 0.5, %v3294_v20  ;;  %v3295_v31 = vmul.f32 0.5, %v16055_v22  ;;  %v14772_v20 = vld [vmem:[#allocation5 + $0xa4] ss:$16 sps:$4 sm:$0xff]   ;;  %v14781_v22 = vld [vmem:[#allocation5 + $0xcc] ss:$16 sps:$4 sm:$0xff]  }
 0x32b   :  { %v3301_v27 = vmul.f32 %v16053_v52, %v3296_v47  ;;  %v14767_v47 = vld [vmem:[#allocation5 + $0x88] ss:$16 sps:$4 sm:$0xff]   ;;  %v14775_v52 = vld [vmem:[#allocation5 + $0xac] ss:$16 sps:$4 sm:$0xff]  }
 0x32c   :  { %v3300_v50 = vmul.f32 %v3297_v49, %v16929_v13  ;;  %v3298_v32 = vadd.f32 0.5, %v3295_v31  ;;  %v14746_v13 = vld [vmem:[#allocation5 + $0x20] ss:$16 sps:$4 sm:$0xff]  }
 0x32d   :  { %v14770_v49 = vld [vmem:[#allocation5 + $0xa0] ss:$16 sps:$4 sm:$0xff]  }
 0x32e   :  { %v17121_v29 = vadd.f32 %v3301_v27, %v3300_v50  ;;  %v14773_v27 = vld [vmem:[#allocation5 + $0xa8] ss:$16 sps:$4 sm:$0xff]   ;;  %v14778_v50 = vld [vmem:[#allocation5 + $0xc4] ss:$16 sps:$4 sm:$0xff]   ;;  %v14776_v31 = vld [vmem:[#allocation5 + $0xc0] ss:$16 sps:$4 sm:$0xff]  }
 0x330   :  { %16056 = vtanh.f32 %v17121_v29 }
 0x33a   :  { %v16057_v24 = vpop.eup %16056 }
 0x33b   :  { %v3304_v37 = vmul.f32 %v16057_v24, %v3298_v32  ;;  %v14779_v32 = vld [vmem:[#allocation5 + $0xc8] ss:$16 sps:$4 sm:$0xff]   ;;  %v14784_v24 = vld [vmem:[#allocation5 + $0xe4] ss:$16 sps:$4 sm:$0xff]  }
 0x33d   :  { %v17124_v26 = vpack.c.bf16 %v3304_v37, %v3304_v37  ;;  %v14787_v37 = vld [vmem:[#allocation5 + $0xec] ss:$16 sps:$4 sm:$0xff]  }
 0x33f   :  { %4515 = vmatmul.mubr.bf16.vlgmr.msra.gmra.mrb[52].mxu0 %v17124_v26  ;;  %4556 = vmatmul.mubr.bf16.vlgmr.msra.gmra.mrb[52].mxu1 %v17124_v26 }
 0x340   :  { %4971 = vmatpush1.bf16.msra.mxu0 %v14740_v30  ;;  %5012 = vmatpush1.bf16.msra.mxu1 %v14743_v43  ;;  %v14782_v30 = vld [vmem:[#allocation5 + $0xe0] ss:$16 sps:$4 sm:$0xff]   ;;  %v14785_v43 = vld [vmem:[#allocation5 + $0xe8] ss:$16 sps:$4 sm:$0xff]  }
 0x341   :  { %4972 = vmatprep.subr.bf16.mxu0 %v14748_v51  ;;  %5013 = vmatprep.subr.bf16.mxu1 %v14751_v39  ;;  %v14790_v51 = vld [vmem:[#allocation5 + $0x104] ss:$16 sps:$4 sm:$0xff]   ;;  %v14793_v39 = vld [vmem:[#allocation5 + $0x10c] ss:$16 sps:$4 sm:$0xff]  }
 0x344   :  { %4973 = vmatpush1.bf16.msra.mxu0 %v14746_v13  ;;  %5014 = vmatpush1.bf16.msra.mxu1 %v14749_v17  ;;  %v14788_v13 = vld [vmem:[#allocation5 + $0x100] ss:$16 sps:$4 sm:$0xff]   ;;  %v14791_v17 = vld [vmem:[#allocation5 + $0x108] ss:$16 sps:$4 sm:$0xff]  }
 0x345   :  { %4974 = vmatprep.subr.bf16.mxu0 %v14754_v23  ;;  %5015 = vmatprep.subr.bf16.mxu1 %v14757_v33 }
 0x348   :  { %4975 = vmatpush1.bf16.msra.mxu0 %v14752_v62  ;;  %5016 = vmatpush1.bf16.msra.mxu1 %v14755_v60  ;;  %v14796_v62 = vld [vmem:[#allocation5 + $0x124] ss:$16 sps:$4 sm:$0xff]   ;;  %v14799_v60 = vld [vmem:[#allocation5 + $0x12c] ss:$16 sps:$4 sm:$0xff]  }
 0x349   :  { %4976 = vmatprep.subr.bf16.mxu0 %v14760_v42  ;;  %5017 = vmatprep.subr.bf16.mxu1 %v14763_v34 }
 0x34c   :  { %4977 = vmatpush1.bf16.msra.mxu0 %v14758_v48  ;;  %5018 = vmatpush1.bf16.msra.mxu1 %v14761_v4 }
 0x34d   :  { %4978 = vmatprep.subr.bf16.mxu0 %v14766_v41  ;;  %5019 = vmatprep.subr.bf16.mxu1 %v14769_v45 }
 0x350   :  { %4979 = vmatpush1.bf16.msra.mxu0 %v14764_v2  ;;  %5020 = vmatpush1.bf16.msra.mxu1 %v14767_v47  ;;  %v14794_v2 = vld [vmem:[#allocation5 + $0x120] ss:$16 sps:$4 sm:$0xff]  }
 0x351   :  { %4980 = vmatprep.subr.bf16.mxu0 %v14772_v20  ;;  %5021 = vmatprep.subr.bf16.mxu1 %v14775_v52 }
 0x354   :  { %4981 = vmatpush1.bf16.msra.mxu0 %v14770_v49  ;;  %5022 = vmatpush1.bf16.msra.mxu1 %v14773_v27  ;;  %v14797_v49 = vld [vmem:[#allocation5 + $0x128] ss:$16 sps:$4 sm:$0xff]  }
 0x355   :  { %4982 = vmatprep.subr.bf16.mxu0 %v14778_v50  ;;  %5023 = vmatprep.subr.bf16.mxu1 %v14781_v22  ;;  %v14802_v50 = vld [vmem:[#allocation5 + $0x144] ss:$16 sps:$4 sm:$0xff]   ;;  %v14805_v22 = vld [vmem:[#allocation5 + $0x14c] ss:$16 sps:$4 sm:$0xff]  }
 0x358   :  { %4983 = vmatpush1.bf16.msra.mxu0 %v14776_v31  ;;  %5024 = vmatpush1.bf16.msra.mxu1 %v14779_v32  ;;  %v14800_v32 = vld [vmem:[#allocation5 + $0x140] ss:$16 sps:$4 sm:$0xff]  }
 0x359   :  { %4984 = vmatprep.subr.bf16.mxu0 %v14784_v24  ;;  %5025 = vmatprep.subr.bf16.mxu1 %v14787_v37  ;;  %v14803_v24 = vld [vmem:[#allocation5 + $0x148] ss:$16 sps:$4 sm:$0xff]   ;;  %v14808_v37 = vld [vmem:[#allocation5 + $0x164] ss:$16 sps:$4 sm:$0xff]  }
 0x35c   :  { %4985 = vmatpush1.bf16.msra.mxu0 %v14782_v30  ;;  %5026 = vmatpush1.bf16.msra.mxu1 %v14785_v43  ;;  %v14811_v30 = vld [vmem:[#allocation5 + $0x16c] ss:$16 sps:$4 sm:$0xff]  }
 0x35d   :  { %4986 = vmatprep.subr.bf16.mxu0 %v14790_v51  ;;  %5027 = vmatprep.subr.bf16.mxu1 %v14793_v39  ;;  %v14806_v51 = vld [vmem:[#allocation5 + $0x160] ss:$16 sps:$4 sm:$0xff]   ;;  %v14809_v39 = vld [vmem:[#allocation5 + $0x168] ss:$16 sps:$4 sm:$0xff]  }
 0x35f   :  { %v3723_v23 = vpop.f32.mrb[44].mxu0  ;;  %v3764_v33 = vpop.f32.mrb[44].mxu1 }
 0x360   :  { %v3724_v42 = vadd.f32 %v3723_v23, %v16770_v59  ;;  %v3725_v34 = vpop.f32.mrb[45].mxu0  ;;  %v3766_v48 = vpop.f32.mrb[45].mxu1  ;;  %4987 = vmatpush1.bf16.msra.mxu0 %v14788_v13  ;;  %5028 = vmatpush1.bf16.msra.mxu1 %v14791_v17  ;;  %v3765_v43 = vadd.f32 %v3764_v33, %v16782_v7  ;;  %v14814_v13 = vld [vmem:[#allocation5 + $0x184] ss:$16 sps:$4 sm:$0xff]   ;;  %v14817_v17 = vld [vmem:[#allocation5 + $0x18c] ss:$16 sps:$4 sm:$0xff]  }
 0x361   :  { %v3726_v4 = vadd.f32 %v3725_v34, %v16773_v0  ;;  %v3727_v41 = vpop.f32.mrb[46].mxu0  ;;  %v3768_v45 = vpop.f32.mrb[46].mxu1  ;;  %4988 = vmatprep.subr.bf16.mxu0 %v14796_v62  ;;  %5029 = vmatprep.subr.bf16.mxu1 %v14799_v60  ;;  %v3767_v31 = vadd.f32 %v3766_v48, %v16776_v5  ;;  %v14812_v60 = vld [vmem:[#allocation5 + $0x180] ss:$16 sps:$4 sm:$0xff]   ;;  %v14820_v48 = vld [vmem:[#allocation5 + $0x1a4] ss:$16 sps:$4 sm:$0xff]  }
 0x362   :  { %v3771_v47 = vmul.f32 0.5, %v3724_v42  ;;  %v3728_v20 = vpop.f32.mrb[47].mxu0  ;;  %v3769_v52 = vpop.f32.mrb[47].mxu1  ;;  %v3773_v23 = vmul.f32 0.5, %v3765_v43  ;;  %v14815_v42 = vld [vmem:[#allocation5 + $0x188] ss:$16 sps:$4 sm:$0xff]  }
 0x363   :  { %v3772_v27 = vmul.f32 0.5, %v3726_v4  ;;  %v14823_v4 = vld [vmem:[#allocation5 + $0x1ac] ss:$16 sps:$4 sm:$0xff]   ;;  %v14821_v20 = vld [vmem:[#allocation5 + $0x1a8] ss:$16 sps:$4 sm:$0xff]  }
 0x364   :  { %16058 = vtanh.f32 %v3771_v47  ;;  %4989 = vmatpush1.bf16.msra.mxu0 %v14794_v2  ;;  %5030 = vmatpush1.bf16.msra.mxu1 %v14797_v49  ;;  %v14818_v47 = vld [vmem:[#allocation5 + $0x1a0] ss:$16 sps:$4 sm:$0xff]  }
 0x365   :  { %16060 = vtanh.f32 %v3772_v27  ;;  %4990 = vmatprep.subr.bf16.mxu0 %v14802_v50  ;;  %5031 = vmatprep.subr.bf16.mxu1 %v14805_v22  ;;  %v14826_v27 = vld [vmem:[#allocation5 + $0x1c4] ss:$16 sps:$4 sm:$0xff]   ;;  %v14829_v50 = vld [vmem:[#allocation5 + $0x1cc] ss:$16 sps:$4 sm:$0xff]  }
 0x366   :  { %16062 = vtanh.f32 %v3767_v31  ;;  %v14824_v31 = vld [vmem:[#allocation5 + $0x1c0] ss:$16 sps:$4 sm:$0xff]  }
 0x367   :  { %16064 = vtanh.f32 %v3773_v23  ;;  %v14841_v23 = vld [vmem:[#allocation7 + $0xc] ss:$16 sps:$4 sm:$0xff]  }
 0x368   :  { %4991 = vmatpush1.bf16.msra.mxu0 %v14800_v32  ;;  %5032 = vmatpush1.bf16.msra.mxu1 %v14803_v24  ;;  %v14827_v32 = vld [vmem:[#allocation5 + $0x1c8] ss:$16 sps:$4 sm:$0xff]  }
 0x369   :  { %4992 = vmatprep.subr.bf16.mxu0 %v14808_v37  ;;  %5033 = vmatprep.subr.bf16.mxu1 %v14811_v30  ;;  %v14832_v37 = vld [vmem:[#allocation5 + $0x1e4] ss:$16 sps:$4 sm:$0xff]   ;;  %v14835_v30 = vld [vmem:[#allocation5 + $0x1ec] ss:$16 sps:$4 sm:$0xff]  }
 0x36c   :  { %4993 = vmatpush1.bf16.msra.mxu0 %v14806_v51  ;;  %5034 = vmatpush1.bf16.msra.mxu1 %v14809_v39  ;;  %v14830_v51 = vld [vmem:[#allocation5 + $0x1e0] ss:$16 sps:$4 sm:$0xff]   ;;  %v14833_v39 = vld [vmem:[#allocation5 + $0x1e8] ss:$16 sps:$4 sm:$0xff]  }
 0x36d   :  { %4994 = vmatprep.subr.bf16.mxu0 %v14814_v13  ;;  %5035 = vmatprep.subr.bf16.mxu1 %v14817_v17  ;;  %v14838_v17 = vld [vmem:[#allocation7 + $0x4] ss:$16 sps:$4 sm:$0xff]  }
 0x36e   :  { %v16059_v62 = vpop.eup %16058 }
 0x36f   :  { %v3777_v34 = vmul.f32 0.5, %v16059_v62  ;;  %v16061_v33 = vpop.eup %16060 }
 0x370   :  { %v3778_v45 = vmul.f32 0.5, %v16061_v33  ;;  %v16063_v2 = vpop.eup %16062  ;;  %4995 = vmatpush1.bf16.msra.mxu0 %v14812_v60  ;;  %5036 = vmatpush1.bf16.msra.mxu1 %v14815_v42 }
 0x371   :  { %v3780_v41 = vadd.f32 0.5, %v3777_v34  ;;  %4996 = vmatprep.subr.bf16.mxu0 %v14820_v48  ;;  %5037 = vmatprep.subr.bf16.mxu1 %v14823_v4  ;;  %v16065_v13 = vpop.eup %16064 }
 0x372   :  { %v3781_v52 = vadd.f32 0.5, %v3778_v45  ;;  %v3779_v60 = vmul.f32 0.5, %v16065_v13  ;;  %v14836_v45 = vld [vmem:[#allocation7] ss:$16 sps:$4 sm:$0xff]   ;;  %v14862_v13 = vld [vmem:[#allocation7 + $0x84] ss:$16 sps:$4 sm:$0xff]  }
 0x373   :  { %v3785_v49 = vmul.f32 %v16063_v2, %v3780_v41  ;;  %v14844_v2 = vld [vmem:[#allocation7 + $0x24] ss:$16 sps:$4 sm:$0xff]  }
 0x374   :  { %v3784_v22 = vmul.f32 %v3781_v52, %v16941_v9  ;;  %4997 = vmatpush1.bf16.msra.mxu0 %v14818_v47  ;;  %5038 = vmatpush1.bf16.msra.mxu1 %v14821_v20  ;;  %v3782_v42 = vadd.f32 0.5, %v3779_v60  ;;  %v14847_v47 = vld [vmem:[#allocation7 + $0x2c] ss:$16 sps:$4 sm:$0xff]   ;;  %v14845_v20 = vld [vmem:[#allocation7 + $0x28] ss:$16 sps:$4 sm:$0xff]  }
 0x375   :  { %4998 = vmatprep.subr.bf16.mxu0 %v14826_v27  ;;  %5039 = vmatprep.subr.bf16.mxu1 %v14829_v50  ;;  %v14850_v52 = vld [vmem:[#allocation7 + $0x44] ss:$16 sps:$4 sm:$0xff]   ;;  %v18524_v27 = vlaneseq }
 0x376   :  { %v3786_v24 = vadd.f32 %v3785_v49, %v3784_v22  ;;  %v14853_v49 = vld [vmem:[#allocation7 + $0x4c] ss:$16 sps:$4 sm:$0xff]   ;;  %v14848_v22 = vld [vmem:[#allocation7 + $0x40] ss:$16 sps:$4 sm:$0xff]  }
 0x377   :  { %v17150_v50 = vand.u32 127, %v18524_v27  ;;  %v14866_v27 = vld [vmem:[#allocation7 + $0xa0] ss:$16 sps:$4 sm:$0xff]  }
 0x378   :  { %16066 = vtanh.f32 %v3786_v24  ;;  %v3791_v43 = vsub.f32 %v3786_v24, %v16941_v9  ;;  %4999 = vmatpush1.bf16.msra.mxu0 %v14824_v31  ;;  %5040 = vmatpush1.bf16.msra.mxu1 %v14827_v32  ;;  %v14851_v31 = vld [vmem:[#allocation7 + $0x48] ss:$16 sps:$4 sm:$0xff]   ;;  %v14856_v32 = vld [vmem:[#allocation7 + $0x64] ss:$16 sps:$4 sm:$0xff]   ;;  %v14859_v24 = vld [vmem:[#allocation7 + $0x6c] ss:$16 sps:$4 sm:$0xff]  }
 0x379   :  { %5000 = vmatprep.subr.bf16.mxu0 %v14832_v37  ;;  %5041 = vmatprep.subr.bf16.mxu1 %v14835_v30  ;;  %v12203_v37 = vpop.permute.xlu0 %12202  ;;  %v12209_v30 = vpop.permute.xlu1 %12208 }
 0x37a   :  { %v17135_v62 = vadd.f32 %v3791_v43, %v16941_v9  ;;  %v14839_v9 = vld [vmem:[#allocation7 + $0x8] ss:$16 sps:$4 sm:$0xff]   ;;  %v14854_v43 = vld [vmem:[#allocation7 + $0x60] ss:$16 sps:$4 sm:$0xff]  }
 0x37c   :  { %5001 = vmatpush1.bf16.msra.mxu0 %v14830_v51  ;;  %5042 = vmatpush1.bf16.msra.mxu1 %v14833_v39  ;;  %v14857_v51 = vld [vmem:[#allocation7 + $0x68] ss:$16 sps:$4 sm:$0xff]   ;;  %v12262_v39 = vadd.s32 4294967280, %v17150_v50 }
 0x37d   :  { %5458 = vmatprep.subr.bf16.mxu0 %v14838_v17  ;;  %5499 = vmatprep.subr.bf16.mxu1 %v14841_v23  ;;  %v14865_v17 = vld [vmem:[#allocation7 + $0x8c] ss:$16 sps:$4 sm:$0xff]   ;;  %v17156_v23 = vsub.s32 %v17150_v50, %v16670_v21 }
 0x37f   :  { %18525 = vst [vmem:[#allocation22_spill] sm:$0xff] %v17156_v23 }
 0x382   :  { %v16067_v34 = vpop.eup %16066 }
 0x383   :  { %v3788_v48 = vmul.f32 %v16067_v34, %v3782_v42  ;;  %v12269_v42 = vadd.s32 4294967272, %v17150_v50  ;;  %v14860_v34 = vld [vmem:[#allocation7 + $0x80] ss:$16 sps:$4 sm:$0xff]  }
 0x385   :  { %v3789_v4 = vsub.f32 %v3788_v48, %v16945_v54  ;;  %v14863_v48 = vld [vmem:[#allocation7 + $0x88] ss:$16 sps:$4 sm:$0xff]  }
 0x387   :  { %v17139_v33 = vadd.f32 %v3789_v4, %v16945_v54  ;;  %v14842_v54 = vld [vmem:[#allocation7 + $0x20] ss:$16 sps:$4 sm:$0xff]   ;;  %v12265_v4 = vsub.s32 %v12262_v39, %v16670_v21 }
 0x389   :  { %v17143_v41 = vpack.c.bf16 %v17139_v33, %v17139_v33 }
 0x38b   :  { %5002 = vmatprep.mubr.bf16.mxu0 %v17143_v41  ;;  %5043 = vmatprep.mubr.bf16.mxu1 %v17143_v41 }
 0x38c   :  { %5003 = vmatmul.mubr.bf16.vlgmr.msra.gmra.mrb[56].mxu0 %v17124_v26  ;;  %5044 = vmatmul.mubr.bf16.vlgmr.msra.gmra.mrb[56].mxu1 %v17124_v26  ;;  %v12255_v26 = vadd.s32 4294967288, %v17150_v50 }
 0x38d   :  { %5459 = vmatpush1.bf16.msra.mxu0 %v14836_v45  ;;  %5500 = vmatpush1.bf16.msra.mxu1 %v14839_v9  ;;  %v12206_v45 = vpop.permute.xlu0 %12205  ;;  %v12212_v9 = vpop.permute.xlu1 %12211 }
 0x38e   :  { %5460 = vmatprep.subr.bf16.mxu0 %v14844_v2  ;;  %5501 = vmatprep.subr.bf16.mxu1 %v14847_v47  ;;  %v12258_v60 = vsub.s32 %v12255_v26, %v16670_v21  ;;  %v14868_v2 = vld [vmem:[#allocation7 + $0xa4] ss:$16 sps:$4 sm:$0xff]   ;;  %v14871_v47 = vld [vmem:[#allocation7 + $0xac] ss:$16 sps:$4 sm:$0xff]  }
 0x391   :  { %5461 = vmatpush1.bf16.msra.mxu0 %v14842_v54  ;;  %5502 = vmatpush1.bf16.msra.mxu1 %v14845_v20  ;;  %v12254_v54 = vrot.slane %v12203_v37, %v17156_v23  ;;  %v12259_v20 = vrot.slane %v12206_v45, %v12258_v60  ;;  %v12218_v39 = vpop.permute.xlu1 %12217  ;;  %v14872_v60 = vld [vmem:[#allocation7 + $0xc0] ss:$16 sps:$4 sm:$0xff]  }
 0x392   :  { %5462 = vmatprep.subr.bf16.mxu0 %v14850_v52  ;;  %5503 = vmatprep.subr.bf16.mxu1 %v14853_v49  ;;  %v12276_v52 = vadd.s32 4294967264, %v17150_v50  ;;  %v12272_v49 = vsub.s32 %v12269_v42, %v16670_v21 }
 0x393   :  { %v12261_v26 = vsel %vm12260_vm2, %v12259_v20, %v12254_v54  ;;  %vm12361_vm2 = vcmask 1042434  }
 0x394   :  { %v12279_v37 = vsub.s32 %v12276_v52, %v16670_v21  ;;  %v12273_v42 = vrot.slane %v12212_v9, %v12272_v49  ;;  %v14880_v52 = vld [vmem:[#allocation7 + $0xe4] ss:$16 sps:$4 sm:$0xff]   ;;  %v14883_v9 = vld [vmem:[#allocation7 + $0xec] ss:$16 sps:$4 sm:$0xff]  }
 0x395   :  { %5463 = vmatpush1.bf16.msra.mxu0 %v14848_v22  ;;  %5504 = vmatpush1.bf16.msra.mxu1 %v14851_v31  ;;  %v14869_v22 = vld [vmem:[#allocation7 + $0xa8] ss:$16 sps:$4 sm:$0xff]   ;;  %v12266_v31 = vrot.slane %v12209_v30, %v12265_v4 }
 0x396   :  { %5464 = vmatprep.subr.bf16.mxu0 %v14856_v32  ;;  %5505 = vmatprep.subr.bf16.mxu1 %v14859_v24  ;;  %v14874_v32 = vld [vmem:[#allocation7 + $0xc4] ss:$16 sps:$4 sm:$0xff]   ;;  %v14877_v24 = vld [vmem:[#allocation7 + $0xcc] ss:$16 sps:$4 sm:$0xff]   ;;  %v14875_v4 = vld [vmem:[#allocation7 + $0xc8] ss:$16 sps:$4 sm:$0xff]  }
 0x397   :  { %v12268_v45 = vsel %vm12267_vm3, %v12266_v31, %v12261_v26  ;;  %v12297_v31 = vadd.s32 4294967240, %v17150_v50  ;;  %vm12363_vm3 = vcmask 1043459  }
 0x398   :  { %v12275_v44 = vsel %vm12274_vm4, %v12273_v42, %v12268_v45  ;;  %vm12365_vm4 = vcmask 1044484  }
 0x399   :  { %5465 = vmatpush1.bf16.msra.mxu0 %v14854_v43  ;;  %5506 = vmatpush1.bf16.msra.mxu1 %v14857_v51  ;;  %v12283_v43 = vadd.s32 4294967256, %v17150_v50  ;;  %v12215_v51 = vpop.permute.xlu0 %12214 }
 0x39a   :  { %5466 = vmatprep.subr.bf16.mxu0 %v14862_v13  ;;  %5507 = vmatprep.subr.bf16.mxu1 %v14865_v17 }
 0x39b   :  { %v12286_v49 = vsub.s32 %v12283_v43, %v16670_v21  ;;  %v14889_v43 = vld [vmem:[#allocation7 + $0x10c] ss:$16 sps:$4 sm:$0xff]  }
 0x39d   :  { %5467 = vmatpush1.bf16.msra.mxu0 %v14860_v34  ;;  %5508 = vmatpush1.bf16.msra.mxu1 %v14863_v48 }
 0x39e   :  { %5468 = vmatprep.subr.bf16.mxu0 %v14868_v2  ;;  %5509 = vmatprep.subr.bf16.mxu1 %v14871_v47  ;;  %v12290_v2 = vadd.s32 4294967248, %v17150_v50 }
 0x3a1   :  { %v4211_v13 = vpop.f32.mrb[48].mxu0  ;;  %v4252_v17 = vpop.f32.mrb[48].mxu1  ;;  %5469 = vmatpush1.bf16.msra.mxu0 %v14866_v27  ;;  %5510 = vmatpush1.bf16.msra.mxu1 %v14869_v22  ;;  %v12280_v22 = vrot.slane %v12215_v51, %v12279_v37  ;;  %v12287_v37 = vrot.slane %v12218_v39, %v12286_v49  ;;  %v14892_v39 = vld [vmem:[#allocation7 + $0x124] ss:$16 sps:$4 sm:$0xff]   ;;  %v14890_v49 = vld [vmem:[#allocation7 + $0x120] ss:$16 sps:$4 sm:$0xff]  }
 0x3a2   :  { %v4212_v34 = vadd.f32 %v4211_v13, %v16802_v56  ;;  %v4213_v48 = vpop.f32.mrb[49].mxu0  ;;  %v4254_v30 = vpop.f32.mrb[49].mxu1  ;;  %5470 = vmatprep.subr.bf16.mxu0 %v14874_v32  ;;  %5511 = vmatprep.subr.bf16.mxu1 %v14877_v24  ;;  %v14878_v32 = vld [vmem:[#allocation7 + $0xe0] ss:$16 sps:$4 sm:$0xff]   ;;  %v14881_v24 = vld [vmem:[#allocation7 + $0xe8] ss:$16 sps:$4 sm:$0xff]  }
 0x3a3   :  { %v4214_v47 = vadd.f32 %v4213_v48, %v16805_v15  ;;  %v4215_v54 = vpop.f32.mrb[50].mxu0  ;;  %v4256_v20 = vpop.f32.mrb[50].mxu1  ;;  %v4255_v26 = vadd.f32 %v4254_v30, %v16808_v25  ;;  %v12293_v48 = vsub.s32 %v12290_v2, %v16670_v21  ;;  %v12282_v42 = vsel %vm12281_vm5, %v12280_v22, %v12275_v44 }
 0x3a4   :  { %v4259_v13 = vmul.f32 0.5, %v4212_v34  ;;  %v4216_v23 = vpop.f32.mrb[51].mxu0  ;;  %v4257_v27 = vpop.f32.mrb[51].mxu1  ;;  %v12304_v34 = vadd.s32 4294967232, %v17150_v50  ;;  %v12300_v30 = vsub.s32 %v12297_v31, %v16670_v21  ;;  %v12289_v54 = vsel %vm12288_vm6, %v12287_v37, %v12282_v42  ;;  %v14898_v31 = vld [vmem:[#allocation7 + $0x144] ss:$16 sps:$4 sm:$0xff]  }
 0x3a5   :  { %v4260_v46 = vmul.f32 0.5, %v4214_v47  ;;  %5471 = vmatpush1.bf16.msra.mxu0 %v14872_v60  ;;  %5512 = vmatpush1.bf16.msra.mxu1 %v14875_v4  ;;  %v14886_v23 = vld [vmem:[#allocation7 + $0x104] ss:$16 sps:$4 sm:$0xff]   ;;  %v12221_v51 = vpop.permute.xlu0 %12220  ;;  %v14884_v60 = vld [vmem:[#allocation7 + $0x100] ss:$16 sps:$4 sm:$0xff]   ;;  %v12224_v2 = vpop.permute.xlu1 %12223  ;;  %v4253_v47 = vadd.f32 %v4252_v17, %v16814_v12  ;;  %v12311_v44 = vadd.s32 4294967224, %v17150_v50 }
 0x3a6   :  { %16068 = vtanh.f32 %v4259_v13  ;;  %5472 = vmatprep.subr.bf16.mxu0 %v14880_v52  ;;  %5513 = vmatprep.subr.bf16.mxu1 %v14883_v9  ;;  %v14887_v4 = vld [vmem:[#allocation7 + $0x108] ss:$16 sps:$4 sm:$0xff]   ;;  %v12294_v45 = vrot.slane %v12221_v51, %v12293_v48  ;;  %v12307_v20 = vsub.s32 %v12304_v34, %v16670_v21  ;;  %v12301_v52 = vrot.slane %v12224_v2, %v12300_v30  ;;  %v14896_v34 = vld [vmem:[#allocation7 + $0x140] ss:$16 sps:$4 sm:$0xff]   ;;  %v14904_v2 = vld [vmem:[#allocation7 + $0x164] ss:$16 sps:$4 sm:$0xff]  }
 0x3a7   :  { %16070 = vtanh.f32 %v4260_v46  ;;  %v14895_v46 = vld [vmem:[#allocation7 + $0x12c] ss:$16 sps:$4 sm:$0xff]   ;;  %v14893_v13 = vld [vmem:[#allocation7 + $0x128] ss:$16 sps:$4 sm:$0xff]   ;;  %v12318_v17 = vadd.s32 4294967216, %v17150_v50  ;;  %v4261_v22 = vmul.f32 0.5, %v4253_v47 }
 0x3a8   :  { %16072 = vtanh.f32 %v4255_v26  ;;  %v12296_v27 = vsel %vm12295_vm7, %v12294_v45, %v12289_v54  ;;  %v14901_v26 = vld [vmem:[#allocation7 + $0x14c] ss:$16 sps:$4 sm:$0xff]   ;;  %v12325_v51 = vadd.s32 4294967208, %v17150_v50  ;;  %v14899_v30 = vld [vmem:[#allocation7 + $0x148] ss:$16 sps:$4 sm:$0xff]   ;;  %vm12367_vm5 = vcmask 1045509  }
 0x3a9   :  { %5473 = vmatpush1.bf16.msra.mxu0 %v14878_v32  ;;  %5514 = vmatpush1.bf16.msra.mxu1 %v14881_v24  ;;  %v12227_v9 = vpop.permute.xlu0 %12226  ;;  %v12314_v32 = vsub.s32 %v12311_v44, %v16670_v21  ;;  %v12303_v37 = vsel %vm12302_vm8, %v12301_v52, %v12296_v27  ;;  %16074 = vtanh.f32 %v4261_v22  ;;  %v14907_v47 = vld [vmem:[#allocation7 + $0x16c] ss:$16 sps:$4 sm:$0xff]   ;;  %v14905_v27 = vld [vmem:[#allocation7 + $0x168] ss:$16 sps:$4 sm:$0xff]   ;;  %vm12369_vm6 = vcmask 1046534  }
 0x3aa   :  { %5474 = vmatprep.subr.bf16.mxu0 %v14886_v23  ;;  %5515 = vmatprep.subr.bf16.mxu1 %v14889_v43  ;;  %v12308_v48 = vrot.slane %v12227_v9, %v12307_v20  ;;  %v12230_v23 = vpop.permute.xlu1 %12229  ;;  %v12332_v20 = vadd.s32 4294967200, %v17150_v50  ;;  %vm12371_vm7 = vcmask 1047559  }
 0x3ac   :  { %v12310_v44 = vsel %vm12309_vm9, %v12308_v48, %v12303_v37  ;;  %v12339_v48 = vadd.s32 4294967192, %v17150_v50  ;;  %vm12459_vm9 = vcmask 64512  }
 0x3ad   :  { %5475 = vmatpush1.bf16.msra.mxu0 %v14884_v60  ;;  %5516 = vmatpush1.bf16.msra.mxu1 %v14887_v4  ;;  %v12321_v60 = vsub.s32 %v12318_v17, %v16670_v21 }
 0x3ae   :  { %5476 = vmatprep.subr.bf16.mxu0 %v14892_v39  ;;  %5517 = vmatprep.subr.bf16.mxu1 %v14895_v46  ;;  %v12315_v39 = vrot.slane %v12230_v23, %v12314_v32  ;;  %v12233_v46 = vpop.permute.xlu0 %12232  ;;  %v12236_v22 = vpop.permute.xlu1 %12235  ;;  %v14910_v32 = vld [vmem:[#allocation7 + $0x184] ss:$16 sps:$4 sm:$0xff]   ;;  %v12335_v23 = vsub.s32 %v12332_v20, %v16670_v21  ;;  %v12353_v20 = vadd.s32 4294967176, %v17150_v50 }
 0x3af   :  { %v12322_v17 = vrot.slane %v12233_v46, %v12321_v60  ;;  %v12346_v60 = vadd.s32 4294967184, %v17150_v50 }
 0x3b0   :  { %v16069_v24 = vpop.eup %16068  ;;  %v12356_v50 = vsub.s32 %v12353_v20, %v16670_v21 }
 0x3b1   :  { %v4265_v43 = vmul.f32 0.5, %v16069_v24  ;;  %v16071_v42 = vpop.eup %16070  ;;  %5477 = vmatpush1.bf16.msra.mxu0 %v14890_v49  ;;  %5518 = vmatpush1.bf16.msra.mxu1 %v14893_v13  ;;  %v12328_v49 = vsub.s32 %v12325_v51, %v16670_v21  ;;  %v14902_v13 = vld [vmem:[#allocation7 + $0x160] ss:$16 sps:$4 sm:$0xff]   ;;  %v14913_v24 = vld [vmem:[#allocation7 + $0x18c] ss:$16 sps:$4 sm:$0xff]  }
 0x3b2   :  { %v4266_v45 = vmul.f32 0.5, %v16071_v42  ;;  %5478 = vmatprep.subr.bf16.mxu0 %v14898_v31  ;;  %5519 = vmatprep.subr.bf16.mxu1 %v14901_v26  ;;  %v16073_v54 = vpop.eup %16072  ;;  %v12317_v26 = vsel %vm12316_vm10, %v12315_v39, %v12310_v44  ;;  %v12239_v51 = vpop.permute.xlu0 %12238 }
 0x3b3   :  { %v4268_v4 = vadd.f32 0.5, %v4265_v43  ;;  %v12329_v37 = vrot.slane %v12236_v22, %v12328_v49  ;;  %v12324_v42 = vsel %vm12323_vm11, %v12322_v17, %v12317_v26  ;;  %v12336_v39 = vrot.slane %v12239_v51, %v12335_v23  ;;  %v12242_v46 = vpop.permute.xlu1 %12241  ;;  %v14917_v49 = vld [vmem:[#allocation7 + $0x1a8] ss:$16 sps:$4 sm:$0xff]   ;;  %v14922_v22 = vld [vmem:[#allocation7 + $0x1c4] ss:$16 sps:$4 sm:$0xff]  }
 0x3b4   :  { %v4269_v52 = vadd.f32 0.5, %v4266_v45  ;;  %v14919_v45 = vld [vmem:[#allocation7 + $0x1ac] ss:$16 sps:$4 sm:$0xff]  }
 0x3b5   :  { %v4273_v9 = vmul.f32 %v16073_v54, %v4268_v4  ;;  %5479 = vmatpush1.bf16.msra.mxu0 %v14896_v34  ;;  %5520 = vmatpush1.bf16.msra.mxu1 %v14899_v30  ;;  %v14908_v34 = vld [vmem:[#allocation7 + $0x180] ss:$16 sps:$4 sm:$0xff]   ;;  %v14911_v30 = vld [vmem:[#allocation7 + $0x188] ss:$16 sps:$4 sm:$0xff]   ;;  %v14916_v4 = vld [vmem:[#allocation7 + $0x1a4] ss:$16 sps:$4 sm:$0xff]   ;;  %v16075_v54 = vpop.eup %16074  ;;  %v12331_v44 = vsel %vm12330_vm12, %v12329_v37, %v12324_v42 }
 0x3b6   :  { %v4272_v31 = vmul.f32 %v4269_v52, %v16990_v28  ;;  %5480 = vmatprep.subr.bf16.mxu0 %v14904_v2  ;;  %5521 = vmatprep.subr.bf16.mxu1 %v14907_v47  ;;  %v12342_v2 = vsub.s32 %v12339_v48, %v16670_v21  ;;  %v12245_v17 = vpop.permute.xlu0 %12244  ;;  %v4267_v26 = vmul.f32 0.5, %v16075_v54  ;;  %v14923_v48 = vld [vmem:[#allocation7 + $0x1c8] ss:$16 sps:$4 sm:$0xff]   ;;  %v14928_v37 = vld [vmem:[#allocation7 + $0x1e4] ss:$16 sps:$4 sm:$0xff]  }
 0x3b7   :  { %v12248_v23 = vpop.permute.xlu1 %12247  ;;  %v14931_v51 = vld [vmem:[#allocation7 + $0x1ec] ss:$16 sps:$4 sm:$0xff]  }
 0x3b8   :  { %v4274_v43 = vadd.f32 %v4273_v9, %v4272_v31  ;;  %v14914_v9 = vld [vmem:[#allocation7 + $0x1a0] ss:$16 sps:$4 sm:$0xff]   ;;  %v14925_v31 = vld [vmem:[#allocation7 + $0x1cc] ss:$16 sps:$4 sm:$0xff]   ;;  %v4270_v42 = vadd.f32 0.5, %v4267_v26 }
 0x3b9   :  { %5481 = vmatpush1.bf16.msra.mxu0 %v14902_v13  ;;  %5522 = vmatpush1.bf16.msra.mxu1 %v14905_v27  ;;  %v12349_v13 = vsub.s32 %v12346_v60, %v16670_v21  ;;  %v12343_v27 = vrot.slane %v12242_v46, %v12342_v2  ;;  %v14944_v26 = vld [vmem:[%s18407_s3 + $0x40] ss:$16 sps:$4 sm:$0xff]  }
 0x3ba   :  { %16076 = vtanh.f32 %v4274_v43  ;;  %5482 = vmatprep.subr.bf16.mxu0 %v14910_v32  ;;  %5523 = vmatprep.subr.bf16.mxu1 %v14913_v24  ;;  %v4279_v47 = vsub.f32 %v4274_v43, %v16990_v28  ;;  %v12338_v32 = vsel %vm12337_vm13, %v12336_v39, %v12331_v44  ;;  %v14920_v24 = vld [vmem:[#allocation7 + $0x1c0] ss:$16 sps:$4 sm:$0xff]   ;;  %v14937_v39 = vld [vmem:[%s18407_s3 + $0xc] ss:$16 sps:$4 sm:$0xff]  }
 0x3bb   :  { %v12345_v43 = vsel %vm12344_vm14, %v12343_v27, %v12338_v32  ;;  %v14943_v27 = vld [vmem:[%s18407_s3 + $0x2c] ss:$16 sps:$4 sm:$0xff]   ;;  %v14947_v32 = vld [vmem:[%s18407_s3 + $0x48] ss:$16 sps:$4 sm:$0xff]   ;;  %v17908_v21 = vld [vmem:[#allocation5 + $0x160] ss:$16 sps:$4 sm:$0xff]  }
 0x3bc   :  { %v17196_v52 = vadd.f32 %v4279_v47, %v16990_v28  ;;  %v12350_v28 = vrot.slane %v12245_v17, %v12349_v13  ;;  %v14934_v47 = vld [vmem:[%s18407_s3 + $0x4] ss:$16 sps:$4 sm:$0xff]   ;;  %v14935_v13 = vld [vmem:[%s18407_s3 + $0x8] ss:$16 sps:$4 sm:$0xff]   ;;  %v14938_v17 = vld [vmem:[%s18407_s3 + $0x20] ss:$16 sps:$4 sm:$0xff]  }
 0x3bd   :  { %5483 = vmatpush1.bf16.msra.mxu0 %v14908_v34  ;;  %5524 = vmatpush1.bf16.msra.mxu1 %v14911_v30  ;;  %v12357_v30 = vrot.slane %v12248_v23, %v12356_v50  ;;  %v14952_v50 = vld [vmem:[%s18407_s3 + $0x64] ss:$16 sps:$4 sm:$0xff]   ;;  %18541 = vst [vmem:[#allocation38_spill] sm:$0xff] %v17908_v21 }
 0x3be   :  { %5484 = vmatprep.subr.bf16.mxu0 %v14916_v4  ;;  %5525 = vmatprep.subr.bf16.mxu1 %v14919_v45  ;;  %v12352_v60 = vsel %vm12351_vm15, %v12350_v28, %v12345_v43  ;;  %v14926_v4 = vld [vmem:[#allocation7 + $0x1e0] ss:$16 sps:$4 sm:$0xff]   ;;  %v14929_v45 = vld [vmem:[#allocation7 + $0x1e8] ss:$16 sps:$4 sm:$0xff]  }
 0x3bf   :  { %v17207_v54 = vsel %vm12358_vm0, %v12357_v30, %v12352_v60  ;;  %v14955_v28 = vld [vmem:[%s18407_s3 + $0x6c] ss:$16 sps:$4 sm:$0xff]   ;;  %v14958_v23 = vld [vmem:[%s18407_s3 + $0x84] ss:$16 sps:$4 sm:$0xff]   ;;  %v14962_v30 = vld [vmem:[%s18407_s3 + $0xa0] ss:$16 sps:$4 sm:$0xff]  }
 0x3c0   :  { %v14961_v43 = vld [vmem:[%s18407_s3 + $0x8c] ss:$16 sps:$4 sm:$0xff]   ;;  %v14965_v60 = vld [vmem:[%s18407_s3 + $0xa8] ss:$16 sps:$4 sm:$0xff]  }
 0x3c1   :  { %5485 = vmatpush1.bf16.msra.mxu0 %v14914_v9  ;;  %5526 = vmatpush1.bf16.msra.mxu1 %v14917_v49  ;;  %v14932_v49 = vld [vmem:[%s18407_s3] ss:$16 sps:$4 sm:$0xff]  }
 0x3c2   :  { %5486 = vmatprep.subr.bf16.mxu0 %v14922_v22  ;;  %5527 = vmatprep.subr.bf16.mxu1 %v14925_v31  ;;  %v14941_v22 = vld [vmem:[%s18407_s3 + $0x28] ss:$16 sps:$4 sm:$0xff]   ;;  %v14946_v31 = vld [vmem:[%s18407_s3 + $0x44] ss:$16 sps:$4 sm:$0xff]  }
 0x3c4   :  { %v16077_v34 = vpop.eup %16076 }
 0x3c5   :  { %5487 = vmatpush1.bf16.msra.mxu0 %v14920_v24  ;;  %5528 = vmatpush1.bf16.msra.mxu1 %v14923_v48  ;;  %v4276_v2 = vmul.f32 %v16077_v34, %v4270_v42  ;;  %v14950_v24 = vld [vmem:[%s18407_s3 + $0x60] ss:$16 sps:$4 sm:$0xff]   ;;  %v14953_v48 = vld [vmem:[%s18407_s3 + $0x68] ss:$16 sps:$4 sm:$0xff]   ;;  %v14964_v42 = vld [vmem:[%s18407_s3 + $0xa4] ss:$16 sps:$4 sm:$0xff]  }
 0x3c6   :  { %5488 = vmatprep.subr.bf16.mxu0 %v14928_v37  ;;  %5529 = vmatprep.subr.bf16.mxu1 %v14931_v51  ;;  %v14956_v37 = vld [vmem:[%s18407_s3 + $0x80] ss:$16 sps:$4 sm:$0xff]   ;;  %v14959_v51 = vld [vmem:[%s18407_s3 + $0x88] ss:$16 sps:$4 sm:$0xff]   ;;  %v14967_v34 = vld [vmem:[%s18407_s3 + $0xac] ss:$16 sps:$4 sm:$0xff]  }
 0x3c7   :  { %v4277_v46 = vsub.f32 %v4276_v2, %v17018_v38  ;;  %v14968_v2 = vld [vmem:[%s18407_s3 + $0xc0] ss:$16 sps:$4 sm:$0xff]  }
 0x3c9   :  { %5489 = vmatpush1.bf16.msra.mxu0 %v14926_v4  ;;  %5530 = vmatpush1.bf16.msra.mxu1 %v14929_v45  ;;  %v17210_v44 = vadd.f32 %v4277_v46, %v17018_v38  ;;  %v14940_v38 = vld [vmem:[%s18407_s3 + $0x24] ss:$16 sps:$4 sm:$0xff]   ;;  %v14973_v45 = vld [vmem:[%s18407_s3 + $0xcc] ss:$16 sps:$4 sm:$0xff]  }
 0x3ca   :  { %5764 = vmatprep.subr.bf16.mxu0 %v14934_v47  ;;  %5805 = vmatprep.subr.bf16.mxu1 %v14937_v39  ;;  %v14970_v4 = vld [vmem:[%s18407_s3 + $0xc4] ss:$16 sps:$4 sm:$0xff]   ;;  %v14971_v47 = vld [vmem:[%s18407_s3 + $0xc8] ss:$16 sps:$4 sm:$0xff]   ;;  %v14979_v46 = vld [vmem:[%s18407_s3 + $0xec] ss:$16 sps:$4 sm:$0xff]  }
 0x3cb   :  { %v12374_v20 = vmul.f32 %v17207_v54, %v17210_v44  ;;  %v4284_v9 = vpack.c.bf16 %v17210_v44, %v17210_v44  ;;  %v14976_v39 = vld [vmem:[%s18407_s3 + $0xe4] ss:$16 sps:$4 sm:$0xff]  }
 0x3cd   :  { %12382 = vadd.xlane.f32.xlu0 %v12374_v20  ;;  %5490 = vmatprep.mubr.bf16.mxu0 %v4284_v9  ;;  %v14974_v20 = vld [vmem:[%s18407_s3 + $0xe0] ss:$16 sps:$4 sm:$0xff]  }
 0x3ce   :  { %5531 = vmatprep.mubr.bf16.mxu1 %v4284_v9  ;;  %5491 = vmatmul.mubr.bf16.vlgmr.msra.gmra.mrb[60].mxu0 %v17143_v41  ;;  %v14977_v9 = vld [vmem:[%s18407_s3 + $0xe8] ss:$16 sps:$4 sm:$0xff]  }
 0x3cf   :  { %5532 = vmatmul.mubr.bf16.vlgmr.msra.gmra.mrb[60].mxu1 %v17143_v41  ;;  %5765 = vmatpush1.bf16.msra.mxu0 %v14932_v49  ;;  %v14949_v41 = vld [vmem:[%s18407_s3 + $0x4c] ss:$16 sps:$4 sm:$0xff]   ;;  %v14982_v49 = vld [vmem:[#allocation5 + $0x4] ss:$16 sps:$4 sm:$0xff]  }
 0x3d0   :  { %5806 = vmatpush1.bf16.msra.mxu1 %v14935_v13  ;;  %5766 = vmatprep.subr.bf16.mxu0 %v14940_v38  ;;  %v14985_v13 = vld [vmem:[#allocation5 + $0xc] ss:$16 sps:$4 sm:$0xff]  }
 0x3d1   :  { %5807 = vmatprep.subr.bf16.mxu1 %v14943_v27  ;;  %5796 = vmatprep.mubr.bf16.mxu0 %v18523_v35 }
 0x3d2   :  { %5837 = vmatprep.mubr.bf16.mxu1 %v18523_v35 }
 0x3d3   :  { %5767 = vmatpush1.bf16.msra.mxu0 %v14938_v17 }
 0x3d4   :  { %5808 = vmatpush1.bf16.msra.mxu1 %v14941_v22  ;;  %5768 = vmatprep.subr.bf16.mxu0 %v14946_v31 }
 0x3d5   :  { %5809 = vmatprep.subr.bf16.mxu1 %v14949_v41 }
 0x3d7   :  { %5769 = vmatpush1.bf16.msra.mxu0 %v14944_v26 }
 0x3d8   :  { %5810 = vmatpush1.bf16.msra.mxu1 %v14947_v32  ;;  %5770 = vmatprep.subr.bf16.mxu0 %v14952_v50 }
 0x3d9   :  { %5811 = vmatprep.subr.bf16.mxu1 %v14955_v28 }
 0x3db   :  { %5771 = vmatpush1.bf16.msra.mxu0 %v14950_v24 }
 0x3dc   :  { %5812 = vmatpush1.bf16.msra.mxu1 %v14953_v48  ;;  %5772 = vmatprep.subr.bf16.mxu0 %v14958_v23 }
 0x3dd   :  { %5813 = vmatprep.subr.bf16.mxu1 %v14961_v43 }
 0x3df   :  { %5773 = vmatpush1.bf16.msra.mxu0 %v14956_v37 }
 0x3e0   :  { %5814 = vmatpush1.bf16.msra.mxu1 %v14959_v51  ;;  %5774 = vmatprep.subr.bf16.mxu0 %v14964_v42 }
 0x3e1   :  { %5815 = vmatprep.subr.bf16.mxu1 %v14967_v34 }
 0x3e3   :  { %5775 = vmatpush1.bf16.msra.mxu0 %v14962_v30 }
 0x3e4   :  { %5816 = vmatpush1.bf16.msra.mxu1 %v14965_v60  ;;  %5776 = vmatprep.subr.bf16.mxu0 %v14970_v4 }
 0x3e5   :  { %5817 = vmatprep.subr.bf16.mxu1 %v14973_v45 }
 0x3e7   :  { %5777 = vmatpush1.bf16.msra.mxu0 %v14968_v2 }
 0x3e8   :  { %5818 = vmatpush1.bf16.msra.mxu1 %v14971_v47  ;;  %5778 = vmatprep.subr.bf16.mxu0 %v14976_v39 }
 0x3e9   :  { %5819 = vmatprep.subr.bf16.mxu1 %v14979_v46 }
 0x3eb   :  { %5779 = vmatpush1.bf16.msra.mxu0 %v14974_v20  ;;  %v14980_v20 = vld [vmem:[#allocation5] ss:$16 sps:$4 sm:$0xff]  }
 0x3ec   :  { %5820 = vmatpush1.bf16.msra.mxu1 %v14977_v9  ;;  %6252 = vmatprep.subr.bf16.mxu0 %v14982_v49  ;;  %v14983_v9 = vld [vmem:[#allocation5 + $0x8] ss:$16 sps:$4 sm:$0xff]  }
 0x3ed   :  { %6293 = vmatprep.subr.bf16.mxu1 %v14985_v13  ;;  %v14988_v13 = vld [vmem:[#allocation5 + $0x24] ss:$16 sps:$4 sm:$0xff]  }
 0x412   :  { %v4516_v38 = vpop.f32.mrb[52].mxu0  ;;  %v4557_v27 = vpop.f32.mrb[52].mxu1 }
 0x413   :  { %v4564_v17 = vadd.f32 %v4516_v38, %v16715_v53  ;;  %v4566_v22 = vadd.f32 %v4557_v27, %v16717_v55  ;;  %v4518_v31 = vpop.f32.mrb[53].mxu0  ;;  %v4559_v41 = vpop.f32.mrb[53].mxu1  ;;  %v14991_v38 = vld [vmem:[#allocation5 + $0x2c] ss:$16 sps:$4 sm:$0xff]   ;;  %v14989_v27 = vld [vmem:[#allocation5 + $0x28] ss:$16 sps:$4 sm:$0xff]  }
 0x414   :  { %v4565_v26 = vadd.f32 %v4518_v31, %v16719_v57  ;;  %v4567_v32 = vadd.f32 %v4559_v41, %v16721_v58  ;;  %v4520_v50 = vpop.f32.mrb[54].mxu0  ;;  %v4561_v28 = vpop.f32.mrb[54].mxu1  ;;  %v14992_v31 = vld [vmem:[#allocation5 + $0x40] ss:$16 sps:$4 sm:$0xff]   ;;  %v14995_v41 = vld [vmem:[#allocation5 + $0x48] ss:$16 sps:$4 sm:$0xff]  }
 0x415   :  { %v4568_v24 = vmul.f32 0.5, %v4564_v17  ;;  %v4521_v48 = vpop.f32.mrb[55].mxu0  ;;  %v4562_v23 = vpop.f32.mrb[55].mxu1  ;;  %v4570_v37 = vmul.f32 0.5, %v4566_v22  ;;  %v14994_v17 = vld [vmem:[#allocation5 + $0x44] ss:$16 sps:$4 sm:$0xff]  }
 0x416   :  { %v4569_v43 = vmul.f32 0.5, %v4565_v26  ;;  %v14997_v22 = vld [vmem:[#allocation5 + $0x4c] ss:$16 sps:$4 sm:$0xff]   ;;  %v15000_v26 = vld [vmem:[#allocation5 + $0x64] ss:$16 sps:$4 sm:$0xff]  }
 0x417   :  { %16078 = vtanh.f32 %v4568_v24  ;;  %v14998_v50 = vld [vmem:[#allocation5 + $0x60] ss:$16 sps:$4 sm:$0xff]   ;;  %v15001_v28 = vld [vmem:[#allocation5 + $0x68] ss:$16 sps:$4 sm:$0xff]   ;;  %v15006_v24 = vld [vmem:[#allocation5 + $0x84] ss:$16 sps:$4 sm:$0xff]  }
 0x418   :  { %16080 = vtanh.f32 %v4569_v43  ;;  %v15009_v48 = vld [vmem:[#allocation5 + $0x8c] ss:$16 sps:$4 sm:$0xff]   ;;  %v15004_v23 = vld [vmem:[#allocation5 + $0x80] ss:$16 sps:$4 sm:$0xff]   ;;  %v15007_v43 = vld [vmem:[#allocation5 + $0x88] ss:$16 sps:$4 sm:$0xff]  }
 0x419   :  { %16082 = vtanh.f32 %v4567_v32  ;;  %v15003_v32 = vld [vmem:[#allocation5 + $0x6c] ss:$16 sps:$4 sm:$0xff]  }
 0x41a   :  { %16084 = vtanh.f32 %v4570_v37  ;;  %v15012_v37 = vld [vmem:[#allocation5 + $0xa4] ss:$16 sps:$4 sm:$0xff]  }
 0x421   :  { %v16079_v51 = vpop.eup %16078 }
 0x422   :  { %v4574_v53 = vmul.f32 0.5, %v16079_v51  ;;  %v16081_v42 = vpop.eup %16080  ;;  %v15015_v51 = vld [vmem:[#allocation5 + $0xac] ss:$16 sps:$4 sm:$0xff]  }
 0x423   :  { %v4575_v34 = vmul.f32 0.5, %v16081_v42  ;;  %v16083_v30 = vpop.eup %16082  ;;  %v15013_v42 = vld [vmem:[#allocation5 + $0xa8] ss:$16 sps:$4 sm:$0xff]  }
 0x424   :  { %v4577_v55 = vadd.f32 0.5, %v4574_v53  ;;  %v16085_v45 = vpop.eup %16084  ;;  %v15010_v53 = vld [vmem:[#allocation5 + $0xa0] ss:$16 sps:$4 sm:$0xff]  }
 0x425   :  { %v4578_v57 = vadd.f32 0.5, %v4575_v34  ;;  %v4576_v2 = vmul.f32 0.5, %v16085_v45  ;;  %v15021_v34 = vld [vmem:[#allocation5 + $0xcc] ss:$16 sps:$4 sm:$0xff]   ;;  %v15022_v45 = vld [vmem:[#allocation5 + $0xe0] ss:$16 sps:$4 sm:$0xff]  }
 0x426   :  { %v4582_v60 = vmul.f32 %v16083_v30, %v4577_v55  ;;  %v15018_v55 = vld [vmem:[#allocation5 + $0xc4] ss:$16 sps:$4 sm:$0xff]   ;;  %v15016_v30 = vld [vmem:[#allocation5 + $0xc0] ss:$16 sps:$4 sm:$0xff]  }
 0x427   :  { %v4581_v58 = vmul.f32 %v4578_v57, %v17121_v29  ;;  %v4579_v47 = vadd.f32 0.5, %v4576_v2  ;;  %v14986_v29 = vld [vmem:[#allocation5 + $0x20] ss:$16 sps:$4 sm:$0xff]   ;;  %v15019_v57 = vld [vmem:[#allocation5 + $0xc8] ss:$16 sps:$4 sm:$0xff]  }
 0x428   :  { %v15025_v2 = vld [vmem:[#allocation5 + $0xe8] ss:$16 sps:$4 sm:$0xff]  }
 0x429   :  { %v17315_v4 = vadd.f32 %v4582_v60, %v4581_v58  ;;  %v15024_v60 = vld [vmem:[#allocation5 + $0xe4] ss:$16 sps:$4 sm:$0xff]   ;;  %v15027_v58 = vld [vmem:[#allocation5 + $0xec] ss:$16 sps:$4 sm:$0xff]  }
 0x42b   :  { %16086 = vtanh.f32 %v17315_v4 }
 0x435   :  { %v16087_v39 = vpop.eup %16086 }
 0x436   :  { %v4585_v46 = vmul.f32 %v16087_v39, %v4579_v47  ;;  %v15030_v47 = vld [vmem:[#allocation5 + $0x104] ss:$16 sps:$4 sm:$0xff]   ;;  %v15033_v39 = vld [vmem:[#allocation5 + $0x10c] ss:$16 sps:$4 sm:$0xff]  }
 0x438   :  { %v17318_v49 = vpack.c.bf16 %v4585_v46, %v4585_v46  ;;  %v15028_v46 = vld [vmem:[#allocation5 + $0x100] ss:$16 sps:$4 sm:$0xff]  }
 0x43a   :  { %5797 = vmatmul.mubr.bf16.vlgmr.msra.gmra.mrb[64].mxu0 %v17318_v49  ;;  %5838 = vmatmul.mubr.bf16.vlgmr.msra.gmra.mrb[64].mxu1 %v17318_v49 }
 0x43b   :  { %6253 = vmatpush1.bf16.msra.mxu0 %v14980_v20  ;;  %6294 = vmatpush1.bf16.msra.mxu1 %v14983_v9  ;;  %v15031_v20 = vld [vmem:[#allocation5 + $0x108] ss:$16 sps:$4 sm:$0xff]   ;;  %v15036_v9 = vld [vmem:[#allocation5 + $0x124] ss:$16 sps:$4 sm:$0xff]  }
 0x43c   :  { %6254 = vmatprep.subr.bf16.mxu0 %v14988_v13  ;;  %6295 = vmatprep.subr.bf16.mxu1 %v14991_v38  ;;  %v15039_v13 = vld [vmem:[#allocation5 + $0x12c] ss:$16 sps:$4 sm:$0xff]   ;;  %v15034_v38 = vld [vmem:[#allocation5 + $0x120] ss:$16 sps:$4 sm:$0xff]  }
 0x43f   :  { %6255 = vmatpush1.bf16.msra.mxu0 %v14986_v29  ;;  %6296 = vmatpush1.bf16.msra.mxu1 %v14989_v27  ;;  %v15037_v29 = vld [vmem:[#allocation5 + $0x128] ss:$16 sps:$4 sm:$0xff]   ;;  %v15042_v27 = vld [vmem:[#allocation5 + $0x144] ss:$16 sps:$4 sm:$0xff]  }
 0x440   :  { %6256 = vmatprep.subr.bf16.mxu0 %v14994_v17  ;;  %6297 = vmatprep.subr.bf16.mxu1 %v14997_v22  ;;  %v15045_v17 = vld [vmem:[#allocation5 + $0x14c] ss:$16 sps:$4 sm:$0xff]  }
 0x443   :  { %6257 = vmatpush1.bf16.msra.mxu0 %v14992_v31  ;;  %6298 = vmatpush1.bf16.msra.mxu1 %v14995_v41 }
 0x444   :  { %6258 = vmatprep.subr.bf16.mxu0 %v15000_v26  ;;  %6299 = vmatprep.subr.bf16.mxu1 %v15003_v32 }
 0x447   :  { %6259 = vmatpush1.bf16.msra.mxu0 %v14998_v50  ;;  %6300 = vmatpush1.bf16.msra.mxu1 %v15001_v28  ;;  %v15040_v50 = vld [vmem:[#allocation5 + $0x140] ss:$16 sps:$4 sm:$0xff]  }
 0x448   :  { %6260 = vmatprep.subr.bf16.mxu0 %v15006_v24  ;;  %6301 = vmatprep.subr.bf16.mxu1 %v15009_v48 }
 0x44b   :  { %6261 = vmatpush1.bf16.msra.mxu0 %v15004_v23  ;;  %6302 = vmatpush1.bf16.msra.mxu1 %v15007_v43  ;;  %v15043_v23 = vld [vmem:[#allocation5 + $0x148] ss:$16 sps:$4 sm:$0xff]   ;;  %v15048_v43 = vld [vmem:[#allocation5 + $0x164] ss:$16 sps:$4 sm:$0xff]  }
 0x44c   :  { %6262 = vmatprep.subr.bf16.mxu0 %v15012_v37  ;;  %6303 = vmatprep.subr.bf16.mxu1 %v15015_v51 }
 0x44f   :  { %6263 = vmatpush1.bf16.msra.mxu0 %v15010_v53  ;;  %6304 = vmatpush1.bf16.msra.mxu1 %v15013_v42  ;;  %v15051_v42 = vld [vmem:[#allocation5 + $0x16c] ss:$16 sps:$4 sm:$0xff]  }
 0x450   :  { %6264 = vmatprep.subr.bf16.mxu0 %v15018_v55  ;;  %6305 = vmatprep.subr.bf16.mxu1 %v15021_v34 }
 0x453   :  { %6265 = vmatpush1.bf16.msra.mxu0 %v15016_v30  ;;  %6306 = vmatpush1.bf16.msra.mxu1 %v15019_v57  ;;  %v15046_v30 = vld [vmem:[#allocation5 + $0x160] ss:$16 sps:$4 sm:$0xff]   ;;  %v15049_v57 = vld [vmem:[#allocation5 + $0x168] ss:$16 sps:$4 sm:$0xff]  }
 0x454   :  { %6266 = vmatprep.subr.bf16.mxu0 %v15024_v60  ;;  %6307 = vmatprep.subr.bf16.mxu1 %v15027_v58  ;;  %v15054_v60 = vld [vmem:[#allocation5 + $0x184] ss:$16 sps:$4 sm:$0xff]   ;;  %v15057_v58 = vld [vmem:[#allocation5 + $0x18c] ss:$16 sps:$4 sm:$0xff]  }
 0x457   :  { %6267 = vmatpush1.bf16.msra.mxu0 %v15022_v45  ;;  %6308 = vmatpush1.bf16.msra.mxu1 %v15025_v2  ;;  %v15052_v2 = vld [vmem:[#allocation5 + $0x180] ss:$16 sps:$4 sm:$0xff]  }
 0x458   :  { %6268 = vmatprep.subr.bf16.mxu0 %v15030_v47  ;;  %6309 = vmatprep.subr.bf16.mxu1 %v15033_v39  ;;  %v15055_v47 = vld [vmem:[#allocation5 + $0x188] ss:$16 sps:$4 sm:$0xff]   ;;  %v15060_v39 = vld [vmem:[#allocation5 + $0x1a4] ss:$16 sps:$4 sm:$0xff]  }
 0x45b   :  { %6269 = vmatpush1.bf16.msra.mxu0 %v15028_v46  ;;  %6310 = vmatpush1.bf16.msra.mxu1 %v15031_v20  ;;  %v15063_v46 = vld [vmem:[#allocation5 + $0x1ac] ss:$16 sps:$4 sm:$0xff]  }
 0x45c   :  { %6270 = vmatprep.subr.bf16.mxu0 %v15036_v9  ;;  %6311 = vmatprep.subr.bf16.mxu1 %v15039_v13  ;;  %v15058_v9 = vld [vmem:[#allocation5 + $0x1a0] ss:$16 sps:$4 sm:$0xff]   ;;  %v15061_v13 = vld [vmem:[#allocation5 + $0x1a8] ss:$16 sps:$4 sm:$0xff]  }
 0x45f   :  { %v5004_v22 = vpop.f32.mrb[56].mxu0  ;;  %v5045_v31 = vpop.f32.mrb[56].mxu1  ;;  %6271 = vmatpush1.bf16.msra.mxu0 %v15034_v38  ;;  %6312 = vmatpush1.bf16.msra.mxu1 %v15037_v29  ;;  %v15066_v29 = vld [vmem:[#allocation5 + $0x1c4] ss:$16 sps:$4 sm:$0xff]  }
 0x460   :  { %v5005_v41 = vadd.f32 %v5004_v22, %v16770_v59  ;;  %v5006_v26 = vpop.f32.mrb[57].mxu0  ;;  %v5047_v32 = vpop.f32.mrb[57].mxu1  ;;  %6272 = vmatprep.subr.bf16.mxu0 %v15042_v27  ;;  %6313 = vmatprep.subr.bf16.mxu1 %v15045_v17  ;;  %v5046_v45 = vadd.f32 %v5045_v31, %v16782_v7  ;;  %v15069_v27 = vld [vmem:[#allocation5 + $0x1cc] ss:$16 sps:$4 sm:$0xff]  }
 0x461   :  { %v5007_v28 = vadd.f32 %v5006_v26, %v16773_v0  ;;  %v5008_v24 = vpop.f32.mrb[58].mxu0  ;;  %v5049_v48 = vpop.f32.mrb[58].mxu1  ;;  %v5048_v34 = vadd.f32 %v5047_v32, %v16776_v5  ;;  %v15064_v26 = vld [vmem:[#allocation5 + $0x1c0] ss:$16 sps:$4 sm:$0xff]   ;;  %v15067_v32 = vld [vmem:[#allocation5 + $0x1c8] ss:$16 sps:$4 sm:$0xff]  }
 0x462   :  { %v5052_v37 = vmul.f32 0.5, %v5005_v41  ;;  %v5009_v51 = vpop.f32.mrb[59].mxu0  ;;  %v5050_v53 = vpop.f32.mrb[59].mxu1  ;;  %v5054_v20 = vmul.f32 0.5, %v5046_v45  ;;  %v15075_v24 = vld [vmem:[#allocation5 + $0x1ec] ss:$16 sps:$4 sm:$0xff]  }
 0x463   :  { %v5053_v55 = vmul.f32 0.5, %v5007_v28  ;;  %6273 = vmatpush1.bf16.msra.mxu0 %v15040_v50  ;;  %6314 = vmatpush1.bf16.msra.mxu1 %v15043_v23  ;;  %v15072_v28 = vld [vmem:[#allocation5 + $0x1e4] ss:$16 sps:$4 sm:$0xff]   ;;  %v15073_v51 = vld [vmem:[#allocation5 + $0x1e8] ss:$16 sps:$4 sm:$0xff]  }
 0x464   :  { %16088 = vtanh.f32 %v5052_v37  ;;  %6274 = vmatprep.subr.bf16.mxu0 %v15048_v43  ;;  %6315 = vmatprep.subr.bf16.mxu1 %v15051_v42  ;;  %v15070_v37 = vld [vmem:[#allocation5 + $0x1e0] ss:$16 sps:$4 sm:$0xff]   ;;  %v15078_v53 = vld [vmem:[#allocation7 + $0x4] ss:$16 sps:$4 sm:$0xff]   ;;  %v15081_v42 = vld [vmem:[#allocation7 + $0xc] ss:$16 sps:$4 sm:$0xff]  }
 0x465   :  { %16090 = vtanh.f32 %v5053_v55 }
 0x466   :  { %16092 = vtanh.f32 %v5048_v34 }
 0x467   :  { %6275 = vmatpush1.bf16.msra.mxu0 %v15046_v30  ;;  %6316 = vmatpush1.bf16.msra.mxu1 %v15049_v57  ;;  %16094 = vtanh.f32 %v5054_v20  ;;  %v15076_v20 = vld [vmem:[#allocation7] ss:$16 sps:$4 sm:$0xff]  }
 0x468   :  { %6276 = vmatprep.subr.bf16.mxu0 %v15054_v60  ;;  %6317 = vmatprep.subr.bf16.mxu1 %v15057_v58 }
 0x46b   :  { %6277 = vmatpush1.bf16.msra.mxu0 %v15052_v2  ;;  %6318 = vmatpush1.bf16.msra.mxu1 %v15055_v47 }
 0x46c   :  { %6278 = vmatprep.subr.bf16.mxu0 %v15060_v39  ;;  %6319 = vmatprep.subr.bf16.mxu1 %v15063_v46 }
 0x46e   :  { %v16089_v38 = vpop.eup %16088 }
 0x46f   :  { %v5058_v17 = vmul.f32 0.5, %v16089_v38  ;;  %v16091_v22 = vpop.eup %16090  ;;  %6279 = vmatpush1.bf16.msra.mxu0 %v15058_v9  ;;  %6320 = vmatpush1.bf16.msra.mxu1 %v15061_v13  ;;  %v15079_v9 = vld [vmem:[#allocation7 + $0x8] ss:$16 sps:$4 sm:$0xff]   ;;  %v15084_v13 = vld [vmem:[#allocation7 + $0x24] ss:$16 sps:$4 sm:$0xff]  }
 0x470   :  { %v5059_v41 = vmul.f32 0.5, %v16091_v22  ;;  %v16093_v50 = vpop.eup %16092  ;;  %6280 = vmatprep.subr.bf16.mxu0 %v15066_v29  ;;  %6321 = vmatprep.subr.bf16.mxu1 %v15069_v27  ;;  %v15087_v38 = vld [vmem:[#allocation7 + $0x2c] ss:$16 sps:$4 sm:$0xff]   ;;  %v15090_v29 = vld [vmem:[#allocation7 + $0x44] ss:$16 sps:$4 sm:$0xff]  }
 0x471   :  { %v5061_v31 = vadd.f32 0.5, %v5058_v17  ;;  %v16095_v30 = vpop.eup %16094  ;;  %v15093_v27 = vld [vmem:[#allocation7 + $0x4c] ss:$16 sps:$4 sm:$0xff]   ;;  %v15088_v17 = vld [vmem:[#allocation7 + $0x40] ss:$16 sps:$4 sm:$0xff]  }
 0x472   :  { %v5062_v48 = vadd.f32 0.5, %v5059_v41  ;;  %v5060_v60 = vmul.f32 0.5, %v16095_v30  ;;  %v15091_v22 = vld [vmem:[#allocation7 + $0x48] ss:$16 sps:$4 sm:$0xff]   ;;  %v15099_v41 = vld [vmem:[#allocation7 + $0x6c] ss:$16 sps:$4 sm:$0xff]  }
 0x473   :  { %v5066_v23 = vmul.f32 %v16093_v50, %v5061_v31  ;;  %6281 = vmatpush1.bf16.msra.mxu0 %v15064_v26  ;;  %6322 = vmatpush1.bf16.msra.mxu1 %v15067_v32  ;;  %v15096_v31 = vld [vmem:[#allocation7 + $0x64] ss:$16 sps:$4 sm:$0xff]   ;;  %v15094_v26 = vld [vmem:[#allocation7 + $0x60] ss:$16 sps:$4 sm:$0xff]   ;;  %v15105_v50 = vld [vmem:[#allocation7 + $0x8c] ss:$16 sps:$4 sm:$0xff]  }
 0x474   :  { %v5065_v43 = vmul.f32 %v5062_v48, %v17135_v62  ;;  %6282 = vmatprep.subr.bf16.mxu0 %v15072_v28  ;;  %6323 = vmatprep.subr.bf16.mxu1 %v15075_v24  ;;  %v5063_v58 = vadd.f32 0.5, %v5060_v60  ;;  %v15102_v32 = vld [vmem:[#allocation7 + $0x84] ss:$16 sps:$4 sm:$0xff]   ;;  %v15100_v28 = vld [vmem:[#allocation7 + $0x80] ss:$16 sps:$4 sm:$0xff]  }
 0x475   :  { %v15103_v24 = vld [vmem:[#allocation7 + $0x88] ss:$16 sps:$4 sm:$0xff]   ;;  %v15108_v48 = vld [vmem:[#allocation7 + $0xa4] ss:$16 sps:$4 sm:$0xff]   ;;  %v15112_v60 = vld [vmem:[#allocation7 + $0xc0] ss:$16 sps:$4 sm:$0xff]  }
 0x476   :  { %v5067_v55 = vadd.f32 %v5066_v23, %v5065_v43  ;;  %v15111_v23 = vld [vmem:[#allocation7 + $0xac] ss:$16 sps:$4 sm:$0xff]   ;;  %v15106_v43 = vld [vmem:[#allocation7 + $0xa0] ss:$16 sps:$4 sm:$0xff]  }
 0x477   :  { %6283 = vmatpush1.bf16.msra.mxu0 %v15070_v37  ;;  %6324 = vmatpush1.bf16.msra.mxu1 %v15073_v51  ;;  %v15109_v37 = vld [vmem:[#allocation7 + $0xa8] ss:$16 sps:$4 sm:$0xff]   ;;  %v15114_v51 = vld [vmem:[#allocation7 + $0xc4] ss:$16 sps:$4 sm:$0xff]  }
 0x478   :  { %16096 = vtanh.f32 %v5067_v55  ;;  %v5072_v34 = vsub.f32 %v5067_v55, %v17135_v62  ;;  %6740 = vmatprep.subr.bf16.mxu0 %v15078_v53  ;;  %6781 = vmatprep.subr.bf16.mxu1 %v15081_v42  ;;  %v15117_v53 = vld [vmem:[#allocation7 + $0xcc] ss:$16 sps:$4 sm:$0xff]  }
 0x47a   :  { %v17329_v57 = vadd.f32 %v5072_v34, %v17135_v62  ;;  %v15082_v62 = vld [vmem:[#allocation7 + $0x20] ss:$16 sps:$4 sm:$0xff]  }
 0x482   :  { %v16097_v45 = vpop.eup %16096 }
 0x483   :  { %v5069_v2 = vmul.f32 %v16097_v45, %v5063_v58  ;;  %v15115_v58 = vld [vmem:[#allocation7 + $0xc8] ss:$16 sps:$4 sm:$0xff]  }
 0x485   :  { %v5070_v47 = vsub.f32 %v5069_v2, %v17139_v33 }
 0x487   :  { %v17333_v39 = vadd.f32 %v5070_v47, %v17139_v33  ;;  %v15085_v33 = vld [vmem:[#allocation7 + $0x28] ss:$16 sps:$4 sm:$0xff]  }
 0x489   :  { %v17337_v46 = vpack.c.bf16 %v17333_v39, %v17333_v39 }
 0x48b   :  { %6284 = vmatprep.mubr.bf16.mxu0 %v17337_v46  ;;  %6325 = vmatprep.mubr.bf16.mxu1 %v17337_v46 }
 0x48c   :  { %6285 = vmatmul.mubr.bf16.vlgmr.msra.gmra.mrb[68].mxu0 %v17318_v49  ;;  %6326 = vmatmul.mubr.bf16.vlgmr.msra.gmra.mrb[68].mxu1 %v17318_v49  ;;  %v15097_v49 = vld [vmem:[#allocation7 + $0x68] ss:$16 sps:$4 sm:$0xff]  }
 0x48d   :  { %6741 = vmatpush1.bf16.msra.mxu0 %v15076_v20  ;;  %6782 = vmatpush1.bf16.msra.mxu1 %v15079_v9  ;;  %v15120_v20 = vld [vmem:[#allocation7 + $0xe4] ss:$16 sps:$4 sm:$0xff]   ;;  %v15123_v9 = vld [vmem:[#allocation7 + $0xec] ss:$16 sps:$4 sm:$0xff]  }
 0x48e   :  { %6742 = vmatprep.subr.bf16.mxu0 %v15084_v13  ;;  %6783 = vmatprep.subr.bf16.mxu1 %v15087_v38 }
 0x491   :  { %6743 = vmatpush1.bf16.msra.mxu0 %v15082_v62  ;;  %6784 = vmatpush1.bf16.msra.mxu1 %v15085_v33 }
 0x492   :  { %6744 = vmatprep.subr.bf16.mxu0 %v15090_v29  ;;  %6785 = vmatprep.subr.bf16.mxu1 %v15093_v27 }
 0x495   :  { %6745 = vmatpush1.bf16.msra.mxu0 %v15088_v17  ;;  %6786 = vmatpush1.bf16.msra.mxu1 %v15091_v22  ;;  %v15118_v17 = vld [vmem:[#allocation7 + $0xe0] ss:$16 sps:$4 sm:$0xff]   ;;  %v15121_v22 = vld [vmem:[#allocation7 + $0xe8] ss:$16 sps:$4 sm:$0xff]  }
 0x496   :  { %6746 = vmatprep.subr.bf16.mxu0 %v15096_v31  ;;  %6787 = vmatprep.subr.bf16.mxu1 %v15099_v41  ;;  %v15126_v31 = vld [vmem:[#allocation7 + $0x104] ss:$16 sps:$4 sm:$0xff]   ;;  %v15129_v41 = vld [vmem:[#allocation7 + $0x10c] ss:$16 sps:$4 sm:$0xff]  }
 0x499   :  { %6747 = vmatpush1.bf16.msra.mxu0 %v15094_v26  ;;  %6788 = vmatpush1.bf16.msra.mxu1 %v15097_v49  ;;  %v15124_v26 = vld [vmem:[#allocation7 + $0x100] ss:$16 sps:$4 sm:$0xff]   ;;  %v15127_v49 = vld [vmem:[#allocation7 + $0x108] ss:$16 sps:$4 sm:$0xff]  }
 0x49a   :  { %6748 = vmatprep.subr.bf16.mxu0 %v15102_v32  ;;  %6789 = vmatprep.subr.bf16.mxu1 %v15105_v50  ;;  %v15132_v50 = vld [vmem:[#allocation7 + $0x124] ss:$16 sps:$4 sm:$0xff]  }
 0x49d   :  { %6749 = vmatpush1.bf16.msra.mxu0 %v15100_v28  ;;  %6790 = vmatpush1.bf16.msra.mxu1 %v15103_v24  ;;  %v15135_v28 = vld [vmem:[#allocation7 + $0x12c] ss:$16 sps:$4 sm:$0xff]   ;;  %v15130_v24 = vld [vmem:[#allocation7 + $0x120] ss:$16 sps:$4 sm:$0xff]  }
 0x49e   :  { %6750 = vmatprep.subr.bf16.mxu0 %v15108_v48  ;;  %6791 = vmatprep.subr.bf16.mxu1 %v15111_v23  ;;  %v15133_v48 = vld [vmem:[#allocation7 + $0x128] ss:$16 sps:$4 sm:$0xff]  }
 0x4a1   :  { %v5492_v42 = vpop.f32.mrb[60].mxu0  ;;  %6751 = vmatpush1.bf16.msra.mxu0 %v15106_v43  ;;  %6792 = vmatpush1.bf16.msra.mxu1 %v15109_v37  ;;  %v15138_v43 = vld [vmem:[#allocation7 + $0x144] ss:$16 sps:$4 sm:$0xff]   ;;  %v15141_v37 = vld [vmem:[#allocation7 + $0x14c] ss:$16 sps:$4 sm:$0xff]  }
 0x4a2   :  { %v5493_v55 = vadd.f32 %v5492_v42, %v16802_v56  ;;  %v5533_v34 = vpop.f32.mrb[60].mxu1  ;;  %v5494_v30 = vpop.f32.mrb[61].mxu0  ;;  %6752 = vmatprep.subr.bf16.mxu0 %v15114_v51  ;;  %6793 = vmatprep.subr.bf16.mxu1 %v15117_v53 }
 0x4a3   :  { %v5495_v45 = vadd.f32 %v5494_v30, %v16805_v15  ;;  %v5535_v2 = vpop.f32.mrb[61].mxu1  ;;  %v5496_v47 = vpop.f32.mrb[62].mxu0  ;;  %v5534_v32 = vadd.f32 %v5533_v34, %v16814_v12  ;;  %v15139_v34 = vld [vmem:[#allocation7 + $0x148] ss:$16 sps:$4 sm:$0xff]  }
 0x4a4   :  { %v5540_v13 = vmul.f32 0.5, %v5493_v55  ;;  %v5537_v38 = vpop.f32.mrb[62].mxu1  ;;  %v5497_v62 = vpop.f32.mrb[63].mxu0  ;;  %v5536_v27 = vadd.f32 %v5535_v2, %v16808_v25  ;;  %v15136_v55 = vld [vmem:[#allocation7 + $0x140] ss:$16 sps:$4 sm:$0xff]  }
 0x4a5   :  { %v5541_v33 = vmul.f32 0.5, %v5495_v45  ;;  %v5538_v29 = vpop.f32.mrb[63].mxu1  ;;  %6753 = vmatpush1.bf16.msra.mxu0 %v15112_v60  ;;  %6794 = vmatpush1.bf16.msra.mxu1 %v15115_v58  ;;  %v5542_v23 = vmul.f32 0.5, %v5534_v32  ;;  %v15144_v58 = vld [vmem:[#allocation7 + $0x164] ss:$16 sps:$4 sm:$0xff]  }
 0x4a6   :  { %16098 = vtanh.f32 %v5540_v13  ;;  %6754 = vmatprep.subr.bf16.mxu0 %v15120_v20  ;;  %6795 = vmatprep.subr.bf16.mxu1 %v15123_v9  ;;  %v15147_v45 = vld [vmem:[#allocation7 + $0x16c] ss:$16 sps:$4 sm:$0xff]   ;;  %v15142_v9 = vld [vmem:[#allocation7 + $0x160] ss:$16 sps:$4 sm:$0xff]   ;;  %v15145_v13 = vld [vmem:[#allocation7 + $0x168] ss:$16 sps:$4 sm:$0xff]  }
 0x4a7   :  { %16100 = vtanh.f32 %v5541_v33  ;;  %v15150_v62 = vld [vmem:[#allocation7 + $0x184] ss:$16 sps:$4 sm:$0xff]   ;;  %v15153_v33 = vld [vmem:[#allocation7 + $0x18c] ss:$16 sps:$4 sm:$0xff]   ;;  %v15154_v32 = vld [vmem:[#allocation7 + $0x1a0] ss:$16 sps:$4 sm:$0xff]  }
 0x4a8   :  { %16102 = vtanh.f32 %v5536_v27  ;;  %v15148_v27 = vld [vmem:[#allocation7 + $0x180] ss:$16 sps:$4 sm:$0xff]  }
 0x4a9   :  { %6755 = vmatpush1.bf16.msra.mxu0 %v15118_v17  ;;  %6796 = vmatpush1.bf16.msra.mxu1 %v15121_v22  ;;  %16104 = vtanh.f32 %v5542_v23  ;;  %v15151_v17 = vld [vmem:[#allocation7 + $0x188] ss:$16 sps:$4 sm:$0xff]   ;;  %v15156_v22 = vld [vmem:[#allocation7 + $0x1a4] ss:$16 sps:$4 sm:$0xff]   ;;  %v15160_v23 = vld [vmem:[#allocation7 + $0x1c0] ss:$16 sps:$4 sm:$0xff]  }
 0x4aa   :  { %6756 = vmatprep.subr.bf16.mxu0 %v15126_v31  ;;  %6797 = vmatprep.subr.bf16.mxu1 %v15129_v41  ;;  %v15159_v31 = vld [vmem:[#allocation7 + $0x1ac] ss:$16 sps:$4 sm:$0xff]  }
 0x4ad   :  { %6757 = vmatpush1.bf16.msra.mxu0 %v15124_v26  ;;  %6798 = vmatpush1.bf16.msra.mxu1 %v15127_v49 }
 0x4ae   :  { %6758 = vmatprep.subr.bf16.mxu0 %v15132_v50  ;;  %6799 = vmatprep.subr.bf16.mxu1 %v15135_v28  ;;  %v15157_v50 = vld [vmem:[#allocation7 + $0x1a8] ss:$16 sps:$4 sm:$0xff]   ;;  %v15162_v28 = vld [vmem:[#allocation7 + $0x1c4] ss:$16 sps:$4 sm:$0xff]  }
 0x4b0   :  { %v16099_v51 = vpop.eup %16098 }
 0x4b1   :  { %v5546_v53 = vmul.f32 0.5, %v16099_v51  ;;  %v16101_v42 = vpop.eup %16100  ;;  %6759 = vmatpush1.bf16.msra.mxu0 %v15130_v24  ;;  %6800 = vmatpush1.bf16.msra.mxu1 %v15133_v48  ;;  %v15165_v24 = vld [vmem:[#allocation7 + $0x1cc] ss:$16 sps:$4 sm:$0xff]  }
 0x4b2   :  { %v5547_v60 = vmul.f32 0.5, %v16101_v42  ;;  %6760 = vmatprep.subr.bf16.mxu0 %v15138_v43  ;;  %6801 = vmatprep.subr.bf16.mxu1 %v15141_v37  ;;  %v16103_v2 = vpop.eup %16102  ;;  %v15163_v43 = vld [vmem:[#allocation7 + $0x1c8] ss:$16 sps:$4 sm:$0xff]   ;;  %v15168_v37 = vld [vmem:[#allocation7 + $0x1e4] ss:$16 sps:$4 sm:$0xff]  }
 0x4b3   :  { %v5549_v30 = vadd.f32 0.5, %v5546_v53  ;;  %v16105_v26 = vpop.eup %16104  ;;  %v15171_v51 = vld [vmem:[#allocation7 + $0x1ec] ss:$16 sps:$4 sm:$0xff]   ;;  %v15166_v42 = vld [vmem:[#allocation7 + $0x1e0] ss:$16 sps:$4 sm:$0xff]  }
 0x4b4   :  { %v5550_v47 = vadd.f32 0.5, %v5547_v60  ;;  %v5548_v48 = vmul.f32 0.5, %v16105_v26  ;;  %v15177_v60 = vld [vmem:[%s18407_s3 + $0xc] ss:$16 sps:$4 sm:$0xff]   ;;  %v15198_v26 = vld [vmem:[%s18407_s3 + $0x84] ss:$16 sps:$4 sm:$0xff]  }
 0x4b5   :  { %v5554_v20 = vmul.f32 %v16103_v2, %v5549_v30  ;;  %6761 = vmatpush1.bf16.msra.mxu0 %v15136_v55  ;;  %6802 = vmatpush1.bf16.msra.mxu1 %v15139_v34  ;;  %v15169_v55 = vld [vmem:[#allocation7 + $0x1e8] ss:$16 sps:$4 sm:$0xff]   ;;  %v15174_v30 = vld [vmem:[%s18407_s3 + $0x4] ss:$16 sps:$4 sm:$0xff]  }
 0x4b6   :  { %v5553_v38 = vmul.f32 %v5550_v47, %v17196_v52  ;;  %6762 = vmatprep.subr.bf16.mxu0 %v15144_v58  ;;  %6803 = vmatprep.subr.bf16.mxu1 %v15147_v45  ;;  %v5551_v53 = vadd.f32 0.5, %v5548_v48  ;;  %v15207_v48 = vld [vmem:[%s18407_s3 + $0xac] ss:$16 sps:$4 sm:$0xff]  }
 0x4b8   :  { %v5555_v29 = vadd.f32 %v5554_v20, %v5553_v38  ;;  %v15172_v20 = vld [vmem:[%s18407_s3] ss:$16 sps:$4 sm:$0xff]  }
 0x4b9   :  { %6763 = vmatpush1.bf16.msra.mxu0 %v15142_v9  ;;  %6804 = vmatpush1.bf16.msra.mxu1 %v15145_v13  ;;  %v15175_v9 = vld [vmem:[%s18407_s3 + $0x8] ss:$16 sps:$4 sm:$0xff]   ;;  %v15183_v13 = vld [vmem:[%s18407_s3 + $0x2c] ss:$16 sps:$4 sm:$0xff]   ;;  %v15178_v38 = vld [vmem:[%s18407_s3 + $0x20] ss:$16 sps:$4 sm:$0xff]  }
 0x4ba   :  { %16106 = vtanh.f32 %v5555_v29  ;;  %6764 = vmatprep.subr.bf16.mxu0 %v15150_v62  ;;  %6805 = vmatprep.subr.bf16.mxu1 %v15153_v33  ;;  %v5560_v41 = vsub.f32 %v5555_v29, %v17196_v52  ;;  %v15181_v62 = vld [vmem:[%s18407_s3 + $0x28] ss:$16 sps:$4 sm:$0xff]   ;;  %v15186_v33 = vld [vmem:[%s18407_s3 + $0x44] ss:$16 sps:$4 sm:$0xff]   ;;  %v15184_v29 = vld [vmem:[%s18407_s3 + $0x40] ss:$16 sps:$4 sm:$0xff]  }
 0x4bc   :  { %v17350_v49 = vadd.f32 %v5560_v41, %v17196_v52  ;;  %v15193_v41 = vld [vmem:[%s18407_s3 + $0x68] ss:$16 sps:$4 sm:$0xff]  }
 0x4bd   :  { %6765 = vmatpush1.bf16.msra.mxu0 %v15148_v27  ;;  %6806 = vmatpush1.bf16.msra.mxu1 %v15151_v17  ;;  %v15187_v27 = vld [vmem:[%s18407_s3 + $0x48] ss:$16 sps:$4 sm:$0xff]   ;;  %v15192_v17 = vld [vmem:[%s18407_s3 + $0x64] ss:$16 sps:$4 sm:$0xff]  }
 0x4be   :  { %6766 = vmatprep.subr.bf16.mxu0 %v15156_v22  ;;  %6807 = vmatprep.subr.bf16.mxu1 %v15159_v31  ;;  %v15195_v22 = vld [vmem:[%s18407_s3 + $0x6c] ss:$16 sps:$4 sm:$0xff]   ;;  %v15190_v31 = vld [vmem:[%s18407_s3 + $0x60] ss:$16 sps:$4 sm:$0xff]  }
 0x4c1   :  { %6767 = vmatpush1.bf16.msra.mxu0 %v15154_v32  ;;  %6808 = vmatpush1.bf16.msra.mxu1 %v15157_v50  ;;  %v15201_v32 = vld [vmem:[%s18407_s3 + $0x8c] ss:$16 sps:$4 sm:$0xff]   ;;  %v15196_v50 = vld [vmem:[%s18407_s3 + $0x80] ss:$16 sps:$4 sm:$0xff]  }
 0x4c2   :  { %6768 = vmatprep.subr.bf16.mxu0 %v15162_v28  ;;  %6809 = vmatprep.subr.bf16.mxu1 %v15165_v24  ;;  %v15199_v28 = vld [vmem:[%s18407_s3 + $0x88] ss:$16 sps:$4 sm:$0xff]   ;;  %v15204_v24 = vld [vmem:[%s18407_s3 + $0xa4] ss:$16 sps:$4 sm:$0xff]  }
 0x4c4   :  { %v16107_v52 = vpop.eup %16106 }
 0x4c5   :  { %6769 = vmatpush1.bf16.msra.mxu0 %v15160_v23  ;;  %6810 = vmatpush1.bf16.msra.mxu1 %v15163_v43  ;;  %v5557_v34 = vmul.f32 %v16107_v52, %v5551_v53  ;;  %v15202_v23 = vld [vmem:[%s18407_s3 + $0xa0] ss:$16 sps:$4 sm:$0xff]   ;;  %v15205_v43 = vld [vmem:[%s18407_s3 + $0xa8] ss:$16 sps:$4 sm:$0xff]  }
 0x4c6   :  { %6770 = vmatprep.subr.bf16.mxu0 %v15168_v37  ;;  %6811 = vmatprep.subr.bf16.mxu1 %v15171_v51  ;;  %v15210_v37 = vld [vmem:[%s18407_s3 + $0xc4] ss:$16 sps:$4 sm:$0xff]   ;;  %v15213_v51 = vld [vmem:[%s18407_s3 + $0xcc] ss:$16 sps:$4 sm:$0xff]   ;;  %v15208_v53 = vld [vmem:[%s18407_s3 + $0xc0] ss:$16 sps:$4 sm:$0xff]  }
 0x4c7   :  { %v5558_v58 = vsub.f32 %v5557_v34, %v17210_v44  ;;  %v15211_v52 = vld [vmem:[%s18407_s3 + $0xc8] ss:$16 sps:$4 sm:$0xff]   ;;  %v15214_v34 = vld [vmem:[%s18407_s3 + $0xe0] ss:$16 sps:$4 sm:$0xff]  }
 0x4c9   :  { %6771 = vmatpush1.bf16.msra.mxu0 %v15166_v42  ;;  %6812 = vmatpush1.bf16.msra.mxu1 %v15169_v55  ;;  %v17360_v45 = vadd.f32 %v5558_v58, %v17210_v44  ;;  %v15180_v44 = vld [vmem:[%s18407_s3 + $0x24] ss:$16 sps:$4 sm:$0xff]   ;;  %v15219_v55 = vld [vmem:[%s18407_s3 + $0xec] ss:$16 sps:$4 sm:$0xff]  }
 0x4ca   :  { %7046 = vmatprep.subr.bf16.mxu0 %v15174_v30  ;;  %7087 = vmatprep.subr.bf16.mxu1 %v15177_v60  ;;  %v15216_v42 = vld [vmem:[%s18407_s3 + $0xe4] ss:$16 sps:$4 sm:$0xff]   ;;  %v15217_v30 = vld [vmem:[%s18407_s3 + $0xe8] ss:$16 sps:$4 sm:$0xff]   ;;  %v15225_v58 = vld [vmem:[#allocation5 + $0xc] ss:$16 sps:$4 sm:$0xff]  }
 0x4cb   :  { %v12375_v2 = vmul.f32 %v17207_v54, %v17360_v45  ;;  %v5566_v47 = vpack.c.bf16 %v17360_v45, %v17360_v45  ;;  %v15222_v60 = vld [vmem:[#allocation5 + $0x4] ss:$16 sps:$4 sm:$0xff]  }
 0x4cd   :  { %12384 = vadd.xlane.f32.xlu1 %v12375_v2  ;;  %6772 = vmatprep.mubr.bf16.mxu0 %v5566_v47 }
 0x4ce   :  { %6813 = vmatprep.mubr.bf16.mxu1 %v5566_v47  ;;  %6773 = vmatmul.mubr.bf16.vlgmr.msra.gmra.mrb[72].mxu0 %v17337_v46 }
 0x4cf   :  { %6814 = vmatmul.mubr.bf16.vlgmr.msra.gmra.mrb[72].mxu1 %v17337_v46  ;;  %7047 = vmatpush1.bf16.msra.mxu0 %v15172_v20  ;;  %v15189_v46 = vld [vmem:[%s18407_s3 + $0x4c] ss:$16 sps:$4 sm:$0xff]  }
 0x4d0   :  { %7088 = vmatpush1.bf16.msra.mxu1 %v15175_v9  ;;  %7048 = vmatprep.subr.bf16.mxu0 %v15180_v44 }
 0x4d1   :  { %7089 = vmatprep.subr.bf16.mxu1 %v15183_v13  ;;  %7078 = vmatprep.mubr.bf16.mxu0 %v18523_v35 }
 0x4d2   :  { %7119 = vmatprep.mubr.bf16.mxu1 %v18523_v35 }
 0x4d3   :  { %7049 = vmatpush1.bf16.msra.mxu0 %v15178_v38 }
 0x4d4   :  { %7090 = vmatpush1.bf16.msra.mxu1 %v15181_v62  ;;  %7050 = vmatprep.subr.bf16.mxu0 %v15186_v33 }
 0x4d5   :  { %7091 = vmatprep.subr.bf16.mxu1 %v15189_v46 }
 0x4d7   :  { %7051 = vmatpush1.bf16.msra.mxu0 %v15184_v29 }
 0x4d8   :  { %7092 = vmatpush1.bf16.msra.mxu1 %v15187_v27  ;;  %7052 = vmatprep.subr.bf16.mxu0 %v15192_v17 }
 0x4d9   :  { %7093 = vmatprep.subr.bf16.mxu1 %v15195_v22 }
 0x4db   :  { %7053 = vmatpush1.bf16.msra.mxu0 %v15190_v31 }
 0x4dc   :  { %7094 = vmatpush1.bf16.msra.mxu1 %v15193_v41  ;;  %7054 = vmatprep.subr.bf16.mxu0 %v15198_v26 }
 0x4dd   :  { %7095 = vmatprep.subr.bf16.mxu1 %v15201_v32 }
 0x4df   :  { %7055 = vmatpush1.bf16.msra.mxu0 %v15196_v50 }
 0x4e0   :  { %7096 = vmatpush1.bf16.msra.mxu1 %v15199_v28  ;;  %7056 = vmatprep.subr.bf16.mxu0 %v15204_v24 }
 0x4e1   :  { %7097 = vmatprep.subr.bf16.mxu1 %v15207_v48 }
 0x4e3   :  { %7057 = vmatpush1.bf16.msra.mxu0 %v15202_v23 }
 0x4e4   :  { %7098 = vmatpush1.bf16.msra.mxu1 %v15205_v43  ;;  %7058 = vmatprep.subr.bf16.mxu0 %v15210_v37 }
 0x4e5   :  { %7099 = vmatprep.subr.bf16.mxu1 %v15213_v51 }
 0x4e7   :  { %7059 = vmatpush1.bf16.msra.mxu0 %v15208_v53  ;;  %v15220_v53 = vld [vmem:[#allocation5] ss:$16 sps:$4 sm:$0xff]  }
 0x4e8   :  { %7100 = vmatpush1.bf16.msra.mxu1 %v15211_v52  ;;  %7060 = vmatprep.subr.bf16.mxu0 %v15216_v42  ;;  %v15223_v52 = vld [vmem:[#allocation5 + $0x8] ss:$16 sps:$4 sm:$0xff]  }
 0x4e9   :  { %7101 = vmatprep.subr.bf16.mxu1 %v15219_v55  ;;  %v15228_v55 = vld [vmem:[#allocation5 + $0x24] ss:$16 sps:$4 sm:$0xff]  }
 0x4eb   :  { %7061 = vmatpush1.bf16.msra.mxu0 %v15214_v34  ;;  %v15231_v34 = vld [vmem:[#allocation5 + $0x2c] ss:$16 sps:$4 sm:$0xff]  }
 0x4ec   :  { %7102 = vmatpush1.bf16.msra.mxu1 %v15217_v30  ;;  %7534 = vmatprep.subr.bf16.mxu0 %v15222_v60  ;;  %v15229_v30 = vld [vmem:[#allocation5 + $0x28] ss:$16 sps:$4 sm:$0xff]   ;;  %v15234_v60 = vld [vmem:[#allocation5 + $0x44] ss:$16 sps:$4 sm:$0xff]  }
 0x4ed   :  { %7575 = vmatprep.subr.bf16.mxu1 %v15225_v58  ;;  %v15237_v58 = vld [vmem:[#allocation5 + $0x4c] ss:$16 sps:$4 sm:$0xff]  }
 0x50d   :  { %v5798_v2 = vpop.f32.mrb[64].mxu0  ;;  %v5839_v47 = vpop.f32.mrb[64].mxu1 }
 0x50e   :  { %v5846_v20 = vadd.f32 %v5798_v2, %v16723_v61  ;;  %v5848_v9 = vadd.f32 %v5839_v47, %v16725_v63  ;;  %v5800_v44 = vpop.f32.mrb[65].mxu0  ;;  %v5841_v13 = vpop.f32.mrb[65].mxu1  ;;  %v15232_v2 = vld [vmem:[#allocation5 + $0x40] ss:$16 sps:$4 sm:$0xff]   ;;  %v15235_v47 = vld [vmem:[#allocation5 + $0x48] ss:$16 sps:$4 sm:$0xff]  }
 0x50f   :  { %v5847_v38 = vadd.f32 %v5800_v44, %v16727_v1  ;;  %v5849_v62 = vadd.f32 %v5841_v13, %v16729_v3  ;;  %v5802_v33 = vpop.f32.mrb[66].mxu0  ;;  %v5843_v46 = vpop.f32.mrb[66].mxu1  ;;  %v15238_v44 = vld [vmem:[#allocation5 + $0x60] ss:$16 sps:$4 sm:$0xff]   ;;  %v15241_v13 = vld [vmem:[#allocation5 + $0x68] ss:$16 sps:$4 sm:$0xff]  }
 0x510   :  { %v5850_v29 = vmul.f32 0.5, %v5846_v20  ;;  %v5803_v27 = vpop.f32.mrb[67].mxu0  ;;  %v5844_v17 = vpop.f32.mrb[67].mxu1  ;;  %v5852_v31 = vmul.f32 0.5, %v5848_v9  ;;  %v15240_v20 = vld [vmem:[#allocation5 + $0x64] ss:$16 sps:$4 sm:$0xff]  }
 0x511   :  { %v5851_v22 = vmul.f32 0.5, %v5847_v38  ;;  %v15243_v9 = vld [vmem:[#allocation5 + $0x6c] ss:$16 sps:$4 sm:$0xff]   ;;  %v15246_v38 = vld [vmem:[#allocation5 + $0x84] ss:$16 sps:$4 sm:$0xff]  }
 0x512   :  { %16108 = vtanh.f32 %v5850_v29  ;;  %v15244_v33 = vld [vmem:[#allocation5 + $0x80] ss:$16 sps:$4 sm:$0xff]   ;;  %v15247_v46 = vld [vmem:[#allocation5 + $0x88] ss:$16 sps:$4 sm:$0xff]   ;;  %v15252_v29 = vld [vmem:[#allocation5 + $0xa4] ss:$16 sps:$4 sm:$0xff]  }
 0x513   :  { %16110 = vtanh.f32 %v5851_v22  ;;  %v15255_v27 = vld [vmem:[#allocation5 + $0xac] ss:$16 sps:$4 sm:$0xff]   ;;  %v15250_v17 = vld [vmem:[#allocation5 + $0xa0] ss:$16 sps:$4 sm:$0xff]   ;;  %v15253_v22 = vld [vmem:[#allocation5 + $0xa8] ss:$16 sps:$4 sm:$0xff]  }
 0x514   :  { %16112 = vtanh.f32 %v5849_v62  ;;  %v15249_v62 = vld [vmem:[#allocation5 + $0x8c] ss:$16 sps:$4 sm:$0xff]  }
 0x515   :  { %16114 = vtanh.f32 %v5852_v31  ;;  %v15258_v31 = vld [vmem:[#allocation5 + $0xc4] ss:$16 sps:$4 sm:$0xff]  }
 0x51c   :  { %v16109_v41 = vpop.eup %16108 }
 0x51d   :  { %v5856_v61 = vmul.f32 0.5, %v16109_v41  ;;  %v16111_v26 = vpop.eup %16110  ;;  %v15261_v41 = vld [vmem:[#allocation5 + $0xcc] ss:$16 sps:$4 sm:$0xff]  }
 0x51e   :  { %v5857_v32 = vmul.f32 0.5, %v16111_v26  ;;  %v16113_v50 = vpop.eup %16112  ;;  %v15259_v26 = vld [vmem:[#allocation5 + $0xc8] ss:$16 sps:$4 sm:$0xff]  }
 0x51f   :  { %v5859_v63 = vadd.f32 0.5, %v5856_v61  ;;  %v16115_v48 = vpop.eup %16114  ;;  %v15256_v61 = vld [vmem:[#allocation5 + $0xc0] ss:$16 sps:$4 sm:$0xff]  }
 0x520   :  { %v5860_v1 = vadd.f32 0.5, %v5857_v32  ;;  %v5858_v23 = vmul.f32 0.5, %v16115_v48  ;;  %v15267_v32 = vld [vmem:[#allocation5 + $0xec] ss:$16 sps:$4 sm:$0xff]   ;;  %v15268_v48 = vld [vmem:[#allocation5 + $0x100] ss:$16 sps:$4 sm:$0xff]  }
 0x521   :  { %v5864_v28 = vmul.f32 %v16113_v50, %v5859_v63  ;;  %v15264_v63 = vld [vmem:[#allocation5 + $0xe4] ss:$16 sps:$4 sm:$0xff]   ;;  %v15262_v50 = vld [vmem:[#allocation5 + $0xe0] ss:$16 sps:$4 sm:$0xff]  }
 0x522   :  { %v5863_v3 = vmul.f32 %v5860_v1, %v17315_v4  ;;  %v5861_v43 = vadd.f32 0.5, %v5858_v23  ;;  %v15226_v4 = vld [vmem:[#allocation5 + $0x20] ss:$16 sps:$4 sm:$0xff]   ;;  %v15265_v1 = vld [vmem:[#allocation5 + $0xe8] ss:$16 sps:$4 sm:$0xff]  }
 0x523   :  { %v15271_v23 = vld [vmem:[#allocation5 + $0x108] ss:$16 sps:$4 sm:$0xff]  }
 0x524   :  { %v17465_v24 = vadd.f32 %v5864_v28, %v5863_v3  ;;  %v15270_v28 = vld [vmem:[#allocation5 + $0x104] ss:$16 sps:$4 sm:$0xff]   ;;  %v15273_v3 = vld [vmem:[#allocation5 + $0x10c] ss:$16 sps:$4 sm:$0xff]  }
 0x526   :  { %16116 = vtanh.f32 %v17465_v24 }
 0x530   :  { %v16117_v37 = vpop.eup %16116 }
 0x531   :  { %v5867_v51 = vmul.f32 %v16117_v37, %v5861_v43  ;;  %v15276_v43 = vld [vmem:[#allocation5 + $0x124] ss:$16 sps:$4 sm:$0xff]   ;;  %v15279_v37 = vld [vmem:[#allocation5 + $0x12c] ss:$16 sps:$4 sm:$0xff]  }
 0x533   :  { %v17468_v42 = vpack.c.bf16 %v5867_v51, %v5867_v51  ;;  %v15274_v51 = vld [vmem:[#allocation5 + $0x120] ss:$16 sps:$4 sm:$0xff]  }
 0x535   :  { %7079 = vmatmul.mubr.bf16.vlgmr.msra.gmra.mrb[76].mxu0 %v17468_v42  ;;  %7120 = vmatmul.mubr.bf16.vlgmr.msra.gmra.mrb[76].mxu1 %v17468_v42 }
 0x536   :  { %7535 = vmatpush1.bf16.msra.mxu0 %v15220_v53  ;;  %7576 = vmatpush1.bf16.msra.mxu1 %v15223_v52  ;;  %v15277_v53 = vld [vmem:[#allocation5 + $0x128] ss:$16 sps:$4 sm:$0xff]   ;;  %v15282_v52 = vld [vmem:[#allocation5 + $0x144] ss:$16 sps:$4 sm:$0xff]  }
 0x537   :  { %7536 = vmatprep.subr.bf16.mxu0 %v15228_v55  ;;  %7577 = vmatprep.subr.bf16.mxu1 %v15231_v34  ;;  %v15285_v55 = vld [vmem:[#allocation5 + $0x14c] ss:$16 sps:$4 sm:$0xff]   ;;  %v15280_v34 = vld [vmem:[#allocation5 + $0x140] ss:$16 sps:$4 sm:$0xff]  }
 0x53a   :  { %7537 = vmatpush1.bf16.msra.mxu0 %v15226_v4  ;;  %7578 = vmatpush1.bf16.msra.mxu1 %v15229_v30  ;;  %v15283_v4 = vld [vmem:[#allocation5 + $0x148] ss:$16 sps:$4 sm:$0xff]   ;;  %v15288_v30 = vld [vmem:[#allocation5 + $0x164] ss:$16 sps:$4 sm:$0xff]  }
 0x53b   :  { %7538 = vmatprep.subr.bf16.mxu0 %v15234_v60  ;;  %7579 = vmatprep.subr.bf16.mxu1 %v15237_v58  ;;  %v15291_v60 = vld [vmem:[#allocation5 + $0x16c] ss:$16 sps:$4 sm:$0xff]  }
 0x53e   :  { %7539 = vmatpush1.bf16.msra.mxu0 %v15232_v2  ;;  %7580 = vmatpush1.bf16.msra.mxu1 %v15235_v47 }
 0x53f   :  { %7540 = vmatprep.subr.bf16.mxu0 %v15240_v20  ;;  %7581 = vmatprep.subr.bf16.mxu1 %v15243_v9 }
 0x542   :  { %7541 = vmatpush1.bf16.msra.mxu0 %v15238_v44  ;;  %7582 = vmatpush1.bf16.msra.mxu1 %v15241_v13  ;;  %v15286_v44 = vld [vmem:[#allocation5 + $0x160] ss:$16 sps:$4 sm:$0xff]   ;;  %v15289_v13 = vld [vmem:[#allocation5 + $0x168] ss:$16 sps:$4 sm:$0xff]  }
 0x543   :  { %7542 = vmatprep.subr.bf16.mxu0 %v15246_v38  ;;  %7583 = vmatprep.subr.bf16.mxu1 %v15249_v62 }
 0x546   :  { %7543 = vmatpush1.bf16.msra.mxu0 %v15244_v33  ;;  %7584 = vmatpush1.bf16.msra.mxu1 %v15247_v46  ;;  %v15294_v46 = vld [vmem:[#allocation5 + $0x184] ss:$16 sps:$4 sm:$0xff]  }
 0x547   :  { %7544 = vmatprep.subr.bf16.mxu0 %v15252_v29  ;;  %7585 = vmatprep.subr.bf16.mxu1 %v15255_v27  ;;  %v15297_v29 = vld [vmem:[#allocation5 + $0x18c] ss:$16 sps:$4 sm:$0xff]  }
 0x54a   :  { %7545 = vmatpush1.bf16.msra.mxu0 %v15250_v17  ;;  %7586 = vmatpush1.bf16.msra.mxu1 %v15253_v22 }
 0x54b   :  { %7546 = vmatprep.subr.bf16.mxu0 %v15258_v31  ;;  %7587 = vmatprep.subr.bf16.mxu1 %v15261_v41 }
 0x54e   :  { %7547 = vmatpush1.bf16.msra.mxu0 %v15256_v61  ;;  %7588 = vmatpush1.bf16.msra.mxu1 %v15259_v26  ;;  %v15292_v61 = vld [vmem:[#allocation5 + $0x180] ss:$16 sps:$4 sm:$0xff]   ;;  %v15295_v26 = vld [vmem:[#allocation5 + $0x188] ss:$16 sps:$4 sm:$0xff]  }
 0x54f   :  { %7548 = vmatprep.subr.bf16.mxu0 %v15264_v63  ;;  %7589 = vmatprep.subr.bf16.mxu1 %v15267_v32  ;;  %v15300_v63 = vld [vmem:[#allocation5 + $0x1a4] ss:$16 sps:$4 sm:$0xff]   ;;  %v15303_v32 = vld [vmem:[#allocation5 + $0x1ac] ss:$16 sps:$4 sm:$0xff]  }
 0x552   :  { %7549 = vmatpush1.bf16.msra.mxu0 %v15262_v50  ;;  %7590 = vmatpush1.bf16.msra.mxu1 %v15265_v1  ;;  %v15298_v50 = vld [vmem:[#allocation5 + $0x1a0] ss:$16 sps:$4 sm:$0xff]   ;;  %v15301_v1 = vld [vmem:[#allocation5 + $0x1a8] ss:$16 sps:$4 sm:$0xff]  }
 0x553   :  { %7550 = vmatprep.subr.bf16.mxu0 %v15270_v28  ;;  %7591 = vmatprep.subr.bf16.mxu1 %v15273_v3  ;;  %v15306_v3 = vld [vmem:[#allocation5 + $0x1c4] ss:$16 sps:$4 sm:$0xff]  }
 0x556   :  { %7551 = vmatpush1.bf16.msra.mxu0 %v15268_v48  ;;  %7592 = vmatpush1.bf16.msra.mxu1 %v15271_v23  ;;  %v15309_v48 = vld [vmem:[#allocation5 + $0x1cc] ss:$16 sps:$4 sm:$0xff]   ;;  %v15304_v23 = vld [vmem:[#allocation5 + $0x1c0] ss:$16 sps:$4 sm:$0xff]  }
 0x557   :  { %7552 = vmatprep.subr.bf16.mxu0 %v15276_v43  ;;  %7593 = vmatprep.subr.bf16.mxu1 %v15279_v37  ;;  %v15307_v43 = vld [vmem:[#allocation5 + $0x1c8] ss:$16 sps:$4 sm:$0xff]  }
 0x55a   :  { %7553 = vmatpush1.bf16.msra.mxu0 %v15274_v51  ;;  %7594 = vmatpush1.bf16.msra.mxu1 %v15277_v53  ;;  %v15312_v51 = vld [vmem:[#allocation5 + $0x1e4] ss:$16 sps:$4 sm:$0xff]   ;;  %v15315_v53 = vld [vmem:[#allocation5 + $0x1ec] ss:$16 sps:$4 sm:$0xff]  }
 0x55b   :  { %7554 = vmatprep.subr.bf16.mxu0 %v15282_v52  ;;  %7595 = vmatprep.subr.bf16.mxu1 %v15285_v55 }
 0x55e   :  { %7555 = vmatpush1.bf16.msra.mxu0 %v15280_v34  ;;  %7596 = vmatpush1.bf16.msra.mxu1 %v15283_v4  ;;  %v15310_v4 = vld [vmem:[#allocation5 + $0x1e0] ss:$16 sps:$4 sm:$0xff]  }
 0x55f   :  { %v6286_v58 = vpop.f32.mrb[68].mxu0  ;;  %v6327_v2 = vpop.f32.mrb[68].mxu1  ;;  %7556 = vmatprep.subr.bf16.mxu0 %v15288_v30  ;;  %7597 = vmatprep.subr.bf16.mxu1 %v15291_v60  ;;  %v15313_v30 = vld [vmem:[#allocation5 + $0x1e8] ss:$16 sps:$4 sm:$0xff]  }
 0x560   :  { %v6287_v47 = vadd.f32 %v6286_v58, %v16770_v59  ;;  %v6288_v20 = vpop.f32.mrb[69].mxu0  ;;  %v6329_v9 = vpop.f32.mrb[69].mxu1  ;;  %v6328_v28 = vadd.f32 %v6327_v2, %v16782_v7  ;;  %v15318_v2 = vld [vmem:[#allocation7 + $0x4] ss:$16 sps:$4 sm:$0xff]  }
 0x561   :  { %v6289_v38 = vadd.f32 %v6288_v20, %v16773_v0  ;;  %v6290_v62 = vpop.f32.mrb[70].mxu0  ;;  %v6331_v33 = vpop.f32.mrb[70].mxu1  ;;  %v6330_v41 = vadd.f32 %v6329_v9, %v16776_v5 }
 0x562   :  { %v6334_v27 = vmul.f32 0.5, %v6287_v47  ;;  %v6291_v17 = vpop.f32.mrb[71].mxu0  ;;  %v6332_v22 = vpop.f32.mrb[71].mxu1  ;;  %7557 = vmatpush1.bf16.msra.mxu0 %v15286_v44  ;;  %7598 = vmatpush1.bf16.msra.mxu1 %v15289_v13  ;;  %v6336_v37 = vmul.f32 0.5, %v6328_v28  ;;  %v15321_v47 = vld [vmem:[#allocation7 + $0xc] ss:$16 sps:$4 sm:$0xff]  }
 0x563   :  { %v6335_v31 = vmul.f32 0.5, %v6289_v38  ;;  %7558 = vmatprep.subr.bf16.mxu0 %v15294_v46  ;;  %7599 = vmatprep.subr.bf16.mxu1 %v15297_v29  ;;  %v15333_v28 = vld [vmem:[#allocation7 + $0x4c] ss:$16 sps:$4 sm:$0xff]  }
 0x564   :  { %16118 = vtanh.f32 %v6334_v27 }
 0x565   :  { %16120 = vtanh.f32 %v6335_v31 }
 0x566   :  { %16122 = vtanh.f32 %v6330_v41  ;;  %7559 = vmatpush1.bf16.msra.mxu0 %v15292_v61  ;;  %7600 = vmatpush1.bf16.msra.mxu1 %v15295_v26  ;;  %v15316_v26 = vld [vmem:[#allocation7] ss:$16 sps:$4 sm:$0xff]  }
 0x567   :  { %7560 = vmatprep.subr.bf16.mxu0 %v15300_v63  ;;  %7601 = vmatprep.subr.bf16.mxu1 %v15303_v32  ;;  %16124 = vtanh.f32 %v6336_v37  ;;  %v15319_v63 = vld [vmem:[#allocation7 + $0x8] ss:$16 sps:$4 sm:$0xff]   ;;  %v15324_v32 = vld [vmem:[#allocation7 + $0x24] ss:$16 sps:$4 sm:$0xff]   ;;  %v15334_v37 = vld [vmem:[#allocation7 + $0x60] ss:$16 sps:$4 sm:$0xff]  }
 0x56a   :  { %7561 = vmatpush1.bf16.msra.mxu0 %v15298_v50  ;;  %7602 = vmatpush1.bf16.msra.mxu1 %v15301_v1  ;;  %v15327_v50 = vld [vmem:[#allocation7 + $0x2c] ss:$16 sps:$4 sm:$0xff]   ;;  %v15330_v1 = vld [vmem:[#allocation7 + $0x44] ss:$16 sps:$4 sm:$0xff]  }
 0x56b   :  { %7562 = vmatprep.subr.bf16.mxu0 %v15306_v3  ;;  %7603 = vmatprep.subr.bf16.mxu1 %v15309_v48  ;;  %v15328_v3 = vld [vmem:[#allocation7 + $0x40] ss:$16 sps:$4 sm:$0xff]   ;;  %v15331_v48 = vld [vmem:[#allocation7 + $0x48] ss:$16 sps:$4 sm:$0xff]  }
 0x56e   :  { %v16119_v52 = vpop.eup %16118  ;;  %7563 = vmatpush1.bf16.msra.mxu0 %v15304_v23  ;;  %7604 = vmatpush1.bf16.msra.mxu1 %v15307_v43  ;;  %v15336_v23 = vld [vmem:[#allocation7 + $0x64] ss:$16 sps:$4 sm:$0xff]   ;;  %v15339_v43 = vld [vmem:[#allocation7 + $0x6c] ss:$16 sps:$4 sm:$0xff]  }
 0x56f   :  { %v6340_v55 = vmul.f32 0.5, %v16119_v52  ;;  %v16121_v34 = vpop.eup %16120  ;;  %7564 = vmatprep.subr.bf16.mxu0 %v15312_v51  ;;  %7605 = vmatprep.subr.bf16.mxu1 %v15315_v53  ;;  %v15342_v51 = vld [vmem:[#allocation7 + $0x84] ss:$16 sps:$4 sm:$0xff]   ;;  %v15345_v53 = vld [vmem:[#allocation7 + $0x8c] ss:$16 sps:$4 sm:$0xff]  }
 0x570   :  { %v6341_v58 = vmul.f32 0.5, %v16121_v34  ;;  %v16123_v20 = vpop.eup %16122  ;;  %v15340_v52 = vld [vmem:[#allocation7 + $0x80] ss:$16 sps:$4 sm:$0xff]   ;;  %v15348_v34 = vld [vmem:[#allocation7 + $0xa4] ss:$16 sps:$4 sm:$0xff]  }
 0x571   :  { %v6343_v60 = vadd.f32 0.5, %v6340_v55  ;;  %v16125_v33 = vpop.eup %16124  ;;  %v15343_v55 = vld [vmem:[#allocation7 + $0x88] ss:$16 sps:$4 sm:$0xff]  }
 0x572   :  { %v6344_v9 = vadd.f32 0.5, %v6341_v58  ;;  %7565 = vmatpush1.bf16.msra.mxu0 %v15310_v4  ;;  %7606 = vmatpush1.bf16.msra.mxu1 %v15313_v30  ;;  %v6342_v29 = vmul.f32 0.5, %v16125_v33  ;;  %v15351_v4 = vld [vmem:[#allocation7 + $0xac] ss:$16 sps:$4 sm:$0xff]   ;;  %v15346_v30 = vld [vmem:[#allocation7 + $0xa0] ss:$16 sps:$4 sm:$0xff]  }
 0x573   :  { %v6348_v44 = vmul.f32 %v16123_v20, %v6343_v60  ;;  %8022 = vmatprep.subr.bf16.mxu0 %v15318_v2  ;;  %8063 = vmatprep.subr.bf16.mxu1 %v15321_v47  ;;  %v15349_v60 = vld [vmem:[#allocation7 + $0xa8] ss:$16 sps:$4 sm:$0xff]   ;;  %v15354_v58 = vld [vmem:[#allocation7 + $0xc4] ss:$16 sps:$4 sm:$0xff]   ;;  %v15357_v2 = vld [vmem:[#allocation7 + $0xcc] ss:$16 sps:$4 sm:$0xff]  }
 0x574   :  { %v6347_v13 = vmul.f32 %v6344_v9, %v17329_v57  ;;  %v6345_v27 = vadd.f32 0.5, %v6342_v29 }
 0x576   :  { %v6349_v38 = vadd.f32 %v6348_v44, %v6347_v13  ;;  %v15352_v13 = vld [vmem:[#allocation7 + $0xc0] ss:$16 sps:$4 sm:$0xff]  }
 0x578   :  { %16126 = vtanh.f32 %v6349_v38  ;;  %v6354_v62 = vsub.f32 %v6349_v38, %v17329_v57  ;;  %v15355_v38 = vld [vmem:[#allocation7 + $0xc8] ss:$16 sps:$4 sm:$0xff]  }
 0x57a   :  { %v17479_v46 = vadd.f32 %v6354_v62, %v17329_v57  ;;  %v15322_v57 = vld [vmem:[#allocation7 + $0x20] ss:$16 sps:$4 sm:$0xff]  }
 0x582   :  { %v16127_v17 = vpop.eup %16126 }
 0x583   :  { %v6351_v22 = vmul.f32 %v16127_v17, %v6345_v27  ;;  %v15360_v27 = vld [vmem:[#allocation7 + $0xe4] ss:$16 sps:$4 sm:$0xff]   ;;  %v15363_v17 = vld [vmem:[#allocation7 + $0xec] ss:$16 sps:$4 sm:$0xff]  }
 0x585   :  { %v6352_v31 = vsub.f32 %v6351_v22, %v17333_v39 }
 0x587   :  { %v17483_v41 = vadd.f32 %v6352_v31, %v17333_v39  ;;  %v15325_v39 = vld [vmem:[#allocation7 + $0x28] ss:$16 sps:$4 sm:$0xff]  }
 0x589   :  { %v17487_v61 = vpack.c.bf16 %v17483_v41, %v17483_v41 }
 0x58b   :  { %7566 = vmatprep.mubr.bf16.mxu0 %v17487_v61  ;;  %7607 = vmatprep.mubr.bf16.mxu1 %v17487_v61 }
 0x58c   :  { %7567 = vmatmul.mubr.bf16.vlgmr.msra.gmra.mrb[80].mxu0 %v17468_v42  ;;  %7608 = vmatmul.mubr.bf16.vlgmr.msra.gmra.mrb[80].mxu1 %v17468_v42  ;;  %v15337_v42 = vld [vmem:[#allocation7 + $0x68] ss:$16 sps:$4 sm:$0xff]  }
 0x58d   :  { %8023 = vmatpush1.bf16.msra.mxu0 %v15316_v26  ;;  %8064 = vmatpush1.bf16.msra.mxu1 %v15319_v63 }
 0x58e   :  { %8024 = vmatprep.subr.bf16.mxu0 %v15324_v32  ;;  %8065 = vmatprep.subr.bf16.mxu1 %v15327_v50 }
 0x591   :  { %8025 = vmatpush1.bf16.msra.mxu0 %v15322_v57  ;;  %8066 = vmatpush1.bf16.msra.mxu1 %v15325_v39  ;;  %v15358_v57 = vld [vmem:[#allocation7 + $0xe0] ss:$16 sps:$4 sm:$0xff]   ;;  %v15361_v39 = vld [vmem:[#allocation7 + $0xe8] ss:$16 sps:$4 sm:$0xff]  }
 0x592   :  { %8026 = vmatprep.subr.bf16.mxu0 %v15330_v1  ;;  %8067 = vmatprep.subr.bf16.mxu1 %v15333_v28  ;;  %v15366_v1 = vld [vmem:[#allocation7 + $0x104] ss:$16 sps:$4 sm:$0xff]   ;;  %v15369_v28 = vld [vmem:[#allocation7 + $0x10c] ss:$16 sps:$4 sm:$0xff]  }
 0x595   :  { %8027 = vmatpush1.bf16.msra.mxu0 %v15328_v3  ;;  %8068 = vmatpush1.bf16.msra.mxu1 %v15331_v48  ;;  %v15364_v3 = vld [vmem:[#allocation7 + $0x100] ss:$16 sps:$4 sm:$0xff]   ;;  %v15367_v48 = vld [vmem:[#allocation7 + $0x108] ss:$16 sps:$4 sm:$0xff]  }
 0x596   :  { %8028 = vmatprep.subr.bf16.mxu0 %v15336_v23  ;;  %8069 = vmatprep.subr.bf16.mxu1 %v15339_v43  ;;  %v15372_v43 = vld [vmem:[#allocation7 + $0x124] ss:$16 sps:$4 sm:$0xff]  }
 0x599   :  { %8029 = vmatpush1.bf16.msra.mxu0 %v15334_v37  ;;  %8070 = vmatpush1.bf16.msra.mxu1 %v15337_v42  ;;  %v15375_v37 = vld [vmem:[#allocation7 + $0x12c] ss:$16 sps:$4 sm:$0xff]   ;;  %v15370_v42 = vld [vmem:[#allocation7 + $0x120] ss:$16 sps:$4 sm:$0xff]  }
 0x59a   :  { %8030 = vmatprep.subr.bf16.mxu0 %v15342_v51  ;;  %8071 = vmatprep.subr.bf16.mxu1 %v15345_v53  ;;  %v15373_v51 = vld [vmem:[#allocation7 + $0x128] ss:$16 sps:$4 sm:$0xff]  }
 0x59d   :  { %8031 = vmatpush1.bf16.msra.mxu0 %v15340_v52  ;;  %8072 = vmatpush1.bf16.msra.mxu1 %v15343_v55  ;;  %v15378_v52 = vld [vmem:[#allocation7 + $0x144] ss:$16 sps:$4 sm:$0xff]   ;;  %v15381_v55 = vld [vmem:[#allocation7 + $0x14c] ss:$16 sps:$4 sm:$0xff]  }
 0x59e   :  { %8032 = vmatprep.subr.bf16.mxu0 %v15348_v34  ;;  %8073 = vmatprep.subr.bf16.mxu1 %v15351_v4 }
 0x5a1   :  { %v6774_v47 = vpop.f32.mrb[72].mxu0  ;;  %8033 = vmatpush1.bf16.msra.mxu0 %v15346_v30  ;;  %8074 = vmatpush1.bf16.msra.mxu1 %v15349_v60  ;;  %v15376_v60 = vld [vmem:[#allocation7 + $0x140] ss:$16 sps:$4 sm:$0xff]  }
 0x5a2   :  { %v6775_v20 = vadd.f32 %v6774_v47, %v16802_v56  ;;  %v6815_v9 = vpop.f32.mrb[72].mxu1  ;;  %v6776_v44 = vpop.f32.mrb[73].mxu0  ;;  %8034 = vmatprep.subr.bf16.mxu0 %v15354_v58  ;;  %8075 = vmatprep.subr.bf16.mxu1 %v15357_v2  ;;  %v15379_v58 = vld [vmem:[#allocation7 + $0x148] ss:$16 sps:$4 sm:$0xff]  }
 0x5a3   :  { %v6777_v62 = vadd.f32 %v6776_v44, %v16805_v15  ;;  %v6817_v33 = vpop.f32.mrb[73].mxu1  ;;  %v6778_v29 = vpop.f32.mrb[74].mxu0  ;;  %v6816_v23 = vadd.f32 %v6815_v9, %v16814_v12  ;;  %v15387_v9 = vld [vmem:[#allocation7 + $0x16c] ss:$16 sps:$4 sm:$0xff]  }
 0x5a4   :  { %v6822_v22 = vmul.f32 0.5, %v6775_v20  ;;  %v6819_v31 = vpop.f32.mrb[74].mxu1  ;;  %v6779_v26 = vpop.f32.mrb[75].mxu0  ;;  %v6818_v50 = vadd.f32 %v6817_v33, %v16808_v25  ;;  %v15384_v20 = vld [vmem:[#allocation7 + $0x164] ss:$16 sps:$4 sm:$0xff]  }
 0x5a5   :  { %v6823_v63 = vmul.f32 0.5, %v6777_v62  ;;  %v6820_v32 = vpop.f32.mrb[75].mxu1  ;;  %8035 = vmatpush1.bf16.msra.mxu0 %v15352_v13  ;;  %8076 = vmatpush1.bf16.msra.mxu1 %v15355_v38  ;;  %v6824_v53 = vmul.f32 0.5, %v6816_v23  ;;  %v15382_v62 = vld [vmem:[#allocation7 + $0x160] ss:$16 sps:$4 sm:$0xff]  }
 0x5a6   :  { %16128 = vtanh.f32 %v6822_v22  ;;  %8036 = vmatprep.subr.bf16.mxu0 %v15360_v27  ;;  %8077 = vmatprep.subr.bf16.mxu1 %v15363_v17  ;;  %v15385_v33 = vld [vmem:[#allocation7 + $0x168] ss:$16 sps:$4 sm:$0xff]   ;;  %v15390_v27 = vld [vmem:[#allocation7 + $0x184] ss:$16 sps:$4 sm:$0xff]   ;;  %v15393_v17 = vld [vmem:[#allocation7 + $0x18c] ss:$16 sps:$4 sm:$0xff]  }
 0x5a7   :  { %16130 = vtanh.f32 %v6823_v63  ;;  %v15388_v31 = vld [vmem:[#allocation7 + $0x180] ss:$16 sps:$4 sm:$0xff]   ;;  %v15391_v26 = vld [vmem:[#allocation7 + $0x188] ss:$16 sps:$4 sm:$0xff]   ;;  %v15396_v63 = vld [vmem:[#allocation7 + $0x1a4] ss:$16 sps:$4 sm:$0xff]  }
 0x5a8   :  { %16132 = vtanh.f32 %v6818_v50  ;;  %v15399_v32 = vld [vmem:[#allocation7 + $0x1ac] ss:$16 sps:$4 sm:$0xff]  }
 0x5a9   :  { %8037 = vmatpush1.bf16.msra.mxu0 %v15358_v57  ;;  %8078 = vmatpush1.bf16.msra.mxu1 %v15361_v39  ;;  %16134 = vtanh.f32 %v6824_v53 }
 0x5aa   :  { %8038 = vmatprep.subr.bf16.mxu0 %v15366_v1  ;;  %8079 = vmatprep.subr.bf16.mxu1 %v15369_v28  ;;  %v15394_v1 = vld [vmem:[#allocation7 + $0x1a0] ss:$16 sps:$4 sm:$0xff]   ;;  %v15397_v28 = vld [vmem:[#allocation7 + $0x1a8] ss:$16 sps:$4 sm:$0xff]  }
 0x5ad   :  { %8039 = vmatpush1.bf16.msra.mxu0 %v15364_v3  ;;  %8080 = vmatpush1.bf16.msra.mxu1 %v15367_v48  ;;  %v15402_v3 = vld [vmem:[#allocation7 + $0x1c4] ss:$16 sps:$4 sm:$0xff]   ;;  %v15405_v48 = vld [vmem:[#allocation7 + $0x1cc] ss:$16 sps:$4 sm:$0xff]  }
 0x5ae   :  { %8040 = vmatprep.subr.bf16.mxu0 %v15372_v43  ;;  %8081 = vmatprep.subr.bf16.mxu1 %v15375_v37  ;;  %v15400_v43 = vld [vmem:[#allocation7 + $0x1c0] ss:$16 sps:$4 sm:$0xff]   ;;  %v15403_v37 = vld [vmem:[#allocation7 + $0x1c8] ss:$16 sps:$4 sm:$0xff]  }
 0x5b0   :  { %v16129_v34 = vpop.eup %16128 }
 0x5b1   :  { %v6828_v4 = vmul.f32 0.5, %v16129_v34  ;;  %v16131_v30 = vpop.eup %16130  ;;  %8041 = vmatpush1.bf16.msra.mxu0 %v15370_v42  ;;  %8082 = vmatpush1.bf16.msra.mxu1 %v15373_v51  ;;  %v15408_v42 = vld [vmem:[#allocation7 + $0x1e4] ss:$16 sps:$4 sm:$0xff]   ;;  %v15411_v51 = vld [vmem:[#allocation7 + $0x1ec] ss:$16 sps:$4 sm:$0xff]  }
 0x5b2   :  { %v6829_v47 = vmul.f32 0.5, %v16131_v30  ;;  %8042 = vmatprep.subr.bf16.mxu0 %v15378_v52  ;;  %8083 = vmatprep.subr.bf16.mxu1 %v15381_v55  ;;  %v16133_v44 = vpop.eup %16132  ;;  %v15406_v52 = vld [vmem:[#allocation7 + $0x1e0] ss:$16 sps:$4 sm:$0xff]   ;;  %v15409_v55 = vld [vmem:[#allocation7 + $0x1e8] ss:$16 sps:$4 sm:$0xff]  }
 0x5b3   :  { %v6831_v2 = vadd.f32 0.5, %v6828_v4  ;;  %v16135_v57 = vpop.eup %16134  ;;  %v15414_v4 = vld [vmem:[%s18407_s3 + $0x4] ss:$16 sps:$4 sm:$0xff]   ;;  %v15417_v30 = vld [vmem:[%s18407_s3 + $0xc] ss:$16 sps:$4 sm:$0xff]  }
 0x5b4   :  { %v6832_v13 = vadd.f32 0.5, %v6829_v47  ;;  %v6830_v23 = vmul.f32 0.5, %v16135_v57  ;;  %v15444_v57 = vld [vmem:[%s18407_s3 + $0xa4] ss:$16 sps:$4 sm:$0xff]  }
 0x5b5   :  { %v6836_v38 = vmul.f32 %v16133_v44, %v6831_v2  ;;  %8043 = vmatpush1.bf16.msra.mxu0 %v15376_v60  ;;  %8084 = vmatpush1.bf16.msra.mxu1 %v15379_v58  ;;  %v15423_v44 = vld [vmem:[%s18407_s3 + $0x2c] ss:$16 sps:$4 sm:$0xff]  }
 0x5b6   :  { %v6835_v29 = vmul.f32 %v6832_v13, %v17350_v49  ;;  %8044 = vmatprep.subr.bf16.mxu0 %v15384_v20  ;;  %8085 = vmatprep.subr.bf16.mxu1 %v15387_v9  ;;  %v6833_v53 = vadd.f32 0.5, %v6830_v23  ;;  %v15412_v20 = vld [vmem:[%s18407_s3] ss:$16 sps:$4 sm:$0xff]   ;;  %v15415_v9 = vld [vmem:[%s18407_s3 + $0x8] ss:$16 sps:$4 sm:$0xff]  }
 0x5b7   :  { %v15418_v13 = vld [vmem:[%s18407_s3 + $0x20] ss:$16 sps:$4 sm:$0xff]   ;;  %v15453_v23 = vld [vmem:[%s18407_s3 + $0xcc] ss:$16 sps:$4 sm:$0xff]  }
 0x5b8   :  { %v6837_v22 = vadd.f32 %v6836_v38, %v6835_v29  ;;  %v15421_v38 = vld [vmem:[%s18407_s3 + $0x28] ss:$16 sps:$4 sm:$0xff]  }
 0x5b9   :  { %8045 = vmatpush1.bf16.msra.mxu0 %v15382_v62  ;;  %8086 = vmatpush1.bf16.msra.mxu1 %v15385_v33  ;;  %v15426_v62 = vld [vmem:[%s18407_s3 + $0x44] ss:$16 sps:$4 sm:$0xff]   ;;  %v15424_v33 = vld [vmem:[%s18407_s3 + $0x40] ss:$16 sps:$4 sm:$0xff]   ;;  %v15427_v29 = vld [vmem:[%s18407_s3 + $0x48] ss:$16 sps:$4 sm:$0xff]  }
 0x5ba   :  { %16136 = vtanh.f32 %v6837_v22  ;;  %8046 = vmatprep.subr.bf16.mxu0 %v15390_v27  ;;  %8087 = vmatprep.subr.bf16.mxu1 %v15393_v17  ;;  %v6842_v50 = vsub.f32 %v6837_v22, %v17350_v49  ;;  %v15432_v27 = vld [vmem:[%s18407_s3 + $0x64] ss:$16 sps:$4 sm:$0xff]   ;;  %v15435_v17 = vld [vmem:[%s18407_s3 + $0x6c] ss:$16 sps:$4 sm:$0xff]   ;;  %v15430_v22 = vld [vmem:[%s18407_s3 + $0x60] ss:$16 sps:$4 sm:$0xff]  }
 0x5bc   :  { %v17500_v39 = vadd.f32 %v6842_v50, %v17350_v49  ;;  %v15439_v50 = vld [vmem:[%s18407_s3 + $0x88] ss:$16 sps:$4 sm:$0xff]  }
 0x5bd   :  { %8047 = vmatpush1.bf16.msra.mxu0 %v15388_v31  ;;  %8088 = vmatpush1.bf16.msra.mxu1 %v15391_v26  ;;  %v15433_v31 = vld [vmem:[%s18407_s3 + $0x68] ss:$16 sps:$4 sm:$0xff]   ;;  %v15438_v26 = vld [vmem:[%s18407_s3 + $0x84] ss:$16 sps:$4 sm:$0xff]  }
 0x5be   :  { %8048 = vmatprep.subr.bf16.mxu0 %v15396_v63  ;;  %8089 = vmatprep.subr.bf16.mxu1 %v15399_v32  ;;  %v15441_v63 = vld [vmem:[%s18407_s3 + $0x8c] ss:$16 sps:$4 sm:$0xff]   ;;  %v15436_v32 = vld [vmem:[%s18407_s3 + $0x80] ss:$16 sps:$4 sm:$0xff]  }
 0x5c1   :  { %8049 = vmatpush1.bf16.msra.mxu0 %v15394_v1  ;;  %8090 = vmatpush1.bf16.msra.mxu1 %v15397_v28  ;;  %v15447_v1 = vld [vmem:[%s18407_s3 + $0xac] ss:$16 sps:$4 sm:$0xff]   ;;  %v15442_v28 = vld [vmem:[%s18407_s3 + $0xa0] ss:$16 sps:$4 sm:$0xff]  }
 0x5c2   :  { %8050 = vmatprep.subr.bf16.mxu0 %v15402_v3  ;;  %8091 = vmatprep.subr.bf16.mxu1 %v15405_v48  ;;  %v15445_v3 = vld [vmem:[%s18407_s3 + $0xa8] ss:$16 sps:$4 sm:$0xff]   ;;  %v15450_v48 = vld [vmem:[%s18407_s3 + $0xc4] ss:$16 sps:$4 sm:$0xff]  }
 0x5c4   :  { %v16137_v49 = vpop.eup %16136 }
 0x5c5   :  { %8051 = vmatpush1.bf16.msra.mxu0 %v15400_v43  ;;  %8092 = vmatpush1.bf16.msra.mxu1 %v15403_v37  ;;  %v6839_v34 = vmul.f32 %v16137_v49, %v6833_v53  ;;  %v15448_v43 = vld [vmem:[%s18407_s3 + $0xc0] ss:$16 sps:$4 sm:$0xff]   ;;  %v15451_v37 = vld [vmem:[%s18407_s3 + $0xc8] ss:$16 sps:$4 sm:$0xff]  }
 0x5c6   :  { %8052 = vmatprep.subr.bf16.mxu0 %v15408_v42  ;;  %8093 = vmatprep.subr.bf16.mxu1 %v15411_v51  ;;  %v15456_v42 = vld [vmem:[%s18407_s3 + $0xe4] ss:$16 sps:$4 sm:$0xff]   ;;  %v15459_v51 = vld [vmem:[%s18407_s3 + $0xec] ss:$16 sps:$4 sm:$0xff]   ;;  %v15454_v53 = vld [vmem:[%s18407_s3 + $0xe0] ss:$16 sps:$4 sm:$0xff]  }
 0x5c7   :  { %v6840_v60 = vsub.f32 %v6839_v34, %v17360_v45  ;;  %v15457_v49 = vld [vmem:[%s18407_s3 + $0xe8] ss:$16 sps:$4 sm:$0xff]  }
 0x5c9   :  { %8053 = vmatpush1.bf16.msra.mxu0 %v15406_v52  ;;  %8094 = vmatpush1.bf16.msra.mxu1 %v15409_v55  ;;  %v17510_v58 = vadd.f32 %v6840_v60, %v17360_v45  ;;  %v15420_v45 = vld [vmem:[%s18407_s3 + $0x24] ss:$16 sps:$4 sm:$0xff]   ;;  %v15465_v55 = vld [vmem:[#allocation5 + $0xc] ss:$16 sps:$4 sm:$0xff]  }
 0x5ca   :  { %8328 = vmatprep.subr.bf16.mxu0 %v15414_v4  ;;  %8369 = vmatprep.subr.bf16.mxu1 %v15417_v30  ;;  %v15462_v52 = vld [vmem:[#allocation5 + $0x4] ss:$16 sps:$4 sm:$0xff]  }
 0x5cb   :  { %v12376_v2 = vmul.f32 %v17207_v54, %v17510_v58  ;;  %v6848_v47 = vpack.c.bf16 %v17510_v58, %v17510_v58 }
 0x5cd   :  { %12386 = vadd.xlane.f32.xlu0 %v12376_v2  ;;  %8054 = vmatprep.mubr.bf16.mxu0 %v6848_v47 }
 0x5ce   :  { %8095 = vmatprep.mubr.bf16.mxu1 %v6848_v47  ;;  %8055 = vmatmul.mubr.bf16.vlgmr.msra.gmra.mrb[84].mxu0 %v17487_v61 }
 0x5cf   :  { %8096 = vmatmul.mubr.bf16.vlgmr.msra.gmra.mrb[84].mxu1 %v17487_v61  ;;  %8329 = vmatpush1.bf16.msra.mxu0 %v15412_v20  ;;  %v15429_v61 = vld [vmem:[%s18407_s3 + $0x4c] ss:$16 sps:$4 sm:$0xff]  }
 0x5d0   :  { %8370 = vmatpush1.bf16.msra.mxu1 %v15415_v9  ;;  %8330 = vmatprep.subr.bf16.mxu0 %v15420_v45 }
 0x5d1   :  { %8371 = vmatprep.subr.bf16.mxu1 %v15423_v44  ;;  %8360 = vmatprep.mubr.bf16.mxu0 %v18523_v35 }
 0x5d2   :  { %8401 = vmatprep.mubr.bf16.mxu1 %v18523_v35 }
 0x5d3   :  { %8331 = vmatpush1.bf16.msra.mxu0 %v15418_v13 }
 0x5d4   :  { %8372 = vmatpush1.bf16.msra.mxu1 %v15421_v38  ;;  %8332 = vmatprep.subr.bf16.mxu0 %v15426_v62 }
 0x5d5   :  { %8373 = vmatprep.subr.bf16.mxu1 %v15429_v61 }
 0x5d7   :  { %8333 = vmatpush1.bf16.msra.mxu0 %v15424_v33 }
 0x5d8   :  { %8374 = vmatpush1.bf16.msra.mxu1 %v15427_v29  ;;  %8334 = vmatprep.subr.bf16.mxu0 %v15432_v27 }
 0x5d9   :  { %8375 = vmatprep.subr.bf16.mxu1 %v15435_v17 }
 0x5db   :  { %8335 = vmatpush1.bf16.msra.mxu0 %v15430_v22 }
 0x5dc   :  { %8376 = vmatpush1.bf16.msra.mxu1 %v15433_v31  ;;  %8336 = vmatprep.subr.bf16.mxu0 %v15438_v26 }
 0x5dd   :  { %8377 = vmatprep.subr.bf16.mxu1 %v15441_v63 }
 0x5df   :  { %8337 = vmatpush1.bf16.msra.mxu0 %v15436_v32 }
 0x5e0   :  { %8378 = vmatpush1.bf16.msra.mxu1 %v15439_v50  ;;  %8338 = vmatprep.subr.bf16.mxu0 %v15444_v57 }
 0x5e1   :  { %8379 = vmatprep.subr.bf16.mxu1 %v15447_v1 }
 0x5e3   :  { %8339 = vmatpush1.bf16.msra.mxu0 %v15442_v28  ;;  %v15460_v28 = vld [vmem:[#allocation5] ss:$16 sps:$4 sm:$0xff]  }
 0x5e4   :  { %8380 = vmatpush1.bf16.msra.mxu1 %v15445_v3  ;;  %8340 = vmatprep.subr.bf16.mxu0 %v15450_v48  ;;  %v15463_v3 = vld [vmem:[#allocation5 + $0x8] ss:$16 sps:$4 sm:$0xff]  }
 0x5e5   :  { %8381 = vmatprep.subr.bf16.mxu1 %v15453_v23  ;;  %v15468_v23 = vld [vmem:[#allocation5 + $0x24] ss:$16 sps:$4 sm:$0xff]  }
 0x5e7   :  { %8341 = vmatpush1.bf16.msra.mxu0 %v15448_v43  ;;  %v15471_v43 = vld [vmem:[#allocation5 + $0x2c] ss:$16 sps:$4 sm:$0xff]  }
 0x5e8   :  { %8382 = vmatpush1.bf16.msra.mxu1 %v15451_v37  ;;  %8342 = vmatprep.subr.bf16.mxu0 %v15456_v42  ;;  %v15469_v37 = vld [vmem:[#allocation5 + $0x28] ss:$16 sps:$4 sm:$0xff]   ;;  %v15474_v42 = vld [vmem:[#allocation5 + $0x44] ss:$16 sps:$4 sm:$0xff]  }
 0x5e9   :  { %8383 = vmatprep.subr.bf16.mxu1 %v15459_v51  ;;  %v15477_v51 = vld [vmem:[#allocation5 + $0x4c] ss:$16 sps:$4 sm:$0xff]  }
 0x5eb   :  { %8343 = vmatpush1.bf16.msra.mxu0 %v15454_v53  ;;  %v15472_v53 = vld [vmem:[#allocation5 + $0x40] ss:$16 sps:$4 sm:$0xff]  }
 0x5ec   :  { %8384 = vmatpush1.bf16.msra.mxu1 %v15457_v49  ;;  %8816 = vmatprep.subr.bf16.mxu0 %v15462_v52  ;;  %v15475_v49 = vld [vmem:[#allocation5 + $0x48] ss:$16 sps:$4 sm:$0xff]   ;;  %v15480_v52 = vld [vmem:[#allocation5 + $0x64] ss:$16 sps:$4 sm:$0xff]  }
 0x5ed   :  { %8857 = vmatprep.subr.bf16.mxu1 %v15465_v55  ;;  %v15483_v55 = vld [vmem:[#allocation5 + $0x6c] ss:$16 sps:$4 sm:$0xff]  }
 0x608   :  { %v7080_v34 = vpop.f32.mrb[76].mxu0  ;;  %v7121_v4 = vpop.f32.mrb[76].mxu1 }
 0x609   :  { %v7128_v30 = vadd.f32 %v7080_v34, %v16731_v6  ;;  %v7130_v60 = vadd.f32 %v7121_v4, %v16733_v8  ;;  %v7082_v2 = vpop.f32.mrb[77].mxu0  ;;  %v7123_v47 = vpop.f32.mrb[77].mxu1  ;;  %v15478_v34 = vld [vmem:[#allocation5 + $0x60] ss:$16 sps:$4 sm:$0xff]   ;;  %v15481_v4 = vld [vmem:[#allocation5 + $0x68] ss:$16 sps:$4 sm:$0xff]  }
 0x60a   :  { %v7129_v20 = vadd.f32 %v7082_v2, %v16735_v10  ;;  %v7131_v9 = vadd.f32 %v7123_v47, %v16737_v11  ;;  %v7084_v45 = vpop.f32.mrb[78].mxu0  ;;  %v7125_v44 = vpop.f32.mrb[78].mxu1  ;;  %v15484_v2 = vld [vmem:[#allocation5 + $0x80] ss:$16 sps:$4 sm:$0xff]   ;;  %v15487_v47 = vld [vmem:[#allocation5 + $0x88] ss:$16 sps:$4 sm:$0xff]  }
 0x60b   :  { %v7132_v13 = vmul.f32 0.5, %v7128_v30  ;;  %v7085_v38 = vpop.f32.mrb[79].mxu0  ;;  %v7126_v62 = vpop.f32.mrb[79].mxu1  ;;  %v7134_v33 = vmul.f32 0.5, %v7130_v60  ;;  %v15486_v30 = vld [vmem:[#allocation5 + $0x84] ss:$16 sps:$4 sm:$0xff]  }
 0x60c   :  { %v7133_v61 = vmul.f32 0.5, %v7129_v20  ;;  %v15489_v60 = vld [vmem:[#allocation5 + $0x8c] ss:$16 sps:$4 sm:$0xff]   ;;  %v15492_v20 = vld [vmem:[#allocation5 + $0xa4] ss:$16 sps:$4 sm:$0xff]  }
 0x60d   :  { %16138 = vtanh.f32 %v7132_v13  ;;  %v15490_v45 = vld [vmem:[#allocation5 + $0xa0] ss:$16 sps:$4 sm:$0xff]   ;;  %v15493_v44 = vld [vmem:[#allocation5 + $0xa8] ss:$16 sps:$4 sm:$0xff]   ;;  %v15498_v13 = vld [vmem:[#allocation5 + $0xc4] ss:$16 sps:$4 sm:$0xff]  }
 0x60e   :  { %16140 = vtanh.f32 %v7133_v61  ;;  %v15501_v38 = vld [vmem:[#allocation5 + $0xcc] ss:$16 sps:$4 sm:$0xff]   ;;  %v15496_v62 = vld [vmem:[#allocation5 + $0xc0] ss:$16 sps:$4 sm:$0xff]   ;;  %v15499_v61 = vld [vmem:[#allocation5 + $0xc8] ss:$16 sps:$4 sm:$0xff]  }
 0x60f   :  { %16142 = vtanh.f32 %v7131_v9  ;;  %v15495_v9 = vld [vmem:[#allocation5 + $0xac] ss:$16 sps:$4 sm:$0xff]  }
 0x610   :  { %16144 = vtanh.f32 %v7134_v33  ;;  %v15504_v33 = vld [vmem:[#allocation5 + $0xe4] ss:$16 sps:$4 sm:$0xff]  }
 0x617   :  { %v16139_v29 = vpop.eup %16138 }
 0x618   :  { %v7138_v6 = vmul.f32 0.5, %v16139_v29  ;;  %v16141_v27 = vpop.eup %16140  ;;  %v15507_v29 = vld [vmem:[#allocation5 + $0xec] ss:$16 sps:$4 sm:$0xff]  }
 0x619   :  { %v7139_v17 = vmul.f32 0.5, %v16141_v27  ;;  %v16143_v22 = vpop.eup %16142  ;;  %v15505_v27 = vld [vmem:[#allocation5 + $0xe8] ss:$16 sps:$4 sm:$0xff]  }
 0x61a   :  { %v7141_v8 = vadd.f32 0.5, %v7138_v6  ;;  %v16145_v63 = vpop.eup %16144  ;;  %v15502_v6 = vld [vmem:[#allocation5 + $0xe0] ss:$16 sps:$4 sm:$0xff]  }
 0x61b   :  { %v7142_v10 = vadd.f32 0.5, %v7139_v17  ;;  %v7140_v32 = vmul.f32 0.5, %v16145_v63  ;;  %v15513_v17 = vld [vmem:[#allocation5 + $0x10c] ss:$16 sps:$4 sm:$0xff]   ;;  %v15514_v63 = vld [vmem:[#allocation5 + $0x120] ss:$16 sps:$4 sm:$0xff]  }
 0x61c   :  { %v7146_v31 = vmul.f32 %v16143_v22, %v7141_v8  ;;  %v15510_v8 = vld [vmem:[#allocation5 + $0x104] ss:$16 sps:$4 sm:$0xff]   ;;  %v15508_v22 = vld [vmem:[#allocation5 + $0x100] ss:$16 sps:$4 sm:$0xff]  }
 0x61d   :  { %v7145_v11 = vmul.f32 %v7142_v10, %v17465_v24  ;;  %v7143_v50 = vadd.f32 0.5, %v7140_v32  ;;  %v15466_v24 = vld [vmem:[#allocation5 + $0x20] ss:$16 sps:$4 sm:$0xff]   ;;  %v15511_v10 = vld [vmem:[#allocation5 + $0x108] ss:$16 sps:$4 sm:$0xff]  }
 0x61e   :  { %v15517_v32 = vld [vmem:[#allocation5 + $0x128] ss:$16 sps:$4 sm:$0xff]  }
 0x61f   :  { %v17615_v26 = vadd.f32 %v7146_v31, %v7145_v11  ;;  %v15516_v31 = vld [vmem:[#allocation5 + $0x124] ss:$16 sps:$4 sm:$0xff]   ;;  %v15519_v11 = vld [vmem:[#allocation5 + $0x12c] ss:$16 sps:$4 sm:$0xff]  }
 0x621   :  { %16146 = vtanh.f32 %v17615_v26 }
 0x62b   :  { %v16147_v57 = vpop.eup %16146 }
 0x62c   :  { %v7149_v1 = vmul.f32 %v16147_v57, %v7143_v50  ;;  %v15522_v50 = vld [vmem:[#allocation5 + $0x144] ss:$16 sps:$4 sm:$0xff]   ;;  %v15525_v57 = vld [vmem:[#allocation5 + $0x14c] ss:$16 sps:$4 sm:$0xff]  }
 0x62e   :  { %v17618_v48 = vpack.c.bf16 %v7149_v1, %v7149_v1  ;;  %v15520_v1 = vld [vmem:[#allocation5 + $0x140] ss:$16 sps:$4 sm:$0xff]  }
 0x630   :  { %8361 = vmatmul.mubr.bf16.vlgmr.msra.gmra.mrb[88].mxu0 %v17618_v48  ;;  %8402 = vmatmul.mubr.bf16.vlgmr.msra.gmra.mrb[88].mxu1 %v17618_v48 }
 0x631   :  { %8817 = vmatpush1.bf16.msra.mxu0 %v15460_v28  ;;  %8858 = vmatpush1.bf16.msra.mxu1 %v15463_v3  ;;  %v15523_v28 = vld [vmem:[#allocation5 + $0x148] ss:$16 sps:$4 sm:$0xff]   ;;  %v15528_v3 = vld [vmem:[#allocation5 + $0x164] ss:$16 sps:$4 sm:$0xff]  }
 0x632   :  { %8818 = vmatprep.subr.bf16.mxu0 %v15468_v23  ;;  %8859 = vmatprep.subr.bf16.mxu1 %v15471_v43  ;;  %v15531_v23 = vld [vmem:[#allocation5 + $0x16c] ss:$16 sps:$4 sm:$0xff]   ;;  %v15526_v43 = vld [vmem:[#allocation5 + $0x160] ss:$16 sps:$4 sm:$0xff]  }
 0x635   :  { %8819 = vmatpush1.bf16.msra.mxu0 %v15466_v24  ;;  %8860 = vmatpush1.bf16.msra.mxu1 %v15469_v37  ;;  %v15529_v24 = vld [vmem:[#allocation5 + $0x168] ss:$16 sps:$4 sm:$0xff]   ;;  %v15534_v37 = vld [vmem:[#allocation5 + $0x184] ss:$16 sps:$4 sm:$0xff]  }
 0x636   :  { %8820 = vmatprep.subr.bf16.mxu0 %v15474_v42  ;;  %8861 = vmatprep.subr.bf16.mxu1 %v15477_v51  ;;  %v15537_v42 = vld [vmem:[#allocation5 + $0x18c] ss:$16 sps:$4 sm:$0xff]  }
 0x639   :  { %8821 = vmatpush1.bf16.msra.mxu0 %v15472_v53  ;;  %8862 = vmatpush1.bf16.msra.mxu1 %v15475_v49  ;;  %v15532_v49 = vld [vmem:[#allocation5 + $0x180] ss:$16 sps:$4 sm:$0xff]  }
 0x63a   :  { %8822 = vmatprep.subr.bf16.mxu0 %v15480_v52  ;;  %8863 = vmatprep.subr.bf16.mxu1 %v15483_v55  ;;  %v15535_v52 = vld [vmem:[#allocation5 + $0x188] ss:$16 sps:$4 sm:$0xff]  }
 0x63d   :  { %8823 = vmatpush1.bf16.msra.mxu0 %v15478_v34  ;;  %8864 = vmatpush1.bf16.msra.mxu1 %v15481_v4 }
 0x63e   :  { %8824 = vmatprep.subr.bf16.mxu0 %v15486_v30  ;;  %8865 = vmatprep.subr.bf16.mxu1 %v15489_v60  ;;  %v15540_v30 = vld [vmem:[#allocation5 + $0x1a4] ss:$16 sps:$4 sm:$0xff]   ;;  %v15543_v60 = vld [vmem:[#allocation5 + $0x1ac] ss:$16 sps:$4 sm:$0xff]  }
 0x641   :  { %8825 = vmatpush1.bf16.msra.mxu0 %v15484_v2  ;;  %8866 = vmatpush1.bf16.msra.mxu1 %v15487_v47 }
 0x642   :  { %8826 = vmatprep.subr.bf16.mxu0 %v15492_v20  ;;  %8867 = vmatprep.subr.bf16.mxu1 %v15495_v9 }
 0x645   :  { %8827 = vmatpush1.bf16.msra.mxu0 %v15490_v45  ;;  %8868 = vmatpush1.bf16.msra.mxu1 %v15493_v44 }
 0x646   :  { %8828 = vmatprep.subr.bf16.mxu0 %v15498_v13  ;;  %8869 = vmatprep.subr.bf16.mxu1 %v15501_v38  ;;  %v15538_v38 = vld [vmem:[#allocation5 + $0x1a0] ss:$16 sps:$4 sm:$0xff]  }
 0x649   :  { %8829 = vmatpush1.bf16.msra.mxu0 %v15496_v62  ;;  %8870 = vmatpush1.bf16.msra.mxu1 %v15499_v61  ;;  %v15541_v62 = vld [vmem:[#allocation5 + $0x1a8] ss:$16 sps:$4 sm:$0xff]  }
 0x64a   :  { %8830 = vmatprep.subr.bf16.mxu0 %v15504_v33  ;;  %8871 = vmatprep.subr.bf16.mxu1 %v15507_v29  ;;  %v15546_v33 = vld [vmem:[#allocation5 + $0x1c4] ss:$16 sps:$4 sm:$0xff]   ;;  %v15549_v29 = vld [vmem:[#allocation5 + $0x1cc] ss:$16 sps:$4 sm:$0xff]  }
 0x64d   :  { %8831 = vmatpush1.bf16.msra.mxu0 %v15502_v6  ;;  %8872 = vmatpush1.bf16.msra.mxu1 %v15505_v27  ;;  %v15544_v6 = vld [vmem:[#allocation5 + $0x1c0] ss:$16 sps:$4 sm:$0xff]   ;;  %v15547_v27 = vld [vmem:[#allocation5 + $0x1c8] ss:$16 sps:$4 sm:$0xff]  }
 0x64e   :  { %8832 = vmatprep.subr.bf16.mxu0 %v15510_v8  ;;  %8873 = vmatprep.subr.bf16.mxu1 %v15513_v17  ;;  %v15552_v8 = vld [vmem:[#allocation5 + $0x1e4] ss:$16 sps:$4 sm:$0xff]   ;;  %v15555_v17 = vld [vmem:[#allocation5 + $0x1ec] ss:$16 sps:$4 sm:$0xff]  }
 0x651   :  { %8833 = vmatpush1.bf16.msra.mxu0 %v15508_v22  ;;  %8874 = vmatpush1.bf16.msra.mxu1 %v15511_v10  ;;  %v15550_v10 = vld [vmem:[#allocation5 + $0x1e0] ss:$16 sps:$4 sm:$0xff]  }
 0x652   :  { %8834 = vmatprep.subr.bf16.mxu0 %v15516_v31  ;;  %8875 = vmatprep.subr.bf16.mxu1 %v15519_v11  ;;  %v15553_v31 = vld [vmem:[#allocation5 + $0x1e8] ss:$16 sps:$4 sm:$0xff]   ;;  %v15558_v11 = vld [vmem:[#allocation7 + $0x4] ss:$16 sps:$4 sm:$0xff]  }
 0x655   :  { %8835 = vmatpush1.bf16.msra.mxu0 %v15514_v63  ;;  %8876 = vmatpush1.bf16.msra.mxu1 %v15517_v32  ;;  %v15561_v63 = vld [vmem:[#allocation7 + $0xc] ss:$16 sps:$4 sm:$0xff]  }
 0x656   :  { %8836 = vmatprep.subr.bf16.mxu0 %v15522_v50  ;;  %8877 = vmatprep.subr.bf16.mxu1 %v15525_v57 }
 0x659   :  { %8837 = vmatpush1.bf16.msra.mxu0 %v15520_v1  ;;  %8878 = vmatpush1.bf16.msra.mxu1 %v15523_v28 }
 0x65a   :  { %8838 = vmatprep.subr.bf16.mxu0 %v15528_v3  ;;  %8879 = vmatprep.subr.bf16.mxu1 %v15531_v23 }
 0x65d   :  { %8839 = vmatpush1.bf16.msra.mxu0 %v15526_v43  ;;  %8880 = vmatpush1.bf16.msra.mxu1 %v15529_v24 }
 0x65e   :  { %8840 = vmatprep.subr.bf16.mxu0 %v15534_v37  ;;  %8881 = vmatprep.subr.bf16.mxu1 %v15537_v42 }
 0x65f   :  { %v7568_v51 = vpop.f32.mrb[80].mxu0  ;;  %v7609_v53 = vpop.f32.mrb[80].mxu1 }
 0x660   :  { %v7569_v55 = vadd.f32 %v7568_v51, %v16770_v59  ;;  %v7570_v34 = vpop.f32.mrb[81].mxu0  ;;  %v7611_v4 = vpop.f32.mrb[81].mxu1  ;;  %v7610_v22 = vadd.f32 %v7609_v53, %v16782_v7 }
 0x661   :  { %v7571_v2 = vadd.f32 %v7570_v34, %v16773_v0  ;;  %v7572_v47 = vpop.f32.mrb[82].mxu0  ;;  %v7613_v20 = vpop.f32.mrb[82].mxu1  ;;  %8841 = vmatpush1.bf16.msra.mxu0 %v15532_v49  ;;  %8882 = vmatpush1.bf16.msra.mxu1 %v15535_v52  ;;  %v7612_v61 = vadd.f32 %v7611_v4, %v16776_v5 }
 0x662   :  { %v7616_v9 = vmul.f32 0.5, %v7569_v55  ;;  %v7573_v45 = vpop.f32.mrb[83].mxu0  ;;  %v7614_v44 = vpop.f32.mrb[83].mxu1  ;;  %8842 = vmatprep.subr.bf16.mxu0 %v15540_v30  ;;  %8883 = vmatprep.subr.bf16.mxu1 %v15543_v60  ;;  %v7618_v32 = vmul.f32 0.5, %v7610_v22  ;;  %v15556_v47 = vld [vmem:[#allocation7] ss:$16 sps:$4 sm:$0xff]  }
 0x663   :  { %v7617_v13 = vmul.f32 0.5, %v7571_v2  ;;  %v15559_v20 = vld [vmem:[#allocation7 + $0x8] ss:$16 sps:$4 sm:$0xff]   ;;  %v15567_v45 = vld [vmem:[#allocation7 + $0x2c] ss:$16 sps:$4 sm:$0xff]  }
 0x664   :  { %16148 = vtanh.f32 %v7616_v9  ;;  %v15564_v9 = vld [vmem:[#allocation7 + $0x24] ss:$16 sps:$4 sm:$0xff]  }
 0x665   :  { %16150 = vtanh.f32 %v7617_v13  ;;  %8843 = vmatpush1.bf16.msra.mxu0 %v15538_v38  ;;  %8884 = vmatpush1.bf16.msra.mxu1 %v15541_v62  ;;  %v15570_v44 = vld [vmem:[#allocation7 + $0x44] ss:$16 sps:$4 sm:$0xff]   ;;  %v15573_v13 = vld [vmem:[#allocation7 + $0x4c] ss:$16 sps:$4 sm:$0xff]   ;;  %v15568_v38 = vld [vmem:[#allocation7 + $0x40] ss:$16 sps:$4 sm:$0xff]  }
 0x666   :  { %16152 = vtanh.f32 %v7612_v61  ;;  %8844 = vmatprep.subr.bf16.mxu0 %v15546_v33  ;;  %8885 = vmatprep.subr.bf16.mxu1 %v15549_v29  ;;  %v15571_v62 = vld [vmem:[#allocation7 + $0x48] ss:$16 sps:$4 sm:$0xff]   ;;  %v15576_v61 = vld [vmem:[#allocation7 + $0x64] ss:$16 sps:$4 sm:$0xff]   ;;  %v15579_v33 = vld [vmem:[#allocation7 + $0x6c] ss:$16 sps:$4 sm:$0xff]  }
 0x667   :  { %16154 = vtanh.f32 %v7618_v32  ;;  %v15574_v29 = vld [vmem:[#allocation7 + $0x60] ss:$16 sps:$4 sm:$0xff]   ;;  %v15588_v22 = vld [vmem:[#allocation7 + $0xa4] ss:$16 sps:$4 sm:$0xff]   ;;  %v15597_v32 = vld [vmem:[#allocation7 + $0xcc] ss:$16 sps:$4 sm:$0xff]  }
 0x669   :  { %8845 = vmatpush1.bf16.msra.mxu0 %v15544_v6  ;;  %8886 = vmatpush1.bf16.msra.mxu1 %v15547_v27  ;;  %v15582_v6 = vld [vmem:[#allocation7 + $0x84] ss:$16 sps:$4 sm:$0xff]   ;;  %v15585_v27 = vld [vmem:[#allocation7 + $0x8c] ss:$16 sps:$4 sm:$0xff]  }
 0x66a   :  { %8846 = vmatprep.subr.bf16.mxu0 %v15552_v8  ;;  %8887 = vmatprep.subr.bf16.mxu1 %v15555_v17  ;;  %v15580_v8 = vld [vmem:[#allocation7 + $0x80] ss:$16 sps:$4 sm:$0xff]   ;;  %v15583_v17 = vld [vmem:[#allocation7 + $0x88] ss:$16 sps:$4 sm:$0xff]  }
 0x66d   :  { %8847 = vmatpush1.bf16.msra.mxu0 %v15550_v10  ;;  %8888 = vmatpush1.bf16.msra.mxu1 %v15553_v31  ;;  %v15591_v10 = vld [vmem:[#allocation7 + $0xac] ss:$16 sps:$4 sm:$0xff]   ;;  %v15586_v31 = vld [vmem:[#allocation7 + $0xa0] ss:$16 sps:$4 sm:$0xff]  }
 0x66e   :  { %v16149_v50 = vpop.eup %16148  ;;  %9304 = vmatprep.subr.bf16.mxu0 %v15558_v11  ;;  %9345 = vmatprep.subr.bf16.mxu1 %v15561_v63  ;;  %v15589_v11 = vld [vmem:[#allocation7 + $0xa8] ss:$16 sps:$4 sm:$0xff]   ;;  %v15594_v63 = vld [vmem:[#allocation7 + $0xc4] ss:$16 sps:$4 sm:$0xff]  }
 0x66f   :  { %v7622_v57 = vmul.f32 0.5, %v16149_v50  ;;  %v16151_v1 = vpop.eup %16150 }
 0x670   :  { %v7623_v3 = vmul.f32 0.5, %v16151_v1  ;;  %v16153_v23 = vpop.eup %16152 }
 0x671   :  { %v7625_v28 = vadd.f32 0.5, %v7622_v57  ;;  %v16155_v53 = vpop.eup %16154 }
 0x672   :  { %v7626_v43 = vadd.f32 0.5, %v7623_v3  ;;  %v7624_v52 = vmul.f32 0.5, %v16155_v53  ;;  %v15592_v3 = vld [vmem:[#allocation7 + $0xc0] ss:$16 sps:$4 sm:$0xff]  }
 0x673   :  { %v7630_v24 = vmul.f32 %v16153_v23, %v7625_v28  ;;  %v15595_v23 = vld [vmem:[#allocation7 + $0xc8] ss:$16 sps:$4 sm:$0xff]  }
 0x674   :  { %v7629_v37 = vmul.f32 %v7626_v43, %v17479_v46  ;;  %v7627_v55 = vadd.f32 0.5, %v7624_v52 }
 0x676   :  { %v7631_v42 = vadd.f32 %v7630_v24, %v7629_v37 }
 0x678   :  { %16156 = vtanh.f32 %v7631_v42  ;;  %v7636_v51 = vsub.f32 %v7631_v42, %v17479_v46  ;;  %v15600_v42 = vld [vmem:[#allocation7 + $0xe4] ss:$16 sps:$4 sm:$0xff]  }
 0x67a   :  { %v17629_v49 = vadd.f32 %v7636_v51, %v17479_v46  ;;  %v15562_v46 = vld [vmem:[#allocation7 + $0x20] ss:$16 sps:$4 sm:$0xff]   ;;  %v15603_v51 = vld [vmem:[#allocation7 + $0xec] ss:$16 sps:$4 sm:$0xff]  }
 0x682   :  { %v16157_v34 = vpop.eup %16156 }
 0x683   :  { %v7633_v4 = vmul.f32 %v16157_v34, %v7627_v55 }
 0x685   :  { %v7634_v30 = vsub.f32 %v7633_v4, %v17483_v41 }
 0x687   :  { %v17633_v60 = vadd.f32 %v7634_v30, %v17483_v41  ;;  %v15565_v41 = vld [vmem:[#allocation7 + $0x28] ss:$16 sps:$4 sm:$0xff]  }
 0x689   :  { %v17637_v2 = vpack.c.bf16 %v17633_v60, %v17633_v60 }
 0x68b   :  { %8848 = vmatprep.mubr.bf16.mxu0 %v17637_v2  ;;  %8889 = vmatprep.mubr.bf16.mxu1 %v17637_v2 }
 0x68c   :  { %8849 = vmatmul.mubr.bf16.vlgmr.msra.gmra.mrb[92].mxu0 %v17618_v48  ;;  %8890 = vmatmul.mubr.bf16.vlgmr.msra.gmra.mrb[92].mxu1 %v17618_v48  ;;  %v15577_v48 = vld [vmem:[#allocation7 + $0x68] ss:$16 sps:$4 sm:$0xff]  }
 0x68d   :  { %9305 = vmatpush1.bf16.msra.mxu0 %v15556_v47  ;;  %9346 = vmatpush1.bf16.msra.mxu1 %v15559_v20  ;;  %v15598_v47 = vld [vmem:[#allocation7 + $0xe0] ss:$16 sps:$4 sm:$0xff]   ;;  %v15601_v20 = vld [vmem:[#allocation7 + $0xe8] ss:$16 sps:$4 sm:$0xff]  }
 0x68e   :  { %9306 = vmatprep.subr.bf16.mxu0 %v15564_v9  ;;  %9347 = vmatprep.subr.bf16.mxu1 %v15567_v45  ;;  %v15606_v9 = vld [vmem:[#allocation7 + $0x104] ss:$16 sps:$4 sm:$0xff]   ;;  %v15609_v45 = vld [vmem:[#allocation7 + $0x10c] ss:$16 sps:$4 sm:$0xff]  }
 0x691   :  { %9307 = vmatpush1.bf16.msra.mxu0 %v15562_v46  ;;  %9348 = vmatpush1.bf16.msra.mxu1 %v15565_v41  ;;  %v15604_v46 = vld [vmem:[#allocation7 + $0x100] ss:$16 sps:$4 sm:$0xff]   ;;  %v15607_v41 = vld [vmem:[#allocation7 + $0x108] ss:$16 sps:$4 sm:$0xff]  }
 0x692   :  { %9308 = vmatprep.subr.bf16.mxu0 %v15570_v44  ;;  %9349 = vmatprep.subr.bf16.mxu1 %v15573_v13  ;;  %v15612_v13 = vld [vmem:[#allocation7 + $0x124] ss:$16 sps:$4 sm:$0xff]  }
 0x695   :  { %9309 = vmatpush1.bf16.msra.mxu0 %v15568_v38  ;;  %9350 = vmatpush1.bf16.msra.mxu1 %v15571_v62  ;;  %v15615_v38 = vld [vmem:[#allocation7 + $0x12c] ss:$16 sps:$4 sm:$0xff]   ;;  %v15610_v62 = vld [vmem:[#allocation7 + $0x120] ss:$16 sps:$4 sm:$0xff]  }
 0x696   :  { %9310 = vmatprep.subr.bf16.mxu0 %v15576_v61  ;;  %9351 = vmatprep.subr.bf16.mxu1 %v15579_v33  ;;  %v15613_v61 = vld [vmem:[#allocation7 + $0x128] ss:$16 sps:$4 sm:$0xff]  }
 0x699   :  { %9311 = vmatpush1.bf16.msra.mxu0 %v15574_v29  ;;  %9352 = vmatpush1.bf16.msra.mxu1 %v15577_v48  ;;  %v15618_v29 = vld [vmem:[#allocation7 + $0x144] ss:$16 sps:$4 sm:$0xff]   ;;  %v15621_v48 = vld [vmem:[#allocation7 + $0x14c] ss:$16 sps:$4 sm:$0xff]  }
 0x69a   :  { %9312 = vmatprep.subr.bf16.mxu0 %v15582_v6  ;;  %9353 = vmatprep.subr.bf16.mxu1 %v15585_v27 }
 0x69d   :  { %9313 = vmatpush1.bf16.msra.mxu0 %v15580_v8  ;;  %9354 = vmatpush1.bf16.msra.mxu1 %v15583_v17  ;;  %v15616_v17 = vld [vmem:[#allocation7 + $0x140] ss:$16 sps:$4 sm:$0xff]  }
 0x69e   :  { %9314 = vmatprep.subr.bf16.mxu0 %v15588_v22  ;;  %9355 = vmatprep.subr.bf16.mxu1 %v15591_v10  ;;  %v15619_v22 = vld [vmem:[#allocation7 + $0x148] ss:$16 sps:$4 sm:$0xff]  }
 0x6a1   :  { %v8056_v50 = vpop.f32.mrb[84].mxu0  ;;  %9315 = vmatpush1.bf16.msra.mxu0 %v15586_v31  ;;  %9356 = vmatpush1.bf16.msra.mxu1 %v15589_v11  ;;  %v15624_v11 = vld [vmem:[#allocation7 + $0x164] ss:$16 sps:$4 sm:$0xff]  }
 0x6a2   :  { %v8057_v57 = vadd.f32 %v8056_v50, %v16802_v56  ;;  %v8097_v1 = vpop.f32.mrb[84].mxu1  ;;  %v8058_v28 = vpop.f32.mrb[85].mxu0  ;;  %9316 = vmatprep.subr.bf16.mxu0 %v15594_v63  ;;  %9357 = vmatprep.subr.bf16.mxu1 %v15597_v32  ;;  %v15627_v63 = vld [vmem:[#allocation7 + $0x16c] ss:$16 sps:$4 sm:$0xff]  }
 0x6a3   :  { %v8059_v43 = vadd.f32 %v8058_v28, %v16805_v15  ;;  %v8099_v24 = vpop.f32.mrb[85].mxu1  ;;  %v8060_v37 = vpop.f32.mrb[86].mxu0  ;;  %v8098_v44 = vadd.f32 %v8097_v1, %v16814_v12  ;;  %v15622_v1 = vld [vmem:[#allocation7 + $0x160] ss:$16 sps:$4 sm:$0xff]   ;;  %v15625_v28 = vld [vmem:[#allocation7 + $0x168] ss:$16 sps:$4 sm:$0xff]  }
 0x6a4   :  { %v8104_v53 = vmul.f32 0.5, %v8057_v57  ;;  %v8101_v52 = vpop.f32.mrb[86].mxu1  ;;  %v8061_v55 = vpop.f32.mrb[87].mxu0  ;;  %v8100_v30 = vadd.f32 %v8099_v24, %v16808_v25  ;;  %v15628_v37 = vld [vmem:[#allocation7 + $0x180] ss:$16 sps:$4 sm:$0xff]  }
 0x6a5   :  { %v8105_v34 = vmul.f32 0.5, %v8059_v43  ;;  %v8102_v4 = vpop.f32.mrb[87].mxu1  ;;  %9317 = vmatpush1.bf16.msra.mxu0 %v15592_v3  ;;  %9358 = vmatpush1.bf16.msra.mxu1 %v15595_v23  ;;  %v8106_v33 = vmul.f32 0.5, %v8098_v44  ;;  %v15630_v23 = vld [vmem:[#allocation7 + $0x184] ss:$16 sps:$4 sm:$0xff]  }
 0x6a6   :  { %16158 = vtanh.f32 %v8104_v53  ;;  %9318 = vmatprep.subr.bf16.mxu0 %v15600_v42  ;;  %9359 = vmatprep.subr.bf16.mxu1 %v15603_v51  ;;  %v15633_v43 = vld [vmem:[#allocation7 + $0x18c] ss:$16 sps:$4 sm:$0xff]   ;;  %v15631_v42 = vld [vmem:[#allocation7 + $0x188] ss:$16 sps:$4 sm:$0xff]   ;;  %v15636_v51 = vld [vmem:[#allocation7 + $0x1a4] ss:$16 sps:$4 sm:$0xff]  }
 0x6a7   :  { %16160 = vtanh.f32 %v8105_v34  ;;  %v15639_v53 = vld [vmem:[#allocation7 + $0x1ac] ss:$16 sps:$4 sm:$0xff]   ;;  %v15634_v4 = vld [vmem:[#allocation7 + $0x1a0] ss:$16 sps:$4 sm:$0xff]  }
 0x6a8   :  { %16162 = vtanh.f32 %v8100_v30  ;;  %v15637_v30 = vld [vmem:[#allocation7 + $0x1a8] ss:$16 sps:$4 sm:$0xff]   ;;  %v15651_v44 = vld [vmem:[#allocation7 + $0x1ec] ss:$16 sps:$4 sm:$0xff]  }
 0x6a9   :  { %9319 = vmatpush1.bf16.msra.mxu0 %v15598_v47  ;;  %9360 = vmatpush1.bf16.msra.mxu1 %v15601_v20  ;;  %16164 = vtanh.f32 %v8106_v33  ;;  %v15642_v47 = vld [vmem:[#allocation7 + $0x1c4] ss:$16 sps:$4 sm:$0xff]   ;;  %v15645_v20 = vld [vmem:[#allocation7 + $0x1cc] ss:$16 sps:$4 sm:$0xff]  }
 0x6aa   :  { %9320 = vmatprep.subr.bf16.mxu0 %v15606_v9  ;;  %9361 = vmatprep.subr.bf16.mxu1 %v15609_v45  ;;  %v15640_v45 = vld [vmem:[#allocation7 + $0x1c0] ss:$16 sps:$4 sm:$0xff]  }
 0x6ab   :  { %v15654_v33 = vld [vmem:[%s18407_s3 + $0x4] ss:$16 sps:$4 sm:$0xff]  }
 0x6ad   :  { %9321 = vmatpush1.bf16.msra.mxu0 %v15604_v46  ;;  %9362 = vmatpush1.bf16.msra.mxu1 %v15607_v41  ;;  %v15643_v46 = vld [vmem:[#allocation7 + $0x1c8] ss:$16 sps:$4 sm:$0xff]   ;;  %v15648_v41 = vld [vmem:[#allocation7 + $0x1e4] ss:$16 sps:$4 sm:$0xff]  }
 0x6ae   :  { %9322 = vmatprep.subr.bf16.mxu0 %v15612_v13  ;;  %9363 = vmatprep.subr.bf16.mxu1 %v15615_v38  ;;  %v15646_v38 = vld [vmem:[#allocation7 + $0x1e0] ss:$16 sps:$4 sm:$0xff]  }
 0x6b0   :  { %v16159_v6 = vpop.eup %16158 }
 0x6b1   :  { %v8110_v27 = vmul.f32 0.5, %v16159_v6  ;;  %v16161_v8 = vpop.eup %16160  ;;  %9323 = vmatpush1.bf16.msra.mxu0 %v15610_v62  ;;  %9364 = vmatpush1.bf16.msra.mxu1 %v15613_v61  ;;  %v15649_v62 = vld [vmem:[#allocation7 + $0x1e8] ss:$16 sps:$4 sm:$0xff]  }
 0x6b2   :  { %v8111_v31 = vmul.f32 0.5, %v16161_v8  ;;  %9324 = vmatprep.subr.bf16.mxu0 %v15618_v29  ;;  %9365 = vmatprep.subr.bf16.mxu1 %v15621_v48  ;;  %v16163_v32 = vpop.eup %16162  ;;  %v15657_v29 = vld [vmem:[%s18407_s3 + $0xc] ss:$16 sps:$4 sm:$0xff]  }
 0x6b3   :  { %v8113_v10 = vadd.f32 0.5, %v8110_v27  ;;  %v16165_v55 = vpop.eup %16164 }
 0x6b4   :  { %v8114_v50 = vadd.f32 0.5, %v8111_v31  ;;  %v8112_v9 = vmul.f32 0.5, %v16165_v55  ;;  %v15658_v31 = vld [vmem:[%s18407_s3 + $0x20] ss:$16 sps:$4 sm:$0xff]   ;;  %v15693_v55 = vld [vmem:[%s18407_s3 + $0xcc] ss:$16 sps:$4 sm:$0xff]  }
 0x6b5   :  { %v8118_v57 = vmul.f32 %v16163_v32, %v8113_v10  ;;  %9325 = vmatpush1.bf16.msra.mxu0 %v15616_v17  ;;  %9366 = vmatpush1.bf16.msra.mxu1 %v15619_v22  ;;  %v15652_v17 = vld [vmem:[%s18407_s3] ss:$16 sps:$4 sm:$0xff]   ;;  %v15655_v22 = vld [vmem:[%s18407_s3 + $0x8] ss:$16 sps:$4 sm:$0xff]   ;;  %v15663_v10 = vld [vmem:[%s18407_s3 + $0x2c] ss:$16 sps:$4 sm:$0xff]  }
 0x6b6   :  { %v8117_v3 = vmul.f32 %v8114_v50, %v17500_v39  ;;  %9326 = vmatprep.subr.bf16.mxu0 %v15624_v11  ;;  %9367 = vmatprep.subr.bf16.mxu1 %v15627_v63  ;;  %v8115_v13 = vadd.f32 0.5, %v8112_v9  ;;  %v15661_v11 = vld [vmem:[%s18407_s3 + $0x28] ss:$16 sps:$4 sm:$0xff]   ;;  %v15666_v63 = vld [vmem:[%s18407_s3 + $0x44] ss:$16 sps:$4 sm:$0xff]  }
 0x6b7   :  { %v15664_v32 = vld [vmem:[%s18407_s3 + $0x40] ss:$16 sps:$4 sm:$0xff]   ;;  %v15667_v50 = vld [vmem:[%s18407_s3 + $0x48] ss:$16 sps:$4 sm:$0xff]  }
 0x6b8   :  { %v8119_v24 = vadd.f32 %v8118_v57, %v8117_v3  ;;  %v15672_v57 = vld [vmem:[%s18407_s3 + $0x64] ss:$16 sps:$4 sm:$0xff]   ;;  %v15694_v9 = vld [vmem:[%s18407_s3 + $0xe0] ss:$16 sps:$4 sm:$0xff]  }
 0x6b9   :  { %9327 = vmatpush1.bf16.msra.mxu0 %v15622_v1  ;;  %9368 = vmatpush1.bf16.msra.mxu1 %v15625_v28  ;;  %v15670_v1 = vld [vmem:[%s18407_s3 + $0x60] ss:$16 sps:$4 sm:$0xff]   ;;  %v15673_v28 = vld [vmem:[%s18407_s3 + $0x68] ss:$16 sps:$4 sm:$0xff]   ;;  %v15678_v3 = vld [vmem:[%s18407_s3 + $0x84] ss:$16 sps:$4 sm:$0xff]  }
 0x6ba   :  { %16166 = vtanh.f32 %v8119_v24  ;;  %9328 = vmatprep.subr.bf16.mxu0 %v15630_v23  ;;  %9369 = vmatprep.subr.bf16.mxu1 %v15633_v43  ;;  %v8124_v52 = vsub.f32 %v8119_v24, %v17500_v39  ;;  %v15681_v23 = vld [vmem:[%s18407_s3 + $0x8c] ss:$16 sps:$4 sm:$0xff]   ;;  %v15676_v43 = vld [vmem:[%s18407_s3 + $0x80] ss:$16 sps:$4 sm:$0xff]   ;;  %v15679_v24 = vld [vmem:[%s18407_s3 + $0x88] ss:$16 sps:$4 sm:$0xff]  }
 0x6bc   :  { %v17650_v34 = vadd.f32 %v8124_v52, %v17500_v39  ;;  %v15690_v52 = vld [vmem:[%s18407_s3 + $0xc4] ss:$16 sps:$4 sm:$0xff]  }
 0x6bd   :  { %9329 = vmatpush1.bf16.msra.mxu0 %v15628_v37  ;;  %9370 = vmatpush1.bf16.msra.mxu1 %v15631_v42  ;;  %v15684_v37 = vld [vmem:[%s18407_s3 + $0xa4] ss:$16 sps:$4 sm:$0xff]   ;;  %v15687_v42 = vld [vmem:[%s18407_s3 + $0xac] ss:$16 sps:$4 sm:$0xff]  }
 0x6be   :  { %9330 = vmatprep.subr.bf16.mxu0 %v15636_v51  ;;  %9371 = vmatprep.subr.bf16.mxu1 %v15639_v53  ;;  %v15682_v51 = vld [vmem:[%s18407_s3 + $0xa0] ss:$16 sps:$4 sm:$0xff]   ;;  %v15685_v53 = vld [vmem:[%s18407_s3 + $0xa8] ss:$16 sps:$4 sm:$0xff]  }
 0x6c1   :  { %9331 = vmatpush1.bf16.msra.mxu0 %v15634_v4  ;;  %9372 = vmatpush1.bf16.msra.mxu1 %v15637_v30  ;;  %v15688_v4 = vld [vmem:[%s18407_s3 + $0xc0] ss:$16 sps:$4 sm:$0xff]   ;;  %v15691_v30 = vld [vmem:[%s18407_s3 + $0xc8] ss:$16 sps:$4 sm:$0xff]  }
 0x6c2   :  { %9332 = vmatprep.subr.bf16.mxu0 %v15642_v47  ;;  %9373 = vmatprep.subr.bf16.mxu1 %v15645_v20  ;;  %v15696_v47 = vld [vmem:[%s18407_s3 + $0xe4] ss:$16 sps:$4 sm:$0xff]   ;;  %v15699_v20 = vld [vmem:[%s18407_s3 + $0xec] ss:$16 sps:$4 sm:$0xff]  }
 0x6c4   :  { %v16167_v39 = vpop.eup %16166 }
 0x6c5   :  { %9333 = vmatpush1.bf16.msra.mxu0 %v15640_v45  ;;  %9374 = vmatpush1.bf16.msra.mxu1 %v15643_v46  ;;  %v8121_v61 = vmul.f32 %v16167_v39, %v8115_v13  ;;  %v15697_v45 = vld [vmem:[%s18407_s3 + $0xe8] ss:$16 sps:$4 sm:$0xff]  }
 0x6c6   :  { %9334 = vmatprep.subr.bf16.mxu0 %v15648_v41  ;;  %9375 = vmatprep.subr.bf16.mxu1 %v15651_v44  ;;  %v17760_v46 = vld [vmem:[#allocation5 + $0x4] ss:$16 sps:$4 sm:$0xff]   ;;  %v17762_v41 = vld [vmem:[#allocation5 + $0xc] ss:$16 sps:$4 sm:$0xff]  }
 0x6c7   :  { %v8122_v48 = vsub.f32 %v8121_v61, %v17510_v58 }
 0x6c9   :  { %9335 = vmatpush1.bf16.msra.mxu0 %v15646_v38  ;;  %9376 = vmatpush1.bf16.msra.mxu1 %v15649_v62  ;;  %v17660_v6 = vadd.f32 %v8122_v48, %v17510_v58  ;;  %v15660_v58 = vld [vmem:[%s18407_s3 + $0x24] ss:$16 sps:$4 sm:$0xff]  }
 0x6ca   :  { %9610 = vmatprep.subr.bf16.mxu0 %v15654_v33  ;;  %9651 = vmatprep.subr.bf16.mxu1 %v15657_v29 }
 0x6cb   :  { %v12377_v27 = vmul.f32 %v17207_v54, %v17660_v6  ;;  %v8130_v8 = vpack.c.bf16 %v17660_v6, %v17660_v6 }
 0x6cd   :  { %12388 = vadd.xlane.f32.xlu0 %v12377_v27  ;;  %9336 = vmatprep.mubr.bf16.mxu0 %v8130_v8 }
 0x6ce   :  { %9377 = vmatprep.mubr.bf16.mxu1 %v8130_v8  ;;  %9337 = vmatmul.mubr.bf16.vlgmr.msra.gmra.mrb[96].mxu0 %v17637_v2 }
 0x6cf   :  { %9378 = vmatmul.mubr.bf16.vlgmr.msra.gmra.mrb[96].mxu1 %v17637_v2  ;;  %9611 = vmatpush1.bf16.msra.mxu0 %v15652_v17  ;;  %v15669_v2 = vld [vmem:[%s18407_s3 + $0x4c] ss:$16 sps:$4 sm:$0xff]  }
 0x6d0   :  { %9652 = vmatpush1.bf16.msra.mxu1 %v15655_v22  ;;  %9612 = vmatprep.subr.bf16.mxu0 %v15660_v58 }
 0x6d1   :  { %9653 = vmatprep.subr.bf16.mxu1 %v15663_v10  ;;  %9642 = vmatprep.mubr.bf16.mxu0 %v18523_v35 }
 0x6d2   :  { %9683 = vmatprep.mubr.bf16.mxu1 %v18523_v35  ;;  %v15675_v35 = vld [vmem:[%s18407_s3 + $0x6c] ss:$16 sps:$4 sm:$0xff]  }
 0x6d3   :  { %9613 = vmatpush1.bf16.msra.mxu0 %v15658_v31 }
 0x6d4   :  { %9654 = vmatpush1.bf16.msra.mxu1 %v15661_v11  ;;  %9614 = vmatprep.subr.bf16.mxu0 %v15666_v63 }
 0x6d5   :  { %9655 = vmatprep.subr.bf16.mxu1 %v15669_v2 }
 0x6d7   :  { %9615 = vmatpush1.bf16.msra.mxu0 %v15664_v32 }
 0x6d8   :  { %9656 = vmatpush1.bf16.msra.mxu1 %v15667_v50  ;;  %9616 = vmatprep.subr.bf16.mxu0 %v15672_v57 }
 0x6d9   :  { %9657 = vmatprep.subr.bf16.mxu1 %v15675_v35 }
 0x6db   :  { %9617 = vmatpush1.bf16.msra.mxu0 %v15670_v1 }
 0x6dc   :  { %9658 = vmatpush1.bf16.msra.mxu1 %v15673_v28  ;;  %9618 = vmatprep.subr.bf16.mxu0 %v15678_v3 }
 0x6dd   :  { %9659 = vmatprep.subr.bf16.mxu1 %v15681_v23  ;;  %v17774_v23 = vld [vmem:[#allocation5] ss:$16 sps:$4 sm:$0xff]  }
 0x6df   :  { %9619 = vmatpush1.bf16.msra.mxu0 %v15676_v43  ;;  %v17776_v43 = vld [vmem:[#allocation5 + $0x8] ss:$16 sps:$4 sm:$0xff]  }
 0x6e0   :  { %9660 = vmatpush1.bf16.msra.mxu1 %v15679_v24  ;;  %9620 = vmatprep.subr.bf16.mxu0 %v15684_v37  ;;  %v17780_v37 = vld [vmem:[#allocation5 + $0x24] ss:$16 sps:$4 sm:$0xff]  }
 0x6e1   :  { %9661 = vmatprep.subr.bf16.mxu1 %v15687_v42  ;;  %v17782_v42 = vld [vmem:[#allocation5 + $0x2c] ss:$16 sps:$4 sm:$0xff]  }
 0x6e3   :  { %9621 = vmatpush1.bf16.msra.mxu0 %v15682_v51  ;;  %v17790_v51 = vld [vmem:[#allocation5 + $0x28] ss:$16 sps:$4 sm:$0xff]  }
 0x6e4   :  { %9662 = vmatpush1.bf16.msra.mxu1 %v15685_v53  ;;  %9622 = vmatprep.subr.bf16.mxu0 %v15690_v52  ;;  %v17794_v53 = vld [vmem:[#allocation5 + $0x44] ss:$16 sps:$4 sm:$0xff]   ;;  %v17796_v52 = vld [vmem:[#allocation5 + $0x4c] ss:$16 sps:$4 sm:$0xff]  }
 0x6e5   :  { %9663 = vmatprep.subr.bf16.mxu1 %v15693_v55  ;;  %v17800_v55 = vld [vmem:[#allocation5 + $0x40] ss:$16 sps:$4 sm:$0xff]  }
 0x6e7   :  { %9623 = vmatpush1.bf16.msra.mxu0 %v15688_v4  ;;  %v17802_v4 = vld [vmem:[#allocation5 + $0x48] ss:$16 sps:$4 sm:$0xff]  }
 0x6e8   :  { %9664 = vmatpush1.bf16.msra.mxu1 %v15691_v30  ;;  %9624 = vmatprep.subr.bf16.mxu0 %v15696_v47  ;;  %v17806_v30 = vld [vmem:[#allocation5 + $0x64] ss:$16 sps:$4 sm:$0xff]   ;;  %v17808_v47 = vld [vmem:[#allocation5 + $0x6c] ss:$16 sps:$4 sm:$0xff]  }
 0x6e9   :  { %9665 = vmatprep.subr.bf16.mxu1 %v15699_v20  ;;  %v17812_v20 = vld [vmem:[#allocation5 + $0x60] ss:$16 sps:$4 sm:$0xff]  }
 0x6eb   :  { %9625 = vmatpush1.bf16.msra.mxu0 %v15694_v9  ;;  %v17814_v9 = vld [vmem:[#allocation5 + $0x68] ss:$16 sps:$4 sm:$0xff]  }
 0x6ec   :  { %9666 = vmatpush1.bf16.msra.mxu1 %v15697_v45  ;;  %10098 = vmatprep.subr.bf16.mxu0 %v17760_v46  ;;  %v17818_v45 = vld [vmem:[#allocation5 + $0x84] ss:$16 sps:$4 sm:$0xff]  }
 0x6ed   :  { %10139 = vmatprep.subr.bf16.mxu1 %v17762_v41 }
 0x703   :  { %v8362_v44 = vpop.f32.mrb[88].mxu0  ;;  %v8403_v13 = vpop.f32.mrb[88].mxu1 }
 0x704   :  { %v8410_v39 = vadd.f32 %v8362_v44, %v16739_v14  ;;  %v8412_v38 = vadd.f32 %v8403_v13, %v16741_v16  ;;  %v8364_v62 = vpop.f32.mrb[89].mxu0  ;;  %v8405_v61 = vpop.f32.mrb[89].mxu1  ;;  %v17820_v44 = vld [vmem:[#allocation5 + $0x8c] ss:$16 sps:$4 sm:$0xff]   ;;  %v17824_v13 = vld [vmem:[#allocation5 + $0x80] ss:$16 sps:$4 sm:$0xff]  }
 0x705   :  { %v8411_v33 = vadd.f32 %v8364_v62, %v16743_v18  ;;  %v8413_v29 = vadd.f32 %v8405_v61, %v16745_v19  ;;  %v8366_v48 = vpop.f32.mrb[90].mxu0  ;;  %v8407_v27 = vpop.f32.mrb[90].mxu1  ;;  %v17832_v62 = vld [vmem:[#allocation5 + $0xac] ss:$16 sps:$4 sm:$0xff]   ;;  %v17836_v61 = vld [vmem:[#allocation5 + $0xa0] ss:$16 sps:$4 sm:$0xff]  }
 0x706   :  { %v8414_v8 = vmul.f32 0.5, %v8410_v39  ;;  %v8367_v17 = vpop.f32.mrb[91].mxu0  ;;  %v8408_v22 = vpop.f32.mrb[91].mxu1  ;;  %v8416_v10 = vmul.f32 0.5, %v8412_v38  ;;  %v17826_v39 = vld [vmem:[#allocation5 + $0x88] ss:$16 sps:$4 sm:$0xff]  }
 0x707   :  { %v8415_v58 = vmul.f32 0.5, %v8411_v33  ;;  %v17830_v38 = vld [vmem:[#allocation5 + $0xa4] ss:$16 sps:$4 sm:$0xff]   ;;  %v17838_v33 = vld [vmem:[#allocation5 + $0xa8] ss:$16 sps:$4 sm:$0xff]  }
 0x708   :  { %16168 = vtanh.f32 %v8414_v8  ;;  %v17844_v48 = vld [vmem:[#allocation5 + $0xcc] ss:$16 sps:$4 sm:$0xff]   ;;  %v17848_v27 = vld [vmem:[#allocation5 + $0xc0] ss:$16 sps:$4 sm:$0xff]   ;;  %v17850_v8 = vld [vmem:[#allocation5 + $0xc8] ss:$16 sps:$4 sm:$0xff]  }
 0x709   :  { %16170 = vtanh.f32 %v8415_v58  ;;  %v17854_v17 = vld [vmem:[#allocation5 + $0xe4] ss:$16 sps:$4 sm:$0xff]   ;;  %v17856_v22 = vld [vmem:[#allocation5 + $0xec] ss:$16 sps:$4 sm:$0xff]   ;;  %v17860_v58 = vld [vmem:[#allocation5 + $0xe0] ss:$16 sps:$4 sm:$0xff]  }
 0x70a   :  { %16172 = vtanh.f32 %v8413_v29  ;;  %v17842_v29 = vld [vmem:[#allocation5 + $0xc4] ss:$16 sps:$4 sm:$0xff]  }
 0x70b   :  { %16174 = vtanh.f32 %v8416_v10  ;;  %v17862_v10 = vld [vmem:[#allocation5 + $0xe8] ss:$16 sps:$4 sm:$0xff]  }
 0x712   :  { %v16169_v31 = vpop.eup %16168 }
 0x713   :  { %v8420_v14 = vmul.f32 0.5, %v16169_v31  ;;  %v16171_v11 = vpop.eup %16170  ;;  %v17866_v31 = vld [vmem:[#allocation5 + $0x104] ss:$16 sps:$4 sm:$0xff]  }
 0x714   :  { %v8421_v63 = vmul.f32 0.5, %v16171_v11  ;;  %v16173_v2 = vpop.eup %16172  ;;  %18527 = vst [vmem:[#allocation24_spill] sm:$0xff] %v17866_v31  ;;  %v17872_v11 = vld [vmem:[#allocation5 + $0x100] ss:$16 sps:$4 sm:$0xff]  }
 0x715   :  { %v8423_v16 = vadd.f32 0.5, %v8420_v14  ;;  %v16175_v57 = vpop.eup %16174  ;;  %v17868_v14 = vld [vmem:[#allocation5 + $0x10c] ss:$16 sps:$4 sm:$0xff]   ;;  %18529 = vst [vmem:[#allocation26_spill] sm:$0xff] %v17872_v11 }
 0x716   :  { %v8424_v18 = vadd.f32 0.5, %v8421_v63  ;;  %v8422_v35 = vmul.f32 0.5, %v16175_v57  ;;  %18528 = vst [vmem:[#allocation25_spill] sm:$0xff] %v17868_v14  ;;  %v17878_v63 = vld [vmem:[#allocation5 + $0x124] ss:$16 sps:$4 sm:$0xff]  }
 0x717   :  { %v8428_v32 = vmul.f32 %v16173_v2, %v8423_v16  ;;  %v17874_v16 = vld [vmem:[#allocation5 + $0x108] ss:$16 sps:$4 sm:$0xff]   ;;  %18531 = vst [vmem:[#allocation28_spill] sm:$0xff] %v17878_v63  ;;  %v17880_v2 = vld [vmem:[#allocation5 + $0x12c] ss:$16 sps:$4 sm:$0xff]  }
 0x718   :  { %v8427_v19 = vmul.f32 %v8424_v18, %v17615_v26  ;;  %v8425_v1 = vadd.f32 0.5, %v8422_v35  ;;  %v17788_v26 = vld [vmem:[#allocation5 + $0x20] ss:$16 sps:$4 sm:$0xff]   ;;  %18530 = vst [vmem:[#allocation27_spill] sm:$0xff] %v17874_v16  ;;  %18532 = vst [vmem:[#allocation29_spill] sm:$0xff] %v17880_v2 }
 0x719   :  { %v17884_v18 = vld [vmem:[#allocation5 + $0x120] ss:$16 sps:$4 sm:$0xff]   ;;  %v17892_v57 = vld [vmem:[#allocation5 + $0x14c] ss:$16 sps:$4 sm:$0xff]  }
 0x71a   :  { %v17771_v50 = vadd.f32 %v8428_v32, %v8427_v19  ;;  %18533 = vst [vmem:[#allocation30_spill] sm:$0xff] %v17884_v18  ;;  %v17886_v32 = vld [vmem:[#allocation5 + $0x128] ss:$16 sps:$4 sm:$0xff]   ;;  %v17890_v19 = vld [vmem:[#allocation5 + $0x144] ss:$16 sps:$4 sm:$0xff]   ;;  %18536 = vst [vmem:[#allocation33_spill] sm:$0xff] %v17892_v57 }
 0x71b   :  { %18534 = vst [vmem:[#allocation31_spill] sm:$0xff] %v17886_v32  ;;  %18535 = vst [vmem:[#allocation32_spill] sm:$0xff] %v17890_v19  ;;  %v17896_v35 = vld [vmem:[#allocation5 + $0x140] ss:$16 sps:$4 sm:$0xff]  }
 0x71c   :  { %18526 = vst [vmem:[#allocation23_spill] sm:$0xff] %v17771_v50  ;;  %16176 = vtanh.f32 %v17771_v50  ;;  %18537 = vst [vmem:[#allocation34_spill] sm:$0xff] %v17896_v35  ;;  %v17910_v50 = vld [vmem:[#allocation5 + $0x168] ss:$16 sps:$4 sm:$0xff]  }
 0x71d   :  { %18542 = vst [vmem:[#allocation39_spill] sm:$0xff] %v17910_v50 }
 0x726   :  { %v16177_v28 = vpop.eup %16176 }
 0x727   :  { %v8431_v3 = vmul.f32 %v16177_v28, %v8425_v1  ;;  %v17898_v1 = vld [vmem:[#allocation5 + $0x148] ss:$16 sps:$4 sm:$0xff]   ;;  %v17902_v28 = vld [vmem:[#allocation5 + $0x164] ss:$16 sps:$4 sm:$0xff]  }
 0x728   :  { %18538 = vst [vmem:[#allocation35_spill] sm:$0xff] %v17898_v1  ;;  %18539 = vst [vmem:[#allocation36_spill] sm:$0xff] %v17902_v28 }
 0x729   :  { %v17778_v24 = vpack.c.bf16 %v8431_v3, %v8431_v3  ;;  %v17904_v3 = vld [vmem:[#allocation5 + $0x16c] ss:$16 sps:$4 sm:$0xff]  }
 0x72a   :  { %18540 = vst [vmem:[#allocation37_spill] sm:$0xff] %v17904_v3 }
 0x72b   :  { %9643 = vmatmul.mubr.bf16.vlgmr.msra.gmra.mrb[100].mxu0 %v17778_v24  ;;  %9684 = vmatmul.mubr.bf16.vlgmr.msra.gmra.mrb[100].mxu1 %v17778_v24 }
 0x72c   :  { %10099 = vmatpush1.bf16.msra.mxu0 %v17774_v23  ;;  %10140 = vmatpush1.bf16.msra.mxu1 %v17776_v43 }
 0x72d   :  { %10100 = vmatprep.subr.bf16.mxu0 %v17780_v37  ;;  %10141 = vmatprep.subr.bf16.mxu1 %v17782_v42 }
 0x730   :  { %10101 = vmatpush1.bf16.msra.mxu0 %v17788_v26  ;;  %10142 = vmatpush1.bf16.msra.mxu1 %v17790_v51 }
 0x731   :  { %10102 = vmatprep.subr.bf16.mxu0 %v17794_v53  ;;  %10143 = vmatprep.subr.bf16.mxu1 %v17796_v52 }
 0x734   :  { %10103 = vmatpush1.bf16.msra.mxu0 %v17800_v55  ;;  %10144 = vmatpush1.bf16.msra.mxu1 %v17802_v4 }
 0x735   :  { %10104 = vmatprep.subr.bf16.mxu0 %v17806_v30  ;;  %10145 = vmatprep.subr.bf16.mxu1 %v17808_v47 }
 0x738   :  { %10105 = vmatpush1.bf16.msra.mxu0 %v17812_v20  ;;  %10146 = vmatpush1.bf16.msra.mxu1 %v17814_v9 }
 0x739   :  { %10106 = vmatprep.subr.bf16.mxu0 %v17818_v45  ;;  %10147 = vmatprep.subr.bf16.mxu1 %v17820_v44 }
 0x73c   :  { %10107 = vmatpush1.bf16.msra.mxu0 %v17824_v13  ;;  %10148 = vmatpush1.bf16.msra.mxu1 %v17826_v39 }
 0x73d   :  { %10108 = vmatprep.subr.bf16.mxu0 %v17830_v38  ;;  %10149 = vmatprep.subr.bf16.mxu1 %v17832_v62 }
 0x740   :  { %10109 = vmatpush1.bf16.msra.mxu0 %v17836_v61  ;;  %10150 = vmatpush1.bf16.msra.mxu1 %v17838_v33 }
 0x741   :  { %10110 = vmatprep.subr.bf16.mxu0 %v17842_v29  ;;  %10151 = vmatprep.subr.bf16.mxu1 %v17844_v48 }
 0x744   :  { %10111 = vmatpush1.bf16.msra.mxu0 %v17848_v27  ;;  %10152 = vmatpush1.bf16.msra.mxu1 %v17850_v8 }
 0x745   :  { %10112 = vmatprep.subr.bf16.mxu0 %v17854_v17  ;;  %10153 = vmatprep.subr.bf16.mxu1 %v17856_v22 }
 0x748   :  { %10113 = vmatpush1.bf16.msra.mxu0 %v17860_v58  ;;  %10154 = vmatpush1.bf16.msra.mxu1 %v17862_v10 }
 0x749   :  { %10114 = vmatprep.subr.bf16.mxu0 %v17866_v31  ;;  %10155 = vmatprep.subr.bf16.mxu1 %v17868_v14 }
 0x74c   :  { %10115 = vmatpush1.bf16.msra.mxu0 %v17872_v11  ;;  %10156 = vmatpush1.bf16.msra.mxu1 %v17874_v16  ;;  %v17944_v16 = vld [vmem:[#allocation5 + $0x1c0] ss:$16 sps:$4 sm:$0xff]  }
 0x74d   :  { %10116 = vmatprep.subr.bf16.mxu0 %v17878_v63  ;;  %10157 = vmatprep.subr.bf16.mxu1 %v17880_v2 }
 0x750   :  { %10117 = vmatpush1.bf16.msra.mxu0 %v17884_v18  ;;  %10158 = vmatpush1.bf16.msra.mxu1 %v17886_v32 }
 0x751   :  { %10118 = vmatprep.subr.bf16.mxu0 %v17890_v19  ;;  %10159 = vmatprep.subr.bf16.mxu1 %v17892_v57  ;;  %v17920_v57 = vld [vmem:[#allocation5 + $0x180] ss:$16 sps:$4 sm:$0xff]  }
 0x752   :  { %18545 = vst [vmem:[#allocation42_spill] sm:$0xff] %v17920_v57 }
 0x754   :  { %10119 = vmatpush1.bf16.msra.mxu0 %v17896_v35  ;;  %10160 = vmatpush1.bf16.msra.mxu1 %v17898_v1  ;;  %v17922_v35 = vld [vmem:[#allocation5 + $0x188] ss:$16 sps:$4 sm:$0xff]   ;;  %v17926_v1 = vld [vmem:[#allocation5 + $0x1a4] ss:$16 sps:$4 sm:$0xff]  }
 0x755   :  { %10120 = vmatprep.subr.bf16.mxu0 %v17902_v28  ;;  %10161 = vmatprep.subr.bf16.mxu1 %v17904_v3  ;;  %18546 = vst [vmem:[#allocation43_spill] sm:$0xff] %v17922_v35  ;;  %18547 = vst [vmem:[#allocation44_spill] sm:$0xff] %v17926_v1  ;;  %v17928_v28 = vld [vmem:[#allocation5 + $0x1ac] ss:$16 sps:$4 sm:$0xff]   ;;  %v17932_v3 = vld [vmem:[#allocation5 + $0x1a0] ss:$16 sps:$4 sm:$0xff]  }
 0x756   :  { %18548 = vst [vmem:[#allocation45_spill] sm:$0xff] %v17928_v28 }
 0x758   :  { %10121 = vmatpush1.bf16.msra.mxu0 %v17908_v21  ;;  %10162 = vmatpush1.bf16.msra.mxu1 %v17910_v50  ;;  %v17934_v21 = vld [vmem:[#allocation5 + $0x1a8] ss:$16 sps:$4 sm:$0xff]  }
 0x759   :  { %10122 = vmatprep.subr.bf16.mxu0 %v17914_v40  ;;  %10163 = vmatprep.subr.bf16.mxu1 %v17916_v36  ;;  %v17938_v40 = vld [vmem:[#allocation5 + $0x1c4] ss:$16 sps:$4 sm:$0xff]   ;;  %v17940_v36 = vld [vmem:[#allocation5 + $0x1cc] ss:$16 sps:$4 sm:$0xff]  }
 0x75c   :  { %10123 = vmatpush1.bf16.msra.mxu0 %v17920_v57  ;;  %10164 = vmatpush1.bf16.msra.mxu1 %v17922_v35 }
 0x75d   :  { %10124 = vmatprep.subr.bf16.mxu0 %v17926_v1  ;;  %10165 = vmatprep.subr.bf16.mxu1 %v17928_v28  ;;  %v17948_v28 = vld [vmem:[#allocation5 + $0x1c8] ss:$16 sps:$4 sm:$0xff]  }
 0x75e   :  { %18549 = vst [vmem:[#allocation46_spill] sm:$0xff] %v17948_v28 }
 0x75f   :  { %v8850_v50 = vpop.f32.mrb[92].mxu0  ;;  %v8891_v19 = vpop.f32.mrb[92].mxu1 }
 0x760   :  { %v8851_v32 = vadd.f32 %v8850_v50, %v16770_v59  ;;  %v8852_v18 = vpop.f32.mrb[93].mxu0  ;;  %v8893_v57 = vpop.f32.mrb[93].mxu1  ;;  %10125 = vmatpush1.bf16.msra.mxu0 %v17932_v3  ;;  %10166 = vmatpush1.bf16.msra.mxu1 %v17934_v21  ;;  %v17952_v50 = vld [vmem:[#allocation5 + $0x1e4] ss:$16 sps:$4 sm:$0xff]  }
 0x761   :  { %v8853_v35 = vadd.f32 %v8852_v18, %v16773_v0  ;;  %v8854_v2 = vpop.f32.mrb[94].mxu0  ;;  %v8895_v63 = vpop.f32.mrb[94].mxu1  ;;  %10126 = vmatprep.subr.bf16.mxu0 %v17938_v40  ;;  %10167 = vmatprep.subr.bf16.mxu1 %v17940_v36  ;;  %18550 = vst [vmem:[#allocation47_spill] sm:$0xff] %v17952_v50  ;;  %v17965_v18 = vld [vmem:[#allocation7 + $0x4] ss:$16 sps:$4 sm:$0xff]  }
 0x762   :  { %v8898_v11 = vmul.f32 0.5, %v8851_v32  ;;  %v8855_v14 = vpop.f32.mrb[95].mxu0  ;;  %v8896_v31 = vpop.f32.mrb[95].mxu1  ;;  %v17954_v2 = vld [vmem:[#allocation5 + $0x1ec] ss:$16 sps:$4 sm:$0xff]   ;;  %v8894_v63 = vadd.f32 %v8893_v57, %v16776_v5  ;;  %18554 = vst [vmem:[#allocation51_spill] sm:$0xff] %v17965_v18 }
 0x763   :  { %v8899_v1 = vmul.f32 0.5, %v8853_v35  ;;  %18551 = vst [vmem:[#allocation48_spill] sm:$0xff] %v17954_v2  ;;  %v17959_v31 = vld [vmem:[#allocation5 + $0x1e0] ss:$16 sps:$4 sm:$0xff]   ;;  %v17961_v14 = vld [vmem:[#allocation5 + $0x1e8] ss:$16 sps:$4 sm:$0xff]  }
 0x764   :  { %16178 = vtanh.f32 %v8898_v11  ;;  %10127 = vmatpush1.bf16.msra.mxu0 %v17944_v16  ;;  %10168 = vmatpush1.bf16.msra.mxu1 %v17948_v28  ;;  %18552 = vst [vmem:[#allocation49_spill] sm:$0xff] %v17959_v31  ;;  %18553 = vst [vmem:[#allocation50_spill] sm:$0xff] %v17961_v14  ;;  %v17967_v32 = vld [vmem:[#allocation7 + $0xc] ss:$16 sps:$4 sm:$0xff]   ;;  %v8892_v11 = vadd.f32 %v8891_v19, %v16782_v7 }
 0x765   :  { %16180 = vtanh.f32 %v8899_v1  ;;  %10128 = vmatprep.subr.bf16.mxu0 %v17952_v50  ;;  %10169 = vmatprep.subr.bf16.mxu1 %v17954_v2  ;;  %18555 = vst [vmem:[#allocation52_spill] sm:$0xff] %v17967_v32 }
 0x766   :  { %16182 = vtanh.f32 %v8894_v63  ;;  %v8900_v57 = vmul.f32 0.5, %v8892_v11 }
 0x768   :  { %10129 = vmatpush1.bf16.msra.mxu0 %v17959_v31  ;;  %10170 = vmatpush1.bf16.msra.mxu1 %v17961_v14  ;;  %16184 = vtanh.f32 %v8900_v57 }
 0x769   :  { %10586 = vmatprep.subr.bf16.mxu0 %v17965_v18  ;;  %10627 = vmatprep.subr.bf16.mxu1 %v17967_v32 }
 0x76e   :  { %v16179_v35 = vpop.eup %16178 }
 0x76f   :  { %v8904_v1 = vmul.f32 0.5, %v16179_v35  ;;  %v16181_v5 = vpop.eup %16180 }
 0x770   :  { %v8905_v59 = vmul.f32 0.5, %v16181_v5  ;;  %v16183_v2 = vpop.eup %16182 }
 0x771   :  { %v8907_v0 = vadd.f32 0.5, %v8904_v1  ;;  %v18021_v1 = vld [vmem:[#allocation7 + $0x6c] ss:$16 sps:$4 sm:$0xff]  }
 0x772   :  { %v8908_v50 = vadd.f32 0.5, %v8905_v59  ;;  %v16185_v31 = vpop.eup %16184  ;;  %18567 = vst [vmem:[#allocation64_spill] sm:$0xff] %v18021_v1 }
 0x773   :  { %v8912_v63 = vmul.f32 %v16183_v2, %v8907_v0  ;;  %v8906_v11 = vmul.f32 0.5, %v16185_v31  ;;  %v17987_v0 = vld [vmem:[#allocation7] ss:$16 sps:$4 sm:$0xff]   ;;  %v18007_v2 = vld [vmem:[#allocation7 + $0x44] ss:$16 sps:$4 sm:$0xff]  }
 0x774   :  { %v8911_v19 = vmul.f32 %v8908_v50, %v17629_v49  ;;  %18556 = vst [vmem:[#allocation53_spill] sm:$0xff] %v17987_v0  ;;  %v17991_v50 = vld [vmem:[#allocation7 + $0x24] ss:$16 sps:$4 sm:$0xff]   ;;  %18562 = vst [vmem:[#allocation59_spill] sm:$0xff] %v18007_v2  ;;  %v18009_v31 = vld [vmem:[#allocation7 + $0x4c] ss:$16 sps:$4 sm:$0xff]  }
 0x775   :  { %v8909_v32 = vadd.f32 0.5, %v8906_v11  ;;  %18558 = vst [vmem:[#allocation55_spill] sm:$0xff] %v17991_v50  ;;  %18563 = vst [vmem:[#allocation60_spill] sm:$0xff] %v18009_v31  ;;  %v18031_v11 = vld [vmem:[#allocation7 + $0x84] ss:$16 sps:$4 sm:$0xff]  }
 0x776   :  { %v8913_v7 = vadd.f32 %v8912_v63, %v8911_v19  ;;  %v18025_v63 = vld [vmem:[#allocation7 + $0x60] ss:$16 sps:$4 sm:$0xff]   ;;  %v18027_v19 = vld [vmem:[#allocation7 + $0x68] ss:$16 sps:$4 sm:$0xff]   ;;  %18570 = vst [vmem:[#allocation67_spill] sm:$0xff] %v18031_v11 }
 0x777   :  { %18568 = vst [vmem:[#allocation65_spill] sm:$0xff] %v18025_v63  ;;  %18569 = vst [vmem:[#allocation66_spill] sm:$0xff] %v18027_v19 }
 0x778   :  { %16186 = vtanh.f32 %v8913_v7  ;;  %v8918_v14 = vsub.f32 %v8913_v7, %v17629_v49  ;;  %v17989_v7 = vld [vmem:[#allocation7 + $0x8] ss:$16 sps:$4 sm:$0xff]  }
 0x779   :  { %18557 = vst [vmem:[#allocation54_spill] sm:$0xff] %v17989_v7 }
 0x77a   :  { %v17977_v18 = vadd.f32 %v8918_v14, %v17629_v49  ;;  %v17993_v49 = vld [vmem:[#allocation7 + $0x2c] ss:$16 sps:$4 sm:$0xff]   ;;  %v18015_v14 = vld [vmem:[#allocation7 + $0x48] ss:$16 sps:$4 sm:$0xff]  }
 0x77b   :  { %18559 = vst [vmem:[#allocation56_spill] sm:$0xff] %v17993_v49  ;;  %18565 = vst [vmem:[#allocation62_spill] sm:$0xff] %v18015_v14 }
 0x782   :  { %v16187_v35 = vpop.eup %16186 }
 0x783   :  { %v8915_v28 = vmul.f32 %v16187_v35, %v8909_v32  ;;  %v18019_v32 = vld [vmem:[#allocation7 + $0x64] ss:$16 sps:$4 sm:$0xff]   ;;  %v18033_v35 = vld [vmem:[#allocation7 + $0x8c] ss:$16 sps:$4 sm:$0xff]  }
 0x784   :  { %18566 = vst [vmem:[#allocation63_spill] sm:$0xff] %v18019_v32  ;;  %18571 = vst [vmem:[#allocation68_spill] sm:$0xff] %v18033_v35 }
 0x785   :  { %v8916_v57 = vsub.f32 %v8915_v28, %v17633_v60  ;;  %v18003_v28 = vld [vmem:[#allocation7 + $0x28] ss:$16 sps:$4 sm:$0xff]  }
 0x786   :  { %18561 = vst [vmem:[#allocation58_spill] sm:$0xff] %v18003_v28 }
 0x787   :  { %v17981_v5 = vadd.f32 %v8916_v57, %v17633_v60  ;;  %v18001_v60 = vld [vmem:[#allocation7 + $0x20] ss:$16 sps:$4 sm:$0xff]  }
 0x788   :  { %18560 = vst [vmem:[#allocation57_spill] sm:$0xff] %v18001_v60  ;;  %v18037_v57 = vld [vmem:[#allocation7 + $0x80] ss:$16 sps:$4 sm:$0xff]  }
 0x789   :  { %v17985_v59 = vpack.c.bf16 %v17981_v5, %v17981_v5  ;;  %18572 = vst [vmem:[#allocation69_spill] sm:$0xff] %v18037_v57 }
 0x78b   :  { %10130 = vmatprep.mubr.bf16.mxu0 %v17985_v59  ;;  %10171 = vmatprep.mubr.bf16.mxu1 %v17985_v59 }
 0x78c   :  { %10131 = vmatmul.mubr.bf16.vlgmr.msra.gmra.mrb[104].mxu0 %v17778_v24  ;;  %10172 = vmatmul.mubr.bf16.vlgmr.msra.gmra.mrb[104].mxu1 %v17778_v24  ;;  %v18013_v24 = vld [vmem:[#allocation7 + $0x40] ss:$16 sps:$4 sm:$0xff]  }
 0x78d   :  { %10587 = vmatpush1.bf16.msra.mxu0 %v17987_v0  ;;  %10628 = vmatpush1.bf16.msra.mxu1 %v17989_v7  ;;  %18564 = vst [vmem:[#allocation61_spill] sm:$0xff] %v18013_v24 }
 0x78e   :  { %10588 = vmatprep.subr.bf16.mxu0 %v17991_v50  ;;  %10629 = vmatprep.subr.bf16.mxu1 %v17993_v49  ;;  %v18069_v49 = vld [vmem:[#allocation7 + $0xe4] ss:$16 sps:$4 sm:$0xff]  }
 0x78f   :  { %18578 = vst [vmem:[#allocation75_spill] sm:$0xff] %v18069_v49 }
 0x791   :  { %10589 = vmatpush1.bf16.msra.mxu0 %v18001_v60  ;;  %10630 = vmatpush1.bf16.msra.mxu1 %v18003_v28 }
 0x792   :  { %10590 = vmatprep.subr.bf16.mxu0 %v18007_v2  ;;  %10631 = vmatprep.subr.bf16.mxu1 %v18009_v31 }
 0x795   :  { %10591 = vmatpush1.bf16.msra.mxu0 %v18013_v24  ;;  %10632 = vmatpush1.bf16.msra.mxu1 %v18015_v14  ;;  %v18039_v24 = vld [vmem:[#allocation7 + $0x88] ss:$16 sps:$4 sm:$0xff]   ;;  %v18043_v14 = vld [vmem:[#allocation7 + $0xa4] ss:$16 sps:$4 sm:$0xff]  }
 0x796   :  { %10592 = vmatprep.subr.bf16.mxu0 %v18019_v32  ;;  %10633 = vmatprep.subr.bf16.mxu1 %v18021_v1  ;;  %18573 = vst [vmem:[#allocation70_spill] sm:$0xff] %v18039_v24  ;;  %18574 = vst [vmem:[#allocation71_spill] sm:$0xff] %v18043_v14  ;;  %v18045_v32 = vld [vmem:[#allocation7 + $0xac] ss:$16 sps:$4 sm:$0xff]   ;;  %v18049_v1 = vld [vmem:[#allocation7 + $0xa0] ss:$16 sps:$4 sm:$0xff]  }
 0x797   :  { %18575 = vst [vmem:[#allocation72_spill] sm:$0xff] %v18045_v32  ;;  %18576 = vst [vmem:[#allocation73_spill] sm:$0xff] %v18049_v1 }
 0x799   :  { %10593 = vmatpush1.bf16.msra.mxu0 %v18025_v63  ;;  %10634 = vmatpush1.bf16.msra.mxu1 %v18027_v19  ;;  %v18051_v63 = vld [vmem:[#allocation7 + $0xa8] ss:$16 sps:$4 sm:$0xff]   ;;  %v18055_v19 = vld [vmem:[#allocation7 + $0xc4] ss:$16 sps:$4 sm:$0xff]  }
 0x79a   :  { %10594 = vmatprep.subr.bf16.mxu0 %v18031_v11  ;;  %10635 = vmatprep.subr.bf16.mxu1 %v18033_v35  ;;  %18577 = vst [vmem:[#allocation74_spill] sm:$0xff] %v18051_v63  ;;  %v18057_v11 = vld [vmem:[#allocation7 + $0xcc] ss:$16 sps:$4 sm:$0xff]  }
 0x79d   :  { %10595 = vmatpush1.bf16.msra.mxu0 %v18037_v57  ;;  %10636 = vmatpush1.bf16.msra.mxu1 %v18039_v24  ;;  %v18062_v24 = vld [vmem:[#allocation7 + $0xc0] ss:$16 sps:$4 sm:$0xff]   ;;  %v18064_v57 = vld [vmem:[#allocation7 + $0xc8] ss:$16 sps:$4 sm:$0xff]  }
 0x79e   :  { %10596 = vmatprep.subr.bf16.mxu0 %v18043_v14  ;;  %10637 = vmatprep.subr.bf16.mxu1 %v18045_v32 }
 0x7a1   :  { %v9338_v35 = vpop.f32.mrb[96].mxu0  ;;  %10597 = vmatpush1.bf16.msra.mxu0 %v18049_v1  ;;  %10638 = vmatpush1.bf16.msra.mxu1 %v18051_v63 }
 0x7a2   :  { %v9339_v31 = vadd.f32 %v9338_v35, %v16802_v56  ;;  %v9379_v2 = vpop.f32.mrb[96].mxu1  ;;  %v9340_v28 = vpop.f32.mrb[97].mxu0  ;;  %10598 = vmatprep.subr.bf16.mxu0 %v18055_v19  ;;  %10639 = vmatprep.subr.bf16.mxu1 %v18057_v11  ;;  %v18071_v35 = vld [vmem:[#allocation7 + $0xec] ss:$16 sps:$4 sm:$0xff]  }
 0x7a3   :  { %v9341_v14 = vadd.f32 %v9340_v28, %v16805_v15  ;;  %v9381_v32 = vpop.f32.mrb[97].mxu1  ;;  %v9342_v60 = vpop.f32.mrb[98].mxu0  ;;  %18579 = vst [vmem:[#allocation76_spill] sm:$0xff] %v18071_v35  ;;  %v18078_v28 = vld [vmem:[#allocation7 + $0xe8] ss:$16 sps:$4 sm:$0xff]  }
 0x7a4   :  { %v9386_v56 = vmul.f32 0.5, %v9339_v31  ;;  %v9383_v1 = vpop.f32.mrb[98].mxu1  ;;  %v9343_v50 = vpop.f32.mrb[99].mxu0  ;;  %v9382_v0 = vadd.f32 %v9381_v32, %v16808_v25  ;;  %v18076_v60 = vld [vmem:[#allocation7 + $0xe0] ss:$16 sps:$4 sm:$0xff]   ;;  %18581 = vst [vmem:[#allocation78_spill] sm:$0xff] %v18078_v28 }
 0x7a5   :  { %v9387_v63 = vmul.f32 0.5, %v9341_v14  ;;  %v9384_v7 = vpop.f32.mrb[99].mxu1  ;;  %10599 = vmatpush1.bf16.msra.mxu0 %v18062_v24  ;;  %10640 = vmatpush1.bf16.msra.mxu1 %v18064_v57  ;;  %18580 = vst [vmem:[#allocation77_spill] sm:$0xff] %v18076_v60  ;;  %v18082_v31 = vld [vmem:[#allocation7 + $0x104] ss:$16 sps:$4 sm:$0xff]   ;;  %v9380_v14 = vadd.f32 %v9379_v2, %v16814_v12 }
 0x7a6   :  { %16188 = vtanh.f32 %v9386_v56  ;;  %10600 = vmatprep.subr.bf16.mxu0 %v18069_v49  ;;  %10641 = vmatprep.subr.bf16.mxu1 %v18071_v35  ;;  %18582 = vst [vmem:[#allocation79_spill] sm:$0xff] %v18082_v31  ;;  %v18084_v50 = vld [vmem:[#allocation7 + $0x10c] ss:$16 sps:$4 sm:$0xff]   ;;  %v18088_v56 = vld [vmem:[#allocation7 + $0x100] ss:$16 sps:$4 sm:$0xff]  }
 0x7a7   :  { %18583 = vst [vmem:[#allocation80_spill] sm:$0xff] %v18084_v50  ;;  %16190 = vtanh.f32 %v9387_v63  ;;  %18584 = vst [vmem:[#allocation81_spill] sm:$0xff] %v18088_v56  ;;  %v18090_v7 = vld [vmem:[#allocation7 + $0x108] ss:$16 sps:$4 sm:$0xff]   ;;  %v18095_v32 = vld [vmem:[#allocation7 + $0x124] ss:$16 sps:$4 sm:$0xff]  }
 0x7a8   :  { %16192 = vtanh.f32 %v9382_v0  ;;  %18585 = vst [vmem:[#allocation82_spill] sm:$0xff] %v18090_v7  ;;  %18586 = vst [vmem:[#allocation83_spill] sm:$0xff] %v18095_v32  ;;  %v18097_v1 = vld [vmem:[#allocation7 + $0x12c] ss:$16 sps:$4 sm:$0xff]   ;;  %v18101_v0 = vld [vmem:[#allocation7 + $0x120] ss:$16 sps:$4 sm:$0xff]  }
 0x7a9   :  { %10601 = vmatpush1.bf16.msra.mxu0 %v18076_v60  ;;  %10642 = vmatpush1.bf16.msra.mxu1 %v18078_v28  ;;  %18587 = vst [vmem:[#allocation84_spill] sm:$0xff] %v18097_v1  ;;  %18588 = vst [vmem:[#allocation85_spill] sm:$0xff] %v18101_v0  ;;  %v18103_v63 = vld [vmem:[#allocation7 + $0x128] ss:$16 sps:$4 sm:$0xff]   ;;  %v9388_v28 = vmul.f32 0.5, %v9380_v14 }
 0x7aa   :  { %10602 = vmatprep.subr.bf16.mxu0 %v18082_v31  ;;  %10643 = vmatprep.subr.bf16.mxu1 %v18084_v50  ;;  %18589 = vst [vmem:[#allocation86_spill] sm:$0xff] %v18103_v63  ;;  %v18107_v2 = vld [vmem:[#allocation7 + $0x144] ss:$16 sps:$4 sm:$0xff]   ;;  %v18109_v50 = vld [vmem:[#allocation7 + $0x14c] ss:$16 sps:$4 sm:$0xff]  }
 0x7ab   :  { %18590 = vst [vmem:[#allocation87_spill] sm:$0xff] %v18109_v50  ;;  %16194 = vtanh.f32 %v9388_v28  ;;  %v18121_v35 = vld [vmem:[#allocation7 + $0x16c] ss:$16 sps:$4 sm:$0xff]   ;;  %v18132_v28 = vld [vmem:[#allocation7 + $0x184] ss:$16 sps:$4 sm:$0xff]  }
 0x7ac   :  { %18592 = vst [vmem:[#allocation89_spill] sm:$0xff] %v18121_v35  ;;  %18595 = vst [vmem:[#allocation92_spill] sm:$0xff] %v18132_v28 }
 0x7ad   :  { %10603 = vmatpush1.bf16.msra.mxu0 %v18088_v56  ;;  %10644 = vmatpush1.bf16.msra.mxu1 %v18090_v7  ;;  %v18113_v7 = vld [vmem:[#allocation7 + $0x140] ss:$16 sps:$4 sm:$0xff]   ;;  %v18115_v56 = vld [vmem:[#allocation7 + $0x148] ss:$16 sps:$4 sm:$0xff]  }
 0x7ae   :  { %10604 = vmatprep.subr.bf16.mxu0 %v18095_v32  ;;  %10645 = vmatprep.subr.bf16.mxu1 %v18097_v1  ;;  %v18119_v1 = vld [vmem:[#allocation7 + $0x164] ss:$16 sps:$4 sm:$0xff]  }
 0x7af   :  { %18591 = vst [vmem:[#allocation88_spill] sm:$0xff] %v18119_v1 }
 0x7b0   :  { %v16189_v31 = vpop.eup %16188 }
 0x7b1   :  { %v9392_v12 = vmul.f32 0.5, %v16189_v31  ;;  %v16191_v60 = vpop.eup %16190  ;;  %10605 = vmatpush1.bf16.msra.mxu0 %v18101_v0  ;;  %10646 = vmatpush1.bf16.msra.mxu1 %v18103_v63  ;;  %v18125_v63 = vld [vmem:[#allocation7 + $0x160] ss:$16 sps:$4 sm:$0xff]  }
 0x7b2   :  { %v9393_v32 = vmul.f32 0.5, %v16191_v60  ;;  %10606 = vmatprep.subr.bf16.mxu0 %v18107_v2  ;;  %10647 = vmatprep.subr.bf16.mxu1 %v18109_v50  ;;  %v16193_v31 = vpop.eup %16192  ;;  %18593 = vst [vmem:[#allocation90_spill] sm:$0xff] %v18125_v63  ;;  %v18134_v50 = vld [vmem:[#allocation7 + $0x18c] ss:$16 sps:$4 sm:$0xff]  }
 0x7b3   :  { %v9395_v14 = vadd.f32 0.5, %v9392_v12  ;;  %v18127_v12 = vld [vmem:[#allocation7 + $0x168] ss:$16 sps:$4 sm:$0xff]   ;;  %18596 = vst [vmem:[#allocation93_spill] sm:$0xff] %v18134_v50 }
 0x7b4   :  { %v9396_v49 = vadd.f32 0.5, %v9393_v32  ;;  %18594 = vst [vmem:[#allocation91_spill] sm:$0xff] %v18127_v12 }
 0x7b5   :  { %v9400_v0 = vmul.f32 %v16193_v31, %v9395_v14  ;;  %10607 = vmatpush1.bf16.msra.mxu0 %v18113_v7  ;;  %10648 = vmatpush1.bf16.msra.mxu1 %v18115_v56  ;;  %v18138_v14 = vld [vmem:[#allocation7 + $0x180] ss:$16 sps:$4 sm:$0xff]   ;;  %v18140_v31 = vld [vmem:[#allocation7 + $0x188] ss:$16 sps:$4 sm:$0xff]  }
 0x7b6   :  { %v9399_v60 = vmul.f32 %v9396_v49, %v17650_v34  ;;  %10608 = vmatprep.subr.bf16.mxu0 %v18119_v1  ;;  %10649 = vmatprep.subr.bf16.mxu1 %v18121_v35  ;;  %18597 = vst [vmem:[#allocation94_spill] sm:$0xff] %v18138_v14  ;;  %18598 = vst [vmem:[#allocation95_spill] sm:$0xff] %v18140_v31  ;;  %v18144_v49 = vld [vmem:[#allocation7 + $0x1a4] ss:$16 sps:$4 sm:$0xff]   ;;  %v18146_v35 = vld [vmem:[#allocation7 + $0x1ac] ss:$16 sps:$4 sm:$0xff]  }
 0x7b7   :  { %18599 = vst [vmem:[#allocation96_spill] sm:$0xff] %v18144_v49  ;;  %18600 = vst [vmem:[#allocation97_spill] sm:$0xff] %v18146_v35 }
 0x7b8   :  { %v9401_v32 = vadd.f32 %v9400_v0, %v9399_v60  ;;  %v16195_v0 = vpop.eup %16194 }
 0x7b9   :  { %10609 = vmatpush1.bf16.msra.mxu0 %v18125_v63  ;;  %10650 = vmatpush1.bf16.msra.mxu1 %v18127_v12  ;;  %v18154_v12 = vld [vmem:[#allocation7 + $0x1a0] ss:$16 sps:$4 sm:$0xff]   ;;  %v18156_v63 = vld [vmem:[#allocation7 + $0x1a8] ss:$16 sps:$4 sm:$0xff]  }
 0x7ba   :  { %16196 = vtanh.f32 %v9401_v32  ;;  %10610 = vmatprep.subr.bf16.mxu0 %v18132_v28  ;;  %10651 = vmatprep.subr.bf16.mxu1 %v18134_v50  ;;  %v9406_v1 = vsub.f32 %v9401_v32, %v17650_v34  ;;  %18601 = vst [vmem:[#allocation98_spill] sm:$0xff] %v18154_v12  ;;  %18602 = vst [vmem:[#allocation99_spill] sm:$0xff] %v18156_v63  ;;  %v18160_v50 = vld [vmem:[#allocation7 + $0x1c4] ss:$16 sps:$4 sm:$0xff]   ;;  %v18162_v28 = vld [vmem:[#allocation7 + $0x1cc] ss:$16 sps:$4 sm:$0xff]  }
 0x7bb   :  { %18603 = vst [vmem:[#allocation100_spill] sm:$0xff] %v18162_v28  ;;  %v9394_v32 = vmul.f32 0.5, %v16195_v0  ;;  %v18178_v0 = vld [vmem:[#allocation7 + $0x1e0] ss:$16 sps:$4 sm:$0xff]  }
 0x7bc   :  { %v18150_v60 = vadd.f32 %v9406_v1, %v17650_v34  ;;  %v18166_v34 = vld [vmem:[#allocation7 + $0x1c0] ss:$16 sps:$4 sm:$0xff]   ;;  %v18168_v1 = vld [vmem:[#allocation7 + $0x1c8] ss:$16 sps:$4 sm:$0xff]  }
 0x7bd   :  { %10611 = vmatpush1.bf16.msra.mxu0 %v18138_v14  ;;  %10652 = vmatpush1.bf16.msra.mxu1 %v18140_v31  ;;  %v9397_v31 = vadd.f32 0.5, %v9394_v32 }
 0x7be   :  { %10612 = vmatprep.subr.bf16.mxu0 %v18144_v49  ;;  %10653 = vmatprep.subr.bf16.mxu1 %v18146_v35  ;;  %v18172_v49 = vld [vmem:[#allocation7 + $0x1e4] ss:$16 sps:$4 sm:$0xff]   ;;  %v18174_v35 = vld [vmem:[#allocation7 + $0x1ec] ss:$16 sps:$4 sm:$0xff]  }
 0x7c1   :  { %10613 = vmatpush1.bf16.msra.mxu0 %v18154_v12  ;;  %10654 = vmatpush1.bf16.msra.mxu1 %v18156_v63  ;;  %v18180_v63 = vld [vmem:[#allocation7 + $0x1e8] ss:$16 sps:$4 sm:$0xff]  }
 0x7c2   :  { %10614 = vmatprep.subr.bf16.mxu0 %v18160_v50  ;;  %10655 = vmatprep.subr.bf16.mxu1 %v18162_v28 }
 0x7c4   :  { %v16197_v14 = vpop.eup %16196 }
 0x7c5   :  { %10615 = vmatpush1.bf16.msra.mxu0 %v18166_v34  ;;  %10656 = vmatpush1.bf16.msra.mxu1 %v18168_v1  ;;  %v9403_v12 = vmul.f32 %v16197_v14, %v9397_v31 }
 0x7c6   :  { %10616 = vmatprep.subr.bf16.mxu0 %v18172_v49  ;;  %10657 = vmatprep.subr.bf16.mxu1 %v18174_v35 }
 0x7c7   :  { %v9404_v28 = vsub.f32 %v9403_v12, %v17660_v6 }
 0x7c9   :  { %10617 = vmatpush1.bf16.msra.mxu0 %v18178_v0  ;;  %10658 = vmatpush1.bf16.msra.mxu1 %v18180_v63  ;;  %v18188_v32 = vadd.f32 %v9404_v28, %v17660_v6  ;;  %v18604_v6 = vld [vmem:[#allocation24_spill] sm:$0xff]  ;;  %v18629_v28 = vld [vmem:[#allocation45_spill] sm:$0xff] }
 0x7ca   :  { %11079 = vmatprep.subr.bf16.mxu0 %v17760_v46  ;;  %11120 = vmatprep.subr.bf16.mxu1 %v17762_v41  ;;  %v18605_v46 = vld [vmem:[#allocation25_spill] sm:$0xff]  ;;  %v18606_v41 = vld [vmem:[#allocation26_spill] sm:$0xff] }
 0x7cb   :  { %v12378_v14 = vmul.f32 %v17207_v54, %v18188_v32  ;;  %v9412_v31 = vpack.c.bf16 %v18188_v32, %v18188_v32 }
 0x7cd   :  { %12390 = vadd.xlane.f32.xlu1 %v12378_v14  ;;  %10618 = vmatprep.mubr.bf16.mxu0 %v9412_v31 }
 0x7ce   :  { %10659 = vmatprep.mubr.bf16.mxu1 %v9412_v31  ;;  %10619 = vmatmul.mubr.bf16.vlgmr.msra.gmra.mrb[108].mxu0 %v17985_v59 }
 0x7cf   :  { %10660 = vmatmul.mubr.bf16.vlgmr.msra.gmra.mrb[108].mxu1 %v17985_v59  ;;  %11080 = vmatpush1.bf16.msra.mxu0 %v17774_v23  ;;  %v18607_v23 = vld [vmem:[#allocation27_spill] sm:$0xff] }
 0x7d0   :  { %11121 = vmatpush1.bf16.msra.mxu1 %v17776_v43  ;;  %11081 = vmatprep.subr.bf16.mxu0 %v17780_v37  ;;  %v18608_v43 = vld [vmem:[#allocation28_spill] sm:$0xff]  ;;  %v18609_v37 = vld [vmem:[#allocation29_spill] sm:$0xff] }
 0x7d1   :  { %11122 = vmatprep.subr.bf16.mxu1 %v17782_v42  ;;  %v18610_v42 = vld [vmem:[#allocation30_spill] sm:$0xff] }
 0x7d3   :  { %11082 = vmatpush1.bf16.msra.mxu0 %v17788_v26  ;;  %v18611_v26 = vld [vmem:[#allocation31_spill] sm:$0xff] }
 0x7d4   :  { %11123 = vmatpush1.bf16.msra.mxu1 %v17790_v51  ;;  %11083 = vmatprep.subr.bf16.mxu0 %v17794_v53  ;;  %v18612_v51 = vld [vmem:[#allocation32_spill] sm:$0xff]  ;;  %v18613_v53 = vld [vmem:[#allocation33_spill] sm:$0xff] }
 0x7d5   :  { %11124 = vmatprep.subr.bf16.mxu1 %v17796_v52  ;;  %v18614_v52 = vld [vmem:[#allocation34_spill] sm:$0xff] }
 0x7d7   :  { %11084 = vmatpush1.bf16.msra.mxu0 %v17800_v55  ;;  %v18615_v55 = vld [vmem:[#allocation35_spill] sm:$0xff] }
 0x7d8   :  { %11125 = vmatpush1.bf16.msra.mxu1 %v17802_v4  ;;  %11085 = vmatprep.subr.bf16.mxu0 %v17806_v30  ;;  %v18616_v4 = vld [vmem:[#allocation36_spill] sm:$0xff]  ;;  %v18617_v30 = vld [vmem:[#allocation37_spill] sm:$0xff] }
 0x7d9   :  { %11126 = vmatprep.subr.bf16.mxu1 %v17808_v47  ;;  %v18618_v47 = vld [vmem:[#allocation38_spill] sm:$0xff] }
 0x7db   :  { %11086 = vmatpush1.bf16.msra.mxu0 %v17812_v20  ;;  %v18619_v20 = vld [vmem:[#allocation39_spill] sm:$0xff] }
 0x7dc   :  { %11127 = vmatpush1.bf16.msra.mxu1 %v17814_v9  ;;  %11087 = vmatprep.subr.bf16.mxu0 %v17818_v45  ;;  %v18620_v9 = vld [vmem:[#allocation40_spill] sm:$0xff]  ;;  %v18621_v45 = vld [vmem:[#allocation41_spill] sm:$0xff] }
 0x7dd   :  { %11128 = vmatprep.subr.bf16.mxu1 %v17820_v44 }
 0x7df   :  { %11088 = vmatpush1.bf16.msra.mxu0 %v17824_v13 }
 0x7e0   :  { %11129 = vmatpush1.bf16.msra.mxu1 %v17826_v39  ;;  %11089 = vmatprep.subr.bf16.mxu0 %v17830_v38  ;;  %v18622_v39 = vld [vmem:[#allocation42_spill] sm:$0xff]  ;;  %v18623_v38 = vld [vmem:[#allocation12_spill] sm:$0xff] }
 0x7e1   :  { %11130 = vmatprep.subr.bf16.mxu1 %v17832_v62 }
 0x7e3   :  { %11090 = vmatpush1.bf16.msra.mxu0 %v17836_v61  ;;  %v18624_v61 = vld [vmem:[#allocation13_spill] sm:$0xff] }
 0x7e4   :  { %11131 = vmatpush1.bf16.msra.mxu1 %v17838_v33  ;;  %11091 = vmatprep.subr.bf16.mxu0 %v17842_v29 }
 0x7e5   :  { %11132 = vmatprep.subr.bf16.mxu1 %v17844_v48 }
 0x7e7   :  { %11092 = vmatpush1.bf16.msra.mxu0 %v17848_v27  ;;  %v18625_v27 = vld [vmem:[#allocation43_spill] sm:$0xff] }
 0x7e8   :  { %11133 = vmatpush1.bf16.msra.mxu1 %v17850_v8  ;;  %11093 = vmatprep.subr.bf16.mxu0 %v17854_v17  ;;  %v18626_v8 = vld [vmem:[#allocation44_spill] sm:$0xff]  ;;  %v18627_v17 = vld [vmem:[#allocation14_spill] sm:$0xff] }
 0x7e9   :  { %11134 = vmatprep.subr.bf16.mxu1 %v17856_v22 }
 0x7eb   :  { %11094 = vmatpush1.bf16.msra.mxu0 %v17860_v58  ;;  %v18628_v58 = vld [vmem:[#allocation15_spill] sm:$0xff] }
 0x7ec   :  { %11135 = vmatpush1.bf16.msra.mxu1 %v17862_v10  ;;  %11095 = vmatprep.subr.bf16.mxu0 %v18604_v6 }
 0x7ed   :  { %11136 = vmatprep.subr.bf16.mxu1 %v18605_v46 }
 0x7ef   :  { %11096 = vmatpush1.bf16.msra.mxu0 %v18606_v41  ;;  %v18630_v41 = vld [vmem:[#allocation46_spill] sm:$0xff] }
 0x7f0   :  { %11137 = vmatpush1.bf16.msra.mxu1 %v18607_v23  ;;  %11097 = vmatprep.subr.bf16.mxu0 %v18608_v43  ;;  %v18631_v23 = vld [vmem:[#allocation47_spill] sm:$0xff]  ;;  %v18632_v43 = vld [vmem:[#allocation48_spill] sm:$0xff] }
 0x7f1   :  { %11138 = vmatprep.subr.bf16.mxu1 %v18609_v37  ;;  %v18633_v37 = vld [vmem:[#allocation49_spill] sm:$0xff] }
 0x7f3   :  { %11098 = vmatpush1.bf16.msra.mxu0 %v18610_v42  ;;  %v18635_v42 = vld [vmem:[#allocation51_spill] sm:$0xff] }
 0x7f4   :  { %11139 = vmatpush1.bf16.msra.mxu1 %v18611_v26  ;;  %11099 = vmatprep.subr.bf16.mxu0 %v18612_v51 }
 0x7f5   :  { %11140 = vmatprep.subr.bf16.mxu1 %v18613_v53 }
 0x7f7   :  { %11100 = vmatpush1.bf16.msra.mxu0 %v18614_v52 }
 0x7f8   :  { %11141 = vmatpush1.bf16.msra.mxu1 %v18615_v55  ;;  %11101 = vmatprep.subr.bf16.mxu0 %v18616_v4 }
 0x7f9   :  { %11142 = vmatprep.subr.bf16.mxu1 %v18617_v30  ;;  %v18637_v30 = vld [vmem:[#allocation23_spill] sm:$0xff] }
 0x7fb   :  { %11102 = vmatpush1.bf16.msra.mxu0 %v18618_v47 }
 0x7fc   :  { %11143 = vmatpush1.bf16.msra.mxu1 %v18619_v20  ;;  %11103 = vmatprep.subr.bf16.mxu0 %v18620_v9 }
 0x7fd   :  { %11144 = vmatprep.subr.bf16.mxu1 %v18621_v45 }
 0x7fe   :  { %v9644_v44 = vpop.f32.mrb[100].mxu0  ;;  %v9685_v13 = vpop.f32.mrb[100].mxu1 }
 0x7ff   :  { %11104 = vmatpush1.bf16.msra.mxu0 %v18622_v39  ;;  %v9692_v62 = vadd.f32 %v9644_v44, %v18623_v38  ;;  %v9694_v33 = vadd.f32 %v9685_v13, %v18624_v61  ;;  %v9646_v29 = vpop.f32.mrb[101].mxu0  ;;  %v9687_v48 = vpop.f32.mrb[101].mxu1  ;;  %v18638_v61 = vld [vmem:[#allocation16_spill] sm:$0xff] }
 0x800   :  { %11145 = vmatpush1.bf16.msra.mxu1 %v18625_v27  ;;  %11105 = vmatprep.subr.bf16.mxu0 %v18626_v8  ;;  %v9693_v22 = vadd.f32 %v9646_v29, %v18627_v17  ;;  %v9695_v10 = vadd.f32 %v9687_v48, %v18628_v58  ;;  %v9648_v59 = vpop.f32.mrb[102].mxu0  ;;  %v9689_v12 = vpop.f32.mrb[102].mxu1  ;;  %v18639_v27 = vld [vmem:[#allocation17_spill] sm:$0xff] }
 0x801   :  { %11146 = vmatprep.subr.bf16.mxu1 %v18629_v28  ;;  %v9696_v14 = vmul.f32 0.5, %v9692_v62  ;;  %v9649_v31 = vpop.f32.mrb[103].mxu0  ;;  %v9690_v6 = vpop.f32.mrb[103].mxu1  ;;  %v18640_v28 = vld [vmem:[#allocation18_spill] sm:$0xff] }
 0x802   :  { %v9697_v46 = vmul.f32 0.5, %v9693_v22  ;;  %v18641_v31 = vld [vmem:[#allocation19_spill] sm:$0xff] }
 0x803   :  { %11106 = vmatpush1.bf16.msra.mxu0 %v17932_v3  ;;  %16198 = vtanh.f32 %v9696_v14  ;;  %v18634_v3 = vld [vmem:[#allocation50_spill] sm:$0xff] }
 0x804   :  { %11147 = vmatpush1.bf16.msra.mxu1 %v17934_v21  ;;  %11107 = vmatprep.subr.bf16.mxu0 %v17938_v40  ;;  %16200 = vtanh.f32 %v9697_v46  ;;  %v9698_v21 = vmul.f32 0.5, %v9694_v33  ;;  %v18636_v40 = vld [vmem:[#allocation52_spill] sm:$0xff] }
 0x805   :  { %11148 = vmatprep.subr.bf16.mxu1 %v17940_v36  ;;  %16202 = vtanh.f32 %v9695_v10 }
 0x806   :  { %16204 = vtanh.f32 %v9698_v21 }
 0x807   :  { %11108 = vmatpush1.bf16.msra.mxu0 %v17944_v16 }
 0x808   :  { %11149 = vmatpush1.bf16.msra.mxu1 %v18630_v41  ;;  %11109 = vmatprep.subr.bf16.mxu0 %v18631_v23 }
 0x809   :  { %11150 = vmatprep.subr.bf16.mxu1 %v18632_v43 }
 0x80b   :  { %11110 = vmatpush1.bf16.msra.mxu0 %v18633_v37 }
 0x80c   :  { %11151 = vmatpush1.bf16.msra.mxu1 %v18634_v3  ;;  %11565 = vmatprep.subr.bf16.mxu0 %v18635_v42 }
 0x80d   :  { %11606 = vmatprep.subr.bf16.mxu1 %v18636_v40  ;;  %v16199_v36 = vpop.eup %16198 }
 0x80e   :  { %v9702_v26 = vmul.f32 0.5, %v16199_v36  ;;  %v16201_v51 = vpop.eup %16200 }
 0x80f   :  { %v9703_v53 = vmul.f32 0.5, %v16201_v51  ;;  %v16203_v52 = vpop.eup %16202 }
 0x810   :  { %v9705_v16 = vadd.f32 0.5, %v9702_v26  ;;  %v16205_v9 = vpop.eup %16204 }
 0x811   :  { %v9706_v55 = vadd.f32 0.5, %v9703_v53  ;;  %v9704_v45 = vmul.f32 0.5, %v16205_v9 }
 0x812   :  { %v9710_v4 = vmul.f32 %v16203_v52, %v9705_v16 }
 0x813   :  { %v9709_v47 = vmul.f32 %v9706_v55, %v18637_v30  ;;  %v9707_v44 = vadd.f32 0.5, %v9704_v45 }
 0x815   :  { %v9711_v20 = vadd.f32 %v9710_v4, %v9709_v47 }
 0x817   :  { %16206 = vtanh.f32 %v9711_v20 }
 0x821   :  { %v16207_v13 = vpop.eup %16206 }
 0x822   :  { %v9713_v39 = vmul.f32 %v16207_v13, %v9707_v44  ;;  %v18643_v44 = vld [vmem:[#allocation54_spill] sm:$0xff]  ;;  %v18644_v13 = vld [vmem:[#allocation55_spill] sm:$0xff] }
 0x824   :  { %v10692_v45 = vpack.c.bf16 %v9713_v39, %v9713_v39  ;;  %v18649_v39 = vld [vmem:[#allocation60_spill] sm:$0xff] }
 0x85f   :  { %v10132_v38 = vpop.f32.mrb[104].mxu0  ;;  %v10173_v62 = vpop.f32.mrb[104].mxu1 }
 0x860   :  { %v10133_v33 = vadd.f32 %v10132_v38, %v18638_v61  ;;  %v10134_v29 = vpop.f32.mrb[105].mxu0  ;;  %v10175_v48 = vpop.f32.mrb[105].mxu1  ;;  %v10174_v6 = vadd.f32 %v10173_v62, %v18641_v31  ;;  %v18645_v38 = vld [vmem:[#allocation56_spill] sm:$0xff]  ;;  %v18647_v62 = vld [vmem:[#allocation58_spill] sm:$0xff] }
 0x861   :  { %v10135_v8 = vadd.f32 %v10134_v29, %v18639_v27  ;;  %v10136_v17 = vpop.f32.mrb[106].mxu0  ;;  %v10177_v22 = vpop.f32.mrb[106].mxu1  ;;  %v10176_v14 = vadd.f32 %v10175_v48, %v18640_v28  ;;  %v18650_v29 = vld [vmem:[#allocation61_spill] sm:$0xff]  ;;  %v18651_v48 = vld [vmem:[#allocation62_spill] sm:$0xff] }
 0x862   :  { %v10180_v58 = vmul.f32 0.5, %v10133_v33  ;;  %v10137_v10 = vpop.f32.mrb[107].mxu0  ;;  %v10178_v59 = vpop.f32.mrb[107].mxu1  ;;  %v10182_v46 = vmul.f32 0.5, %v10174_v6  ;;  %v18648_v33 = vld [vmem:[#allocation59_spill] sm:$0xff]  ;;  %v18653_v17 = vld [vmem:[#allocation64_spill] sm:$0xff] }
 0x863   :  { %v10181_v12 = vmul.f32 0.5, %v10135_v8  ;;  %v18652_v8 = vld [vmem:[#allocation63_spill] sm:$0xff]  ;;  %v18654_v22 = vld [vmem:[#allocation65_spill] sm:$0xff]  ;;  %v18657_v59 = vld [vmem:[#allocation68_spill] sm:$0xff] }
 0x864   :  { %16208 = vtanh.f32 %v10180_v58  ;;  %v18655_v58 = vld [vmem:[#allocation66_spill] sm:$0xff]  ;;  %v18656_v10 = vld [vmem:[#allocation67_spill] sm:$0xff] }
 0x865   :  { %16210 = vtanh.f32 %v10181_v12  ;;  %v18658_v12 = vld [vmem:[#allocation69_spill] sm:$0xff]  ;;  %v18660_v6 = vld [vmem:[#allocation71_spill] sm:$0xff] }
 0x866   :  { %16212 = vtanh.f32 %v10176_v14  ;;  %v18659_v14 = vld [vmem:[#allocation70_spill] sm:$0xff] }
 0x867   :  { %16214 = vtanh.f32 %v10182_v46  ;;  %v18661_v46 = vld [vmem:[#allocation72_spill] sm:$0xff] }
 0x86e   :  { %v16209_v41 = vpop.eup %16208 }
 0x86f   :  { %v10186_v23 = vmul.f32 0.5, %v16209_v41  ;;  %v16211_v43 = vpop.eup %16210 }
 0x870   :  { %v10187_v3 = vmul.f32 0.5, %v16211_v43  ;;  %v16213_v42 = vpop.eup %16212 }
 0x871   :  { %v10189_v37 = vadd.f32 0.5, %v10186_v23  ;;  %v16215_v16 = vpop.eup %16214  ;;  %v18662_v23 = vld [vmem:[#allocation20_spill] sm:$0xff] }
 0x872   :  { %v10190_v21 = vadd.f32 0.5, %v10187_v3  ;;  %v10188_v52 = vmul.f32 0.5, %v16215_v16 }
 0x873   :  { %v10194_v40 = vmul.f32 %v16213_v42, %v10189_v37  ;;  %v18663_v42 = vld [vmem:[#allocation73_spill] sm:$0xff] }
 0x874   :  { %v10193_v36 = vmul.f32 %v10190_v21, %v17977_v18  ;;  %v10191_v55 = vadd.f32 0.5, %v10188_v52  ;;  %v18664_v21 = vld [vmem:[#allocation74_spill] sm:$0xff] }
 0x876   :  { %v10195_v26 = vadd.f32 %v10194_v40, %v10193_v36 }
 0x878   :  { %16216 = vtanh.f32 %v10195_v26  ;;  %v10200_v51 = vsub.f32 %v10195_v26, %v17977_v18 }
 0x87a   :  { %v18274_v53 = vadd.f32 %v10200_v51, %v17977_v18  ;;  %v18642_v18 = vld [vmem:[#allocation53_spill] sm:$0xff] }
 0x882   :  { %v16217_v4 = vpop.eup %16216 }
 0x883   :  { %v10197_v30 = vmul.f32 %v16217_v4, %v10191_v55 }
 0x885   :  { %v10198_v47 = vsub.f32 %v10197_v30, %v17981_v5 }
 0x887   :  { %v18278_v20 = vadd.f32 %v10198_v47, %v17981_v5  ;;  %v18646_v5 = vld [vmem:[#allocation57_spill] sm:$0xff]  ;;  %v18665_v47 = vld [vmem:[#allocation75_spill] sm:$0xff] }
 0x889   :  { %v18282_v9 = vpack.c.bf16 %v18278_v20, %v18278_v20 }
 0x88b   :  { %11111 = vmatprep.mubr.bf16.mxu0 %v18282_v9  ;;  %11152 = vmatprep.mubr.bf16.mxu1 %v18282_v9 }
 0x88c   :  { %11112 = vmatmul.mubr.bf16.vlgmr.msra.gmra.mrb[112].mxu0 %v10692_v45  ;;  %11153 = vmatmul.mubr.bf16.vlgmr.msra.gmra.mrb[112].mxu1 %v10692_v45  ;;  %v18666_v45 = vld [vmem:[#allocation76_spill] sm:$0xff] }
 0x88d   :  { %11566 = vmatpush1.bf16.msra.mxu0 %v18642_v18  ;;  %11607 = vmatpush1.bf16.msra.mxu1 %v18643_v44  ;;  %v18669_v18 = vld [vmem:[#allocation21_spill] sm:$0xff] }
 0x88e   :  { %11567 = vmatprep.subr.bf16.mxu0 %v18644_v13  ;;  %11608 = vmatprep.subr.bf16.mxu1 %v18645_v38  ;;  %v18670_v13 = vld [vmem:[#allocation79_spill] sm:$0xff]  ;;  %v18671_v38 = vld [vmem:[#allocation80_spill] sm:$0xff] }
 0x891   :  { %11568 = vmatpush1.bf16.msra.mxu0 %v18646_v5  ;;  %11609 = vmatpush1.bf16.msra.mxu1 %v18647_v62  ;;  %v18672_v5 = vld [vmem:[#allocation81_spill] sm:$0xff]  ;;  %v18674_v62 = vld [vmem:[#allocation83_spill] sm:$0xff] }
 0x892   :  { %11569 = vmatprep.subr.bf16.mxu0 %v18648_v33  ;;  %11610 = vmatprep.subr.bf16.mxu1 %v18649_v39  ;;  %v18675_v33 = vld [vmem:[#allocation84_spill] sm:$0xff] }
 0x895   :  { %11570 = vmatpush1.bf16.msra.mxu0 %v18650_v29  ;;  %11611 = vmatpush1.bf16.msra.mxu1 %v18651_v48 }
 0x896   :  { %11571 = vmatprep.subr.bf16.mxu0 %v18652_v8  ;;  %11612 = vmatprep.subr.bf16.mxu1 %v18653_v17  ;;  %v18676_v8 = vld [vmem:[#allocation85_spill] sm:$0xff]  ;;  %v18677_v17 = vld [vmem:[#allocation86_spill] sm:$0xff] }
 0x899   :  { %11572 = vmatpush1.bf16.msra.mxu0 %v18654_v22  ;;  %11613 = vmatpush1.bf16.msra.mxu1 %v18655_v58 }
 0x89a   :  { %11573 = vmatprep.subr.bf16.mxu0 %v18656_v10  ;;  %11614 = vmatprep.subr.bf16.mxu1 %v18657_v59  ;;  %v18678_v10 = vld [vmem:[#allocation87_spill] sm:$0xff] }
 0x89d   :  { %11574 = vmatpush1.bf16.msra.mxu0 %v18658_v12  ;;  %11615 = vmatpush1.bf16.msra.mxu1 %v18659_v14 }
 0x89e   :  { %11575 = vmatprep.subr.bf16.mxu0 %v18660_v6  ;;  %11616 = vmatprep.subr.bf16.mxu1 %v18661_v46  ;;  %v18679_v46 = vld [vmem:[#allocation88_spill] sm:$0xff] }
 0x8a1   :  { %v10620_v41 = vpop.f32.mrb[108].mxu0  ;;  %11576 = vmatpush1.bf16.msra.mxu0 %v18663_v42  ;;  %11617 = vmatpush1.bf16.msra.mxu1 %v18664_v21  ;;  %v18684_v42 = vld [vmem:[#allocation93_spill] sm:$0xff] }
 0x8a2   :  { %v10621_v43 = vadd.f32 %v10620_v41, %v18662_v23  ;;  %v10661_v37 = vpop.f32.mrb[108].mxu1  ;;  %v10622_v3 = vpop.f32.mrb[109].mxu0  ;;  %11577 = vmatprep.subr.bf16.mxu0 %v18055_v19  ;;  %11618 = vmatprep.subr.bf16.mxu1 %v18057_v11  ;;  %v18667_v19 = vld [vmem:[#allocation77_spill] sm:$0xff]  ;;  %v18668_v11 = vld [vmem:[#allocation78_spill] sm:$0xff] }
 0x8a3   :  { %v10623_v40 = vadd.f32 %v10622_v3, %v16805_v15  ;;  %v10663_v36 = vpop.f32.mrb[109].mxu1  ;;  %v10624_v26 = vpop.f32.mrb[110].mxu0  ;;  %v10662_v44 = vadd.f32 %v10661_v37, %v18669_v18  ;;  %v18680_v41 = vld [vmem:[#allocation89_spill] sm:$0xff]  ;;  %v18681_v37 = vld [vmem:[#allocation90_spill] sm:$0xff]  ;;  %v18682_v3 = vld [vmem:[#allocation91_spill] sm:$0xff] }
 0x8a4   :  { %v10668_v51 = vmul.f32 0.5, %v10621_v43  ;;  %v10665_v16 = vpop.f32.mrb[110].mxu1  ;;  %v10625_v52 = vpop.f32.mrb[111].mxu0  ;;  %v10664_v30 = vadd.f32 %v10663_v36, %v16808_v25  ;;  %v18686_v36 = vld [vmem:[#allocation95_spill] sm:$0xff]  ;;  %v18687_v26 = vld [vmem:[#allocation96_spill] sm:$0xff] }
 0x8a5   :  { %v10669_v55 = vmul.f32 0.5, %v10623_v40  ;;  %v10666_v4 = vpop.f32.mrb[111].mxu1  ;;  %11578 = vmatpush1.bf16.msra.mxu0 %v18062_v24  ;;  %11619 = vmatpush1.bf16.msra.mxu1 %v18064_v57  ;;  %v18673_v24 = vld [vmem:[#allocation82_spill] sm:$0xff]  ;;  %v10670_v57 = vmul.f32 0.5, %v10662_v44 }
 0x8a6   :  { %16218 = vtanh.f32 %v10668_v51  ;;  %11579 = vmatprep.subr.bf16.mxu0 %v18665_v47  ;;  %11620 = vmatprep.subr.bf16.mxu1 %v18666_v45  ;;  %v18685_v40 = vld [vmem:[#allocation94_spill] sm:$0xff]  ;;  %v18688_v51 = vld [vmem:[#allocation97_spill] sm:$0xff]  ;;  %v18691_v4 = vld [vmem:[#allocation100_spill] sm:$0xff] }
 0x8a7   :  { %16220 = vtanh.f32 %v10669_v55  ;;  %v18689_v52 = vld [vmem:[#allocation98_spill] sm:$0xff]  ;;  %v18690_v55 = vld [vmem:[#allocation99_spill] sm:$0xff] }
 0x8a8   :  { %16222 = vtanh.f32 %v10664_v30  ;;  %v15901_v44 = vld [vmem:[#allocation7 + $0x28] ss:$16 sps:$4 sm:$0xff]  }
 0x8a9   :  { %11580 = vmatpush1.bf16.msra.mxu0 %v18667_v19  ;;  %11621 = vmatpush1.bf16.msra.mxu1 %v18668_v11  ;;  %16224 = vtanh.f32 %v10670_v57  ;;  %v15898_v11 = vld [vmem:[#allocation7 + $0x20] ss:$16 sps:$4 sm:$0xff]   ;;  %v15915_v57 = vld [vmem:[#allocation7 + $0x6c] ss:$16 sps:$4 sm:$0xff]  }
 0x8aa   :  { %11581 = vmatprep.subr.bf16.mxu0 %v18670_v13  ;;  %11622 = vmatprep.subr.bf16.mxu1 %v18671_v38  ;;  %v15906_v13 = vld [vmem:[#allocation7 + $0x44] ss:$16 sps:$4 sm:$0xff]   ;;  %v15909_v38 = vld [vmem:[#allocation7 + $0x4c] ss:$16 sps:$4 sm:$0xff]  }
 0x8ad   :  { %11582 = vmatpush1.bf16.msra.mxu0 %v18672_v5  ;;  %11623 = vmatpush1.bf16.msra.mxu1 %v18673_v24  ;;  %v15904_v5 = vld [vmem:[#allocation7 + $0x40] ss:$16 sps:$4 sm:$0xff]   ;;  %v15912_v24 = vld [vmem:[#allocation7 + $0x64] ss:$16 sps:$4 sm:$0xff]  }
 0x8ae   :  { %11583 = vmatprep.subr.bf16.mxu0 %v18674_v62  ;;  %11624 = vmatprep.subr.bf16.mxu1 %v18675_v33  ;;  %v15910_v62 = vld [vmem:[#allocation7 + $0x60] ss:$16 sps:$4 sm:$0xff]   ;;  %v15913_v33 = vld [vmem:[#allocation7 + $0x68] ss:$16 sps:$4 sm:$0xff]  }
 0x8b0   :  { %v16219_v39 = vpop.eup %16218 }
 0x8b1   :  { %v10674_v29 = vmul.f32 0.5, %v16219_v39  ;;  %v16221_v48 = vpop.eup %16220  ;;  %11584 = vmatpush1.bf16.msra.mxu0 %v18676_v8  ;;  %11625 = vmatpush1.bf16.msra.mxu1 %v18677_v17  ;;  %v15918_v39 = vld [vmem:[#allocation7 + $0x84] ss:$16 sps:$4 sm:$0xff]   ;;  %v15919_v8 = vld [vmem:[#allocation7 + $0x88] ss:$16 sps:$4 sm:$0xff]  }
 0x8b2   :  { %v10675_v58 = vmul.f32 0.5, %v16221_v48  ;;  %11585 = vmatprep.subr.bf16.mxu0 %v18107_v2  ;;  %11626 = vmatprep.subr.bf16.mxu1 %v18678_v10  ;;  %v16223_v59 = vpop.eup %16222  ;;  %v18683_v2 = vld [vmem:[#allocation92_spill] sm:$0xff]  ;;  %v15916_v48 = vld [vmem:[#allocation7 + $0x80] ss:$16 sps:$4 sm:$0xff]   ;;  %v15924_v17 = vld [vmem:[#allocation7 + $0xa4] ss:$16 sps:$4 sm:$0xff]  }
 0x8b3   :  { %v10677_v22 = vadd.f32 0.5, %v10674_v29  ;;  %v16225_v21 = vpop.eup %16224  ;;  %v15921_v29 = vld [vmem:[#allocation7 + $0x8c] ss:$16 sps:$4 sm:$0xff]   ;;  %v15925_v10 = vld [vmem:[#allocation7 + $0xa8] ss:$16 sps:$4 sm:$0xff]  }
 0x8b4   :  { %v10678_v12 = vadd.f32 0.5, %v10675_v58  ;;  %v10676_v16 = vmul.f32 0.5, %v16225_v21  ;;  %v15922_v58 = vld [vmem:[#allocation7 + $0xa0] ss:$16 sps:$4 sm:$0xff]   ;;  %v15948_v21 = vld [vmem:[#allocation7 + $0x124] ss:$16 sps:$4 sm:$0xff]  }
 0x8b5   :  { %v10682_v14 = vmul.f32 %v16223_v59, %v10677_v22  ;;  %11586 = vmatpush1.bf16.msra.mxu0 %v18113_v7  ;;  %11627 = vmatpush1.bf16.msra.mxu1 %v18115_v56  ;;  %v15927_v22 = vld [vmem:[#allocation7 + $0xac] ss:$16 sps:$4 sm:$0xff]   ;;  %v15930_v59 = vld [vmem:[#allocation7 + $0xc4] ss:$16 sps:$4 sm:$0xff]  }
 0x8b6   :  { %v10681_v6 = vmul.f32 %v10678_v12, %v18150_v60  ;;  %11587 = vmatprep.subr.bf16.mxu0 %v18679_v46  ;;  %11628 = vmatprep.subr.bf16.mxu1 %v18680_v41  ;;  %v10679_v30 = vadd.f32 0.5, %v10676_v16  ;;  %v15933_v12 = vld [vmem:[#allocation7 + $0xcc] ss:$16 sps:$4 sm:$0xff]   ;;  %v15936_v46 = vld [vmem:[#allocation7 + $0xe4] ss:$16 sps:$4 sm:$0xff]  }
 0x8b7   :  { %v15939_v41 = vld [vmem:[#allocation7 + $0xec] ss:$16 sps:$4 sm:$0xff]  }
 0x8b8   :  { %v10683_v43 = vadd.f32 %v10682_v14, %v10681_v6  ;;  %v15928_v14 = vld [vmem:[#allocation7 + $0xc0] ss:$16 sps:$4 sm:$0xff]   ;;  %v15931_v6 = vld [vmem:[#allocation7 + $0xc8] ss:$16 sps:$4 sm:$0xff]   ;;  %v15957_v16 = vld [vmem:[#allocation7 + $0x14c] ss:$16 sps:$4 sm:$0xff]  }
 0x8b9   :  { %11588 = vmatpush1.bf16.msra.mxu0 %v18681_v37  ;;  %11629 = vmatpush1.bf16.msra.mxu1 %v18682_v3  ;;  %v15937_v37 = vld [vmem:[#allocation7 + $0xe8] ss:$16 sps:$4 sm:$0xff]   ;;  %v15942_v3 = vld [vmem:[#allocation7 + $0x104] ss:$16 sps:$4 sm:$0xff]  }
 0x8ba   :  { %16226 = vtanh.f32 %v10683_v43  ;;  %11589 = vmatprep.subr.bf16.mxu0 %v18683_v2  ;;  %11630 = vmatprep.subr.bf16.mxu1 %v18684_v42  ;;  %v10688_v7 = vsub.f32 %v10683_v43, %v18150_v60  ;;  %v15934_v43 = vld [vmem:[#allocation7 + $0xe0] ss:$16 sps:$4 sm:$0xff]   ;;  %v15945_v2 = vld [vmem:[#allocation7 + $0x10c] ss:$16 sps:$4 sm:$0xff]  }
 0x8bb   :  { %v15940_v42 = vld [vmem:[#allocation7 + $0x100] ss:$16 sps:$4 sm:$0xff]  }
 0x8bc   :  { %v18341_v56 = vadd.f32 %v10688_v7, %v18150_v60  ;;  %v15943_v7 = vld [vmem:[#allocation7 + $0x108] ss:$16 sps:$4 sm:$0xff]  }
 0x8bd   :  { %11590 = vmatpush1.bf16.msra.mxu0 %v18685_v40  ;;  %11631 = vmatpush1.bf16.msra.mxu1 %v18686_v36  ;;  %v15951_v40 = vld [vmem:[#allocation7 + $0x12c] ss:$16 sps:$4 sm:$0xff]   ;;  %v15946_v36 = vld [vmem:[#allocation7 + $0x120] ss:$16 sps:$4 sm:$0xff]  }
 0x8be   :  { %11591 = vmatprep.subr.bf16.mxu0 %v18687_v26  ;;  %11632 = vmatprep.subr.bf16.mxu1 %v18688_v51  ;;  %v15949_v26 = vld [vmem:[#allocation7 + $0x128] ss:$16 sps:$4 sm:$0xff]   ;;  %v15954_v51 = vld [vmem:[#allocation7 + $0x144] ss:$16 sps:$4 sm:$0xff]  }
 0x8c1   :  { %11592 = vmatpush1.bf16.msra.mxu0 %v18689_v52  ;;  %11633 = vmatpush1.bf16.msra.mxu1 %v18690_v55  ;;  %v15952_v52 = vld [vmem:[#allocation7 + $0x140] ss:$16 sps:$4 sm:$0xff]   ;;  %v15955_v55 = vld [vmem:[#allocation7 + $0x148] ss:$16 sps:$4 sm:$0xff]  }
 0x8c2   :  { %11593 = vmatprep.subr.bf16.mxu0 %v18160_v50  ;;  %11634 = vmatprep.subr.bf16.mxu1 %v18691_v4  ;;  %v15958_v4 = vld [vmem:[#allocation7 + $0x160] ss:$16 sps:$4 sm:$0xff]  }
 0x8c4   :  { %v16227_v60 = vpop.eup %16226 }
 0x8c5   :  { %11594 = vmatpush1.bf16.msra.mxu0 %v18166_v34  ;;  %11635 = vmatpush1.bf16.msra.mxu1 %v18168_v1  ;;  %v10685_v47 = vmul.f32 %v16227_v60, %v10679_v30  ;;  %v15895_v1 = vld [vmem:[#allocation7 + $0x8] ss:$16 sps:$4 sm:$0xff]   ;;  %v15960_v30 = vld [vmem:[#allocation7 + $0x164] ss:$16 sps:$4 sm:$0xff]  }
 0x8c6   :  { %11595 = vmatprep.subr.bf16.mxu0 %v18172_v49  ;;  %11636 = vmatprep.subr.bf16.mxu1 %v18174_v35  ;;  %v15892_v35 = vld [vmem:[#allocation7] ss:$16 sps:$4 sm:$0xff]   ;;  %v15894_v49 = vld [vmem:[#allocation7 + $0x4] ss:$16 sps:$4 sm:$0xff]   ;;  %v15961_v60 = vld [vmem:[#allocation7 + $0x168] ss:$16 sps:$4 sm:$0xff]  }
 0x8c7   :  { %v10686_v45 = vsub.f32 %v10685_v47, %v18188_v32  ;;  %v15963_v47 = vld [vmem:[#allocation7 + $0x16c] ss:$16 sps:$4 sm:$0xff]  }
 0x8c9   :  { %11596 = vmatpush1.bf16.msra.mxu0 %v18178_v0  ;;  %11637 = vmatpush1.bf16.msra.mxu1 %v18180_v63  ;;  %v18359_v50 = vadd.f32 %v10686_v45, %v18188_v32  ;;  %v15897_v63 = vld [vmem:[#allocation7 + $0xc] ss:$16 sps:$4 sm:$0xff]   ;;  %v15900_v0 = vld [vmem:[#allocation7 + $0x24] ss:$16 sps:$4 sm:$0xff]  }
 0x8ca   :  { %12057 = vmatprep.subr.bf16.mxu0 %v15894_v49  ;;  %v15903_v32 = vld [vmem:[#allocation7 + $0x2c] ss:$16 sps:$4 sm:$0xff]   ;;  %12098 = vmatprep.subr.bf16.mxu1 %v15897_v63  ;;  %v15966_v45 = vld [vmem:[#allocation7 + $0x184] ss:$16 sps:$4 sm:$0xff]   ;;  %v15970_v63 = vld [vmem:[#allocation7 + $0x1a0] ss:$16 sps:$4 sm:$0xff]  }
 0x8cb   :  { %v12379_v19 = vmul.f32 %v17207_v54, %v18359_v50  ;;  %v10694_v34 = vpack.c.bf16 %v18359_v50, %v18359_v50  ;;  %v15972_v49 = vld [vmem:[#allocation7 + $0x1a4] ss:$16 sps:$4 sm:$0xff]  }
 0x8cd   :  { %12392 = vadd.xlane.f32.xlu0 %v12379_v19  ;;  %11597 = vmatprep.mubr.bf16.mxu0 %v10694_v34  ;;  %v15969_v19 = vld [vmem:[#allocation7 + $0x18c] ss:$16 sps:$4 sm:$0xff]  }
 0x8ce   :  { %11638 = vmatprep.mubr.bf16.mxu1 %v10694_v34  ;;  %11598 = vmatmul.mubr.bf16.vlgmr.msra.gmra.mrb[116].mxu0 %v18282_v9  ;;  %v15964_v34 = vld [vmem:[#allocation7 + $0x180] ss:$16 sps:$4 sm:$0xff]  }
 0x8cf   :  { %11639 = vmatmul.mubr.bf16.vlgmr.msra.gmra.mrb[116].mxu1 %v18282_v9  ;;  %12058 = vmatpush1.bf16.msra.mxu0 %v15892_v35  ;;  %v15907_v9 = vld [vmem:[#allocation7 + $0x48] ss:$16 sps:$4 sm:$0xff]  }
 0x8d0   :  { %12099 = vmatpush1.bf16.msra.mxu1 %v15895_v1  ;;  %12059 = vmatprep.subr.bf16.mxu0 %v15900_v0  ;;  %v15967_v35 = vld [vmem:[#allocation7 + $0x188] ss:$16 sps:$4 sm:$0xff]   ;;  %v15975_v1 = vld [vmem:[#allocation7 + $0x1ac] ss:$16 sps:$4 sm:$0xff]  }
 0x8d1   :  { %12100 = vmatprep.subr.bf16.mxu1 %v15903_v32  ;;  %v15973_v0 = vld [vmem:[#allocation7 + $0x1a8] ss:$16 sps:$4 sm:$0xff]   ;;  %v15978_v32 = vld [vmem:[#allocation7 + $0x1c4] ss:$16 sps:$4 sm:$0xff]  }
 0x8d3   :  { %12060 = vmatpush1.bf16.msra.mxu0 %v15898_v11  ;;  %v15981_v11 = vld [vmem:[#allocation7 + $0x1cc] ss:$16 sps:$4 sm:$0xff]  }
 0x8d4   :  { %12101 = vmatpush1.bf16.msra.mxu1 %v15901_v44  ;;  %12061 = vmatprep.subr.bf16.mxu0 %v15906_v13  ;;  %v15976_v44 = vld [vmem:[#allocation7 + $0x1c0] ss:$16 sps:$4 sm:$0xff]   ;;  %v15979_v13 = vld [vmem:[#allocation7 + $0x1c8] ss:$16 sps:$4 sm:$0xff]  }
 0x8d5   :  { %12102 = vmatprep.subr.bf16.mxu1 %v15909_v38  ;;  %v15984_v38 = vld [vmem:[#allocation7 + $0x1e4] ss:$16 sps:$4 sm:$0xff]  }
 0x8d7   :  { %12062 = vmatpush1.bf16.msra.mxu0 %v15904_v5  ;;  %v15987_v5 = vld [vmem:[#allocation7 + $0x1ec] ss:$16 sps:$4 sm:$0xff]  }
 0x8d8   :  { %12103 = vmatpush1.bf16.msra.mxu1 %v15907_v9  ;;  %12063 = vmatprep.subr.bf16.mxu0 %v15912_v24  ;;  %v15982_v9 = vld [vmem:[#allocation7 + $0x1e0] ss:$16 sps:$4 sm:$0xff]   ;;  %v15985_v24 = vld [vmem:[#allocation7 + $0x1e8] ss:$16 sps:$4 sm:$0xff]  }
 0x8d9   :  { %12104 = vmatprep.subr.bf16.mxu1 %v15915_v57 }
 0x8db   :  { %12064 = vmatpush1.bf16.msra.mxu0 %v15910_v62 }
 0x8dc   :  { %12105 = vmatpush1.bf16.msra.mxu1 %v15913_v33  ;;  %12065 = vmatprep.subr.bf16.mxu0 %v15918_v39 }
 0x8dd   :  { %12106 = vmatprep.subr.bf16.mxu1 %v15921_v29 }
 0x8df   :  { %12066 = vmatpush1.bf16.msra.mxu0 %v15916_v48 }
 0x8e0   :  { %12107 = vmatpush1.bf16.msra.mxu1 %v15919_v8  ;;  %12067 = vmatprep.subr.bf16.mxu0 %v15924_v17 }
 0x8e1   :  { %12108 = vmatprep.subr.bf16.mxu1 %v15927_v22 }
 0x8e3   :  { %12068 = vmatpush1.bf16.msra.mxu0 %v15922_v58 }
 0x8e4   :  { %12109 = vmatpush1.bf16.msra.mxu1 %v15925_v10  ;;  %12069 = vmatprep.subr.bf16.mxu0 %v15930_v59 }
 0x8e5   :  { %12110 = vmatprep.subr.bf16.mxu1 %v15933_v12 }
 0x8e7   :  { %12070 = vmatpush1.bf16.msra.mxu0 %v15928_v14 }
 0x8e8   :  { %12111 = vmatpush1.bf16.msra.mxu1 %v15931_v6  ;;  %12071 = vmatprep.subr.bf16.mxu0 %v15936_v46 }
 0x8e9   :  { %12112 = vmatprep.subr.bf16.mxu1 %v15939_v41 }
 0x8eb   :  { %12072 = vmatpush1.bf16.msra.mxu0 %v15934_v43 }
 0x8ec   :  { %12113 = vmatpush1.bf16.msra.mxu1 %v15937_v37  ;;  %12073 = vmatprep.subr.bf16.mxu0 %v15942_v3 }
 0x8ed   :  { %12114 = vmatprep.subr.bf16.mxu1 %v15945_v2 }
 0x8ef   :  { %12074 = vmatpush1.bf16.msra.mxu0 %v15940_v42 }
 0x8f0   :  { %12115 = vmatpush1.bf16.msra.mxu1 %v15943_v7  ;;  %12075 = vmatprep.subr.bf16.mxu0 %v15948_v21 }
 0x8f1   :  { %12116 = vmatprep.subr.bf16.mxu1 %v15951_v40 }
 0x8f3   :  { %12076 = vmatpush1.bf16.msra.mxu0 %v15946_v36 }
 0x8f4   :  { %12117 = vmatpush1.bf16.msra.mxu1 %v15949_v26  ;;  %12077 = vmatprep.subr.bf16.mxu0 %v15954_v51 }
 0x8f5   :  { %12118 = vmatprep.subr.bf16.mxu1 %v15957_v16 }
 0x8f7   :  { %12078 = vmatpush1.bf16.msra.mxu0 %v15952_v52 }
 0x8f8   :  { %12119 = vmatpush1.bf16.msra.mxu1 %v15955_v55  ;;  %12079 = vmatprep.subr.bf16.mxu0 %v15960_v30 }
 0x8f9   :  { %12120 = vmatprep.subr.bf16.mxu1 %v15963_v47 }
 0x8fb   :  { %12080 = vmatpush1.bf16.msra.mxu0 %v15958_v4 }
 0x8fc   :  { %12121 = vmatpush1.bf16.msra.mxu1 %v15961_v60  ;;  %12081 = vmatprep.subr.bf16.mxu0 %v15966_v45 }
 0x8fd   :  { %12122 = vmatprep.subr.bf16.mxu1 %v15969_v19 }
 0x8ff   :  { %12082 = vmatpush1.bf16.msra.mxu0 %v15964_v34 }
 0x900   :  { %12123 = vmatpush1.bf16.msra.mxu1 %v15967_v35  ;;  %12083 = vmatprep.subr.bf16.mxu0 %v15972_v49 }
 0x901   :  { %12124 = vmatprep.subr.bf16.mxu1 %v15975_v1 }
 0x903   :  { %12084 = vmatpush1.bf16.msra.mxu0 %v15970_v63 }
 0x904   :  { %12125 = vmatpush1.bf16.msra.mxu1 %v15973_v0  ;;  %12085 = vmatprep.subr.bf16.mxu0 %v15978_v32 }
 0x905   :  { %12126 = vmatprep.subr.bf16.mxu1 %v15981_v11 }
 0x907   :  { %12086 = vmatpush1.bf16.msra.mxu0 %v15976_v44 }
 0x908   :  { %12127 = vmatpush1.bf16.msra.mxu1 %v15979_v13  ;;  %12087 = vmatprep.subr.bf16.mxu0 %v15984_v38 }
 0x909   :  { %12128 = vmatprep.subr.bf16.mxu1 %v15987_v5 }
 0x90b   :  { %12088 = vmatpush1.bf16.msra.mxu0 %v15982_v9 }
 0x90c   :  { %12129 = vmatpush1.bf16.msra.mxu1 %v15985_v24 }
 0x95f   :  { %v11113_v57 = vpop.f32.mrb[112].mxu0  ;;  %v11154_v62 = vpop.f32.mrb[112].mxu1 }
 0x960   :  { %v11114_v33 = vadd.f32 %v11113_v57, %v18638_v61  ;;  %v11115_v39 = vpop.f32.mrb[113].mxu0  ;;  %v11156_v29 = vpop.f32.mrb[113].mxu1  ;;  %v11155_v14 = vadd.f32 %v11154_v62, %v18641_v31 }
 0x961   :  { %v11116_v48 = vadd.f32 %v11115_v39, %v18639_v27  ;;  %v11117_v8 = vpop.f32.mrb[114].mxu0  ;;  %v11158_v17 = vpop.f32.mrb[114].mxu1  ;;  %v11157_v12 = vadd.f32 %v11156_v29, %v18640_v28 }
 0x962   :  { %v11161_v22 = vmul.f32 0.5, %v11114_v33  ;;  %v11118_v58 = vpop.f32.mrb[115].mxu0  ;;  %v11159_v10 = vpop.f32.mrb[115].mxu1  ;;  %v11163_v6 = vmul.f32 0.5, %v11155_v14 }
 0x963   :  { %v11162_v59 = vmul.f32 0.5, %v11116_v48 }
 0x964   :  { %16228 = vtanh.f32 %v11161_v22 }
 0x965   :  { %16230 = vtanh.f32 %v11162_v59 }
 0x966   :  { %16232 = vtanh.f32 %v11157_v12 }
 0x967   :  { %16234 = vtanh.f32 %v11163_v6 }
 0x96e   :  { %v16229_v46 = vpop.eup %16228 }
 0x96f   :  { %v11167_v61 = vmul.f32 0.5, %v16229_v46  ;;  %v16231_v41 = vpop.eup %16230 }
 0x970   :  { %v11168_v27 = vmul.f32 0.5, %v16231_v41  ;;  %v16233_v37 = vpop.eup %16232 }
 0x971   :  { %v11170_v43 = vadd.f32 0.5, %v11167_v61  ;;  %v16235_v21 = vpop.eup %16234 }
 0x972   :  { %v11171_v3 = vadd.f32 0.5, %v11168_v27  ;;  %v11169_v28 = vmul.f32 0.5, %v16235_v21 }
 0x973   :  { %v11175_v2 = vmul.f32 %v16233_v37, %v11170_v43 }
 0x974   :  { %v11174_v42 = vmul.f32 %v11171_v3, %v18274_v53  ;;  %v11172_v40 = vadd.f32 0.5, %v11169_v28 }
 0x976   :  { %v11176_v7 = vadd.f32 %v11175_v2, %v11174_v42 }
 0x978   :  { %16236 = vtanh.f32 %v11176_v7 }
 0x982   :  { %v16237_v36 = vpop.eup %16236 }
 0x983   :  { %v11178_v26 = vmul.f32 %v16237_v36, %v11172_v40 }
 0x985   :  { %v11179_v48 = vsub.f32 %v11178_v26, %v18278_v20 }
 0x987   :  { %v11180_v22 = vadd.f32 %v11179_v48, %v18278_v20 }
 0x989   :  { %v11671_v12 = vpack.c.bf16 %v11180_v22, %v11180_v22 }
 0x9a1   :  { %v11599_v31 = vpop.f32.mrb[116].mxu0 }
 0x9a2   :  { %v11600_v51 = vadd.f32 %v11599_v31, %v18662_v23  ;;  %v11640_v16 = vpop.f32.mrb[116].mxu1  ;;  %v11601_v52 = vpop.f32.mrb[117].mxu0 }
 0x9a3   :  { %v11602_v55 = vadd.f32 %v11601_v52, %v16805_v15  ;;  %v11642_v4 = vpop.f32.mrb[117].mxu1  ;;  %v11603_v30 = vpop.f32.mrb[118].mxu0  ;;  %v11641_v35 = vadd.f32 %v11640_v16, %v18669_v18 }
 0x9a4   :  { %v11647_v60 = vmul.f32 0.5, %v11600_v51  ;;  %v11644_v47 = vpop.f32.mrb[118].mxu1  ;;  %v11604_v45 = vpop.f32.mrb[119].mxu0  ;;  %v11643_v34 = vadd.f32 %v11642_v4, %v16808_v25 }
 0x9a5   :  { %v11648_v53 = vmul.f32 0.5, %v11602_v55  ;;  %v11645_v19 = vpop.f32.mrb[119].mxu1  ;;  %v11649_v49 = vmul.f32 0.5, %v11641_v35 }
 0x9a6   :  { %16238 = vtanh.f32 %v11647_v60 }
 0x9a7   :  { %16240 = vtanh.f32 %v11648_v53  ;;  %v12383_v53 = vpop.xlane.xlu0 %12382 }
 0x9a8   :  { %16242 = vtanh.f32 %v11643_v34  ;;  %v12385_v34 = vpop.xlane.xlu1 %12384 }
 0x9a9   :  { %16244 = vtanh.f32 %v11649_v49 }
 0x9ab   :  { %v12387_v19 = vpop.xlane.xlu0 %12386 }
 0x9ac   :  { %v12391_v49 = vpop.xlane.xlu1 %12390 }
 0x9af   :  { %v12389_v35 = vpop.xlane.xlu0 %12388 }
 0x9b0   :  { %v16239_v1 = vpop.eup %16238 }
 0x9b1   :  { %v11653_v63 = vmul.f32 0.5, %v16239_v1  ;;  %v16241_v0 = vpop.eup %16240  ;;  %v18692_v1 = vld [vmem:[#allocation22_spill] sm:$0xff] }
 0x9b2   :  { %v11654_v11 = vmul.f32 0.5, %v16241_v0  ;;  %v16243_v44 = vpop.eup %16242  ;;  %v12425_v0 = vrot.slane %v12387_v19, %v18692_v1 }
 0x9b3   :  { %v11656_v32 = vadd.f32 0.5, %v11653_v63  ;;  %v16245_v57 = vpop.eup %16244  ;;  %v12421_v63 = vrot.slane %v12385_v34, %v18692_v1 }
 0x9b4   :  { %v11657_v13 = vadd.f32 0.5, %v11654_v11  ;;  %v11655_v33 = vmul.f32 0.5, %v16245_v57  ;;  %v12417_v11 = vrot.slane %v12383_v53, %v18692_v1  ;;  %v13959_v57 = vld [vmem:[%s18405_s1] ss:$0 sm:$0xff] }
 0x9b5   :  { %v11661_v38 = vmul.f32 %v16243_v44, %v11656_v32  ;;  %v12393_v32 = vpop.xlane.xlu0 %12392  ;;  %v12429_v44 = vrot.slane %v12389_v35, %v18692_v1 }
 0x9b6   :  { %v11660_v5 = vmul.f32 %v11657_v13, %v18341_v56  ;;  %v11658_v39 = vadd.f32 0.5, %v11655_v33 }
 0x9b8   :  { %v11662_v9 = vadd.f32 %v11661_v38, %v11660_v5  ;;  %v12446_v38 = vsel %vm12360_vm1, %v12421_v63, %v12417_v11  ;;  %v12437_v5 = vrot.slane %v12393_v32, %v18692_v1 }
 0x9ba   :  { %16246 = vtanh.f32 %v11662_v9  ;;  %v11667_v24 = vsub.f32 %v11662_v9, %v18341_v56  ;;  %v12447_v9 = vsel %vm12361_vm2, %v12425_v0, %v12446_v38 }
 0x9bc   :  { %v11668_v62 = vadd.f32 %v11667_v24, %v18341_v56  ;;  %v12455_v56 = vld [vmem:[#allocation4] sm:$0x1] }
 0x9bd   :  { %13960 = vpush %v12455_v56 }
 0x9c4   :  { %v16247_v29 = vpop.eup %16246 }
 0x9c5   :  { %v11664_v8 = vmul.f32 %v16247_v29, %v11658_v39 }
 0x9c7   :  { %v11665_v17 = vsub.f32 %v11664_v8, %v18359_v50  ;;  %v18693_v8 = vld [vmem:[#allocation11_spill] sm:$0xff] }
 0x9c8   :  { %vm12405_vm8 = vcmp.lt.s32.totalorder %v18693_v8, %v13959_v57 }
 0x9c9   :  { %v11666_v58 = vadd.f32 %v11665_v17, %v18359_v50 }
 0x9cb   :  { %v12380_v10 = vmul.f32 %v17207_v54, %v11666_v58  ;;  %v11672_v59 = vpack.c.bf16 %v11666_v58, %v11666_v58 }
 0x9cd   :  { %12394 = vadd.xlane.f32.xlu1 %v12380_v10  ;;  %12089 = vmatprep.mubr.bf16.mxu0 %v11672_v59 }
 0x9ce   :  { %12130 = vmatprep.mubr.bf16.mxu1 %v11672_v59  ;;  %12090 = vmatmul.mubr.bf16.vlgmr.msra.gmra.mrb[120].mxu0 %v11671_v12 }
 0x9cf   :  { %12131 = vmatmul.mubr.bf16.vlgmr.msra.gmra.mrb[120].mxu1 %v11671_v12 }
 0x9ee   :  { %s13961_s8 = spop %13960 }
 0x9ef   :  { %v12457_v22 = vstv %s13961_s8 }
 0xa5a   :  { %v12395_v13 = vpop.xlane.xlu1 %12394 }
 0xa5b   :  { %v12441_v24 = vrot.slane %v12395_v13, %v18692_v1 }
 0xaa1   :  { %v12091_v14 = vpop.f32.mrb[120].mxu0 }
 0xaa2   :  { %v12092_v6 = vadd.f32 %v12091_v14, %v18662_v23  ;;  %v12132_v46 = vpop.f32.mrb[120].mxu1  ;;  %v12093_v61 = vpop.f32.mrb[121].mxu0 }
 0xaa3   :  { %v12094_v20 = vadd.f32 %v12093_v61, %v16805_v15  ;;  %v12134_v41 = vpop.f32.mrb[121].mxu1  ;;  %v12095_v50 = vpop.f32.mrb[122].mxu0  ;;  %v12133_v7 = vadd.f32 %v12132_v46, %v18669_v18 }
 0xaa4   :  { %v12139_v43 = vmul.f32 0.5, %v12092_v6  ;;  %v12136_v27 = vpop.f32.mrb[122].mxu1  ;;  %v12096_v37 = vpop.f32.mrb[123].mxu0  ;;  %v12135_v42 = vadd.f32 %v12134_v41, %v16808_v25 }
 0xaa5   :  { %v12140_v3 = vmul.f32 0.5, %v12094_v20  ;;  %v12137_v2 = vpop.f32.mrb[123].mxu1  ;;  %v12141_v21 = vmul.f32 0.5, %v12133_v7 }
 0xaa6   :  { %16248 = vtanh.f32 %v12139_v43 }
 0xaa7   :  { %16250 = vtanh.f32 %v12140_v3 }
 0xaa8   :  { %16252 = vtanh.f32 %v12135_v42 }
 0xaa9   :  { %16254 = vtanh.f32 %v12141_v21 }
 0xab0   :  { %v16249_v23 = vpop.eup %16248 }
 0xab1   :  { %v12145_v28 = vmul.f32 0.5, %v16249_v23  ;;  %v16251_v40 = vpop.eup %16250 }
 0xab2   :  { %v12146_v15 = vmul.f32 0.5, %v16251_v40  ;;  %v16253_v26 = vpop.eup %16252 }
 0xab3   :  { %v12148_v36 = vadd.f32 0.5, %v12145_v28  ;;  %v16255_v55 = vpop.eup %16254 }
 0xab4   :  { %v12149_v31 = vadd.f32 0.5, %v12146_v15  ;;  %v12147_v4 = vmul.f32 0.5, %v16255_v55 }
 0xab5   :  { %v12153_v51 = vmul.f32 %v16253_v26, %v12148_v36 }
 0xab6   :  { %v12152_v16 = vmul.f32 %v12149_v31, %v11668_v62  ;;  %v12150_v25 = vadd.f32 0.5, %v12147_v4  ;;  %v12448_v62 = vsel %vm12363_vm3, %v12429_v44, %v12447_v9 }
 0xab8   :  { %v12154_v52 = vadd.f32 %v12153_v51, %v12152_v16 }
 0xaba   :  { %16256 = vtanh.f32 %v12154_v52 }
 0xac4   :  { %v16257_v30 = vpop.eup %16256 }
 0xac5   :  { %v12156_v60 = vmul.f32 %v16257_v30, %v12150_v25 }
 0xac7   :  { %v12157_v47 = vsub.f32 %v12156_v60, %v11666_v58 }
 0xac9   :  { %v12158_v18 = vadd.f32 %v12157_v47, %v11666_v58 }
 0xacb   :  { %v12381_v45 = vmul.f32 %v17207_v54, %v12158_v18  ;;  %v12433_v54 = vrot.slane %v12391_v49, %v18692_v1 }
 0xacd   :  { %12396 = vadd.xlane.f32.xlu0 %v12381_v45  ;;  %v12449_v33 = vsel %vm12365_vm4, %v12433_v54, %v12448_v62 }
 0xace   :  { %v12450_v29 = vsel %vm12367_vm5, %v12437_v5, %v12449_v33 }
 0xacf   :  { %v12451_v17 = vsel %vm12369_vm6, %v12441_v24, %v12450_v29 }
 0xb5a   :  { %v12397_v39 = vpop.xlane.xlu0 %12396 }
 0xb5b   :  { %v12445_v48 = vrot.slane %v12397_v39, %v18692_v1 }
 0xb5d   :  { %v12452_v58 = vsel %vm12371_vm7, %v12445_v48, %v12451_v17 }
 0xb5e   :  { %v12454_v10 = vsel %vm12405_vm8, %v12452_v58, 0.0 }
 0xb5f   :  { %v12458_v59 = vadd.f32 %v12457_v22, %v12454_v10 }
 0xb61   :  { %12460 = vst.msk [vmem:[%s18415_s11] sm:$0xff] %vm12459_vm9, %v12458_v59 }
 0xb62   :  { %12465 = vsyncpa [#allocation6], 1 }
 0xb63   :  { %12466 = vsyncpa [#allocation8], 1 }

</bundles_post_ra>
